<compile_context>
chip_gen: v6e
topology: v6e:2x2x1
jax: 0.10.0
libtpu: 0.0.40
codegen_flags: <defaults>
</compile_context>

<pallas_src>
import functools

import jax
import jax.numpy as jnp
from jax import lax
from jax.experimental import pallas as pl
from jax.experimental.pallas import tpu as pltpu

EPS = 1e-5  # nn.InstanceNorm2d default (affine=False, biased variance)


def _resnet_block_kernel(x_ref, w1_ref, b1_ref, w2_ref, b2_ref, o_ref, pad_ref,
                         *, nb, H, W, C, CP, d):
    """One grid step = `nb` batch images, whole images resident in VMEM.

    x_ref:   (nb, H, W, C)        f32   input (conv1 source + residual), true C
    w*_ref:  (9, CP, CP)          bf16  conv weights, tap-major (ky*3+kx), (cin, cout)
    b*_ref:  (1, CP)              f32   conv biases (zero-padded lanes)
    o_ref:   (nb, H, W, C)        f32   output, true C
    pad_ref: (nb, H+2d, W+2d, CP) bf16  reflection-pad scratch shared by both convs
    """
    M = nb * H * W

    def lane_pad(v):
        # Zero-pad channels C -> CP inside VMEM. Padded lanes stay exactly zero
        # through conv (zero weights/bias), InstanceNorm and ReLU.
        if CP == C:
            return v
        z = jnp.zeros(v.shape[:-1] + (CP - C,), v.dtype)
        return jnp.concatenate([v, z], axis=-1)

    def reflect_pad(img_bf16, p):
        # ReflectionPad2d(p) of img into pad_ref[:, :H+2p, :W+2p, :].
        # Rows first (full padded width), then columns -> PyTorch corner values.
        # Requires H > p and W > p (checked in the wrapper).
        Wp = W + 2 * p
        pad_ref[:, p:p + H, p:p + W, :] = img_bf16
        for r in range(p):
            pad_ref[:, r:r + 1, :Wp, :] = pad_ref[:, 2 * p - r:2 * p - r + 1, :Wp, :]
            pad_ref[:, p + H + r:p + H + r + 1, :Wp, :] = (
                pad_ref[:, p + H - 2 - r:p + H - 1 - r, :Wp, :])
        for c in range(p):
            pad_ref[:, :H + 2 * p, c:c + 1, :] = (
                pad_ref[:, :H + 2 * p, 2 * p - c:2 * p - c + 1, :])
            pad_ref[:, :H + 2 * p, p + W + c:p + W + c + 1, :] = (
                pad_ref[:, :H + 2 * p, p + W - 2 - c:p + W - 1 - c, :])

    def conv3x3(p, w_ref, b_ref):
        # 9 accumulating (M, CP) x (CP, CP) dots (no im2col slab), f32 accumulation.
        acc = None
        for ky in range(3):
            for kx in range(3):
                tap = pad_ref[:, ky * p:ky * p + H, kx * p:kx * p + W, :].reshape(M, CP)
                part = jnp.dot(tap, w_ref[ky * 3 + kx],
                               preferred_element_type=jnp.float32)
                acc = part if acc is None else acc + part
        return acc + b_ref[...]

    def inorm_relu(y):
        # InstanceNorm2d (affine=False, biased var): two-pass stats in f32, then ReLU.
        y = y.reshape(nb, H * W, CP)
        mean = jnp.mean(y, axis=1, keepdims=True)
        yc = y - mean
        var = jnp.mean(yc * yc, axis=1, keepdims=True)
        return jnp.maximum(yc * lax.rsqrt(var + EPS), 0.0)

    # ---- conv_block1: ReflectionPad2d(d) -> conv(dil=d) -> InstanceNorm -> ReLU ----
    reflect_pad(lane_pad(x_ref[...].astype(jnp.bfloat16)), d)
    h = inorm_relu(conv3x3(d, w1_ref, b1_ref))            # (nb, H*W, CP)

    # ---- conv_block2: ReflectionPad2d(1) -> conv -> InstanceNorm -> ReLU ----
    reflect_pad(h.reshape(nb, H, W, CP).astype(jnp.bfloat16), 1)
    h2 = inorm_relu(conv3x3(1, w2_ref, b2_ref))           # (nb, H*W, CP)

    # ---- residual add, stored at true channel width ----
    o_ref[...] = (h2[..., :C].reshape(nb, H, W, C) + x_ref[...]).astype(o_ref.dtype)


def resnet_block_forward(x_nchw, params, *, dilation=1):
    """x_nchw: (N, C, H, W) float32.  params = (w1, b1, w2, b2), w in HWIO (3,3,C,C)."""
    w1, b1, w2, b2 = params
    x = jnp.transpose(x_nchw, (0, 2, 3, 1)).astype(jnp.float32)   # NHWC, true C
    N, H, W, C = x.shape
    d = int(dilation)
    if not (H > d and W > d and H > 1 and W > 1):
        raise ValueError("ReflectionPad2d needs H, W > dilation (and > 1)")

    CP = ((C + 127) // 128) * 128          # lane width used inside the kernel only
    cpad = CP - C

    def prep_w(w):  # (3,3,Cin,Cout) HWIO -> (9, CP, CP) bf16, tap-major (ky,kx)
        wp = jnp.pad(w.astype(jnp.float32), ((0, 0), (0, 0), (0, cpad), (0, cpad)))
        return wp.reshape(9, CP, CP).astype(jnp.bfloat16)

    def prep_b(b):
        return jnp.pad(b.astype(jnp.float32), (0, cpad)).reshape(1, CP)

    w1r, w2r = prep_w(w1), prep_w(w2)
    b1r, b2r = prep_b(b1), prep_b(b2)

    # Fold batch images per step: larger matmul M for the 256-wide MXUs and fewer
    # grid steps, but keep >= 2 parallel steps when N >= 2 (v7x has 2 TensorCores).
    nb = 1
    while N % (2 * nb) == 0 and N // (2 * nb) >= 2 and 2 * nb * H * W <= 2048:
        nb *= 2
    grid = (N // nb,)

    # Per-step VMEM need (physical lanes pad to CP), incl. double-buffered I/O tiles.
    io_tile = nb * H * W * CP * 4
    scratch = nb * (H + 2 * d) * (W + 2 * d) * CP * 2
    weights = 2 * (9 * CP * CP * 2 + CP * 4)               # single-buffered
    temps = 8 * nb * H * W * CP * 4                        # f32 conv/norm temporaries
    need = 4 * io_tile + scratch + weights + temps
    try:
        vmem_cap = pltpu.get_tpu_info().vmem_capacity_bytes
    except Exception:
        vmem_cap = 64 << 20
    vmem_limit = min(max(int(1.25 * need), 16 << 20), (vmem_cap // 8) * 7)
    vmem_limit = int(max(vmem_limit, need))   # never clamp below the per-step need

    kernel = functools.partial(_resnet_block_kernel,
                               nb=nb, H=H, W=W, C=C, CP=CP, d=d)
    const3 = lambda b: (0, 0, 0)
    const2 = lambda b: (0, 0)
    out = pl.pallas_call(
        kernel,
        out_shape=jax.ShapeDtypeStruct((N, H, W, C), jnp.float32),
        grid_spec=pltpu.PrefetchScalarGridSpec(
            num_scalar_prefetch=0,
            grid=grid,
            in_specs=[
                pl.BlockSpec((nb, H, W, C), lambda b: (b, 0, 0, 0)),
                pl.BlockSpec((9, CP, CP), const3, pipeline_mode=pl.Buffered(1)),
                pl.BlockSpec((1, CP), const2, pipeline_mode=pl.Buffered(1)),
                pl.BlockSpec((9, CP, CP), const3, pipeline_mode=pl.Buffered(1)),
                pl.BlockSpec((1, CP), const2, pipeline_mode=pl.Buffered(1)),
            ],
            out_specs=pl.BlockSpec((nb, H, W, C), lambda b: (b, 0, 0, 0)),
            scratch_shapes=[
                pltpu.VMEM((nb, H + 2 * d, W + 2 * d, CP), jnp.bfloat16),
            ],
        ),
        compiler_params=pltpu.CompilerParams(
            dimension_semantics=("parallel",),
            vmem_limit_bytes=vmem_limit,
        ),
    )(x, w1r, b1r, w2r, b2r)

    return jnp.transpose(out, (0, 3, 1, 2))                # back to NCHW


def _reference_forward(x_nchw, params, *, dilation=1):
    """Pure-JAX reference mirroring the PyTorch forward (for correctness check)."""
    w1, b1, w2, b2 = params
    x = jnp.transpose(x_nchw, (0, 2, 3, 1)).astype(jnp.float32)
    d = dilation
    dn = ("NHWC", "HWIO", "NHWC")

    def inorm(y):
        mean = y.mean(axis=(1, 2), keepdims=True)
        var = ((y - mean) ** 2).mean(axis=(1, 2), keepdims=True)
        return (y - mean) * lax.rsqrt(var + EPS)

    xp = jnp.pad(x, ((0, 0), (d, d), (d, d), (0, 0)), mode="reflect")
    y = lax.conv_general_dilated(xp, w1, (1, 1), "VALID", rhs_dilation=(d, d),
                                 dimension_numbers=dn,
                                 precision=lax.Precision.HIGHEST) + b1
    y = jnp.maximum(inorm(y), 0.0)
    yp = jnp.pad(y, ((0, 0), (1, 1), (1, 1), (0, 0)), mode="reflect")
    z = lax.conv_general_dilated(yp, w2, (1, 1), "VALID",
                                 dimension_numbers=dn,
                                 precision=lax.Precision.HIGHEST) + b2
    z = jnp.maximum(inorm(z), 0.0)
    out = z + x
    return jnp.transpose(out, (0, 3, 1, 2))


if __name__ == "__main__":
    key = jax.random.PRNGKey(0)
    N, C, H, W = 2, 8, 16, 16
    k_x, k_w1, k_w2, k_b1, k_b2 = jax.random.split(key, 5)

    x = jax.random.normal(k_x, (N, C, H, W), jnp.float32)

    # PyTorch Conv2d weight shape is (out, in, 3, 3); transpose to HWIO (3, 3, in, out).
    w1_oihw = 0.2 * jax.random.normal(k_w1, (C, C, 3, 3), jnp.float32)
    w2_oihw = 0.2 * jax.random.normal(k_w2, (C, C, 3, 3), jnp.float32)
    b1 = 0.1 * jax.random.normal(k_b1, (C,), jnp.float32)
    b2 = 0.1 * jax.random.normal(k_b2, (C,), jnp.float32)
    w1 = jnp.transpose(w1_oihw, (2, 3, 1, 0))
    w2 = jnp.transpose(w2_oihw, (2, 3, 1, 0))
    params = (w1, b1, w2, b2)

    fwd = jax.jit(functools.partial(resnet_block_forward, dilation=1))
    out = jax.block_until_ready(fwd(x, params))
    assert out.shape == (N, C, H, W)

    ref = _reference_forward(x, params, dilation=1)
    err = float(jnp.max(jnp.abs(out - ref)))
    if err < 5e-2:  # bf16 MXU operands vs. f32-HIGHEST reference
        print("KERNEL_OK")
    else:
        raise SystemExit(f"max abs error too large: {err}")
</pallas_src>

<mosaic_0001>
module attributes {stable_mosaic.version = 11 : i64} {
  func.func @_resnet_block_kernel(%arg0: i32, %arg1: memref<1x16x16x8xf32, #tpu.memory_space<vmem>>, %arg2: memref<9x128x128xbf16, #tpu.memory_space<vmem>>, %arg3: memref<1x128xf32, #tpu.memory_space<vmem>>, %arg4: memref<9x128x128xbf16, #tpu.memory_space<vmem>>, %arg5: memref<1x128xf32, #tpu.memory_space<vmem>>, %arg6: memref<1x16x16x8xf32, #tpu.memory_space<vmem>>, %arg7: memref<1x18x18x128xbf16, #tpu.memory_space<vmem>>) attributes {dimension_semantics = [#tpu.dimension_semantics<parallel>], iteration_bounds = array<i64: 2>, scalar_prefetch = 0 : i64, scratch_operands = 1 : i64, tpu.core_type = #tpu.core_type<tc>, window_params = [{transform_indices = @transform_0, window_bounds = array<i64: 1, 16, 16, 8>}, {pipeline_mode = #tpu.pipeline_mode<synchronous>, transform_indices = @transform_1, window_bounds = array<i64: 9, 128, 128>}, {pipeline_mode = #tpu.pipeline_mode<synchronous>, transform_indices = @transform_2, window_bounds = array<i64: 1, 128>}, {pipeline_mode = #tpu.pipeline_mode<synchronous>, transform_indices = @transform_3, window_bounds = array<i64: 9, 128, 128>}, {pipeline_mode = #tpu.pipeline_mode<synchronous>, transform_indices = @transform_4, window_bounds = array<i64: 1, 128>}, {transform_indices = @transform_5, window_bounds = array<i64: 1, 16, 16, 8>}]} {
    %c0 = arith.constant 0 : index
    %c0_0 = arith.constant 0 : index
    %c0_1 = arith.constant 0 : index
    %c0_2 = arith.constant 0 : index
    %0 = vector.load %arg1[%c0, %c0_0, %c0_1, %c0_2] : memref<1x16x16x8xf32, #tpu.memory_space<vmem>>, vector<1x16x16x8xf32>
    %1 = arith.truncf %0 : vector<1x16x16x8xf32> to vector<1x16x16x8xbf16>
    %cst = arith.constant 0.000000e+00 : bf16
    %2 = vector.broadcast %cst : bf16 to vector<1x16x16x120xbf16>
    %3 = tpu.concatenate %1, %2 in 3 : vector<1x16x16x8xbf16>, vector<1x16x16x120xbf16> -> vector<1x16x16x128xbf16>
    %c0_3 = arith.constant 0 : index
    %c1 = arith.constant 1 : index
    %c1_4 = arith.constant 1 : index
    %c0_5 = arith.constant 0 : index
    %4 = vector.load %arg7[%c0_3, %c1, %c1_4, %c0_5] : memref<1x18x18x128xbf16, #tpu.memory_space<vmem>>, vector<1x16x16x128xbf16>
    tpu.vector_store %arg7[%c0_3, %c1, %c1_4, %c0_5], %3 {strides = array<i32>} : memref<1x18x18x128xbf16, #tpu.memory_space<vmem>>, vector<1x16x16x128xbf16>,
    %c0_6 = arith.constant 0 : index
    %c2 = arith.constant 2 : index
    %c0_7 = arith.constant 0 : index
    %c0_8 = arith.constant 0 : index
    %5 = vector.load %arg7[%c0_6, %c2, %c0_7, %c0_8] : memref<1x18x18x128xbf16, #tpu.memory_space<vmem>>, vector<1x1x18x128xbf16>
    %c0_9 = arith.constant 0 : index
    %c0_10 = arith.constant 0 : index
    %c0_11 = arith.constant 0 : index
    %c0_12 = arith.constant 0 : index
    %6 = vector.load %arg7[%c0_9, %c0_10, %c0_11, %c0_12] : memref<1x18x18x128xbf16, #tpu.memory_space<vmem>>, vector<1x1x18x128xbf16>
    tpu.vector_store %arg7[%c0_9, %c0_10, %c0_11, %c0_12], %5 {strides = array<i32>} : memref<1x18x18x128xbf16, #tpu.memory_space<vmem>>, vector<1x1x18x128xbf16>,
    %c0_13 = arith.constant 0 : index
    %c15 = arith.constant 15 : index
    %c0_14 = arith.constant 0 : index
    %c0_15 = arith.constant 0 : index
    %7 = vector.load %arg7[%c0_13, %c15, %c0_14, %c0_15] : memref<1x18x18x128xbf16, #tpu.memory_space<vmem>>, vector<1x1x18x128xbf16>
    %c0_16 = arith.constant 0 : index
    %c17 = arith.constant 17 : index
    %c0_17 = arith.constant 0 : index
    %c0_18 = arith.constant 0 : index
    %8 = vector.load %arg7[%c0_16, %c17, %c0_17, %c0_18] : memref<1x18x18x128xbf16, #tpu.memory_space<vmem>>, vector<1x1x18x128xbf16>
    tpu.vector_store %arg7[%c0_16, %c17, %c0_17, %c0_18], %7 {strides = array<i32>} : memref<1x18x18x128xbf16, #tpu.memory_space<vmem>>, vector<1x1x18x128xbf16>,
    %c0_19 = arith.constant 0 : index
    %c0_20 = arith.constant 0 : index
    %c2_21 = arith.constant 2 : index
    %c0_22 = arith.constant 0 : index
    %9 = vector.load %arg7[%c0_19, %c0_20, %c2_21, %c0_22] : memref<1x18x18x128xbf16, #tpu.memory_space<vmem>>, vector<1x18x1x128xbf16>
    %c0_23 = arith.constant 0 : index
    %c0_24 = arith.constant 0 : index
    %c0_25 = arith.constant 0 : index
    %c0_26 = arith.constant 0 : index
    %10 = vector.load %arg7[%c0_23, %c0_24, %c0_25, %c0_26] : memref<1x18x18x128xbf16, #tpu.memory_space<vmem>>, vector<1x18x1x128xbf16>
    tpu.vector_store %arg7[%c0_23, %c0_24, %c0_25, %c0_26], %9 {strides = array<i32>} : memref<1x18x18x128xbf16, #tpu.memory_space<vmem>>, vector<1x18x1x128xbf16>,
    %c0_27 = arith.constant 0 : index
    %c0_28 = arith.constant 0 : index
    %c15_29 = arith.constant 15 : index
    %c0_30 = arith.constant 0 : index
    %11 = vector.load %arg7[%c0_27, %c0_28, %c15_29, %c0_30] : memref<1x18x18x128xbf16, #tpu.memory_space<vmem>>, vector<1x18x1x128xbf16>
    %c0_31 = arith.constant 0 : index
    %c0_32 = arith.constant 0 : index
    %c17_33 = arith.constant 17 : index
    %c0_34 = arith.constant 0 : index
    %12 = vector.load %arg7[%c0_31, %c0_32, %c17_33, %c0_34] : memref<1x18x18x128xbf16, #tpu.memory_space<vmem>>, vector<1x18x1x128xbf16>
    tpu.vector_store %arg7[%c0_31, %c0_32, %c17_33, %c0_34], %11 {strides = array<i32>} : memref<1x18x18x128xbf16, #tpu.memory_space<vmem>>, vector<1x18x1x128xbf16>,
    %c0_35 = arith.constant 0 : index
    %c0_36 = arith.constant 0 : index
    %c0_37 = arith.constant 0 : index
    %c0_38 = arith.constant 0 : index
    %13 = vector.load %arg7[%c0_35, %c0_36, %c0_37, %c0_38] : memref<1x18x18x128xbf16, #tpu.memory_space<vmem>>, vector<1x16x16x128xbf16>
    %14 = vector.shape_cast %13 : vector<1x16x16x128xbf16> to vector<256x128xbf16>
    %c0_39 = arith.constant 0 : index
    %c0_40 = arith.constant 0 : index
    %c0_41 = arith.constant 0 : index
    %15 = vector.load %arg2[%c0_39, %c0_40, %c0_41] : memref<9x128x128xbf16, #tpu.memory_space<vmem>>, vector<1x128x128xbf16>
    %16 = vector.shape_cast %15 : vector<1x128x128xbf16> to vector<128x128xbf16>
    %cst_42 = arith.constant dense<0.000000e+00> : vector<256x128xf32>
    %17 = tpu.matmul %14, %16, %cst_42 {dimension_numbers = #tpu.dot_dimension_numbers<[1], [0], [0], [1], [0, 0, 1, 1], [], []>} : vector<256x128xbf16>, vector<128x128xbf16>, vector<256x128xf32> -> vector<256x128xf32>
    %c0_43 = arith.constant 0 : index
    %c0_44 = arith.constant 0 : index
    %c1_45 = arith.constant 1 : index
    %c0_46 = arith.constant 0 : index
    %18 = vector.load %arg7[%c0_43, %c0_44, %c1_45, %c0_46] : memref<1x18x18x128xbf16, #tpu.memory_space<vmem>>, vector<1x16x16x128xbf16>
    %19 = vector.shape_cast %18 : vector<1x16x16x128xbf16> to vector<256x128xbf16>
    %c1_47 = arith.constant 1 : index
    %c0_48 = arith.constant 0 : index
    %c0_49 = arith.constant 0 : index
    %20 = vector.load %arg2[%c1_47, %c0_48, %c0_49] : memref<9x128x128xbf16, #tpu.memory_space<vmem>>, vector<1x128x128xbf16>
    %21 = vector.shape_cast %20 : vector<1x128x128xbf16> to vector<128x128xbf16>
    %cst_50 = arith.constant dense<0.000000e+00> : vector<256x128xf32>
    %22 = tpu.matmul %19, %21, %cst_50 {dimension_numbers = #tpu.dot_dimension_numbers<[1], [0], [0], [1], [0, 0, 1, 1], [], []>} : vector<256x128xbf16>, vector<128x128xbf16>, vector<256x128xf32> -> vector<256x128xf32>
    %23 = arith.addf %17, %22 : vector<256x128xf32>
    %c0_51 = arith.constant 0 : index
    %c0_52 = arith.constant 0 : index
    %c2_53 = arith.constant 2 : index
    %c0_54 = arith.constant 0 : index
    %24 = vector.load %arg7[%c0_51, %c0_52, %c2_53, %c0_54] : memref<1x18x18x128xbf16, #tpu.memory_space<vmem>>, vector<1x16x16x128xbf16>
    %25 = vector.shape_cast %24 : vector<1x16x16x128xbf16> to vector<256x128xbf16>
    %c2_55 = arith.constant 2 : index
    %c0_56 = arith.constant 0 : index
    %c0_57 = arith.constant 0 : index
    %26 = vector.load %arg2[%c2_55, %c0_56, %c0_57] : memref<9x128x128xbf16, #tpu.memory_space<vmem>>, vector<1x128x128xbf16>
    %27 = vector.shape_cast %26 : vector<1x128x128xbf16> to vector<128x128xbf16>
    %cst_58 = arith.constant dense<0.000000e+00> : vector<256x128xf32>
    %28 = tpu.matmul %25, %27, %cst_58 {dimension_numbers = #tpu.dot_dimension_numbers<[1], [0], [0], [1], [0, 0, 1, 1], [], []>} : vector<256x128xbf16>, vector<128x128xbf16>, vector<256x128xf32> -> vector<256x128xf32>
    %29 = arith.addf %23, %28 : vector<256x128xf32>
    %c0_59 = arith.constant 0 : index
    %c1_60 = arith.constant 1 : index
    %c0_61 = arith.constant 0 : index
    %c0_62 = arith.constant 0 : index
    %30 = vector.load %arg7[%c0_59, %c1_60, %c0_61, %c0_62] : memref<1x18x18x128xbf16, #tpu.memory_space<vmem>>, vector<1x16x16x128xbf16>
    %31 = vector.shape_cast %30 : vector<1x16x16x128xbf16> to vector<256x128xbf16>
    %c3 = arith.constant 3 : index
    %c0_63 = arith.constant 0 : index
    %c0_64 = arith.constant 0 : index
    %32 = vector.load %arg2[%c3, %c0_63, %c0_64] : memref<9x128x128xbf16, #tpu.memory_space<vmem>>, vector<1x128x128xbf16>
    %33 = vector.shape_cast %32 : vector<1x128x128xbf16> to vector<128x128xbf16>
    %cst_65 = arith.constant dense<0.000000e+00> : vector<256x128xf32>
    %34 = tpu.matmul %31, %33, %cst_65 {dimension_numbers = #tpu.dot_dimension_numbers<[1], [0], [0], [1], [0, 0, 1, 1], [], []>} : vector<256x128xbf16>, vector<128x128xbf16>, vector<256x128xf32> -> vector<256x128xf32>
    %35 = arith.addf %29, %34 : vector<256x128xf32>
    %c0_66 = arith.constant 0 : index
    %c1_67 = arith.constant 1 : index
    %c1_68 = arith.constant 1 : index
    %c0_69 = arith.constant 0 : index
    %36 = vector.load %arg7[%c0_66, %c1_67, %c1_68, %c0_69] : memref<1x18x18x128xbf16, #tpu.memory_space<vmem>>, vector<1x16x16x128xbf16>
    %37 = vector.shape_cast %36 : vector<1x16x16x128xbf16> to vector<256x128xbf16>
    %c4 = arith.constant 4 : index
    %c0_70 = arith.constant 0 : index
    %c0_71 = arith.constant 0 : index
    %38 = vector.load %arg2[%c4, %c0_70, %c0_71] : memref<9x128x128xbf16, #tpu.memory_space<vmem>>, vector<1x128x128xbf16>
    %39 = vector.shape_cast %38 : vector<1x128x128xbf16> to vector<128x128xbf16>
    %cst_72 = arith.constant dense<0.000000e+00> : vector<256x128xf32>
    %40 = tpu.matmul %37, %39, %cst_72 {dimension_numbers = #tpu.dot_dimension_numbers<[1], [0], [0], [1], [0, 0, 1, 1], [], []>} : vector<256x128xbf16>, vector<128x128xbf16>, vector<256x128xf32> -> vector<256x128xf32>
    %41 = arith.addf %35, %40 : vector<256x128xf32>
    %c0_73 = arith.constant 0 : index
    %c1_74 = arith.constant 1 : index
    %c2_75 = arith.constant 2 : index
    %c0_76 = arith.constant 0 : index
    %42 = vector.load %arg7[%c0_73, %c1_74, %c2_75, %c0_76] : memref<1x18x18x128xbf16, #tpu.memory_space<vmem>>, vector<1x16x16x128xbf16>
    %43 = vector.shape_cast %42 : vector<1x16x16x128xbf16> to vector<256x128xbf16>
    %c5 = arith.constant 5 : index
    %c0_77 = arith.constant 0 : index
    %c0_78 = arith.constant 0 : index
    %44 = vector.load %arg2[%c5, %c0_77, %c0_78] : memref<9x128x128xbf16, #tpu.memory_space<vmem>>, vector<1x128x128xbf16>
    %45 = vector.shape_cast %44 : vector<1x128x128xbf16> to vector<128x128xbf16>
    %cst_79 = arith.constant dense<0.000000e+00> : vector<256x128xf32>
    %46 = tpu.matmul %43, %45, %cst_79 {dimension_numbers = #tpu.dot_dimension_numbers<[1], [0], [0], [1], [0, 0, 1, 1], [], []>} : vector<256x128xbf16>, vector<128x128xbf16>, vector<256x128xf32> -> vector<256x128xf32>
    %47 = arith.addf %41, %46 : vector<256x128xf32>
    %c0_80 = arith.constant 0 : index
    %c2_81 = arith.constant 2 : index
    %c0_82 = arith.constant 0 : index
    %c0_83 = arith.constant 0 : index
    %48 = vector.load %arg7[%c0_80, %c2_81, %c0_82, %c0_83] : memref<1x18x18x128xbf16, #tpu.memory_space<vmem>>, vector<1x16x16x128xbf16>
    %49 = vector.shape_cast %48 : vector<1x16x16x128xbf16> to vector<256x128xbf16>
    %c6 = arith.constant 6 : index
    %c0_84 = arith.constant 0 : index
    %c0_85 = arith.constant 0 : index
    %50 = vector.load %arg2[%c6, %c0_84, %c0_85] : memref<9x128x128xbf16, #tpu.memory_space<vmem>>, vector<1x128x128xbf16>
    %51 = vector.shape_cast %50 : vector<1x128x128xbf16> to vector<128x128xbf16>
    %cst_86 = arith.constant dense<0.000000e+00> : vector<256x128xf32>
    %52 = tpu.matmul %49, %51, %cst_86 {dimension_numbers = #tpu.dot_dimension_numbers<[1], [0], [0], [1], [0, 0, 1, 1], [], []>} : vector<256x128xbf16>, vector<128x128xbf16>, vector<256x128xf32> -> vector<256x128xf32>
    %53 = arith.addf %47, %52 : vector<256x128xf32>
    %c0_87 = arith.constant 0 : index
    %c2_88 = arith.constant 2 : index
    %c1_89 = arith.constant 1 : index
    %c0_90 = arith.constant 0 : index
    %54 = vector.load %arg7[%c0_87, %c2_88, %c1_89, %c0_90] : memref<1x18x18x128xbf16, #tpu.memory_space<vmem>>, vector<1x16x16x128xbf16>
    %55 = vector.shape_cast %54 : vector<1x16x16x128xbf16> to vector<256x128xbf16>
    %c7 = arith.constant 7 : index
    %c0_91 = arith.constant 0 : index
    %c0_92 = arith.constant 0 : index
    %56 = vector.load %arg2[%c7, %c0_91, %c0_92] : memref<9x128x128xbf16, #tpu.memory_space<vmem>>, vector<1x128x128xbf16>
    %57 = vector.shape_cast %56 : vector<1x128x128xbf16> to vector<128x128xbf16>
    %cst_93 = arith.constant dense<0.000000e+00> : vector<256x128xf32>
    %58 = tpu.matmul %55, %57, %cst_93 {dimension_numbers = #tpu.dot_dimension_numbers<[1], [0], [0], [1], [0, 0, 1, 1], [], []>} : vector<256x128xbf16>, vector<128x128xbf16>, vector<256x128xf32> -> vector<256x128xf32>
    %59 = arith.addf %53, %58 : vector<256x128xf32>
    %c0_94 = arith.constant 0 : index
    %c2_95 = arith.constant 2 : index
    %c2_96 = arith.constant 2 : index
    %c0_97 = arith.constant 0 : index
    %60 = vector.load %arg7[%c0_94, %c2_95, %c2_96, %c0_97] : memref<1x18x18x128xbf16, #tpu.memory_space<vmem>>, vector<1x16x16x128xbf16>
    %61 = vector.shape_cast %60 : vector<1x16x16x128xbf16> to vector<256x128xbf16>
    %c8 = arith.constant 8 : index
    %c0_98 = arith.constant 0 : index
    %c0_99 = arith.constant 0 : index
    %62 = vector.load %arg2[%c8, %c0_98, %c0_99] : memref<9x128x128xbf16, #tpu.memory_space<vmem>>, vector<1x128x128xbf16>
    %63 = vector.shape_cast %62 : vector<1x128x128xbf16> to vector<128x128xbf16>
    %cst_100 = arith.constant dense<0.000000e+00> : vector<256x128xf32>
    %64 = tpu.matmul %61, %63, %cst_100 {dimension_numbers = #tpu.dot_dimension_numbers<[1], [0], [0], [1], [0, 0, 1, 1], [], []>} : vector<256x128xbf16>, vector<128x128xbf16>, vector<256x128xf32> -> vector<256x128xf32>
    %65 = arith.addf %59, %64 : vector<256x128xf32>
    %c0_101 = arith.constant 0 : index
    %c0_102 = arith.constant 0 : index
    %66 = vector.load %arg3[%c0_101, %c0_102] : memref<1x128xf32, #tpu.memory_space<vmem>>, vector<1x128xf32>
    %67 = vector.broadcast %66 : vector<1x128xf32> to vector<256x128xf32>
    %68 = arith.addf %65, %67 : vector<256x128xf32>
    %69 = vector.shape_cast %68 : vector<256x128xf32> to vector<1x256x128xf32>
    %cst_103 = arith.constant dense<0.000000e+00> : vector<1x128xf32>
    %70 = vector.multi_reduction <add>, %69, %cst_103 [1] : vector<1x256x128xf32> to vector<1x128xf32>
    %71 = vector.shape_cast %70 : vector<1x128xf32> to vector<1x1x128xf32>
    %cst_104 = arith.constant 2.560000e+02 : f32
    %72 = vector.broadcast %cst_104 : f32 to vector<1x1x128xf32>
    %73 = arith.divf %71, %72 : vector<1x1x128xf32>
    %74 = vector.broadcast %73 : vector<1x1x128xf32> to vector<1x256x128xf32>
    %75 = arith.subf %69, %74 : vector<1x256x128xf32>
    %76 = arith.mulf %75, %75 : vector<1x256x128xf32>
    %cst_105 = arith.constant dense<0.000000e+00> : vector<1x128xf32>
    %77 = vector.multi_reduction <add>, %76, %cst_105 [1] : vector<1x256x128xf32> to vector<1x128xf32>
    %78 = vector.shape_cast %77 : vector<1x128xf32> to vector<1x1x128xf32>
    %cst_106 = arith.constant 2.560000e+02 : f32
    %79 = vector.broadcast %cst_106 : f32 to vector<1x1x128xf32>
    %80 = arith.divf %78, %79 : vector<1x1x128xf32>
    %cst_107 = arith.constant 9.99999974E-6 : f32
    %81 = vector.broadcast %cst_107 : f32 to vector<1x1x128xf32>
    %82 = arith.addf %80, %81 : vector<1x1x128xf32>
    %83 = math.rsqrt %82 : vector<1x1x128xf32>
    %84 = vector.broadcast %83 : vector<1x1x128xf32> to vector<1x256x128xf32>
    %85 = arith.mulf %75, %84 : vector<1x256x128xf32>
    %cst_108 = arith.constant 0.000000e+00 : f32
    %86 = vector.broadcast %cst_108 : f32 to vector<1x256x128xf32>
    %87 = arith.maximumf %85, %86 : vector<1x256x128xf32>
    %88 = vector.shape_cast %87 : vector<1x256x128xf32> to vector<1x16x16x128xf32>
    %89 = arith.truncf %88 : vector<1x16x16x128xf32> to vector<1x16x16x128xbf16>
    %c0_109 = arith.constant 0 : index
    %c1_110 = arith.constant 1 : index
    %c1_111 = arith.constant 1 : index
    %c0_112 = arith.constant 0 : index
    %90 = vector.load %arg7[%c0_109, %c1_110, %c1_111, %c0_112] : memref<1x18x18x128xbf16, #tpu.memory_space<vmem>>, vector<1x16x16x128xbf16>
    tpu.vector_store %arg7[%c0_109, %c1_110, %c1_111, %c0_112], %89 {strides = array<i32>} : memref<1x18x18x128xbf16, #tpu.memory_space<vmem>>, vector<1x16x16x128xbf16>,
    %c0_113 = arith.constant 0 : index
    %c2_114 = arith.constant 2 : index
    %c0_115 = arith.constant 0 : index
    %c0_116 = arith.constant 0 : index
    %91 = vector.load %arg7[%c0_113, %c2_114, %c0_115, %c0_116] : memref<1x18x18x128xbf16, #tpu.memory_space<vmem>>, vector<1x1x18x128xbf16>
    %c0_117 = arith.constant 0 : index
    %c0_118 = arith.constant 0 : index
    %c0_119 = arith.constant 0 : index
    %c0_120 = arith.constant 0 : index
    %92 = vector.load %arg7[%c0_117, %c0_118, %c0_119, %c0_120] : memref<1x18x18x128xbf16, #tpu.memory_space<vmem>>, vector<1x1x18x128xbf16>
    tpu.vector_store %arg7[%c0_117, %c0_118, %c0_119, %c0_120], %91 {strides = array<i32>} : memref<1x18x18x128xbf16, #tpu.memory_space<vmem>>, vector<1x1x18x128xbf16>,
    %c0_121 = arith.constant 0 : index
    %c15_122 = arith.constant 15 : index
    %c0_123 = arith.constant 0 : index
    %c0_124 = arith.constant 0 : index
    %93 = vector.load %arg7[%c0_121, %c15_122, %c0_123, %c0_124] : memref<1x18x18x128xbf16, #tpu.memory_space<vmem>>, vector<1x1x18x128xbf16>
    %c0_125 = arith.constant 0 : index
    %c17_126 = arith.constant 17 : index
    %c0_127 = arith.constant 0 : index
    %c0_128 = arith.constant 0 : index
    %94 = vector.load %arg7[%c0_125, %c17_126, %c0_127, %c0_128] : memref<1x18x18x128xbf16, #tpu.memory_space<vmem>>, vector<1x1x18x128xbf16>
    tpu.vector_store %arg7[%c0_125, %c17_126, %c0_127, %c0_128], %93 {strides = array<i32>} : memref<1x18x18x128xbf16, #tpu.memory_space<vmem>>, vector<1x1x18x128xbf16>,
    %c0_129 = arith.constant 0 : index
    %c0_130 = arith.constant 0 : index
    %c2_131 = arith.constant 2 : index
    %c0_132 = arith.constant 0 : index
    %95 = vector.load %arg7[%c0_129, %c0_130, %c2_131, %c0_132] : memref<1x18x18x128xbf16, #tpu.memory_space<vmem>>, vector<1x18x1x128xbf16>
    %c0_133 = arith.constant 0 : index
    %c0_134 = arith.constant 0 : index
    %c0_135 = arith.constant 0 : index
    %c0_136 = arith.constant 0 : index
    %96 = vector.load %arg7[%c0_133, %c0_134, %c0_135, %c0_136] : memref<1x18x18x128xbf16, #tpu.memory_space<vmem>>, vector<1x18x1x128xbf16>
    tpu.vector_store %arg7[%c0_133, %c0_134, %c0_135, %c0_136], %95 {strides = array<i32>} : memref<1x18x18x128xbf16, #tpu.memory_space<vmem>>, vector<1x18x1x128xbf16>,
    %c0_137 = arith.constant 0 : index
    %c0_138 = arith.constant 0 : index
    %c15_139 = arith.constant 15 : index
    %c0_140 = arith.constant 0 : index
    %97 = vector.load %arg7[%c0_137, %c0_138, %c15_139, %c0_140] : memref<1x18x18x128xbf16, #tpu.memory_space<vmem>>, vector<1x18x1x128xbf16>
    %c0_141 = arith.constant 0 : index
    %c0_142 = arith.constant 0 : index
    %c17_143 = arith.constant 17 : index
    %c0_144 = arith.constant 0 : index
    %98 = vector.load %arg7[%c0_141, %c0_142, %c17_143, %c0_144] : memref<1x18x18x128xbf16, #tpu.memory_space<vmem>>, vector<1x18x1x128xbf16>
    tpu.vector_store %arg7[%c0_141, %c0_142, %c17_143, %c0_144], %97 {strides = array<i32>} : memref<1x18x18x128xbf16, #tpu.memory_space<vmem>>, vector<1x18x1x128xbf16>,
    %c0_145 = arith.constant 0 : index
    %c0_146 = arith.constant 0 : index
    %c0_147 = arith.constant 0 : index
    %c0_148 = arith.constant 0 : index
    %99 = vector.load %arg7[%c0_145, %c0_146, %c0_147, %c0_148] : memref<1x18x18x128xbf16, #tpu.memory_space<vmem>>, vector<1x16x16x128xbf16>
    %100 = vector.shape_cast %99 : vector<1x16x16x128xbf16> to vector<256x128xbf16>
    %c0_149 = arith.constant 0 : index
    %c0_150 = arith.constant 0 : index
    %c0_151 = arith.constant 0 : index
    %101 = vector.load %arg4[%c0_149, %c0_150, %c0_151] : memref<9x128x128xbf16, #tpu.memory_space<vmem>>, vector<1x128x128xbf16>
    %102 = vector.shape_cast %101 : vector<1x128x128xbf16> to vector<128x128xbf16>
    %cst_152 = arith.constant dense<0.000000e+00> : vector<256x128xf32>
    %103 = tpu.matmul %100, %102, %cst_152 {dimension_numbers = #tpu.dot_dimension_numbers<[1], [0], [0], [1], [0, 0, 1, 1], [], []>} : vector<256x128xbf16>, vector<128x128xbf16>, vector<256x128xf32> -> vector<256x128xf32>
    %c0_153 = arith.constant 0 : index
    %c0_154 = arith.constant 0 : index
    %c1_155 = arith.constant 1 : index
    %c0_156 = arith.constant 0 : index
    %104 = vector.load %arg7[%c0_153, %c0_154, %c1_155, %c0_156] : memref<1x18x18x128xbf16, #tpu.memory_space<vmem>>, vector<1x16x16x128xbf16>
    %105 = vector.shape_cast %104 : vector<1x16x16x128xbf16> to vector<256x128xbf16>
    %c1_157 = arith.constant 1 : index
    %c0_158 = arith.constant 0 : index
    %c0_159 = arith.constant 0 : index
    %106 = vector.load %arg4[%c1_157, %c0_158, %c0_159] : memref<9x128x128xbf16, #tpu.memory_space<vmem>>, vector<1x128x128xbf16>
    %107 = vector.shape_cast %106 : vector<1x128x128xbf16> to vector<128x128xbf16>
    %cst_160 = arith.constant dense<0.000000e+00> : vector<256x128xf32>
    %108 = tpu.matmul %105, %107, %cst_160 {dimension_numbers = #tpu.dot_dimension_numbers<[1], [0], [0], [1], [0, 0, 1, 1], [], []>} : vector<256x128xbf16>, vector<128x128xbf16>, vector<256x128xf32> -> vector<256x128xf32>
    %109 = arith.addf %103, %108 : vector<256x128xf32>
    %c0_161 = arith.constant 0 : index
    %c0_162 = arith.constant 0 : index
    %c2_163 = arith.constant 2 : index
    %c0_164 = arith.constant 0 : index
    %110 = vector.load %arg7[%c0_161, %c0_162, %c2_163, %c0_164] : memref<1x18x18x128xbf16, #tpu.memory_space<vmem>>, vector<1x16x16x128xbf16>
    %111 = vector.shape_cast %110 : vector<1x16x16x128xbf16> to vector<256x128xbf16>
    %c2_165 = arith.constant 2 : index
    %c0_166 = arith.constant 0 : index
    %c0_167 = arith.constant 0 : index
    %112 = vector.load %arg4[%c2_165, %c0_166, %c0_167] : memref<9x128x128xbf16, #tpu.memory_space<vmem>>, vector<1x128x128xbf16>
    %113 = vector.shape_cast %112 : vector<1x128x128xbf16> to vector<128x128xbf16>
    %cst_168 = arith.constant dense<0.000000e+00> : vector<256x128xf32>
    %114 = tpu.matmul %111, %113, %cst_168 {dimension_numbers = #tpu.dot_dimension_numbers<[1], [0], [0], [1], [0, 0, 1, 1], [], []>} : vector<256x128xbf16>, vector<128x128xbf16>, vector<256x128xf32> -> vector<256x128xf32>
    %115 = arith.addf %109, %114 : vector<256x128xf32>
    %c0_169 = arith.constant 0 : index
    %c1_170 = arith.constant 1 : index
    %c0_171 = arith.constant 0 : index
    %c0_172 = arith.constant 0 : index
    %116 = vector.load %arg7[%c0_169, %c1_170, %c0_171, %c0_172] : memref<1x18x18x128xbf16, #tpu.memory_space<vmem>>, vector<1x16x16x128xbf16>
    %117 = vector.shape_cast %116 : vector<1x16x16x128xbf16> to vector<256x128xbf16>
    %c3_173 = arith.constant 3 : index
    %c0_174 = arith.constant 0 : index
    %c0_175 = arith.constant 0 : index
    %118 = vector.load %arg4[%c3_173, %c0_174, %c0_175] : memref<9x128x128xbf16, #tpu.memory_space<vmem>>, vector<1x128x128xbf16>
    %119 = vector.shape_cast %118 : vector<1x128x128xbf16> to vector<128x128xbf16>
    %cst_176 = arith.constant dense<0.000000e+00> : vector<256x128xf32>
    %120 = tpu.matmul %117, %119, %cst_176 {dimension_numbers = #tpu.dot_dimension_numbers<[1], [0], [0], [1], [0, 0, 1, 1], [], []>} : vector<256x128xbf16>, vector<128x128xbf16>, vector<256x128xf32> -> vector<256x128xf32>
    %121 = arith.addf %115, %120 : vector<256x128xf32>
    %c0_177 = arith.constant 0 : index
    %c1_178 = arith.constant 1 : index
    %c1_179 = arith.constant 1 : index
    %c0_180 = arith.constant 0 : index
    %122 = vector.load %arg7[%c0_177, %c1_178, %c1_179, %c0_180] : memref<1x18x18x128xbf16, #tpu.memory_space<vmem>>, vector<1x16x16x128xbf16>
    %123 = vector.shape_cast %122 : vector<1x16x16x128xbf16> to vector<256x128xbf16>
    %c4_181 = arith.constant 4 : index
    %c0_182 = arith.constant 0 : index
    %c0_183 = arith.constant 0 : index
    %124 = vector.load %arg4[%c4_181, %c0_182, %c0_183] : memref<9x128x128xbf16, #tpu.memory_space<vmem>>, vector<1x128x128xbf16>
    %125 = vector.shape_cast %124 : vector<1x128x128xbf16> to vector<128x128xbf16>
    %cst_184 = arith.constant dense<0.000000e+00> : vector<256x128xf32>
    %126 = tpu.matmul %123, %125, %cst_184 {dimension_numbers = #tpu.dot_dimension_numbers<[1], [0], [0], [1], [0, 0, 1, 1], [], []>} : vector<256x128xbf16>, vector<128x128xbf16>, vector<256x128xf32> -> vector<256x128xf32>
    %127 = arith.addf %121, %126 : vector<256x128xf32>
    %c0_185 = arith.constant 0 : index
    %c1_186 = arith.constant 1 : index
    %c2_187 = arith.constant 2 : index
    %c0_188 = arith.constant 0 : index
    %128 = vector.load %arg7[%c0_185, %c1_186, %c2_187, %c0_188] : memref<1x18x18x128xbf16, #tpu.memory_space<vmem>>, vector<1x16x16x128xbf16>
    %129 = vector.shape_cast %128 : vector<1x16x16x128xbf16> to vector<256x128xbf16>
    %c5_189 = arith.constant 5 : index
    %c0_190 = arith.constant 0 : index
    %c0_191 = arith.constant 0 : index
    %130 = vector.load %arg4[%c5_189, %c0_190, %c0_191] : memref<9x128x128xbf16, #tpu.memory_space<vmem>>, vector<1x128x128xbf16>
    %131 = vector.shape_cast %130 : vector<1x128x128xbf16> to vector<128x128xbf16>
    %cst_192 = arith.constant dense<0.000000e+00> : vector<256x128xf32>
    %132 = tpu.matmul %129, %131, %cst_192 {dimension_numbers = #tpu.dot_dimension_numbers<[1], [0], [0], [1], [0, 0, 1, 1], [], []>} : vector<256x128xbf16>, vector<128x128xbf16>, vector<256x128xf32> -> vector<256x128xf32>
    %133 = arith.addf %127, %132 : vector<256x128xf32>
    %c0_193 = arith.constant 0 : index
    %c2_194 = arith.constant 2 : index
    %c0_195 = arith.constant 0 : index
    %c0_196 = arith.constant 0 : index
    %134 = vector.load %arg7[%c0_193, %c2_194, %c0_195, %c0_196] : memref<1x18x18x128xbf16, #tpu.memory_space<vmem>>, vector<1x16x16x128xbf16>
    %135 = vector.shape_cast %134 : vector<1x16x16x128xbf16> to vector<256x128xbf16>
    %c6_197 = arith.constant 6 : index
    %c0_198 = arith.constant 0 : index
    %c0_199 = arith.constant 0 : index
    %136 = vector.load %arg4[%c6_197, %c0_198, %c0_199] : memref<9x128x128xbf16, #tpu.memory_space<vmem>>, vector<1x128x128xbf16>
    %137 = vector.shape_cast %136 : vector<1x128x128xbf16> to vector<128x128xbf16>
    %cst_200 = arith.constant dense<0.000000e+00> : vector<256x128xf32>
    %138 = tpu.matmul %135, %137, %cst_200 {dimension_numbers = #tpu.dot_dimension_numbers<[1], [0], [0], [1], [0, 0, 1, 1], [], []>} : vector<256x128xbf16>, vector<128x128xbf16>, vector<256x128xf32> -> vector<256x128xf32>
    %139 = arith.addf %133, %138 : vector<256x128xf32>
    %c0_201 = arith.constant 0 : index
    %c2_202 = arith.constant 2 : index
    %c1_203 = arith.constant 1 : index
    %c0_204 = arith.constant 0 : index
    %140 = vector.load %arg7[%c0_201, %c2_202, %c1_203, %c0_204] : memref<1x18x18x128xbf16, #tpu.memory_space<vmem>>, vector<1x16x16x128xbf16>
    %141 = vector.shape_cast %140 : vector<1x16x16x128xbf16> to vector<256x128xbf16>
    %c7_205 = arith.constant 7 : index
    %c0_206 = arith.constant 0 : index
    %c0_207 = arith.constant 0 : index
    %142 = vector.load %arg4[%c7_205, %c0_206, %c0_207] : memref<9x128x128xbf16, #tpu.memory_space<vmem>>, vector<1x128x128xbf16>
    %143 = vector.shape_cast %142 : vector<1x128x128xbf16> to vector<128x128xbf16>
    %cst_208 = arith.constant dense<0.000000e+00> : vector<256x128xf32>
    %144 = tpu.matmul %141, %143, %cst_208 {dimension_numbers = #tpu.dot_dimension_numbers<[1], [0], [0], [1], [0, 0, 1, 1], [], []>} : vector<256x128xbf16>, vector<128x128xbf16>, vector<256x128xf32> -> vector<256x128xf32>
    %145 = arith.addf %139, %144 : vector<256x128xf32>
    %c0_209 = arith.constant 0 : index
    %c2_210 = arith.constant 2 : index
    %c2_211 = arith.constant 2 : index
    %c0_212 = arith.constant 0 : index
    %146 = vector.load %arg7[%c0_209, %c2_210, %c2_211, %c0_212] : memref<1x18x18x128xbf16, #tpu.memory_space<vmem>>, vector<1x16x16x128xbf16>
    %147 = vector.shape_cast %146 : vector<1x16x16x128xbf16> to vector<256x128xbf16>
    %c8_213 = arith.constant 8 : index
    %c0_214 = arith.constant 0 : index
    %c0_215 = arith.constant 0 : index
    %148 = vector.load %arg4[%c8_213, %c0_214, %c0_215] : memref<9x128x128xbf16, #tpu.memory_space<vmem>>, vector<1x128x128xbf16>
    %149 = vector.shape_cast %148 : vector<1x128x128xbf16> to vector<128x128xbf16>
    %cst_216 = arith.constant dense<0.000000e+00> : vector<256x128xf32>
    %150 = tpu.matmul %147, %149, %cst_216 {dimension_numbers = #tpu.dot_dimension_numbers<[1], [0], [0], [1], [0, 0, 1, 1], [], []>} : vector<256x128xbf16>, vector<128x128xbf16>, vector<256x128xf32> -> vector<256x128xf32>
    %151 = arith.addf %145, %150 : vector<256x128xf32>
    %c0_217 = arith.constant 0 : index
    %c0_218 = arith.constant 0 : index
    %152 = vector.load %arg5[%c0_217, %c0_218] : memref<1x128xf32, #tpu.memory_space<vmem>>, vector<1x128xf32>
    %153 = vector.broadcast %152 : vector<1x128xf32> to vector<256x128xf32>
    %154 = arith.addf %151, %153 : vector<256x128xf32>
    %155 = vector.shape_cast %154 : vector<256x128xf32> to vector<1x256x128xf32>
    %cst_219 = arith.constant dense<0.000000e+00> : vector<1x128xf32>
    %156 = vector.multi_reduction <add>, %155, %cst_219 [1] : vector<1x256x128xf32> to vector<1x128xf32>
    %157 = vector.shape_cast %156 : vector<1x128xf32> to vector<1x1x128xf32>
    %cst_220 = arith.constant 2.560000e+02 : f32
    %158 = vector.broadcast %cst_220 : f32 to vector<1x1x128xf32>
    %159 = arith.divf %157, %158 : vector<1x1x128xf32>
    %160 = vector.broadcast %159 : vector<1x1x128xf32> to vector<1x256x128xf32>
    %161 = arith.subf %155, %160 : vector<1x256x128xf32>
    %162 = arith.mulf %161, %161 : vector<1x256x128xf32>
    %cst_221 = arith.constant dense<0.000000e+00> : vector<1x128xf32>
    %163 = vector.multi_reduction <add>, %162, %cst_221 [1] : vector<1x256x128xf32> to vector<1x128xf32>
    %164 = vector.shape_cast %163 : vector<1x128xf32> to vector<1x1x128xf32>
    %cst_222 = arith.constant 2.560000e+02 : f32
    %165 = vector.broadcast %cst_222 : f32 to vector<1x1x128xf32>
    %166 = arith.divf %164, %165 : vector<1x1x128xf32>
    %cst_223 = arith.constant 9.99999974E-6 : f32
    %167 = vector.broadcast %cst_223 : f32 to vector<1x1x128xf32>
    %168 = arith.addf %166, %167 : vector<1x1x128xf32>
    %169 = math.rsqrt %168 : vector<1x1x128xf32>
    %170 = vector.broadcast %169 : vector<1x1x128xf32> to vector<1x256x128xf32>
    %171 = arith.mulf %161, %170 : vector<1x256x128xf32>
    %cst_224 = arith.constant 0.000000e+00 : f32
    %172 = vector.broadcast %cst_224 : f32 to vector<1x256x128xf32>
    %173 = arith.maximumf %171, %172 : vector<1x256x128xf32>
    %174 = vector.extract_strided_slice %173 {offsets = [0, 0, 0], sizes = [1, 256, 8], strides = [1, 1, 1]} : vector<1x256x128xf32> to vector<1x256x8xf32>
    %175 = vector.shape_cast %174 : vector<1x256x8xf32> to vector<1x16x16x8xf32>
    %c0_225 = arith.constant 0 : index
    %c0_226 = arith.constant 0 : index
    %c0_227 = arith.constant 0 : index
    %c0_228 = arith.constant 0 : index
    %176 = vector.load %arg1[%c0_225, %c0_226, %c0_227, %c0_228] : memref<1x16x16x8xf32, #tpu.memory_space<vmem>>, vector<1x16x16x8xf32>
    %177 = arith.addf %175, %176 : vector<1x16x16x8xf32>
    %c0_229 = arith.constant 0 : index
    %c0_230 = arith.constant 0 : index
    %c0_231 = arith.constant 0 : index
    %c0_232 = arith.constant 0 : index
    %178 = vector.load %arg6[%c0_229, %c0_230, %c0_231, %c0_232] : memref<1x16x16x8xf32, #tpu.memory_space<vmem>>, vector<1x16x16x8xf32>
    tpu.vector_store %arg6[%c0_229, %c0_230, %c0_231, %c0_232], %177 {strides = array<i32>} : memref<1x16x16x8xf32, #tpu.memory_space<vmem>>, vector<1x16x16x8xf32>,
    return
  }
  func.func @transform_0(%arg0: i32) -> (i32, i32, i32, i32) {
    %c0_i32 = arith.constant 0 : i32
    %c0_i32_0 = arith.constant 0 : i32
    %c0_i32_1 = arith.constant 0 : i32
    %c0_i32_2 = arith.constant 0 : i32
    return %arg0, %c0_i32, %c0_i32_0, %c0_i32_1 : i32, i32, i32, i32
  }
  func.func @transform_1(%arg0: i32) -> (i32, i32, i32) {
    %c0_i32 = arith.constant 0 : i32
    %c0_i32_0 = arith.constant 0 : i32
    %c0_i32_1 = arith.constant 0 : i32
    %c0_i32_2 = arith.constant 0 : i32
    return %c0_i32, %c0_i32_0, %c0_i32_1 : i32, i32, i32
  }
  func.func @transform_2(%arg0: i32) -> (i32, i32) {
    %c0_i32 = arith.constant 0 : i32
    %c0_i32_0 = arith.constant 0 : i32
    %c0_i32_1 = arith.constant 0 : i32
    return %c0_i32, %c0_i32_0 : i32, i32
  }
  func.func @transform_3(%arg0: i32) -> (i32, i32, i32) {
    %c0_i32 = arith.constant 0 : i32
    %c0_i32_0 = arith.constant 0 : i32
    %c0_i32_1 = arith.constant 0 : i32
    %c0_i32_2 = arith.constant 0 : i32
    return %c0_i32, %c0_i32_0, %c0_i32_1 : i32, i32, i32
  }
  func.func @transform_4(%arg0: i32) -> (i32, i32) {
    %c0_i32 = arith.constant 0 : i32
    %c0_i32_0 = arith.constant 0 : i32
    %c0_i32_1 = arith.constant 0 : i32
    return %c0_i32, %c0_i32_0 : i32, i32
  }
  func.func @transform_5(%arg0: i32) -> (i32, i32, i32, i32) {
    %c0_i32 = arith.constant 0 : i32
    %c0_i32_0 = arith.constant 0 : i32
    %c0_i32_1 = arith.constant 0 : i32
    %c0_i32_2 = arith.constant 0 : i32
    return %arg0, %c0_i32, %c0_i32_0, %c0_i32_1 : i32, i32, i32, i32
  }
}

</mosaic_0001>

<bundles_post_ra>
// kernel: resnet_block_forward.1
= control target key start
LH: loop header
LB: loop body
LE: loop exit
PB: predicated region body
PF: predicated region fallthrough
CT: control target
= control target key end

     0   :  { %s14803_s18 = smov 0   ;;  %s20856_s0 = inlined_call_operand.vmem [shape: f32[2,16,16,8], index: 0, kind: input, shape index: {}]   ;;  %s20857_s1 = inlined_call_operand.vmem [shape: bf16[9,128,128], index: 1, kind: input, shape index: {}]   ;;  %s20858_s2 = inlined_call_operand.vmem [shape: f32[1,128], index: 2, kind: input, shape index: {}]   ;;  %s20859_s3 = inlined_call_operand.vmem [shape: bf16[9,128,128], index: 3, kind: input, shape index: {}]   ;;  %s20860_s4 = inlined_call_operand.vmem [shape: f32[1,128], index: 4, kind: input, shape index: {}]   ;;  %s20861_s5 = inlined_call_operand.vmem [shape: f32[2,16,16,8], index: 5, kind: output, shape index: {}]  }
   0x1 LB: > { %s12210_s19 = sadd.s32 4294967295, %s14771_s18   ;;  %p12214_p0 = scmp.ge.s32.totalorder %s14771_s18, 1  ;;  %s14771_s18 = sphi %s14803_s18, %s15_s18  }
   0x2   : > { %p187_p1 = scmp.lt.s32.totalorder %s14771_s18, 3 }
   0x4   : > { %p188_p2 = pnand %p12214_p0, %p187_p1 }
   0x6   : > { %191 = sbr.rel (%p188_p2) target bundleno = 1608 (0x648), region = 40 }
   0xb   : > { %v14481_v0 = vld [vmem:[%s20857_s1 + $0x78] sm:$0xff]   ;;  %v14483_v2 = vld [vmem:[%s20857_s1 + $0x70] sm:$0xff]   ;;  %p215_p3 = scmp.lt.s32.totalorder %s12210_s19, 1  ;;  %v14485_v4 = vld [vmem:[%s20857_s1 + $0x68] sm:$0xff]   ;;  %vm274_vm0 = vcmask 64512   ;;  %vm712_vm3 = vcmask 1043456  }
   0xc   : > { %v14482_v1 = vld [vmem:[%s20857_s1 + $0x38] sm:$0xff]   ;;  %13609 = vmatprep.subr.bf16.mxu0 %v14481_v0  ;;  %v14484_v3 = vld [vmem:[%s20857_s1 + $0x30] sm:$0xff]   ;;  %v14486_v5 = vld [vmem:[%s20857_s1 + $0x28] sm:$0xff]   ;;  %vm388_vm1 = vsmask.f32 256  ;;  %vm719_vm5 = vcmask 1040384  }
   0xd   : > { %13610 = vmatpush3.bf16.msra.mxu0 %v14481_v0  ;;  %13657 = vmatprep.subr.bf16.mxu1 %v14482_v1  ;;  %s21246_s19 = smov (!%p215_p3, %s12210_s19), 1  ;;  %v14487_v6 = vld [vmem:[%s20857_s1 + $0x60] sm:$0xff]   ;;  %v14489_v8 = vld [vmem:[%s20857_s1 + $0x58] sm:$0xff]   ;;  %v14491_v10 = vld [vmem:[%s20857_s1 + $0x50] sm:$0xff]   ;;  %vm389_vm2 = vsmask.f32 4368 }
   0xe   : > { %13658 = vmatpush3.bf16.msra.mxu1 %v14482_v1  ;;  %13611 = vmatprep.subr.bf16.mxu0 %v14483_v2  ;;  %v14488_v7 = vld [vmem:[%s20857_s1 + $0x20] sm:$0xff]   ;;  %s13143_s11 = sshll.u32 %s21246_s19, 8  ;;  %v14490_v9 = vld [vmem:[%s20857_s1 + $0x18] sm:$0xff]   ;;  %v14492_v13 = vld [vmem:[%s20857_s1 + $0x10] sm:$0xff]   ;;  %vm713_vm4 = vsmask.f32 7938 }
   0xf   : > { %13659 = vmatprep.subr.bf16.mxu1 %v14484_v3  ;;  %s14849_s20 = scalar_lea.vmem %s20856_s0, %s13143_s11  ;;  %v14493_v15 = vld [vmem:[%s20857_s1 + $0x48] sm:$0xff]   ;;  %v14495_v23 = vld [vmem:[%s20857_s1 + $0x40] sm:$0xff]   ;;  %vm14873_vm6 = vmor %vm388_vm1, %vm389_vm2  ;;  %v20891_v28 = vmov 0  ;;  %v20894_v34 = vmov 0  ;;  %v20897_v38 = vmov 0  ;;  %vm2227_vm13 = vcmask 1042432   ;;  %s20726_s28 = scalar_lea.vmem %s20861_s5, %s13143_s11 }
  0x10   : > { %v228_v11 = vld [vmem:[%s14849_s20 + $0x10] sm:$0xff]  ;;  %v229_v12 = vld [vmem:[%s14849_s20 + $0x18] sm:$0xff]  ;;  %v226_v19 = vld [vmem:[%s14849_s20] sm:$0xff]  ;;  %v20892_v28 = vsel %vm14873_vm6, 4294967295, %v20891_v28  ;;  %vm1197_vm10 = vsmask.f32 3328 }
  0x11   : > { %13612 = vmatpush3.bf16.msra.mxu0 %v14483_v2  ;;  %v259_v14 = vpack.c.bf16 %v229_v12, %v228_v11  ;;  %v227_v20 = vld [vmem:[%s14849_s20 + $0x8] sm:$0xff]  ;;  %20893 = vst [vmem:[#allocation3_spill] sm:$0xff] %v20892_v28  ;;  %v230_v30 = vld [vmem:[%s14849_s20 + $0x20] sm:$0xff]  ;;  %vm14884_vm7 = vmand %vm712_vm3, %vm713_vm4  ;;  %vm1198_vm11 = vsmask.f32 7440  ;;  %vm2228_vm14 = vcmask 1046532  }
  0x12   : > { %13660 = vmatpush3.bf16.msra.mxu1 %v14484_v3  ;;  %13613 = vmatprep.subr.bf16.mxu0 %v14485_v4  ;;  %v14494_v21 = vld [vmem:[%s20857_s1 + $0x8] sm:$0xff]   ;;  %v258_v22 = vpack.c.bf16 %v227_v20, %v226_v19  ;;  %v14496_v31 = vld [vmem:[%s20857_s1] sm:$0xff]   ;;  %v20895_v34 = vsel %vm14884_vm7, 4294967295, %v20894_v34  ;;  %vm14891_vm8 = vmand %vm719_vm5, %vm388_vm1 }
  0x13   : > { %13661 = vmatprep.subr.bf16.mxu1 %v14486_v5  ;;  %v279_v16 = vsel %vm274_vm0, %v259_v14, 0  ;;  %20896 = vst [vmem:[#allocation4_spill] sm:$0xff] %v20895_v34  ;;  %v231_v37 = vld [vmem:[%s14849_s20 + $0x28] sm:$0xff]  ;;  %v20898_v38 = vsel %vm14891_vm8, 4294967295, %v20897_v38  ;;  %v724_v39 = vld [vmem:[#allocation2 + $0x18] sm:$0xf]  ;;  %vm14925_vm9 = vmand %vm719_vm5, %vm713_vm4 }
  0x14   : > { %v12221_v17 = vcombine.low %v279_v16, %v279_v16  ;;  %v12222_v18 = vcombine.high %v279_v16, %v279_v16  ;;  %v277_v29 = vsel %vm274_vm0, %v258_v22, 0  ;;  %20899 = vst [vmem:[#allocation5_spill] sm:$0xff] %v20898_v38  ;;  %v728_v40 = vld [vmem:[#allocation2 + $0x20] sm:$0x1]  ;;  %v260_v41 = vpack.c.bf16 %v231_v37, %v230_v30  ;;  %v232_v46 = vld [vmem:[%s14849_s20 + $0x30] sm:$0xff]  ;;  %v233_v47 = vld [vmem:[%s14849_s20 + $0x38] sm:$0xff] }
  0x15   : > { %13614 = vmatpush3.bf16.msra.mxu0 %v14485_v4  ;;  %v12219_v35 = vcombine.low %v277_v29, %v277_v29  ;;  %v12220_v36 = vcombine.high %v277_v29, %v277_v29  ;;  %v14906_v55 = vld [vmem:[%s20857_s1 + $0xb8] sm:$0xff]   ;;  %v715_v61 = vld [vmem:[#allocation2 + $0xc] sm:$0xf]  ;;  %v721_v62 = vld [vmem:[#allocation2 + $0x14] sm:$0x1]  ;;  %v261_v63 = vpack.c.bf16 %v233_v47, %v232_v46 }
  0x16   : > { %13662 = vmatpush3.bf16.msra.mxu1 %v14486_v5  ;;  %13615 = vmatprep.subr.bf16.mxu0 %v14487_v6  ;;  %v409_v24 = vshrl.u32 %v12221_v17, 16  ;;  %v412_v25 = vshll.u32 %v12221_v17, 16  ;;  %v417_v26 = vshrl.u32 %v12222_v18, 16  ;;  %v420_v27 = vshll.u32 %v12222_v18, 16  ;;  %v234_v11 = vld [vmem:[%s14849_s20 + $0x40] sm:$0xff]  ;;  %v235_v12 = vld [vmem:[%s14849_s20 + $0x48] sm:$0xff]  ;;  %vm15021_vm12 = vmor %vm1197_vm10, %vm1198_vm11 }
  0x17   : > { %13663 = vmatprep.subr.bf16.mxu1 %v14488_v7  ;;  %v392_v48 = vshrl.u32 %v12219_v35, 16  ;;  %v395_v49 = vshll.u32 %v12219_v35, 16  ;;  %v400_v50 = vshrl.u32 %v12220_v36, 16  ;;  %v403_v51 = vshll.u32 %v12220_v36, 16  ;;  %v14946_v46 = vld [vmem:[%s14849_s20 + $0x68] sm:$0xff]  ;;  %vm15512_vm15 = vmor %vm2227_vm13, %vm2228_vm14 }
  0x18   : > { %v411_v32 = vrot.slane %v409_v24, 7  ;;  %v419_v33 = vrot.slane %v417_v26, 7  ;;  %v281_v56 = vsel %vm274_vm0, %v260_v41, 0  ;;  %v283_v16 = vsel %vm274_vm0, %v261_v63, 0  ;;  %v14935_v41 = vld [vmem:[%s14849_s20 + $0x58] sm:$0xff] }
  0x19   : > { %13616 = vmatpush3.bf16.msra.mxu0 %v14487_v6  ;;  %v394_v57 = vrot.slane %v392_v48, 7  ;;  %v402_v58 = vrot.slane %v400_v50, 7  ;;  %v12223_v59 = vcombine.low %v281_v56, %v281_v56  ;;  %v12224_v60 = vcombine.high %v281_v56, %v281_v56 }
  0x1a   : > { %13664 = vmatpush3.bf16.msra.mxu1 %v14488_v7  ;;  %13617 = vmatprep.subr.bf16.mxu0 %v14489_v8  ;;  %v414_v42 = vor.u32 %v412_v25, %v411_v32  ;;  %v415_v43 = vrot.slane %v411_v32, 4  ;;  %v422_v44 = vor.u32 %v420_v27, %v419_v33  ;;  %v424_v45 = vrot.slane %v419_v33, 4 }
  0x1b   : > { %13665 = vmatprep.subr.bf16.mxu1 %v14490_v9  ;;  %v397_v0 = vor.u32 %v395_v49, %v394_v57  ;;  %v398_v1 = vrot.slane %v394_v57, 4  ;;  %v405_v2 = vor.u32 %v403_v51, %v402_v58  ;;  %v407_v3 = vrot.slane %v402_v58, 4 }
  0x1c   : > { %v423_v52 = vsel %vm14873_vm6, %v415_v43, %v422_v44  ;;  %v725_v53 = vsel %vm14884_vm7, %v414_v42, %v724_v39  ;;  %v729_v54 = vsel %vm14891_vm8, %v424_v45, %v728_v40  ;;  %v426_v4 = vshrl.u32 %v12223_v59, 16  ;;  %v14932_v40 = vld [vmem:[%s14849_s20 + $0x50] sm:$0xff]  ;;  %v14938_v42 = vld [vmem:[%s14849_s20 + $0x60] sm:$0xff] }
  0x1d   : > { %13618 = vmatpush3.bf16.msra.mxu0 %v14489_v8  ;;  %726 = vst [vmem:[#allocation2 + $0x18] sm:$0xf] %v725_v53  ;;  %727 = vst [vmem:[#allocation2 + $0x1c] sm:$0xf] %v423_v52  ;;  %v429_v5 = vshll.u32 %v12223_v59, 16  ;;  %v434_v6 = vshrl.u32 %v12224_v60, 16  ;;  %v406_v7 = vsel %vm14873_vm6, %v398_v1, %v405_v2  ;;  %v716_v8 = vsel %vm14884_vm7, %v397_v0, %v715_v61 }
  0x1e   : > { %13666 = vmatpush3.bf16.msra.mxu1 %v14490_v9  ;;  %13619 = vmatprep.subr.bf16.mxu0 %v14491_v10  ;;  %730 = vst [vmem:[#allocation2 + $0x20] sm:$0x1] %v729_v54  ;;  %v722_v9 = vsel %vm14891_vm8, %v407_v3, %v721_v62  ;;  %717 = vst [vmem:[#allocation2 + $0xc] sm:$0xf] %v716_v8  ;;  %v262_v22 = vpack.c.bf16 %v235_v12, %v234_v11  ;;  %v20900_v33 = vmov 0 }
  0x1f   : > { %13667 = vmatprep.subr.bf16.mxu1 %v14492_v13  ;;  %718 = vst [vmem:[#allocation2 + $0x10] sm:$0xf] %v406_v7  ;;  %723 = vst [vmem:[#allocation2 + $0x14] sm:$0x1] %v722_v9  ;;  %v436_v14 = vrot.slane %v434_v6, 7  ;;  %v20901_v33 = vsel %vm14925_vm9, 4294967295, %v20900_v33  ;;  %v14954_v57 = vcombine.low %v283_v16, %v283_v16  ;;  %v14956_v58 = vcombine.high %v283_v16, %v283_v16 }
  0x20   : > { %20902 = vst [vmem:[#allocation6_spill] sm:$0xff] %v20901_v33  ;;  %v285_v45 = vsel %vm274_vm0, %v262_v22, 0  ;;  %v14985_v22 = vld [vmem:[%s14849_s20 + $0x70] sm:$0xff] }
  0x21   : > { %13620 = vmatpush3.bf16.msra.mxu0 %v14491_v10  ;;  %v437_v10 = vshll.u32 %v12224_v60, 16  ;;  %v441_v39 = vrot.slane %v436_v14, 4  ;;  %v14973_v11 = vcombine.low %v285_v45, %v285_v45 }
  0x22   : > { %13668 = vmatpush3.bf16.msra.mxu1 %v14492_v13  ;;  %13621 = vmatprep.subr.bf16.mxu0 %v14493_v15  ;;  %v428_v13 = vrot.slane %v426_v4, 7  ;;  %v263_v4 = vpack.c.bf16 %v14935_v41, %v14932_v40  ;;  %v749_v41 = vld [vmem:[#allocation2 + $0x44] sm:$0x1] }
  0x23   : > { %13669 = vmatprep.subr.bf16.mxu1 %v14494_v21  ;;  %v439_v26 = vor.u32 %v437_v10, %v436_v14 }
  0x24   : > { %v830_v17 = vld [vmem:[#allocation2 + $0x18] sm:$0xf]  ;;  %v831_v18 = vld [vmem:[#allocation2 + $0x1c] sm:$0xf]  ;;  %v431_v20 = vor.u32 %v429_v5, %v428_v13  ;;  %v432_v37 = vrot.slane %v428_v13, 4  ;;  %v264_v5 = vpack.c.bf16 %v14946_v46, %v14938_v42 }
  0x25   : > { %13622 = vmatpush3.bf16.msra.mxu0 %v14493_v15  ;;  %v731_v15 = vld [vmem:[#allocation2 + $0x24] sm:$0xf]  ;;  %v832_v19 = vld [vmem:[#allocation2 + $0x20] sm:$0x1]  ;;  %833 = vst [vmem:[#allocation2] sm:$0xf] %v830_v17 }
  0x26   : > { %13670 = vmatpush3.bf16.msra.mxu1 %v14494_v21  ;;  %13623 = vmatprep.subr.bf16.mxu0 %v14495_v23  ;;  %v735_v21 = vld [vmem:[#allocation2 + $0x2c] sm:$0x1]  ;;  %834 = vst [vmem:[#allocation2 + $0x4] sm:$0xf] %v831_v18  ;;  %835 = vst [vmem:[#allocation2 + $0x8] sm:$0x1] %v832_v19  ;;  %v732_v32 = vsel %vm14884_vm7, %v431_v20, %v731_v15  ;;  %v440_v50 = vsel %vm14873_vm6, %v432_v37, %v439_v26 }
  0x27   : > { %13671 = vmatprep.subr.bf16.mxu1 %v14496_v31  ;;  %v940_v24 = vld [vmem:[#allocation2 + $0x18] sm:$0x1]  ;;  %v990_v25 = vld [vmem:[#allocation2 + $0x1c] sm:$0x8]  ;;  %v1085_v30 = vld [vmem:[#allocation2 + $0x20] sm:$0x1]  ;;  %v736_v51 = vsel %vm14891_vm8, %v441_v39, %v735_v21 }
  0x28   : > { %v12271_v29 = vrot.slane %v990_v25, 11  ;;  %733 = vst [vmem:[#allocation2 + $0x24] sm:$0xf] %v732_v32  ;;  %v845_v47 = vld [vmem:[#allocation2 + $0xc] sm:$0x2]  ;;  %v443_v21 = vshrl.u32 %v14954_v57, 16  ;;  %v15000_v32 = vcombine.high %v285_v45, %v285_v45 }
  0x29   : > { %13624 = vmatpush3.bf16.msra.mxu0 %v14495_v23  ;;  %v846_v23 = vld [vmem:[#allocation2 + $0x18] sm:$0x2]  ;;  %v937_v48 = vld [vmem:[#allocation2 + $0xc] sm:$0x1]  ;;  %v989_v49 = vld [vmem:[#allocation2 + $0x10] sm:$0x8] }
  0x2a   : > { %13672 = vmatpush3.bf16.msra.mxu1 %v14496_v31  ;;  %13705 = vmatprep.subr.bf16.mxu0 %v14906_v55  ;;  %v12253_v27 = vrot.slane %v846_v23, 9  ;;  %v14919_v31 = vld [vmem:[#allocation2 + $0x1c] sm:$0xf]  ;;  %v1086_v44 = vsel %vm14925_vm9, %v12271_v29, %v1085_v30  ;;  %v12252_v52 = vrot.slane %v845_v47, 9  ;;  %v12270_v53 = vrot.slane %v989_v49, 11 }
  0x2b   : > { %v1258_v35 = vshll.u32 %v14919_v31, 16  ;;  %v1262_v36 = vshrl.u32 %v14919_v31, 16  ;;  %1087 = vst [vmem:[#allocation2 + $0x20] sm:$0x1] %v1086_v44  ;;  %v1082_v54 = vld [vmem:[#allocation2 + $0x14] sm:$0x1] }
  0x2c   : > { %v941_v43 = vsel %vm14891_vm8, %v12253_v27, %v940_v24  ;;  %v14952_v56 = vld [vmem:[#allocation2 + $0x10] sm:$0xf]  ;;  %734 = vst [vmem:[#allocation2 + $0x28] sm:$0xf] %v440_v50  ;;  %737 = vst [vmem:[#allocation2 + $0x2c] sm:$0x1] %v736_v51  ;;  %v938_v2 = vsel %vm14891_vm8, %v12252_v52, %v937_v48  ;;  %v1083_v3 = vsel %vm14925_vm9, %v12270_v53, %v1082_v54 }
  0x2d   : > { %942 = vst [vmem:[#allocation2 + $0x18] sm:$0x1] %v941_v43  ;;  %v1234_v59 = vshll.u32 %v14952_v56, 16  ;;  %v1238_v60 = vshrl.u32 %v14952_v56, 16  ;;  %v14960_v61 = vrot.slane %v1258_v35, 5  ;;  %v1264_v62 = vrot.slane %v1262_v36, 4 }
  0x2e   : > { %v844_v63 = vld [vmem:[#allocation2] sm:$0x2]  ;;  %v934_v0 = vld [vmem:[#allocation2] sm:$0x1]  ;;  %v988_v1 = vld [vmem:[#allocation2 + $0x4] sm:$0x8] }
  0x2f   : > { %v12251_v6 = vrot.slane %v844_v63, 9  ;;  %v12269_v7 = vrot.slane %v988_v1, 11  ;;  %v1079_v8 = vld [vmem:[#allocation2 + $0x8] sm:$0x1]  ;;  %v14970_v9 = vld [vmem:[#allocation2 + $0x4] sm:$0xf]  ;;  %v1265_v10 = vor.u32 %v1264_v62, %v14960_v61 }
  0x30   : > { %939 = vst [vmem:[#allocation2 + $0xc] sm:$0x1] %v938_v2  ;;  %1084 = vst [vmem:[#allocation2 + $0x14] sm:$0x1] %v1083_v3  ;;  %v1210_v12 = vshll.u32 %v14970_v9, 16  ;;  %v1214_v13 = vshrl.u32 %v14970_v9, 16 }
  0x31   : > { %v14977_v14 = vrot.slane %v1234_v59, 5  ;;  %v1240_v15 = vrot.slane %v1238_v60, 4  ;;  %v847_v16 = vld [vmem:[#allocation2 + $0x24] sm:$0x2]  ;;  %v935_v17 = vsel %vm14891_vm8, %v12251_v6, %v934_v0  ;;  %v1080_v18 = vsel %vm14925_vm9, %v12269_v7, %v1079_v8  ;;  %v943_v20 = vld [vmem:[#allocation2 + $0x24] sm:$0x1] }
  0x32   : > { %v12254_v19 = vrot.slane %v847_v16, 9  ;;  %v14988_v23 = vld [vmem:[%s14849_s20 + $0x78] sm:$0xff]  ;;  %936 = vst [vmem:[#allocation2] sm:$0x1] %v935_v17  ;;  %1081 = vst [vmem:[#allocation2 + $0x8] sm:$0x1] %v1080_v18 }
  0x33   : > { %v14993_v24 = vld [vmem:[%s20857_s1 + $0xf8] sm:$0xff]   ;;  %v14995_v25 = vrot.slane %v1210_v12, 5  ;;  %v1216_v26 = vrot.slane %v1214_v13, 4  ;;  %v1241_v27 = vor.u32 %v1240_v15, %v14977_v14  ;;  %v1183_v30 = vld [vmem:[#allocation2 + $0x20] sm:$0x1]  ;;  %v446_v43 = vshll.u32 %v14954_v57, 16 }
  0x34   : > { %v14998_v29 = vld [vmem:[#allocation2 + $0x18] sm:$0xf]  ;;  %v1268_v37 = vshll.u32 %v1183_v30, 16  ;;  %v991_v39 = vld [vmem:[#allocation2 + $0x28] sm:$0x8]  ;;  %13753 = vmatprep.subr.bf16.mxu1 %v14993_v24  ;;  %v1266_v47 = vrot.slane %v1265_v10, 4  ;;  %v944_v48 = vsel %vm14891_vm8, %v12254_v19, %v943_v20  ;;  %v265_v1 = vpack.c.bf16 %v14988_v23, %v14985_v22 }
  0x35   : > { %v1249_v35 = vshrl.u32 %v14998_v29, 16  ;;  %v1252_v36 = vshll.u32 %v14998_v29, 16  ;;  %v1217_v44 = vor.u32 %v1216_v26, %v14995_v25  ;;  %v12272_v49 = vrot.slane %v991_v39, 11  ;;  %v1088_v50 = vld [vmem:[#allocation2 + $0x2c] sm:$0x1]  ;;  %v14522_v42 = vld [vmem:[%s20857_s1 + $0xd8] sm:$0xff]  }
  0x36   : > { %v15009_v45 = vld [vmem:[#allocation2 + $0x28] sm:$0xf]  ;;  %v1270_v53 = vrot.slane %v1268_v37, 5  ;;  %945 = vst [vmem:[#allocation2 + $0x24] sm:$0x1] %v944_v48  ;;  %v1242_v62 = vrot.slane %v1241_v27, 4  ;;  %v12329_v12 = vcombine.low %v14998_v29, %v14919_v31 }
  0x37   : > { %v1251_v51 = vrot.slane %v1249_v35, 4  ;;  %v1254_v52 = vrot.slane %v1252_v36, 5  ;;  %v1282_v54 = vshll.u32 %v15009_v45, 16  ;;  %v1135_v59 = vld [vmem:[#allocation2 + $0xc] sm:$0xf]  ;;  %v1089_v63 = vsel %vm14925_vm9, %v12272_v49, %v1088_v50 }
  0x38   : > { %v1182_v60 = vld [vmem:[#allocation2 + $0x14] sm:$0x1]  ;;  %v1286_v0 = vshrl.u32 %v15009_v45, 16  ;;  %v15017_v2 = vrot.slane %v1217_v44, 4  ;;  %v1225_v3 = vshrl.u32 %v1135_v59, 16  ;;  %v1228_v6 = vshll.u32 %v1135_v59, 16 }
  0x39   : > { %v1244_v7 = vshll.u32 %v1182_v60, 16  ;;  %1090 = vst [vmem:[#allocation2 + $0x2c] sm:$0x1] %v1089_v63  ;;  %v20903_v8 = vmov 0  ;;  %v1255_v10 = vor.u32 %v1254_v52, %v1251_v51  ;;  %v15027_v13 = vrot.slane %v1282_v54, 5  ;;  %v14513_v44 = vld [vmem:[%s20857_s1 + $0xf0] sm:$0xff]  }
  0x3a   : > { %v20904_v8 = vsel %vm15021_vm12, 4294967295, %v20903_v8  ;;  %v1288_v15 = vrot.slane %v1286_v0, 4  ;;  %v1133_v16 = vld [vmem:[#allocation2] sm:$0xf]  ;;  %v1181_v17 = vld [vmem:[#allocation2 + $0x8] sm:$0x1]  ;;  %v12328_v20 = vcombine.low %v1135_v59, %v14952_v56  ;;  %v1271_v26 = vsel %vm15021_vm12, %v1266_v47, %v1270_v53 }
  0x3b   : > { %20905 = vst [vmem:[#allocation7_spill] sm:$0xff] %v20904_v8  ;;  %v1227_v18 = vrot.slane %v1225_v3, 4  ;;  %v1230_v19 = vrot.slane %v1228_v6, 5  ;;  %v1201_v27 = vshrl.u32 %v1133_v16, 16  ;;  %v1204_v30 = vshll.u32 %v1133_v16, 16 }
  0x3c   : > { %v1220_v35 = vshll.u32 %v1181_v17, 16  ;;  %v12327_v36 = vcombine.low %v1133_v16, %v14970_v9  ;;  %v1246_v39 = vrot.slane %v1244_v7, 5  ;;  %v1256_v31 = vrot.slane %v1255_v10, 4 }
  0x3d   : > { %v1231_v37 = vor.u32 %v1230_v19, %v1227_v18  ;;  %v1289_v29 = vor.u32 %v1288_v15, %v15027_v13  ;;  %v1203_v48 = vrot.slane %v1201_v27, 4  ;;  %v1206_v49 = vrot.slane %v1204_v30, 5  ;;  %v1139_v50 = vld [vmem:[#allocation2 + $0x24] sm:$0xf]  ;;  %v738_v15 = vld [vmem:[#allocation2 + $0x30] sm:$0xf] }
  0x3e   : > { %v1222_v56 = vrot.slane %v1220_v35, 5  ;;  %13673 = vmatprep.mubr.bf16.mxu1 %v12327_v36  ;;  %v15039_v47 = vrot.slane %v443_v21, 7  ;;  %v1247_v9 = vsel %vm15021_vm12, %v1242_v62, %v1246_v39  ;;  %v1261_v52 = vsel %vm15021_vm12, %v1256_v31, %v14960_v61  ;;  %v14517_v61 = vld [vmem:[%s20857_s1 + $0xe8] sm:$0xff]   ;;  %v742_v30 = vld [vmem:[#allocation2 + $0x38] sm:$0x1]  ;;  %v14518_v39 = vld [vmem:[%s20857_s1 + $0xe0] sm:$0xff]  }
  0x3f   : > { %v1232_v51 = vrot.slane %v1231_v37, 4  ;;  %13674 = vmatmul.mubr.bf16.vlgmr.msra.gmra.mxu1 %v12328_v20  ;;  %v1273_v53 = vshrl.u32 %v1139_v50, 16  ;;  %v1207_v54 = vor.u32 %v1206_v49, %v1203_v48  ;;  %v12305_v60 = vcombine.low %v1261_v52, %v1271_v26  ;;  %v745_v48 = vld [vmem:[#allocation2 + $0x3c] sm:$0xf] }
  0x40   : > { %v1223_v59 = vsel %vm15021_vm12, %v15017_v2, %v1222_v56  ;;  %13677 = vmatprep.mubr.bf16.mxu1 %v12329_v12  ;;  %v1184_v63 = vld [vmem:[#allocation2 + $0x2c] sm:$0x1]  ;;  %v1276_v21 = vshll.u32 %v1139_v50, 16  ;;  %13754 = vmatpush3.bf16.msra.mxu1 %v14993_v24  ;;  %v1290_v3 = vrot.slane %v1289_v29, 4  ;;  %v12330_v12 = vcombine.low %v1139_v50, %v15009_v45 }
  0x41   : > { %v1237_v62 = vsel %vm15021_vm12, %v1232_v51, %v14977_v14  ;;  %v1275_v0 = vrot.slane %v1273_v53, 4  ;;  %v1292_v6 = vshll.u32 %v1184_v63, 16  ;;  %13755 = vmatprep.subr.bf16.mxu1 %v14513_v44  ;;  %v1208_v7 = vrot.slane %v1207_v54, 4 }
  0x42   : > { %v12304_v2 = vcombine.low %v1237_v62, %v1247_v9  ;;  %v1278_v10 = vrot.slane %v1276_v21, 5  ;;  %v448_v24 = vor.u32 %v446_v43, %v15039_v47  ;;  %v449_v14 = vrot.slane %v15039_v47, 4 }
  0x43   : > { %v1294_v16 = vrot.slane %v1292_v6, 5  ;;  %v451_v17 = vshrl.u32 %v14956_v58, 16  ;;  %v1213_v18 = vsel %vm15021_vm12, %v1208_v7, %v14995_v25  ;;  %v454_v20 = vshll.u32 %v14956_v58, 16  ;;  %v14501_v25 = vld [vmem:[%s20857_s1 + $0xb0] sm:$0xff]   ;;  %v752_v7 = vld [vmem:[#allocation2 + $0x48] sm:$0xf] }
  0x44   : > { %v1279_v19 = vor.u32 %v1278_v10, %v1275_v0  ;;  %v460_v26 = vshrl.u32 %v14973_v11, 16  ;;  %13756 = vmatpush3.bf16.msra.mxu1 %v14513_v44  ;;  %v12303_v45 = vcombine.low %v1213_v18, %v1223_v59  ;;  %v739_v43 = vsel %vm14884_vm7, %v448_v24, %v738_v15  ;;  %v14523_v15 = vld [vmem:[%s20857_s1 + $0xd0] sm:$0xff]  }
  0x45   : > { %v1295_v27 = vsel %vm15021_vm12, %v1290_v3, %v1294_v16  ;;  %v453_v57 = vrot.slane %v451_v17, 7  ;;  %13757 = vmatprep.subr.bf16.mxu1 %v14517_v61  ;;  %740 = vst [vmem:[#allocation2 + $0x30] sm:$0xf] %v739_v43  ;;  %v463_v36 = vshll.u32 %v14973_v11, 16  ;;  %v468_v37 = vshrl.u32 %v15000_v32, 16 }
  0x46   : > { %v1280_v35 = vrot.slane %v1279_v19, 4  ;;  %v462_v58 = vrot.slane %v460_v26, 7  ;;  %13625 = vmatprep.mubr.bf16.mxu0 %v12303_v45  ;;  %v471_v44 = vshll.u32 %v15000_v32, 16  ;;  %v287_v49 = vsel %vm274_vm0, %v263_v4, 0  ;;  %v756_v24 = vld [vmem:[#allocation2 + $0x50] sm:$0x1] }
  0x47   : > { %13678 = vmatmul.mubr.bf16.gmra.mxu1 %v12330_v12  ;;  %v456_v31 = vor.u32 %v454_v20, %v453_v57  ;;  %v458_v29 = vrot.slane %v453_v57, 4  ;;  %13626 = vmatmul.mubr.bf16.vlgmr.msra.gmra.mxu0 %v12304_v2  ;;  %v470_v47 = vrot.slane %v468_v37, 7  ;;  %v289_v4 = vsel %vm274_vm0, %v264_v5, 0  ;;  %v14507_v2 = vld [vmem:[%s20857_s1 + $0xa0] sm:$0xff]  }
  0x48   : > { %v1285_v11 = vsel %vm15021_vm12, %v1280_v35, %v15027_v13  ;;  %v465_v56 = vor.u32 %v463_v36, %v462_v58  ;;  %v466_v50 = vrot.slane %v462_v58, 4  ;;  %13758 = vmatpush3.bf16.msra.mxu1 %v14517_v61  ;;  %13706 = vmatpush3.bf16.msra.mxu0 %v14906_v55  ;;  %v14504_v55 = vld [vmem:[%s20857_s1 + $0xa8] sm:$0xff]   ;;  %v12229_v53 = vcombine.low %v287_v49, %v287_v49 }
  0x49   : > { %13629 = vmatprep.mubr.bf16.mxu0 %v12305_v60  ;;  %v12306_v51 = vcombine.low %v1285_v11, %v1295_v27  ;;  %v457_v32 = vsel %vm14873_vm6, %v449_v14, %v456_v31  ;;  %v743_v40 = vsel %vm14891_vm8, %v458_v29, %v742_v30  ;;  %13707 = vmatprep.subr.bf16.mxu0 %v14501_v25  ;;  %v475_v9 = vrot.slane %v470_v47, 4  ;;  %v15136_v27 = vld [vmem:[%s20857_s1 + $0x98] sm:$0xff]   ;;  %v759_v11 = vld [vmem:[#allocation2 + $0x54] sm:$0xf] }
  0x4a   : > { %741 = vst [vmem:[#allocation2 + $0x34] sm:$0xf] %v457_v32  ;;  %744 = vst [vmem:[#allocation2 + $0x38] sm:$0x1] %v743_v40  ;;  %v473_v13 = vor.u32 %v471_v44, %v470_v47  ;;  %v746_v52 = vsel %vm14884_vm7, %v465_v56, %v745_v48  ;;  %13759 = vmatprep.subr.bf16.mxu1 %v14518_v39  ;;  %v12230_v46 = vcombine.high %v287_v49, %v287_v49 }
  0x4b   : > { %747 = vst [vmem:[#allocation2 + $0x3c] sm:$0xf] %v746_v52  ;;  %v12231_v5 = vcombine.low %v289_v4, %v289_v4  ;;  %v15104_v54 = vcombine.high %v289_v4, %v289_v4  ;;  %v15110_v59 = vsel %vm274_vm0, %v265_v1, 0  ;;  %v750_v63 = vsel %vm14891_vm8, %v475_v9, %v749_v41  ;;  %v763_v52 = vld [vmem:[#allocation2 + $0x5c] sm:$0x1] }
  0x4c   : > { %v474_v60 = vsel %vm14873_vm6, %v466_v50, %v473_v13  ;;  %v477_v21 = vshrl.u32 %v12229_v53, 16  ;;  %v480_v62 = vshll.u32 %v12229_v53, 16  ;;  %13760 = vmatpush3.bf16.msra.mxu1 %v14518_v39  ;;  %13708 = vmatpush3.bf16.msra.mxu0 %v14501_v25  ;;  %v848_v0 = vld [vmem:[#allocation2 + $0x30] sm:$0x2]  ;;  %v946_v3 = vld [vmem:[#allocation2 + $0x30] sm:$0x1]  ;;  %v15118_v22 = vcombine.low %v15110_v59, %v15110_v59 }
  0x4d   : > { %748 = vst [vmem:[#allocation2 + $0x40] sm:$0xf] %v474_v60  ;;  %751 = vst [vmem:[#allocation2 + $0x44] sm:$0x1] %v750_v63  ;;  %v485_v6 = vshrl.u32 %v12230_v46, 16  ;;  %v488_v61 = vshll.u32 %v12230_v46, 16  ;;  %13761 = vmatprep.subr.bf16.mxu1 %v14522_v42  ;;  %13709 = vmatprep.subr.bf16.mxu0 %v14504_v55 }
  0x4e   : > { %v12255_v23 = vrot.slane %v848_v0, 9  ;;  %v479_v1 = vrot.slane %v477_v21, 7  ;;  %v494_v10 = vshrl.u32 %v12231_v5, 16  ;;  %v497_v12 = vshll.u32 %v12231_v5, 16  ;;  %v15168_v60 = vld [vmem:[%s14849_s20 + $0x88] sm:$0xff]  ;;  %v14515_v63 = vld [vmem:[%s20857_s1 + $0x90] sm:$0xff]  }
  0x4f   : > { %v487_v16 = vrot.slane %v485_v6, 7  ;;  %v502_v14 = vshrl.u32 %v15104_v54, 16  ;;  %v505_v17 = vshll.u32 %v15104_v54, 16  ;;  %v511_v18 = vshrl.u32 %v15118_v22, 16  ;;  %13630 = vmatmul.mubr.bf16.gmra.mxu0 %v12306_v51  ;;  %v15165_v54 = vld [vmem:[%s14849_s20 + $0x80] sm:$0xff] }
  0x50   : > { %v947_v19 = vsel %vm14891_vm8, %v12255_v23, %v946_v3  ;;  %v482_v20 = vor.u32 %v480_v62, %v479_v1  ;;  %v483_v26 = vrot.slane %v479_v1, 4  ;;  %v15131_v45 = vrot.slane %v494_v10, 7  ;;  %13762 = vmatpush3.bf16.msra.mxu1 %v14522_v42  ;;  %13710 = vmatpush3.bf16.msra.mxu0 %v14504_v55  ;;  %v766_v6 = vld [vmem:[#allocation2 + $0x60] sm:$0xf]  ;;  %v15181_v23 = vld [vmem:[%s14849_s20 + $0x98] sm:$0xff] }
  0x51   : > { %948 = vst [vmem:[#allocation2 + $0x30] sm:$0x1] %v947_v19  ;;  %v992_v57 = vld [vmem:[#allocation2 + $0x34] sm:$0x8]  ;;  %v1091_v43 = vld [vmem:[#allocation2 + $0x38] sm:$0x1]  ;;  %v490_v25 = vor.u32 %v488_v61, %v487_v16  ;;  %13711 = vmatprep.subr.bf16.mxu0 %v14507_v2  ;;  %13763 = vmatprep.subr.bf16.mxu1 %v14523_v15 }
  0x52   : > { %v15138_v30 = vld [vmem:[#allocation2 + $0x34] sm:$0xf]  ;;  %v12273_v35 = vrot.slane %v992_v57, 11  ;;  %v849_v37 = vld [vmem:[#allocation2 + $0x3c] sm:$0x2]  ;;  %v492_v39 = vrot.slane %v487_v16, 4  ;;  %v753_v48 = vsel %vm14884_vm7, %v482_v20, %v752_v7  ;;  %v499_v49 = vor.u32 %v497_v12, %v15131_v45 }
  0x53   : > { %v1306_v58 = vshll.u32 %v15138_v30, 16  ;;  %v1310_v36 = vshrl.u32 %v15138_v30, 16  ;;  %v12256_v31 = vrot.slane %v849_v37, 9  ;;  %v949_v29 = vld [vmem:[#allocation2 + $0x3c] sm:$0x1]  ;;  %v491_v44 = vsel %vm14873_vm6, %v483_v26, %v490_v25  ;;  %v15178_v61 = vld [vmem:[%s14849_s20 + $0x90] sm:$0xff] }
  0x54   : > { %v1092_v56 = vsel %vm14925_vm9, %v12273_v35, %v1091_v43  ;;  %v993_v51 = vld [vmem:[#allocation2 + $0x40] sm:$0x8]  ;;  %v1094_v32 = vld [vmem:[#allocation2 + $0x44] sm:$0x1]  ;;  %754 = vst [vmem:[#allocation2 + $0x48] sm:$0xf] %v753_v48  ;;  %v757_v40 = vsel %vm14891_vm8, %v492_v39, %v756_v24  ;;  %13764 = vmatpush3.bf16.msra.mxu1 %v14523_v15  ;;  %13712 = vmatpush3.bf16.msra.mxu0 %v14507_v2 }
  0x55   : > { %v15149_v50 = vrot.slane %v1306_v58, 5  ;;  %v1312_v47 = vrot.slane %v1310_v36, 4  ;;  %755 = vst [vmem:[#allocation2 + $0x4c] sm:$0xf] %v491_v44  ;;  %1093 = vst [vmem:[#allocation2 + $0x38] sm:$0x1] %v1092_v56  ;;  %v950_v41 = vsel %vm14891_vm8, %v12256_v31, %v949_v29  ;;  %v760_v5 = vsel %vm14884_vm7, %v499_v49, %v759_v11  ;;  %13713 = vmatprep.subr.bf16.mxu0 %v15136_v27 }
  0x56   : > { %v12274_v4 = vrot.slane %v993_v51, 11  ;;  %v15155_v55 = vld [vmem:[#allocation2 + $0x40] sm:$0xf]  ;;  %758 = vst [vmem:[#allocation2 + $0x50] sm:$0x1] %v757_v40  ;;  %v500_v13 = vrot.slane %v15131_v45, 4  ;;  %v15214_v58 = vcombine.high %v15110_v59, %v15110_v59  ;;  %v266_v36 = vpack.c.bf16 %v15168_v60, %v15165_v54 }
  0x57   : > { %v504_v9 = vrot.slane %v502_v14, 7  ;;  %v1313_v53 = vor.u32 %v1312_v47, %v15149_v50  ;;  %951 = vst [vmem:[#allocation2 + $0x3c] sm:$0x1] %v950_v41  ;;  %v1330_v42 = vshll.u32 %v15155_v55, 16  ;;  %v1334_v46 = vshrl.u32 %v15155_v55, 16  ;;  %v15189_v15 = vld [vmem:[%s14849_s20 + $0xa0] sm:$0xff] }
  0x58   : > { %v1095_v21 = vsel %vm14925_vm9, %v12274_v4, %v1094_v32  ;;  %761 = vst [vmem:[#allocation2 + $0x54] sm:$0xf] %v760_v5  ;;  %v15175_v3 = vrot.slane %v511_v18, 7  ;;  %v1141_v1 = vld [vmem:[#allocation2 + $0x30] sm:$0xf]  ;;  %v514_v12 = vshll.u32 %v15118_v22, 16  ;;  %13714 = vmatpush3.bf16.msra.mxu0 %v15136_v27  ;;  %v267_v48 = vpack.c.bf16 %v15181_v23, %v15178_v61 }
  0x59   : > { %v507_v62 = vor.u32 %v505_v17, %v504_v9  ;;  %v509_v0 = vrot.slane %v504_v9, 4  ;;  %v15183_v7 = vrot.slane %v1313_v53, 4  ;;  %1096 = vst [vmem:[#allocation2 + $0x44] sm:$0x1] %v1095_v21  ;;  %v15185_v2 = vrot.slane %v1330_v42, 5  ;;  %v14527_v18 = vld [vmem:[%s20857_s1 + $0xc8] sm:$0xff]   ;;  %13715 = vmatprep.subr.bf16.mxu0 %v14515_v63 }
  0x5a   : > { %v1336_v10 = vrot.slane %v1334_v46, 4  ;;  %v1297_v16 = vshrl.u32 %v1141_v1, 16  ;;  %v1300_v24 = vshll.u32 %v1141_v1, 16  ;;  %v12331_v14 = vcombine.low %v1141_v1, %v15138_v30  ;;  %v14528_v19 = vld [vmem:[%s20857_s1 + $0xc0] sm:$0xff]   ;;  %v15207_v27 = vld [vmem:[%s14849_s20 + $0xa8] sm:$0xff]  ;;  %13765 = vmatprep.subr.bf16.mxu1 %v14527_v18  ;;  %v14529_v1 = vld [vmem:[%s20857_s1 + $0x138] sm:$0xff]  }
  0x5b   : > { %v508_v17 = vsel %vm14873_vm6, %v500_v13, %v507_v62  ;;  %v764_v20 = vsel %vm14891_vm8, %v509_v0, %v763_v52  ;;  %v516_v26 = vor.u32 %v514_v12, %v15175_v3  ;;  %v517_v45 = vrot.slane %v15175_v3, 4  ;;  %v14520_v57 = vld [vmem:[%s20857_s1 + $0x88] sm:$0xff]   ;;  %v14525_v59 = vld [vmem:[%s20857_s1 + $0x80] sm:$0xff]   ;;  %13766 = vmatpush3.bf16.msra.mxu1 %v14527_v18 }
  0x5c   : > { %v1337_v22 = vor.u32 %v1336_v10, %v15185_v2  ;;  %762 = vst [vmem:[#allocation2 + $0x58] sm:$0xf] %v508_v17  ;;  %v1299_v43 = vrot.slane %v1297_v16, 4  ;;  %v1302_v30 = vrot.slane %v1300_v24, 5  ;;  %13681 = vmatprep.mubr.bf16.mxu1 %v12331_v14  ;;  %v850_v25 = vld [vmem:[#allocation2 + $0x48] sm:$0x2]  ;;  %v268_v32 = vpack.c.bf16 %v15207_v27, %v15189_v15  ;;  %13716 = vmatpush3.bf16.msra.mxu0 %v14515_v63 }
  0x5d   : > { %v952_v35 = vld [vmem:[#allocation2 + $0x48] sm:$0x1]  ;;  %765 = vst [vmem:[#allocation2 + $0x5c] sm:$0x1] %v764_v20  ;;  %v1185_v37 = vld [vmem:[#allocation2 + $0x38] sm:$0x1]  ;;  %v767_v44 = vsel %vm14884_vm7, %v516_v26, %v766_v6  ;;  %13767 = vmatprep.subr.bf16.mxu1 %v14528_v19  ;;  %13717 = vmatprep.subr.bf16.mxu0 %v14520_v57 }
  0x5e   : > { %v15218_v39 = vrot.slane %v1337_v22, 4  ;;  %v12257_v31 = vrot.slane %v850_v25, 9  ;;  %v994_v29 = vld [vmem:[#allocation2 + $0x4c] sm:$0x8]  ;;  %v1303_v49 = vor.u32 %v1302_v30, %v1299_v43  ;;  %v1316_v11 = vshll.u32 %v1185_v37, 16 }
  0x5f   : > { %v1143_v56 = vld [vmem:[#allocation2 + $0x3c] sm:$0xf]  ;;  %v12275_v47 = vrot.slane %v994_v29, 11  ;;  %v1097_v51 = vld [vmem:[#allocation2 + $0x50] sm:$0x1]  ;;  %13768 = vmatpush3.bf16.msra.mxu1 %v14528_v19  ;;  %v519_v37 = vshrl.u32 %v15214_v58, 16 }
  0x60   : > { %768 = vst [vmem:[#allocation2 + $0x60] sm:$0xf] %v767_v44  ;;  %v1321_v40 = vshrl.u32 %v1143_v56, 16  ;;  %v1324_v41 = vshll.u32 %v1143_v56, 16  ;;  %v12332_v4 = vcombine.low %v1143_v56, %v15155_v55  ;;  %v953_v13 = vsel %vm14891_vm8, %v12257_v31, %v952_v35  ;;  %v15232_v9 = vld [vmem:[#allocation2 + $0x4c] sm:$0xf]  ;;  %13718 = vmatpush3.bf16.msra.mxu0 %v14520_v57 }
  0x61   : > { %v851_v52 = vld [vmem:[#allocation2 + $0x54] sm:$0x2]  ;;  %v1304_v53 = vrot.slane %v1303_v49, 4  ;;  %v1318_v42 = vrot.slane %v1316_v11, 5  ;;  %v1186_v46 = vld [vmem:[#allocation2 + $0x44] sm:$0x1]  ;;  %v1098_v5 = vsel %vm14925_vm9, %v12275_v47, %v1097_v51  ;;  %13719 = vmatprep.subr.bf16.mxu0 %v14525_v59 }
  0x62   : > { %954 = vst [vmem:[#allocation2 + $0x48] sm:$0x1] %v953_v13  ;;  %v1354_v63 = vshll.u32 %v15232_v9, 16  ;;  %v1323_v21 = vrot.slane %v1321_v40, 4  ;;  %v1326_v62 = vrot.slane %v1324_v41, 5  ;;  %v1340_v0 = vshll.u32 %v1186_v46, 16  ;;  %13682 = vmatmul.mubr.bf16.gmra.mxu1 %v12332_v4 }
  0x63   : > { %1099 = vst [vmem:[#allocation2 + $0x50] sm:$0x1] %v1098_v5  ;;  %v1358_v55 = vshrl.u32 %v15232_v9, 16  ;;  %v955_v6 = vld [vmem:[#allocation2 + $0x54] sm:$0x1]  ;;  %v1309_v10 = vsel %vm15021_vm12, %v1304_v53, %v15149_v50  ;;  %v1319_v12 = vsel %vm15021_vm12, %v15183_v7, %v1318_v42  ;;  %v12258_v24 = vrot.slane %v851_v52, 9 }
  0x64   : > { %v15247_v16 = vrot.slane %v1354_v63, 5  ;;  %v995_v14 = vld [vmem:[#allocation2 + $0x58] sm:$0x8]  ;;  %v12307_v18 = vcombine.low %v1309_v10, %v1319_v12  ;;  %v1327_v22 = vor.u32 %v1326_v62, %v1323_v21  ;;  %v1342_v20 = vrot.slane %v1340_v0, 5  ;;  %v1100_v43 = vld [vmem:[#allocation2 + $0x5c] sm:$0x1]  ;;  %13720 = vmatpush3.bf16.msra.mxu0 %v14525_v59 }
  0x65   : > { %v15249_v17 = vld [vmem:[#allocation2 + $0x58] sm:$0xf]  ;;  %v1360_v26 = vrot.slane %v1358_v55, 4  ;;  %v956_v50 = vsel %vm14891_vm8, %v12258_v24, %v955_v6  ;;  %v12276_v30 = vrot.slane %v995_v14, 11  ;;  %v522_v11 = vshll.u32 %v15214_v58, 16  ;;  %13801 = vmatprep.subr.bf16.mxu0 %v14529_v1 }
  0x66   : > { %v1378_v7 = vshll.u32 %v15249_v17, 16  ;;  %v1382_v25 = vshrl.u32 %v15249_v17, 16  ;;  %13633 = vmatprep.mubr.bf16.mxu0 %v12307_v18  ;;  %v1328_v35 = vrot.slane %v1327_v22, 4  ;;  %v1343_v19 = vsel %vm15021_vm12, %v15218_v39, %v1342_v20  ;;  %957 = vst [vmem:[#allocation2 + $0x54] sm:$0x1] %v956_v50  ;;  %v15290_v18 = vld [vmem:[%s14849_s20 + $0xb0] sm:$0xff] }
  0x67   : > { %v1361_v57 = vor.u32 %v1360_v26, %v15247_v16  ;;  %v852_v31 = vld [vmem:[#allocation2 + $0x60] sm:$0x2]  ;;  %v1101_v29 = vsel %vm14925_vm9, %v12276_v30, %v1100_v43  ;;  %v770_v56 = vld [vmem:[#allocation2 + $0x68] sm:$0x1]  ;;  %v958_v47 = vld [vmem:[#allocation2 + $0x60] sm:$0x1] }
  0x68   : > { %v15262_v44 = vrot.slane %v1378_v7, 5  ;;  %v1384_v49 = vrot.slane %v1382_v25, 4  ;;  %v1333_v39 = vsel %vm15021_vm12, %v1328_v35, %v15185_v2  ;;  %1102 = vst [vmem:[#allocation2 + $0x5c] sm:$0x1] %v1101_v29  ;;  %v521_v41 = vrot.slane %v519_v37, 7  ;;  %v15293_v22 = vld [vmem:[%s14849_s20 + $0xb8] sm:$0xff] }
  0x69   : > { %v1145_v51 = vld [vmem:[#allocation2 + $0x48] sm:$0xf]  ;;  %v1362_v40 = vrot.slane %v1361_v57, 4  ;;  %v12259_v4 = vrot.slane %v852_v31, 9  ;;  %v12308_v13 = vcombine.low %v1333_v39, %v1343_v19  ;;  %v293_v0 = vsel %vm274_vm0, %v266_v36, 0 }
  0x6a   : > { %v1187_v52 = vld [vmem:[#allocation2 + $0x50] sm:$0x1]  ;;  %v1345_v53 = vshrl.u32 %v1145_v51, 16  ;;  %v1348_v42 = vshll.u32 %v1145_v51, 16  ;;  %v12333_v46 = vcombine.low %v1145_v51, %v15232_v9  ;;  %v1385_v5 = vor.u32 %v1384_v49, %v15262_v44  ;;  %v773_v29 = vld [vmem:[#allocation2 + $0x6c] sm:$0xf] }
  0x6b   : > { %v1364_v58 = vshll.u32 %v1187_v52, 16  ;;  %v524_v59 = vor.u32 %v522_v11, %v521_v41  ;;  %v526_v63 = vrot.slane %v521_v41, 4  ;;  %13634 = vmatmul.mubr.bf16.gmra.mxu0 %v12308_v13  ;;  %v959_v62 = vsel %vm14891_vm8, %v12259_v4, %v958_v47 }
  0x6c   : > { %v1347_v21 = vrot.slane %v1345_v53, 4  ;;  %v1350_v2 = vrot.slane %v1348_v42, 5  ;;  %13685 = vmatprep.mubr.bf16.mxu1 %v12333_v46  ;;  %v1386_v9 = vrot.slane %v1385_v5, 4  ;;  %960 = vst [vmem:[#allocation2 + $0x60] sm:$0x1] %v959_v62  ;;  %v12235_v54 = vcombine.low %v293_v0, %v293_v0 }
  0x6d   : > { %v1366_v55 = vrot.slane %v1364_v58, 5  ;;  %v525_v6 = vsel %vm14873_vm6, %v517_v45, %v524_v59  ;;  %v771_v1 = vsel %vm14891_vm8, %v526_v63, %v770_v56  ;;  %v1147_v12 = vld [vmem:[#allocation2 + $0x54] sm:$0xf]  ;;  %v12236_v60 = vcombine.high %v293_v0, %v293_v0 }
  0x6e   : > { %v1351_v10 = vor.u32 %v1350_v2, %v1347_v21  ;;  %769 = vst [vmem:[#allocation2 + $0x64] sm:$0xf] %v525_v6  ;;  %772 = vst [vmem:[#allocation2 + $0x68] sm:$0x1] %v771_v1  ;;  %v295_v36 = vsel %vm274_vm0, %v267_v48, 0  ;;  %v1369_v24 = vshrl.u32 %v1147_v12, 16  ;;  %v12334_v14 = vcombine.low %v1147_v12, %v15249_v17 }
  0x6f   : > { %v1367_v3 = vsel %vm15021_vm12, %v1362_v40, %v1366_v55  ;;  %v1372_v45 = vshll.u32 %v1147_v12, 16  ;;  %v1188_v26 = vld [vmem:[#allocation2 + $0x5c] sm:$0x1]  ;;  %v528_v43 = vshrl.u32 %v12235_v54, 16  ;;  %v531_v50 = vshll.u32 %v12235_v54, 16 }
  0x70   : > { %v1352_v20 = vrot.slane %v1351_v10, 4  ;;  %v536_v30 = vshrl.u32 %v12236_v60, 16  ;;  %v1371_v7 = vrot.slane %v1369_v24, 4  ;;  %v1388_v23 = vshll.u32 %v1188_v26, 16  ;;  %13686 = vmatmul.mubr.bf16.gmra.mxu1 %v12334_v14  ;;  %v777_v59 = vld [vmem:[#allocation2 + $0x74] sm:$0x1] }
  0x71   : > { %v1374_v61 = vrot.slane %v1372_v45, 5  ;;  %v539_v48 = vshll.u32 %v12236_v60, 16  ;;  %v530_v35 = vrot.slane %v528_v43, 7  ;;  %v269_v19 = vpack.c.bf16 %v15293_v22, %v15290_v18  ;;  %v780_v24 = vld [vmem:[#allocation2 + $0x78] sm:$0xf] }
  0x72   : > { %v1357_v25 = vsel %vm15021_vm12, %v1352_v20, %v15247_v16  ;;  %v538_v17 = vrot.slane %v536_v30, 7  ;;  %v1390_v31 = vrot.slane %v1388_v23, 5  ;;  %v12237_v49 = vcombine.low %v295_v36, %v295_v36  ;;  %v784_v43 = vld [vmem:[#allocation2 + $0x80] sm:$0x1] }
  0x73   : > { %v12309_v57 = vcombine.low %v1357_v25, %v1367_v3  ;;  %v1375_v37 = vor.u32 %v1374_v61, %v1371_v7  ;;  %v1149_v11 = vld [vmem:[#allocation2 + $0x60] sm:$0xf]  ;;  %v533_v56 = vor.u32 %v531_v50, %v530_v35  ;;  %v534_v47 = vrot.slane %v530_v35, 4 }
  0x74   : > { %v541_v39 = vor.u32 %v539_v48, %v538_v17  ;;  %v543_v51 = vrot.slane %v538_v17, 4  ;;  %v1391_v16 = vsel %vm15021_vm12, %v1386_v9, %v1390_v31  ;;  %v1393_v13 = vshrl.u32 %v1149_v11, 16 }
  0x75   : > { %13637 = vmatprep.mubr.bf16.mxu0 %v12309_v57  ;;  %v1376_v40 = vrot.slane %v1375_v37, 4  ;;  %v996_v41 = vld [vmem:[#allocation2 + $0x64] sm:$0x8]  ;;  %v1103_v4 = vld [vmem:[#allocation2 + $0x68] sm:$0x1]  ;;  %v12238_v52 = vcombine.high %v295_v36, %v295_v36  ;;  %v1396_v46 = vshll.u32 %v1149_v11, 16  ;;  %v774_v5 = vsel %vm14884_vm7, %v533_v56, %v773_v29 }
  0x76   : > { %v12277_v53 = vrot.slane %v996_v41, 11  ;;  %v1150_v42 = vld [vmem:[#allocation2 + $0x64] sm:$0xf]  ;;  %v542_v58 = vsel %vm14873_vm6, %v534_v47, %v541_v39  ;;  %v1395_v21 = vrot.slane %v1393_v13, 4  ;;  %775 = vst [vmem:[#allocation2 + $0x6c] sm:$0xf] %v774_v5  ;;  %v778_v12 = vsel %vm14891_vm8, %v543_v51, %v777_v59 }
  0x77   : > { %v1381_v63 = vsel %vm15021_vm12, %v1376_v40, %v15262_v44  ;;  %v1402_v2 = vshll.u32 %v1150_v42, 16  ;;  %v1406_v62 = vshrl.u32 %v1150_v42, 16  ;;  %776 = vst [vmem:[#allocation2 + $0x70] sm:$0xf] %v542_v58  ;;  %v1398_v9 = vrot.slane %v1396_v46, 5 }
  0x78   : > { %v12310_v0 = vcombine.low %v1381_v63, %v1391_v16  ;;  %v1104_v55 = vsel %vm14925_vm9, %v12277_v53, %v1103_v4  ;;  %v12335_v6 = vcombine.low %v1149_v11, %v1150_v42  ;;  %v545_v54 = vshrl.u32 %v12237_v49, 16  ;;  %779 = vst [vmem:[#allocation2 + $0x74] sm:$0x1] %v778_v12 }
  0x79   : > { %1105 = vst [vmem:[#allocation2 + $0x68] sm:$0x1] %v1104_v55  ;;  %v15311_v1 = vrot.slane %v1402_v2, 5  ;;  %v1408_v10 = vrot.slane %v1406_v62, 4  ;;  %v1399_v44 = vor.u32 %v1398_v9, %v1395_v21  ;;  %v548_v60 = vshll.u32 %v12237_v49, 16  ;;  %v15333_v49 = vld [vmem:[%s20857_s1 + $0x178] sm:$0xff]  }
  0x7a   : > { %13638 = vmatmul.mubr.bf16.gmra.mxu0 %v12310_v0  ;;  %13689 = vmatprep.mubr.bf16.mxu1 %v12335_v6  ;;  %v553_v36 = vshrl.u32 %v12238_v52, 16  ;;  %v556_v3 = vshll.u32 %v12238_v52, 16  ;;  %v547_v14 = vrot.slane %v545_v54, 7  ;;  %v297_v18 = vsel %vm274_vm0, %v268_v32, 0  ;;  %v787_v52 = vld [vmem:[#allocation2 + $0x84] sm:$0xf] }
  0x7b   : > { %v1409_v45 = vor.u32 %v1408_v10, %v15311_v1  ;;  %v299_v22 = vsel %vm274_vm0, %v269_v19, 0  ;;  %v1400_v20 = vrot.slane %v1399_v44, 4  ;;  %v12239_v50 = vcombine.low %v297_v18, %v297_v18  ;;  %13849 = vmatprep.subr.bf16.mxu1 %v15333_v49  ;;  %v250_v2 = vld [vmem:[%s14849_s20 + $0xc0] sm:$0xff]  ;;  %v251_v62 = vld [vmem:[%s14849_s20 + $0xc8] sm:$0xff] }
  0x7c   : > { %v555_v26 = vrot.slane %v553_v36, 7  ;;  %v550_v7 = vor.u32 %v548_v60, %v547_v14  ;;  %v551_v61 = vrot.slane %v547_v14, 4  ;;  %v12240_v23 = vcombine.high %v297_v18, %v297_v18  ;;  %v791_v6 = vld [vmem:[#allocation2 + $0x8c] sm:$0x1]  ;;  %v15358_v60 = vld [vmem:[%s14849_s20 + $0xd0] sm:$0xff]  ;;  %v15361_v36 = vld [vmem:[%s14849_s20 + $0xd8] sm:$0xff] }
  0x7d   : > { %v1410_v30 = vrot.slane %v1409_v45, 4  ;;  %v1405_v48 = vsel %vm15021_vm12, %v1400_v20, %v15311_v1  ;;  %v853_v25 = vld [vmem:[#allocation2 + $0x6c] sm:$0x2]  ;;  %v961_v35 = vld [vmem:[#allocation2 + $0x6c] sm:$0x1]  ;;  %v12241_v27 = vcombine.low %v299_v22, %v299_v22  ;;  %v15324_v32 = vcombine.high %v299_v22, %v299_v22 }
  0x7e   : > { %v997_v17 = vld [vmem:[#allocation2 + $0x70] sm:$0x8]  ;;  %v558_v15 = vor.u32 %v556_v3, %v555_v26  ;;  %v12260_v19 = vrot.slane %v853_v25, 9  ;;  %v560_v31 = vrot.slane %v555_v26, 4  ;;  %v781_v29 = vsel %vm14884_vm7, %v550_v7, %v780_v24 }
  0x7f   : > { %v12278_v57 = vrot.slane %v997_v17, 11  ;;  %v15326_v37 = vld [vmem:[#allocation2 + $0x70] sm:$0xf]  ;;  %782 = vst [vmem:[#allocation2 + $0x78] sm:$0xf] %v781_v29  ;;  %v562_v51 = vshrl.u32 %v12239_v50, 16 }
  0x80   : > { %v15335_v11 = vld [vmem:[#allocation2 + $0x68] sm:$0x1]  ;;  %v1426_v56 = vshll.u32 %v15326_v37, 16  ;;  %v1430_v47 = vshrl.u32 %v15326_v37, 16  ;;  %v559_v39 = vsel %vm14873_vm6, %v551_v61, %v558_v15  ;;  %v962_v16 = vsel %vm14891_vm8, %v12260_v19, %v961_v35  ;;  %v1106_v41 = vld [vmem:[#allocation2 + $0x74] sm:$0x1] }
  0x81   : > { %v1412_v40 = vshll.u32 %v15335_v11, 16  ;;  %783 = vst [vmem:[#allocation2 + $0x7c] sm:$0xf] %v559_v39  ;;  %v785_v4 = vsel %vm14891_vm8, %v560_v31, %v784_v43  ;;  %v565_v13 = vshll.u32 %v12239_v50, 16  ;;  %963 = vst [vmem:[#allocation2 + $0x6c] sm:$0x1] %v962_v16  ;;  %v1107_v53 = vsel %vm14925_vm9, %v12278_v57, %v1106_v41 }
  0x82   : > { %v15349_v42 = vrot.slane %v1426_v56, 5  ;;  %v1432_v46 = vrot.slane %v1430_v47, 4  ;;  %786 = vst [vmem:[#allocation2 + $0x80] sm:$0x1] %v785_v4  ;;  %v564_v58 = vrot.slane %v562_v51, 7  ;;  %v570_v59 = vshrl.u32 %v12240_v23, 16 }
  0x83   : > { %v1414_v5 = vrot.slane %v1412_v40, 5  ;;  %1108 = vst [vmem:[#allocation2 + $0x74] sm:$0x1] %v1107_v53  ;;  %v573_v63 = vshll.u32 %v12240_v23, 16  ;;  %v579_v21 = vshrl.u32 %v12241_v27, 16  ;;  %v582_v1 = vshll.u32 %v12241_v27, 16 }
  0x84   : > { %v1433_v0 = vor.u32 %v1432_v46, %v15349_v42  ;;  %v567_v55 = vor.u32 %v565_v13, %v564_v58  ;;  %v568_v9 = vrot.slane %v564_v58, 4  ;;  %v572_v12 = vrot.slane %v570_v59, 7  ;;  %v794_v25 = vld [vmem:[#allocation2 + $0x90] sm:$0xf]  ;;  %v798_v31 = vld [vmem:[#allocation2 + $0x98] sm:$0x1] }
  0x85   : > { %v1415_v10 = vsel %vm15021_vm12, %v1410_v30, %v1414_v5  ;;  %v581_v54 = vrot.slane %v579_v21, 7  ;;  %v587_v44 = vshrl.u32 %v15324_v32, 16  ;;  %v590_v14 = vshll.u32 %v15324_v32, 16 }
  0x86   : > { %v12311_v3 = vcombine.low %v1405_v48, %v1415_v10  ;;  %v15363_v24 = vrot.slane %v1433_v0, 4  ;;  %v788_v45 = vsel %vm14884_vm7, %v567_v55, %v787_v52  ;;  %v854_v18 = vld [vmem:[#allocation2 + $0x78] sm:$0x2]  ;;  %v964_v22 = vld [vmem:[#allocation2 + $0x78] sm:$0x1]  ;;  %v575_v20 = vor.u32 %v573_v63, %v572_v12 }
  0x87   : > { %v577_v26 = vrot.slane %v572_v12, 4  ;;  %789 = vst [vmem:[#allocation2 + $0x84] sm:$0xf] %v788_v45  ;;  %v585_v43 = vrot.slane %v581_v54, 4  ;;  %v270_v50 = vpack.c.bf16 %v251_v62, %v250_v2  ;;  %v12261_v30 = vrot.slane %v854_v18, 9 }
  0x88   : > { %13641 = vmatprep.mubr.bf16.mxu0 %v12311_v3  ;;  %v998_v7 = vld [vmem:[#allocation2 + $0x7c] sm:$0x8]  ;;  %v584_v23 = vor.u32 %v582_v1, %v581_v54  ;;  %v589_v48 = vrot.slane %v587_v44, 7  ;;  %v271_v35 = vpack.c.bf16 %v15361_v36, %v15358_v60  ;;  %v1151_v17 = vld [vmem:[#allocation2 + $0x6c] sm:$0xf]  ;;  %v576_v19 = vsel %vm14873_vm6, %v568_v9, %v575_v20 }
  0x89   : > { %v15368_v61 = vld [vmem:[#allocation2 + $0x7c] sm:$0xf]  ;;  %v12279_v15 = vrot.slane %v998_v7, 11  ;;  %v1109_v27 = vld [vmem:[#allocation2 + $0x80] sm:$0x1]  ;;  %v792_v57 = vsel %vm14891_vm8, %v577_v26, %v791_v6  ;;  %v1417_v56 = vshrl.u32 %v1151_v17, 16  ;;  %v12336_v39 = vcombine.low %v1151_v17, %v15326_v37 }
  0x8a   : > { %v1450_v32 = vshll.u32 %v15368_v61, 16  ;;  %v15377_v29 = vld [vmem:[#allocation2 + $0x74] sm:$0x1]  ;;  %v1420_v47 = vshll.u32 %v1151_v17, 16  ;;  %v965_v51 = vsel %vm14891_vm8, %v12261_v30, %v964_v22  ;;  %790 = vst [vmem:[#allocation2 + $0x88] sm:$0xf] %v576_v19  ;;  %v592_v53 = vor.u32 %v590_v14, %v589_v48 }
  0x8b   : > { %793 = vst [vmem:[#allocation2 + $0x8c] sm:$0x1] %v792_v57  ;;  %v1436_v40 = vshll.u32 %v15377_v29, 16  ;;  %966 = vst [vmem:[#allocation2 + $0x78] sm:$0x1] %v965_v51  ;;  %v1110_v16 = vsel %vm14925_vm9, %v12279_v15, %v1109_v27  ;;  %v1454_v4 = vshrl.u32 %v15368_v61, 16  ;;  %13690 = vmatmul.mubr.bf16.gmra.mxu1 %v12336_v39  ;;  %v795_v59 = vsel %vm14884_vm7, %v584_v23, %v794_v25 }
  0x8c   : > { %v15385_v41 = vrot.slane %v1450_v32, 5  ;;  %v1419_v13 = vrot.slane %v1417_v56, 4  ;;  %v1422_v52 = vrot.slane %v1420_v47, 5  ;;  %1111 = vst [vmem:[#allocation2 + $0x80] sm:$0x1] %v1110_v16  ;;  %v594_v46 = vrot.slane %v589_v48, 4 }
  0x8d   : > { %v1438_v58 = vrot.slane %v1436_v40, 5  ;;  %v1456_v5 = vrot.slane %v1454_v4, 4  ;;  %v301_v63 = vsel %vm274_vm0, %v270_v50, 0  ;;  %v593_v0 = vsel %vm14873_vm6, %v585_v43, %v592_v53  ;;  %796 = vst [vmem:[#allocation2 + $0x90] sm:$0xf] %v795_v59 }
  0x8e   : > { %v1423_v21 = vor.u32 %v1422_v52, %v1419_v13  ;;  %v855_v2 = vld [vmem:[#allocation2 + $0x84] sm:$0x2]  ;;  %v967_v62 = vld [vmem:[#allocation2 + $0x84] sm:$0x1]  ;;  %v799_v55 = vsel %vm14891_vm8, %v594_v46, %v798_v31  ;;  %v12243_v9 = vcombine.low %v301_v63, %v301_v63  ;;  %797 = vst [vmem:[#allocation2 + $0x94] sm:$0xf] %v593_v0  ;;  %v15399_v12 = vcombine.high %v301_v63, %v301_v63 }
  0x8f   : > { %v1439_v6 = vsel %vm15021_vm12, %v15363_v24, %v1438_v58  ;;  %v1457_v1 = vor.u32 %v1456_v5, %v15385_v41  ;;  %v12262_v10 = vrot.slane %v855_v2, 9  ;;  %800 = vst [vmem:[#allocation2 + $0x98] sm:$0x1] %v799_v55  ;;  %v303_v36 = vsel %vm274_vm0, %v271_v35, 0  ;;  %v801_v32 = vld [vmem:[#allocation2 + $0x9c] sm:$0xf] }
  0x90   : > { %v1424_v54 = vrot.slane %v1423_v21, 4  ;;  %v596_v44 = vshrl.u32 %v12243_v9, 16  ;;  %v599_v60 = vshll.u32 %v12243_v9, 16  ;;  %v604_v24 = vshrl.u32 %v15399_v12, 16 }
  0x91   : > { %v15402_v3 = vrot.slane %v1457_v1, 4  ;;  %v968_v45 = vsel %vm14891_vm8, %v12262_v10, %v967_v62  ;;  %v999_v14 = vld [vmem:[#allocation2 + $0x88] sm:$0x8]  ;;  %v15414_v30 = vcombine.low %v303_v36, %v303_v36  ;;  %v15425_v39 = vcombine.high %v303_v36, %v303_v36  ;;  %v805_v10 = vld [vmem:[#allocation2 + $0xa4] sm:$0x1] }
  0x92   : > { %v1112_v18 = vld [vmem:[#allocation2 + $0x8c] sm:$0x1]  ;;  %v1429_v22 = vsel %vm15021_vm12, %v1424_v54, %v15349_v42  ;;  %v1153_v20 = vld [vmem:[#allocation2 + $0x78] sm:$0xf]  ;;  %969 = vst [vmem:[#allocation2 + $0x84] sm:$0x1] %v968_v45 }
  0x93   : > { %v12280_v26 = vrot.slane %v999_v14, 11  ;;  %v15410_v43 = vld [vmem:[#allocation2 + $0x88] sm:$0xf]  ;;  %v15412_v50 = vrot.slane %v596_v44, 7  ;;  %v12312_v7 = vcombine.low %v1429_v22, %v1439_v6  ;;  %v15416_v23 = vld [vmem:[#allocation2 + $0x80] sm:$0x1]  ;;  %v12337_v35 = vcombine.low %v1153_v20, %v15368_v61 }
  0x94   : > { %v1441_v48 = vshrl.u32 %v1153_v20, 16  ;;  %v1444_v25 = vshll.u32 %v1153_v20, 16  ;;  %v1460_v17 = vshll.u32 %v15416_v23, 16  ;;  %v1474_v15 = vshll.u32 %v15410_v43, 16  ;;  %v856_v31 = vld [vmem:[#allocation2 + $0x90] sm:$0x2] }
  0x95   : > { %v1113_v42 = vsel %vm14925_vm9, %v12280_v26, %v1112_v18  ;;  %v1478_v27 = vshrl.u32 %v15410_v43, 16  ;;  %13642 = vmatmul.mubr.bf16.gmra.mxu0 %v12312_v7  ;;  %13693 = vmatprep.mubr.bf16.mxu1 %v12337_v35  ;;  %v970_v56 = vld [vmem:[#allocation2 + $0x90] sm:$0x1]  ;;  %v601_v47 = vor.u32 %v599_v60, %v15412_v50  ;;  %v12263_v4 = vrot.slane %v856_v31, 9  ;;  %v1000_v13 = vld [vmem:[#allocation2 + $0x94] sm:$0x8] }
  0x96   : > { %v1443_v19 = vrot.slane %v1441_v48, 4  ;;  %v1446_v57 = vrot.slane %v1444_v25, 5  ;;  %1114 = vst [vmem:[#allocation2 + $0x8c] sm:$0x1] %v1113_v42  ;;  %v1462_v51 = vrot.slane %v1460_v17, 5  ;;  %v15427_v40 = vrot.slane %v1474_v15, 5 }
  0x97   : > { %v1480_v16 = vrot.slane %v1478_v27, 4  ;;  %v12281_v53 = vrot.slane %v1000_v13, 11  ;;  %v1115_v46 = vld [vmem:[#allocation2 + $0x98] sm:$0x1]  ;;  %v15429_v58 = vld [vmem:[#allocation2 + $0x94] sm:$0xf]  ;;  %v802_v59 = vsel %vm14884_vm7, %v601_v47, %v801_v32  ;;  %v971_v2 = vsel %vm14891_vm8, %v12263_v4, %v970_v56 }
  0x98   : > { %v1447_v52 = vor.u32 %v1446_v57, %v1443_v19  ;;  %v602_v5 = vrot.slane %v15412_v50, 4  ;;  %v1463_v63 = vsel %vm15021_vm12, %v15402_v3, %v1462_v51  ;;  %v1498_v62 = vshll.u32 %v15429_v58, 16  ;;  %803 = vst [vmem:[#allocation2 + $0x9c] sm:$0xf] %v802_v59  ;;  %972 = vst [vmem:[#allocation2 + $0x90] sm:$0x1] %v971_v2 }
  0x99   : > { %v1481_v21 = vor.u32 %v1480_v16, %v15427_v40  ;;  %v1155_v55 = vld [vmem:[#allocation2 + $0x84] sm:$0xf]  ;;  %v1116_v9 = vsel %vm14925_vm9, %v12281_v53, %v1115_v46  ;;  %v1502_v6 = vshrl.u32 %v15429_v58, 16  ;;  %v606_v1 = vrot.slane %v604_v24, 7  ;;  %v255_v48 = vld [vmem:[%s14849_s20 + $0xe8] sm:$0xff] }
  0x9a   : > { %v1448_v0 = vrot.slane %v1447_v52, 4  ;;  %v1465_v54 = vshrl.u32 %v1155_v55, 16  ;;  %v1468_v44 = vshll.u32 %v1155_v55, 16  ;;  %v12338_v36 = vcombine.low %v1155_v55, %v15410_v43  ;;  %1117 = vst [vmem:[#allocation2 + $0x98] sm:$0x1] %v1116_v9  ;;  %v254_v22 = vld [vmem:[%s14849_s20 + $0xe0] sm:$0xff] }
  0x9b   : > { %v1482_v60 = vrot.slane %v1481_v21, 4  ;;  %v15448_v45 = vrot.slane %v1498_v62, 5  ;;  %v1504_v14 = vrot.slane %v1502_v6, 4  ;;  %v607_v18 = vshll.u32 %v15399_v12, 16  ;;  %v808_v47 = vld [vmem:[#allocation2 + $0xa8] sm:$0xf] }
  0x9c   : > { %v1453_v3 = vsel %vm15021_vm12, %v1448_v0, %v15385_v41  ;;  %v1467_v26 = vrot.slane %v1465_v54, 4  ;;  %v1470_v50 = vrot.slane %v1468_v44, 5  ;;  %13694 = vmatmul.mubr.bf16.gmra.mxu1 %v12338_v36  ;;  %v611_v7 = vrot.slane %v606_v1, 4 }
  0x9d   : > { %v12313_v20 = vcombine.low %v1453_v3, %v1463_v63  ;;  %v15452_v24 = vld [vmem:[#allocation2 + $0x8c] sm:$0x1]  ;;  %v1505_v35 = vor.u32 %v1504_v14, %v15448_v45  ;;  %v609_v17 = vor.u32 %v607_v18, %v606_v1  ;;  %v613_v41 = vshrl.u32 %v15414_v30, 16 }
  0x9e   : > { %v1484_v25 = vshll.u32 %v15452_v24, 16  ;;  %v1471_v42 = vor.u32 %v1470_v50, %v1467_v26  ;;  %v806_v12 = vsel %vm14891_vm8, %v611_v7, %v805_v10  ;;  %v616_v15 = vshll.u32 %v15414_v30, 16  ;;  %v812_v10 = vld [vmem:[#allocation2 + $0xb0] sm:$0x1] }
  0x9f   : > { %13645 = vmatprep.mubr.bf16.mxu0 %v12313_v20  ;;  %v621_v27 = vshrl.u32 %v15425_v39, 16  ;;  %v1506_v19 = vrot.slane %v1505_v35, 4  ;;  %v610_v57 = vsel %vm14873_vm6, %v602_v5, %v609_v17  ;;  %807 = vst [vmem:[#allocation2 + $0xa4] sm:$0x1] %v806_v12  ;;  %v857_v31 = vld [vmem:[#allocation2 + $0x9c] sm:$0x2]  ;;  %v272_v51 = vpack.c.bf16 %v255_v48, %v254_v22 }
  0xa0   : > { %v1486_v32 = vrot.slane %v1484_v25, 5  ;;  %v973_v56 = vld [vmem:[#allocation2 + $0x9c] sm:$0x1]  ;;  %v1472_v16 = vrot.slane %v1471_v42, 4  ;;  %v1157_v4 = vld [vmem:[#allocation2 + $0x90] sm:$0xf] }
  0xa1   : > { %804 = vst [vmem:[#allocation2 + $0xa0] sm:$0xf] %v610_v57  ;;  %v12264_v13 = vrot.slane %v857_v31, 9  ;;  %v615_v52 = vrot.slane %v613_v41, 7  ;;  %v623_v53 = vrot.slane %v621_v27, 7  ;;  %v1489_v59 = vshrl.u32 %v1157_v4, 16 }
  0xa2   : > { %v1487_v30 = vsel %vm15021_vm12, %v1482_v60, %v1486_v32  ;;  %v15466_v46 = vld [vmem:[#allocation2 + $0x98] sm:$0x1]  ;;  %v1492_v63 = vshll.u32 %v1157_v4, 16  ;;  %v12339_v5 = vcombine.low %v1157_v4, %v15429_v58  ;;  %v1477_v21 = vsel %vm15021_vm12, %v1472_v16, %v15427_v40 }
  0xa3   : > { %v1508_v2 = vshll.u32 %v15466_v46, 16  ;;  %v974_v62 = vsel %vm14891_vm8, %v12264_v13, %v973_v56  ;;  %v618_v0 = vor.u32 %v616_v15, %v615_v52  ;;  %v12314_v55 = vcombine.low %v1477_v21, %v1487_v30 }
  0xa4   : > { %v1491_v9 = vrot.slane %v1489_v59, 4  ;;  %v1494_v6 = vrot.slane %v1492_v63, 5  ;;  %13697 = vmatprep.mubr.bf16.mxu1 %v12339_v5  ;;  %975 = vst [vmem:[#allocation2 + $0x9c] sm:$0x1] %v974_v62  ;;  %v619_v1 = vrot.slane %v615_v52, 4  ;;  %v624_v44 = vshll.u32 %v15425_v39, 16 }
  0xa5   : > { %v1510_v54 = vrot.slane %v1508_v2, 5  ;;  %v628_v60 = vrot.slane %v623_v53, 4  ;;  %v809_v40 = vsel %vm14884_vm7, %v618_v0, %v808_v47  ;;  %13646 = vmatmul.mubr.bf16.gmra.mxu0 %v12314_v55  ;;  %v305_v3 = vsel %vm274_vm0, %v272_v51, 0  ;;  %v815_v47 = vld [vmem:[#allocation2 + $0xb4] sm:$0xf] }
  0xa6   : > { %v1495_v36 = vor.u32 %v1494_v6, %v1491_v9  ;;  %810 = vst [vmem:[#allocation2 + $0xa8] sm:$0xf] %v809_v40  ;;  %v1118_v14 = vld [vmem:[#allocation2 + $0xa4] sm:$0x1]  ;;  %v626_v18 = vor.u32 %v624_v44, %v623_v53  ;;  %v12247_v20 = vcombine.low %v305_v3, %v305_v3  ;;  %v12248_v48 = vcombine.high %v305_v3, %v305_v3  ;;  %v2179_v62 = vld [vmem:[#allocation2] sm:$0xe] }
  0xa7   : > { %v813_v22 = vsel %vm14891_vm8, %v628_v60, %v812_v10  ;;  %v1511_v39 = vsel %vm15021_vm12, %v1506_v19, %v1510_v54  ;;  %v14725_v40 = vld [vmem:[#allocation2 + $0x4] sm:$0xf] }
  0xa8   : > { %v1496_v26 = vrot.slane %v1495_v36, 4  ;;  %v1001_v50 = vld [vmem:[#allocation2 + $0xa0] sm:$0x8]  ;;  %814 = vst [vmem:[#allocation2 + $0xb0] sm:$0x1] %v813_v22  ;;  %v627_v41 = vsel %vm14873_vm6, %v619_v1, %v626_v18  ;;  %v630_v12 = vshrl.u32 %v12247_v20, 16 }
  0xa9   : > { %v15483_v7 = vld [vmem:[#allocation2 + $0xa0] sm:$0xf]  ;;  %v12282_v25 = vrot.slane %v1001_v50, 11  ;;  %811 = vst [vmem:[#allocation2 + $0xac] sm:$0xf] %v627_v41  ;;  %v633_v15 = vshll.u32 %v12247_v20, 16 }
  0xaa   : > { %v1522_v35 = vshll.u32 %v15483_v7, 16  ;;  %v1526_v17 = vshrl.u32 %v15483_v7, 16  ;;  %v1501_v42 = vsel %vm15021_vm12, %v1496_v26, %v15448_v45  ;;  %v638_v27 = vshrl.u32 %v12248_v48, 16  ;;  %v819_v45 = vld [vmem:[#allocation2 + $0xbc] sm:$0x1] }
  0xab   : > { %v12315_v32 = vcombine.low %v1501_v42, %v1511_v39  ;;  %v1119_v19 = vsel %vm14925_vm9, %v12282_v25, %v1118_v14  ;;  %v1159_v57 = vld [vmem:[#allocation2 + $0x9c] sm:$0xf]  ;;  %v632_v13 = vrot.slane %v630_v12, 7  ;;  %v641_v59 = vshll.u32 %v12248_v48, 16  ;;  %v2180_v1 = vld [vmem:[#allocation2 + $0xc] sm:$0xe] }
  0xac   : > { %v15494_v31 = vrot.slane %v1522_v35, 5  ;;  %v1528_v56 = vrot.slane %v1526_v17, 4  ;;  %1120 = vst [vmem:[#allocation2 + $0xa4] sm:$0x1] %v1119_v19  ;;  %v1513_v51 = vshrl.u32 %v1159_v57, 16  ;;  %v1516_v16 = vshll.u32 %v1159_v57, 16 }
  0xad   : > { %v12340_v4 = vcombine.low %v1159_v57, %v15483_v7  ;;  %13649 = vmatprep.mubr.bf16.mxu0 %v12315_v32  ;;  %v858_v52 = vld [vmem:[#allocation2 + $0xa8] sm:$0x2]  ;;  %v976_v53 = vld [vmem:[#allocation2 + $0xa8] sm:$0x1]  ;;  %v640_v30 = vrot.slane %v638_v27, 7  ;;  %v635_v2 = vor.u32 %v633_v15, %v632_v13  ;;  %v636_v55 = vrot.slane %v632_v13, 4 }
  0xae   : > { %v1515_v63 = vrot.slane %v1513_v51, 4  ;;  %v1518_v5 = vrot.slane %v1516_v16, 5  ;;  %v12265_v21 = vrot.slane %v858_v52, 9  ;;  %v1529_v0 = vor.u32 %v1528_v56, %v15494_v31  ;;  %v14726_v26 = vld [vmem:[#allocation2 + $0x8] sm:$0x1]  ;;  %v15519_v12 = vld [vmem:[%s14849_s20 + $0xf0] sm:$0xff] }
  0xaf   : > { %13698 = vmatmul.mubr.bf16.gmra.mxu1 %v12340_v4  ;;  %v643_v9 = vor.u32 %v641_v59, %v640_v30  ;;  %v645_v6 = vrot.slane %v640_v30, 4  ;;  %v1121_v44 = vld [vmem:[#allocation2 + $0xb0] sm:$0x1]  ;;  %v816_v60 = vsel %vm14884_vm7, %v635_v2, %v815_v47  ;;  %v2232_v36 = vrot.slane %v14725_v40, 5  ;;  %v2181_v50 = vld [vmem:[#allocation2 + $0x18] sm:$0xe] }
  0xb0   : > { %v1519_v10 = vor.u32 %v1518_v5, %v1515_v63  ;;  %v977_v54 = vsel %vm14891_vm8, %v12265_v21, %v976_v53  ;;  %v1002_v3 = vld [vmem:[#allocation2 + $0xac] sm:$0x8]  ;;  %817 = vst [vmem:[#allocation2 + $0xb4] sm:$0xf] %v816_v60  ;;  %v12351_v20 = vrot.slane %v2179_v62, 9  ;;  %v2235_v39 = vrot.slane %v14726_v26, 5 }
  0xb1   : > { %978 = vst [vmem:[#allocation2 + $0xa8] sm:$0x1] %v977_v54  ;;  %v15502_v14 = vld [vmem:[#allocation2 + $0xac] sm:$0xf]  ;;  %v644_v18 = vsel %vm14873_vm6, %v636_v55, %v643_v9  ;;  %v820_v22 = vsel %vm14891_vm8, %v645_v6, %v819_v45  ;;  %v12283_v25 = vrot.slane %v1002_v3, 11  ;;  %v20906_v41 = vmov 0 }
  0xb2   : > { %v1520_v48 = vrot.slane %v1519_v10, 4  ;;  %v1546_v35 = vshll.u32 %v15502_v14, 16  ;;  %v1550_v17 = vshrl.u32 %v15502_v14, 16  ;;  %818 = vst [vmem:[#allocation2 + $0xb8] sm:$0xf] %v644_v18  ;;  %v20907_v41 = vsel %vm15512_vm15, 4294967295, %v20906_v41 }
  0xb3   : > { %821 = vst [vmem:[#allocation2 + $0xbc] sm:$0x1] %v820_v22  ;;  %20908 = vst [vmem:[#allocation8_spill] sm:$0xff] %v20907_v41  ;;  %v15516_v42 = vld [vmem:[#allocation2 + $0x24] sm:$0xe]  ;;  %v1530_v27 = vrot.slane %v1529_v0, 4  ;;  %v1122_v51 = vsel %vm14925_vm9, %v12283_v25, %v1121_v44  ;;  %v15533_v53 = vsel %vm15512_vm15, %v12351_v20, %v2232_v36 }
  0xb4   : > { %v15521_v15 = vld [vmem:[#allocation2 + $0xa4] sm:$0x1]  ;;  %v2234_v32 = vrot.slane %v2232_v36, 4  ;;  %v12352_v19 = vrot.slane %v2180_v1, 9  ;;  %v14727_v57 = vld [vmem:[#allocation2 + $0x10] sm:$0xf]  ;;  %v1525_v63 = vsel %vm15021_vm12, %v1520_v48, %v15494_v31 }
  0xb5   : > { %v2239_v56 = vrot.slane %v14727_v57, 5  ;;  %v1532_v47 = vshll.u32 %v15521_v15, 16  ;;  %v15526_v16 = vrot.slane %v1546_v35, 5  ;;  %v14728_v4 = vld [vmem:[#allocation2 + $0x14] sm:$0x1]  ;;  %v15529_v45 = vld [vmem:[%s14849_s20 + $0xf8] sm:$0xff] }
  0xb6   : > { %v2242_v13 = vrot.slane %v14728_v4, 5  ;;  %1123 = vst [vmem:[#allocation2 + $0xb0] sm:$0x1] %v1122_v51  ;;  %v1552_v52 = vrot.slane %v1550_v17, 4  ;;  %v15537_v30 = vsel %vm15512_vm15, %v2234_v32, %v2235_v39  ;;  %v12353_v21 = vrot.slane %v2181_v50, 9 }
  0xb7   : > { %v2241_v59 = vrot.slane %v2239_v56, 4  ;;  %v1534_v5 = vrot.slane %v1532_v47, 5  ;;  %v14729_v2 = vld [vmem:[#allocation2 + $0x1c] sm:$0xf]  ;;  %v14730_v55 = vld [vmem:[#allocation2 + $0x20] sm:$0x1]  ;;  %v273_v10 = vpack.c.bf16 %v15529_v45, %v15519_v12  ;;  %v12383_v40 = vcombine.low %v15533_v53, %v15537_v30 }
  0xb8   : > { %v2246_v62 = vrot.slane %v14729_v2, 5  ;;  %v1553_v0 = vor.u32 %v1552_v52, %v15526_v16  ;;  %v2249_v9 = vrot.slane %v14730_v55, 5  ;;  %v12354_v6 = vrot.slane %v15516_v42, 9  ;;  %v15544_v1 = vld [vmem:[#allocation2 + $0x30] sm:$0xe]  ;;  %v14742_v12 = vld [vmem:[%s20857_s1 + $0x138] sm:$0xff]  }
  0xb9   : > { %v1535_v54 = vsel %vm15021_vm12, %v1530_v27, %v1534_v5  ;;  %v1161_v44 = vld [vmem:[#allocation2 + $0xa8] sm:$0xf]  ;;  %v837_v31 = vld [vmem:[#allocation2 + $0xb4] sm:$0xf]  ;;  %v15554_v36 = vsel %vm15512_vm15, %v12352_v19, %v2239_v56  ;;  %v15558_v3 = vsel %vm15512_vm15, %v2241_v59, %v2242_v13  ;;  %v1003_v35 = vld [vmem:[#allocation2 + $0xb8] sm:$0x8] }
  0xba   : > { %v859_v60 = vld [vmem:[#allocation2 + $0xb4] sm:$0x2]  ;;  %v12316_v18 = vcombine.low %v1525_v63, %v1535_v54  ;;  %v1537_v22 = vshrl.u32 %v1161_v44, 16  ;;  %v1540_v20 = vshll.u32 %v1161_v44, 16  ;;  %v1554_v26 = vrot.slane %v1553_v0, 4 }
  0xbb   : > { %v839_v39 = vld [vmem:[#allocation2 + $0xbc] sm:$0x1]  ;;  %841 = vst [vmem:[#allocation2 + $0xcc] sm:$0xf] %v837_v31  ;;  %v12341_v50 = vcombine.low %v1161_v44, %v15502_v14  ;;  %v12266_v48 = vrot.slane %v859_v60, 9  ;;  %v15563_v17 = vsel %vm15512_vm15, %v12353_v21, %v2246_v62  ;;  %v2248_v42 = vrot.slane %v2246_v62, 4 }
  0xbc   : > { %v979_v25 = vld [vmem:[#allocation2 + $0xb4] sm:$0x1]  ;;  %843 = vst [vmem:[#allocation2 + $0xd4] sm:$0x1] %v839_v39  ;;  %13650 = vmatmul.mubr.bf16.gmra.mxu0 %v12316_v18  ;;  %v1539_v27 = vrot.slane %v1537_v22, 4  ;;  %v1542_v32 = vrot.slane %v1540_v20, 5 }
  0xbd   : > { %v12284_v19 = vrot.slane %v1003_v35, 11  ;;  %v1124_v57 = vld [vmem:[#allocation2 + $0xbc] sm:$0x1]  ;;  %v14731_v56 = vld [vmem:[#allocation2 + $0x28] sm:$0xf]  ;;  %13701 = vmatprep.mubr.bf16.mxu1 %v12341_v50  ;;  %v980_v4 = vsel %vm14891_vm8, %v12266_v48, %v979_v25  ;;  %v15573_v52 = vsel %vm15512_vm15, %v2248_v42, %v2249_v9  ;;  %v12355_v5 = vrot.slane %v15544_v1, 9 }
  0xbe   : > { %v2253_v47 = vrot.slane %v14731_v56, 5  ;;  %v15565_v51 = vld [vmem:[#allocation2 + $0xb0] sm:$0x1]  ;;  %v15569_v13 = vld [vmem:[#allocation2 + $0xb8] sm:$0xf]  ;;  %v1543_v21 = vor.u32 %v1542_v32, %v1539_v27  ;;  %v20910_v45 = vcombine.low %v15563_v17, %v15573_v52 }
  0xbf   : > { %v14732_v59 = vld [vmem:[#allocation2 + $0x2c] sm:$0x1]  ;;  %v1556_v2 = vshll.u32 %v15565_v51, 16  ;;  %981 = vst [vmem:[#allocation2 + $0xb4] sm:$0x1] %v980_v4  ;;  %v1125_v62 = vsel %vm14925_vm9, %v12284_v19, %v1124_v57  ;;  %v1570_v0 = vshll.u32 %v15569_v13, 16 }
  0xc0   : > { %v2256_v63 = vrot.slane %v14732_v59, 5  ;;  %1126 = vst [vmem:[#allocation2 + $0xbc] sm:$0x1] %v1125_v62  ;;  %v1574_v55 = vshrl.u32 %v15569_v13, 16  ;;  %v2255_v44 = vrot.slane %v2253_v47, 4  ;;  %v1544_v31 = vrot.slane %v1543_v21, 4 }
  0xc1   : > { %v2184_v1 = vld [vmem:[#allocation2 + $0x3c] sm:$0xe]  ;;  %v1558_v60 = vrot.slane %v1556_v2, 5  ;;  %v15585_v18 = vrot.slane %v1570_v0, 5  ;;  %v14733_v22 = vld [vmem:[#allocation2 + $0x34] sm:$0xf]  ;;  %v15589_v50 = vsel %vm15512_vm15, %v12354_v6, %v2253_v47 }
  0xc2   : > { %v2260_v20 = vrot.slane %v14733_v22, 5  ;;  %v1576_v39 = vrot.slane %v1574_v55, 4  ;;  %v15593_v48 = vsel %vm15512_vm15, %v2255_v44, %v2256_v63  ;;  %v14734_v25 = vld [vmem:[#allocation2 + $0x38] sm:$0x1]  ;;  %v2185_v42 = vld [vmem:[#allocation2 + $0x48] sm:$0xe]  ;;  %v1549_v27 = vsel %vm15021_vm12, %v1544_v31, %v15526_v16 }
  0xc3   : > { %v2263_v35 = vrot.slane %v14734_v25, 5  ;;  %v1559_v32 = vsel %vm15021_vm12, %v1554_v26, %v1558_v60  ;;  %v12356_v6 = vrot.slane %v2184_v1, 9  ;;  %v14530_v47 = vld [vmem:[#allocation2 + $0xc] sm:$0xff]   ;;  %v14735_v59 = vld [vmem:[#allocation2 + $0x40] sm:$0xf]  ;;  %v12357_v62 = vrot.slane %v2185_v42, 9 }
  0xc4   : > { %v15602_v19 = vsel %vm15512_vm15, %v12355_v5, %v2260_v20  ;;  %v12317_v57 = vcombine.low %v1549_v27, %v1559_v32  ;;  %v1577_v56 = vor.u32 %v1576_v39, %v15585_v18  ;;  %v2262_v4 = vrot.slane %v2260_v20, 4  ;;  %v14736_v21 = vld [vmem:[#allocation2 + $0x44] sm:$0x1]  ;;  %v14737_v0 = vld [vmem:[#allocation2 + $0x4c] sm:$0xf] }
  0xc5   : > { %v2267_v63 = vrot.slane %v14735_v59, 5  ;;  %v2270_v2 = vrot.slane %v14736_v21, 5  ;;  %v2274_v16 = vrot.slane %v14737_v0, 5  ;;  %v14738_v55 = vld [vmem:[#allocation2 + $0x50] sm:$0x1] }
  0xc6   : > { %v2277_v44 = vrot.slane %v14738_v55, 5  ;;  %v2186_v26 = vld [vmem:[#allocation2 + $0x54] sm:$0xe]  ;;  %13653 = vmatprep.mubr.bf16.mxu0 %v12317_v57  ;;  %v1578_v5 = vrot.slane %v1577_v56, 4  ;;  %v15609_v60 = vsel %vm15512_vm15, %v2262_v4, %v2263_v35  ;;  %v2187_v4 = vld [vmem:[#allocation2 + $0x60] sm:$0xe] }
  0xc7   : > { %v1163_v31 = vld [vmem:[#allocation2 + $0xb4] sm:$0xf]  ;;  %v2269_v22 = vrot.slane %v2267_v63, 4  ;;  %v15611_v20 = vld [vmem:[#allocation2 + $0xbc] sm:$0x1]  ;;  %v15616_v27 = vsel %vm15512_vm15, %v12356_v6, %v2267_v63  ;;  %v2276_v56 = vrot.slane %v2274_v16, 4  ;;  %v15627_v55 = vsel %vm15512_vm15, %v12357_v62, %v2274_v16 }
  0xc8   : > { %v1561_v39 = vshrl.u32 %v1163_v31, 16  ;;  %v1564_v25 = vshll.u32 %v1163_v31, 16  ;;  %v12342_v42 = vcombine.low %v1163_v31, %v15569_v13  ;;  %v1580_v32 = vshll.u32 %v15611_v20, 16  ;;  %v2188_v59 = vld [vmem:[#allocation2 + $0x6c] sm:$0xe] }
  0xc9   : > { %v15623_v35 = vsel %vm15512_vm15, %v2269_v22, %v2270_v2  ;;  %v12358_v6 = vrot.slane %v2186_v26, 9  ;;  %v15631_v31 = vsel %vm15512_vm15, %v2276_v56, %v2277_v44  ;;  %v14739_v57 = vld [vmem:[#allocation2 + $0x58] sm:$0xf]  ;;  %v14740_v22 = vld [vmem:[#allocation2 + $0x5c] sm:$0x1]  ;;  %v2291_v44 = vrot.slane %v15335_v11, 5 }
  0xca   : > { %v1563_v21 = vrot.slane %v1561_v39, 4  ;;  %v1566_v0 = vrot.slane %v1564_v25, 5  ;;  %13702 = vmatmul.mubr.bf16.gmra.mxu1 %v12342_v42  ;;  %v1582_v63 = vrot.slane %v1580_v32, 5  ;;  %v2281_v2 = vrot.slane %v14739_v57, 5  ;;  %v14741_v42 = vld [vmem:[#allocation2 + $0x64] sm:$0xf] }
  0xcb   : > { %13769 = vmatprep.mubr.bf16.mxu1 %v14530_v47  ;;  %v2284_v1 = vrot.slane %v14740_v22, 5  ;;  %v12388_v39 = vcombine.low %v15616_v27, %v15623_v35  ;;  %v12359_v25 = vrot.slane %v2187_v4, 9  ;;  %v2288_v9 = vrot.slane %v14741_v42, 5  ;;  %v2189_v26 = vld [vmem:[#allocation2 + $0x78] sm:$0xe] }
  0xcc   : > { %v1567_v54 = vor.u32 %v1566_v0, %v1563_v21  ;;  %v1583_v62 = vsel %vm15021_vm12, %v1578_v5, %v1582_v63  ;;  %v2283_v16 = vrot.slane %v2281_v2, 4  ;;  %v14531_v57 = vld [vmem:[#allocation2 + $0x18] sm:$0xff]   ;;  %v15642_v56 = vsel %vm15512_vm15, %v12358_v6, %v2281_v2  ;;  %v14533_v0 = vld [vmem:[#allocation2 + $0x24] sm:$0xff]   ;;  %v2191_v42 = vld [vmem:[#allocation2 + $0x90] sm:$0xe] }
  0xcd   : > { %v2290_v21 = vrot.slane %v2288_v9, 4  ;;  %v12360_v4 = vrot.slane %v2188_v59, 9  ;;  %v15650_v5 = vsel %vm15512_vm15, %v12359_v25, %v2288_v9  ;;  %v2295_v11 = vrot.slane %v15326_v37, 5  ;;  %v2190_v63 = vld [vmem:[#allocation2 + $0x84] sm:$0xe]  ;;  %v14543_v35 = vld [vmem:[#allocation2 + $0x78] sm:$0xff]  }
  0xce   : > { %v1568_v32 = vrot.slane %v1567_v54, 4  ;;  %v15646_v22 = vsel %vm15512_vm15, %v2283_v16, %v2284_v1  ;;  %v2298_v54 = vrot.slane %v15377_v29, 5  ;;  %v12361_v2 = vrot.slane %v2189_v26, 9  ;;  %v2192_v26 = vld [vmem:[#allocation2 + $0x9c] sm:$0xe] }
  0xcf   : > { %v15659_v59 = vsel %vm15512_vm15, %v2290_v21, %v2291_v44  ;;  %v2302_v1 = vrot.slane %v15368_v61, 5  ;;  %v15666_v37 = vsel %vm15512_vm15, %v12360_v4, %v2295_v11  ;;  %v2297_v29 = vrot.slane %v2295_v11, 4  ;;  %v826_v9 = vld [vmem:[#allocation2 + $0xc8] sm:$0x1] }
  0xd0   : > { %v1573_v6 = vsel %vm15021_vm12, %v1568_v32, %v15585_v18  ;;  %v14545_v18 = vld [vmem:[%s20857_s1 + $0x170] sm:$0xff]   ;;  %v2305_v61 = vrot.slane %v15416_v23, 5  ;;  %v2309_v21 = vrot.slane %v15410_v43, 5  ;;  %v2312_v4 = vrot.slane %v15452_v24, 5 }
  0xd1   : > { %v12318_v16 = vcombine.low %v1573_v6, %v1583_v62  ;;  %v2304_v44 = vrot.slane %v2302_v1, 4  ;;  %v12362_v62 = vrot.slane %v2190_v63, 9  ;;  %v15676_v32 = vsel %vm15512_vm15, %v2297_v29, %v2298_v54  ;;  %v2193_v54 = vld [vmem:[#allocation2 + $0xa8] sm:$0xe]  ;;  %v14534_v63 = vld [vmem:[#allocation2 + $0x30] sm:$0xff]  }
  0xd2   : > { %13770 = vmatmul.mubr.bf16.vlgmr.msra.gmra.mxu1 %v14531_v57  ;;  %v12363_v11 = vrot.slane %v2191_v42, 9  ;;  %v15688_v57 = vsel %vm15512_vm15, %v12361_v2, %v2302_v1  ;;  %v2319_v43 = vrot.slane %v15466_v46, 5  ;;  %v2311_v30 = vrot.slane %v2309_v21, 4  ;;  %v3050_v1 = vld [vmem:[#allocation2 + $0xc] sm:$0xf]  ;;  %v14536_v42 = vld [vmem:[#allocation2 + $0x3c] sm:$0xff]  }
  0xd3   : > { %13654 = vmatmul.mubr.bf16.gmra.mxu0 %v12318_v16  ;;  %13773 = vmatprep.mubr.bf16.mxu1 %v14533_v0  ;;  %v2316_v0 = vrot.slane %v15429_v58, 5  ;;  %v15694_v24 = vsel %vm15512_vm15, %v2304_v44, %v2305_v61  ;;  %v15698_v53 = vsel %vm15512_vm15, %v12362_v62, %v2309_v21  ;;  %v2323_v6 = vrot.slane %v15483_v7, 5  ;;  %v2194_v62 = vld [vmem:[#allocation2 + $0xb4] sm:$0xe] }
  0xd4   : > { %13721 = vmatprep.mubr.bf16.mxu0 %v12383_v40  ;;  %13850 = vmatpush3.bf16.msra.mxu1 %v15333_v49  ;;  %v14549_v49 = vld [vmem:[%s20857_s1 + $0x168] sm:$0xff]   ;;  %v12364_v40 = vrot.slane %v2192_v26, 9  ;;  %v2326_v2 = vrot.slane %v15521_v15, 5  ;;  %v15711_v16 = vsel %vm15512_vm15, %v2311_v30, %v2312_v4  ;;  %v12365_v29 = vrot.slane %v2193_v54, 9  ;;  %v14532_v4 = vld [vmem:[%s20857_s1 + $0x130] sm:$0xff]  }
  0xd5   : > { %13851 = vmatprep.subr.bf16.mxu1 %v14545_v18  ;;  %v15705_v58 = vsel %vm15512_vm15, %v12363_v11, %v2316_v0  ;;  %v2318_v46 = vrot.slane %v2316_v0, 4  ;;  %v2330_v44 = vrot.slane %v15502_v14, 5  ;;  %v2333_v61 = vrot.slane %v15565_v51, 5  ;;  %v14550_v0 = vld [vmem:[%s20857_s1 + $0x160] sm:$0xff]  }
  0xd6   : > { %v2325_v21 = vrot.slane %v2323_v6, 4  ;;  %v15730_v51 = vsel %vm15512_vm15, %v12364_v40, %v2323_v6  ;;  %v12366_v54 = vrot.slane %v2194_v62, 9  ;;  %v2337_v30 = vrot.slane %v15569_v13, 5 }
  0xd7   : > { %v15721_v15 = vsel %vm15512_vm15, %v2318_v46, %v2319_v43  ;;  %v2332_v11 = vrot.slane %v2330_v44, 4  ;;  %v307_v40 = vsel %vm274_vm0, %v273_v10, 0  ;;  %v20909_v46 = vcombine.low %v15554_v36, %v15558_v3  ;;  %v14535_v10 = vld [vmem:[%s20857_s1 + $0x128] sm:$0xff]  }
  0xd8   : > { %13852 = vmatpush3.bf16.msra.mxu1 %v14545_v18  ;;  %v15734_v18 = vsel %vm15512_vm15, %v12365_v29, %v2330_v44  ;;  %v15741_v43 = vsel %vm15512_vm15, %v2325_v21, %v2326_v2  ;;  %v2340_v6 = vrot.slane %v15611_v20, 5  ;;  %v12249_v2 = vcombine.low %v307_v40, %v307_v40  ;;  %v15756_v29 = vld [vmem:[#allocation2 + $0x10] sm:$0xf]  ;;  %v14537_v36 = vld [vmem:[#allocation2 + $0x48] sm:$0xff]  }
  0xd9   : > { %13853 = vmatprep.subr.bf16.mxu1 %v14549_v49  ;;  %v3099_v13 = vshrl.u32 %v3050_v1, 16  ;;  %v12250_v44 = vcombine.high %v307_v40, %v307_v40  ;;  %v3102_v21 = vshll.u32 %v3050_v1, 16  ;;  %v3108_v20 = vshll.u32 %v15756_v29, 16  ;;  %v14539_v1 = vld [vmem:[#allocation2 + $0x54] sm:$0xff]  }
  0xda   : > { %13774 = vmatmul.mubr.bf16.gmra.mxu1 %v14534_v63  ;;  %v15753_v63 = vsel %vm15512_vm15, %v2332_v11, %v2333_v61  ;;  %v15771_v61 = vld [vmem:[#allocation2 + $0x14] sm:$0x1]  ;;  %v647_v62 = vshrl.u32 %v12249_v2, 16  ;;  %v650_v17 = vshll.u32 %v12249_v2, 16  ;;  %v3053_v11 = vld [vmem:[#allocation2 + $0x18] sm:$0xf]  ;;  %v20913_v27 = vcombine.low %v15627_v55, %v15631_v31 }
  0xdb   : > { %13722 = vmatmul.mubr.bf16.vlgmr.msra.gmra.mxu0 %v20909_v46  ;;  %13777 = vmatprep.mubr.bf16.mxu1 %v14536_v42  ;;  %v2339_v42 = vrot.slane %v2337_v30, 4  ;;  %v3101_v52 = vrot.slane %v3099_v13, 4  ;;  %v14554_v46 = vld [vmem:[%s20857_s1 + $0x158] sm:$0xff]   ;;  %v658_v40 = vshll.u32 %v12250_v44, 16  ;;  %v3104_v3 = vrot.slane %v3102_v21, 5 }
  0xdc   : > { %13802 = vmatpush3.bf16.msra.mxu0 %v14742_v12  ;;  %13725 = vmatprep.mubr.bf16.mxu0 %v20910_v45  ;;  %v15778_v12 = vsel %vm15512_vm15, %v12366_v54, %v2337_v30  ;;  %v655_v45 = vshrl.u32 %v12250_v44, 16  ;;  %v649_v13 = vrot.slane %v647_v62, 7  ;;  %v3112_v14 = vshrl.u32 %v15756_v29, 16  ;;  %v822_v30 = vld [vmem:[#allocation2 + $0xc0] sm:$0xf] }
  0xdd   : > { %13803 = vmatprep.subr.bf16.mxu0 %v14532_v4  ;;  %13854 = vmatpush3.bf16.msra.mxu1 %v14549_v49  ;;  %v15784_v49 = vld [vmem:[%s20857_s1 + $0x120] sm:$0xff]   ;;  %v15788_v2 = vsel %vm15512_vm15, %v2339_v42, %v2340_v6  ;;  %v15791_v44 = vrot.slane %v3108_v20, 5  ;;  %v3118_v7 = vshll.u32 %v15771_v61, 16  ;;  %v3123_v26 = vshrl.u32 %v3053_v11, 16  ;;  %v15794_v42 = vld [vmem:[#allocation2 + $0x1c] sm:$0xf] }
  0xde   : > { %13855 = vmatprep.subr.bf16.mxu1 %v14550_v0  ;;  %v657_v54 = vrot.slane %v655_v45, 7  ;;  %v652_v23 = vor.u32 %v650_v17, %v649_v13  ;;  %v653_v25 = vrot.slane %v649_v13, 4  ;;  %v3105_v47 = vor.u32 %v3104_v3, %v3101_v52  ;;  %v15801_v45 = vld [vmem:[#allocation2 + $0x20] sm:$0x1] }
  0xdf   : > { %v3114_v6 = vrot.slane %v3112_v14, 4  ;;  %v15799_v21 = vrot.slane %v3118_v7, 5  ;;  %v20911_v17 = vcombine.low %v15589_v50, %v15593_v48  ;;  %v15809_v14 = vld [vmem:[%s20857_s1 + $0x118] sm:$0xff]   ;;  %v3126_v52 = vshll.u32 %v3053_v11, 16  ;;  %v14540_v50 = vld [vmem:[#allocation2 + $0x60] sm:$0xff]  }
  0xe0   : > { %13804 = vmatpush3.bf16.msra.mxu0 %v14532_v4  ;;  %v14555_v4 = vld [vmem:[%s20857_s1 + $0x150] sm:$0xff]   ;;  %v660_v20 = vor.u32 %v658_v40, %v657_v54  ;;  %v662_v62 = vrot.slane %v657_v54, 4  ;;  %v3106_v3 = vrot.slane %v3105_v47, 4  ;;  %v3804_v40 = vld [vmem:[#allocation2 + $0xc] sm:$0xe]  ;;  %v3136_v47 = vshrl.u32 %v15794_v42, 16 }
  0xe1   : > { %13805 = vmatprep.subr.bf16.mxu0 %v14535_v10  ;;  %13856 = vmatpush3.bf16.msra.mxu1 %v14550_v0  ;;  %v3125_v0 = vrot.slane %v3123_v26, 4  ;;  %v3115_v7 = vor.u32 %v3114_v6, %v15791_v44  ;;  %v20912_v26 = vcombine.low %v15602_v19, %v15609_v60  ;;  %v14559_v60 = vld [vmem:[%s20857_s1 + $0x148] sm:$0xff]   ;;  %v12487_v54 = vrot.slane %v3804_v40, 9 }
  0xe2   : > { %13778 = vmatmul.mubr.bf16.gmra.mxu1 %v14537_v36  ;;  %13857 = vmatprep.subr.bf16.mxu1 %v14554_v46  ;;  %v823_v36 = vsel %vm14884_vm7, %v652_v23, %v822_v30  ;;  %v661_v48 = vsel %vm14873_vm6, %v653_v25, %v660_v20  ;;  %v3132_v23 = vshll.u32 %v15794_v42, 16  ;;  %v3138_v13 = vrot.slane %v3136_v47, 4  ;;  %v14542_v6 = vld [vmem:[#allocation2 + $0x6c] sm:$0xff]  }
  0xe3   : > { %13726 = vmatmul.mubr.bf16.gmra.mxu0 %v20911_v17  ;;  %13781 = vmatprep.mubr.bf16.mxu1 %v14539_v1  ;;  %824 = vst [vmem:[#allocation2 + $0xc0] sm:$0xf] %v823_v36  ;;  %v827_v1 = vsel %vm14891_vm8, %v662_v62, %v826_v9  ;;  %825 = vst [vmem:[#allocation2 + $0xc4] sm:$0xf] %v661_v48  ;;  %v3116_v25 = vrot.slane %v3115_v7, 4  ;;  %v3142_v9 = vshll.u32 %v15801_v45, 16 }
  0xe4   : > { %13729 = vmatprep.mubr.bf16.mxu0 %v20912_v26  ;;  %13806 = vmatpush3.bf16.msra.mxu0 %v14535_v10  ;;  %828 = vst [vmem:[#allocation2 + $0xc8] sm:$0x1] %v827_v1  ;;  %v3128_v10 = vrot.slane %v3126_v52, 5  ;;  %v3134_v11 = vrot.slane %v3132_v23, 5  ;;  %v3870_v30 = vrot.slane %v15756_v29, 5  ;;  %v15834_v20 = vld [vmem:[%s20857_s1 + $0x110] sm:$0xff]   ;;  %v3111_v62 = vsel %vm15021_vm12, %v3106_v3, %v15791_v44 }
  0xe5   : > { %13807 = vmatprep.subr.bf16.mxu0 %v15784_v49  ;;  %13858 = vmatpush3.bf16.msra.mxu1 %v14554_v46  ;;  %v3805_v46 = vld [vmem:[#allocation2 + $0x18] sm:$0xe]  ;;  %v3121_v17 = vsel %vm15021_vm12, %v3116_v25, %v15799_v21  ;;  %v3873_v7 = vrot.slane %v15771_v61, 5  ;;  %v3056_v52 = vld [vmem:[#allocation2 + $0x24] sm:$0xf]  ;;  %v3144_v40 = vrot.slane %v3142_v9, 5 }
  0xe6   : > { %13859 = vmatprep.subr.bf16.mxu1 %v14555_v4  ;;  %v3129_v36 = vor.u32 %v3128_v10, %v3125_v0  ;;  %v3139_v29 = vor.u32 %v3138_v13, %v3134_v11  ;;  %v15846_v26 = vsel %vm15512_vm15, %v12487_v54, %v3870_v30  ;;  %v3872_v48 = vrot.slane %v3870_v30, 4  ;;  %v15848_v1 = vld [vmem:[#allocation2 + $0x28] sm:$0xf]  ;;  %v15853_v3 = vld [vmem:[#allocation2 + $0x2c] sm:$0x1] }
  0xe7   : > { %v12488_v21 = vrot.slane %v3805_v46, 9  ;;  %v3877_v0 = vrot.slane %v15794_v42, 5  ;;  %v3880_v61 = vrot.slane %v15801_v45, 5  ;;  %v3150_v25 = vshll.u32 %v3056_v52, 16  ;;  %v3059_v10 = vld [vmem:[#allocation2 + $0x30] sm:$0xf] }
  0xe8   : > { %13808 = vmatpush3.bf16.msra.mxu0 %v15784_v49  ;;  %v3130_v44 = vrot.slane %v3129_v36, 4  ;;  %v14560_v49 = vld [vmem:[%s20857_s1 + $0x140] sm:$0xff]   ;;  %v3140_v23 = vrot.slane %v3139_v29, 4  ;;  %v15860_v47 = vsel %vm15512_vm15, %v3872_v48, %v3873_v7  ;;  %v14551_v42 = vld [vmem:[%s20857_s1 + $0x108] sm:$0xff]   ;;  %v15868_v9 = vcombine.low %v3111_v62, %v3121_v17  ;;  %v15891_v7 = vld [vmem:[#allocation2 + $0x38] sm:$0x1] }
  0xe9   : > { %13809 = vmatprep.subr.bf16.mxu0 %v15809_v14  ;;  %13860 = vmatpush3.bf16.msra.mxu1 %v14555_v4  ;;  %v3147_v4 = vshrl.u32 %v3056_v52, 16  ;;  %v12519_v54 = vcombine.low %v15846_v26, %v15860_v47  ;;  %v3879_v30 = vrot.slane %v3877_v0, 4  ;;  %v3152_v62 = vrot.slane %v3150_v25, 5  ;;  %v3806_v48 = vld [vmem:[#allocation2 + $0x24] sm:$0xe] }
  0xea   : > { %13782 = vmatmul.mubr.bf16.gmra.mxu1 %v14540_v50  ;;  %13861 = vmatprep.subr.bf16.mxu1 %v14559_v60  ;;  %v860_v45 = vld [vmem:[#allocation2 + $0xc0] sm:$0x2]  ;;  %v982_v50 = vld [vmem:[#allocation2 + $0xc0] sm:$0x1]  ;;  %v3135_v13 = vsel %vm15021_vm12, %v3130_v44, %v3134_v11  ;;  %v3145_v46 = vsel %vm15021_vm12, %v3140_v23, %v3144_v40  ;;  %v14547_v11 = vld [vmem:[#allocation2 + $0x84] sm:$0xff]   ;;  %v15885_v36 = vsel %vm15512_vm15, %v12488_v21, %v3877_v0  ;;  %v3156_v55 = vshll.u32 %v15848_v1, 16 }
  0xeb   : > { %13730 = vmatmul.mubr.bf16.gmra.mxu0 %v12388_v39  ;;  %13785 = vmatprep.mubr.bf16.mxu1 %v14542_v6  ;;  %v12267_v39 = vrot.slane %v860_v45, 9  ;;  %v3149_v6 = vrot.slane %v3147_v4, 4  ;;  %v15881_v17 = vcombine.low %v3135_v13, %v3145_v46  ;;  %v3160_v31 = vshrl.u32 %v15848_v1, 16  ;;  %v15903_v44 = vld [vmem:[%s20857_s1 + $0x1f8] sm:$0xff]   ;;  %v3807_v25 = vld [vmem:[#allocation2 + $0x30] sm:$0xe] }
  0xec   : > { %13733 = vmatprep.mubr.bf16.mxu0 %v20913_v27  ;;  %13810 = vmatpush3.bf16.msra.mxu0 %v15809_v14  ;;  %v15889_v14 = vld [vmem:[#allocation2 + $0x34] sm:$0xf]  ;;  %v3166_v40 = vshll.u32 %v15853_v3, 16  ;;  %v3158_v21 = vrot.slane %v3156_v55, 5  ;;  %v3171_v23 = vshrl.u32 %v3059_v10, 16  ;;  %v3174_v4 = vshll.u32 %v3059_v10, 16 }
  0xed   : > { %13811 = vmatprep.subr.bf16.mxu0 %v15834_v20  ;;  %13862 = vmatpush3.bf16.msra.mxu1 %v14559_v60  ;;  %v983_v52 = vsel %vm14891_vm8, %v12267_v39, %v982_v50  ;;  %v15897_v60 = vsel %vm15512_vm15, %v3879_v30, %v3880_v61  ;;  %v3153_v29 = vor.u32 %v3152_v62, %v3149_v6  ;;  %v3162_v0 = vrot.slane %v3160_v31, 4  ;;  %v14556_v30 = vld [vmem:[%s20857_s1 + $0x100] sm:$0xff]  }
  0xee   : > { %13863 = vmatprep.subr.bf16.mxu1 %v14560_v49  ;;  %984 = vst [vmem:[#allocation2 + $0xc0] sm:$0x1] %v983_v52  ;;  %v3168_v61 = vrot.slane %v3166_v40, 5  ;;  %v3180_v50 = vshll.u32 %v15889_v14, 16  ;;  %v3184_v13 = vshrl.u32 %v15889_v14, 16  ;;  %v3173_v39 = vrot.slane %v3171_v23, 4 }
  0xef   : > { %v3154_v45 = vrot.slane %v3153_v29, 4  ;;  %v3163_v27 = vor.u32 %v3162_v0, %v3158_v21  ;;  %v3176_v46 = vrot.slane %v3174_v4, 5  ;;  %v3190_v10 = vshll.u32 %v15891_v7, 16  ;;  %v3062_v0 = vld [vmem:[#allocation2 + $0x3c] sm:$0xf]  ;;  %v14548_v4 = vld [vmem:[#allocation2 + $0x90] sm:$0xff]  }
  0xf0   : > { %13812 = vmatpush3.bf16.msra.mxu0 %v15834_v20  ;;  %v3182_v6 = vrot.slane %v3180_v50, 5  ;;  %v3186_v62 = vrot.slane %v3184_v13, 4  ;;  %v12489_v55 = vrot.slane %v3806_v48, 9  ;;  %v20914_v31 = vcombine.low %v15642_v56, %v15646_v22  ;;  %v15925_v48 = vld [vmem:[%s20857_s1 + $0x1b8] sm:$0xff]   ;;  %v15929_v23 = vld [vmem:[#allocation2 + $0x40] sm:$0xf] }
  0xf1   : > { %13813 = vmatprep.subr.bf16.mxu0 %v14551_v42  ;;  %13864 = vmatpush3.bf16.msra.mxu1 %v14560_v49  ;;  %v3159_v20 = vsel %vm15021_vm12, %v3154_v45, %v3158_v21  ;;  %v3164_v49 = vrot.slane %v3163_v27, 4  ;;  %v3177_v52 = vor.u32 %v3176_v46, %v3173_v39  ;;  %v3192_v29 = vrot.slane %v3190_v10, 5  ;;  %v14552_v45 = vld [vmem:[#allocation2 + $0x9c] sm:$0xff]   ;;  %v15948_v39 = vld [vmem:[#allocation2 + $0x44] sm:$0x1] }
  0xf2   : > { %13786 = vmatmul.mubr.bf16.gmra.mxu1 %v14543_v35  ;;  %13945 = vmatprep.subr.bf16.mxu1 %v15903_v44  ;;  %v3884_v40 = vrot.slane %v15848_v1, 5  ;;  %v20915_v35 = vcombine.low %v15650_v5, %v15659_v59  ;;  %v3187_v21 = vor.u32 %v3186_v62, %v3182_v6  ;;  %v3887_v56 = vrot.slane %v15853_v3, 5  ;;  %v3065_v10 = vld [vmem:[#allocation2 + $0x48] sm:$0xf] }
  0xf3   : > { %13734 = vmatmul.mubr.bf16.gmra.mxu0 %v20914_v31  ;;  %13789 = vmatprep.mubr.bf16.mxu1 %v14547_v11  ;;  %v12490_v22 = vrot.slane %v3807_v25, 9  ;;  %v3891_v11 = vrot.slane %v15889_v14, 5  ;;  %v12520_v1 = vcombine.low %v15885_v36, %v15897_v60  ;;  %v3169_v5 = vsel %vm15021_vm12, %v3164_v49, %v3168_v61  ;;  %v15957_v31 = vld [vmem:[#allocation2 + $0x4c] sm:$0xf]  ;;  %v15959_v49 = vld [vmem:[#allocation2 + $0x50] sm:$0x1] }
  0xf4   : > { %13737 = vmatprep.mubr.bf16.mxu0 %v20915_v35  ;;  %13814 = vmatpush3.bf16.msra.mxu0 %v14551_v42  ;;  %v3178_v59 = vrot.slane %v3177_v52, 4  ;;  %v3886_v42 = vrot.slane %v3884_v40, 4  ;;  %v15935_v50 = vcombine.low %v3159_v20, %v3169_v5  ;;  %v3188_v13 = vrot.slane %v3187_v21, 4 }
  0xf5   : > { %13815 = vmatprep.subr.bf16.mxu0 %v14556_v30  ;;  %v15939_v3 = vsel %vm15512_vm15, %v12489_v55, %v3884_v40  ;;  %v3893_v14 = vrot.slane %v3891_v11, 4  ;;  %v3894_v61 = vrot.slane %v15891_v7, 5  ;;  %v3195_v46 = vshrl.u32 %v3062_v0, 16  ;;  %v3808_v40 = vld [vmem:[#allocation2 + $0x3c] sm:$0xe] }
  0xf6   : > { %v3183_v25 = vsel %vm15021_vm12, %v3178_v59, %v3182_v6  ;;  %v15945_v27 = vsel %vm15512_vm15, %v3886_v42, %v3887_v56  ;;  %v3193_v20 = vsel %vm15021_vm12, %v3188_v13, %v3192_v29  ;;  %v15954_v62 = vsel %vm15512_vm15, %v12490_v22, %v3891_v11 }
  0xf7   : > { %v3198_v55 = vshll.u32 %v3062_v0, 16  ;;  %v3204_v6 = vshll.u32 %v15929_v23, 16  ;;  %v15962_v7 = vcombine.low %v3183_v25, %v3193_v20  ;;  %v3197_v52 = vrot.slane %v3195_v46, 4 }
  0xf8   : > { %13816 = vmatpush3.bf16.msra.mxu0 %v14556_v30  ;;  %v3208_v29 = vshrl.u32 %v15929_v23, 16  ;;  %v15969_v0 = vsel %vm15512_vm15, %v3893_v14, %v3894_v61  ;;  %v3214_v56 = vshll.u32 %v15948_v39, 16  ;;  %v20916_v22 = vcombine.low %v15666_v37, %v15676_v32  ;;  %v14557_v30 = vld [vmem:[#allocation2 + $0xb4] sm:$0xff]  }
  0xf9   : > { %13897 = vmatprep.subr.bf16.mxu0 %v15925_v48  ;;  %v3200_v35 = vrot.slane %v3198_v55, 5  ;;  %v3206_v21 = vrot.slane %v3204_v6, 5  ;;  %v3219_v5 = vshrl.u32 %v3065_v10, 16  ;;  %v3222_v59 = vshll.u32 %v3065_v10, 16  ;;  %v14553_v55 = vld [vmem:[#allocation2 + $0xa8] sm:$0xff]  }
  0xfa   : > { %13790 = vmatmul.mubr.bf16.gmra.mxu1 %v14548_v4  ;;  %v3210_v11 = vrot.slane %v3208_v29, 4  ;;  %v3228_v42 = vshll.u32 %v15957_v31, 16  ;;  %v20917_v4 = vcombine.low %v15688_v57, %v15694_v24  ;;  %v3216_v14 = vrot.slane %v3214_v56, 5 }
  0xfb   : > { %13738 = vmatmul.mubr.bf16.gmra.mxu0 %v20916_v22  ;;  %13793 = vmatprep.mubr.bf16.mxu1 %v14552_v45  ;;  %v3201_v13 = vor.u32 %v3200_v35, %v3197_v52  ;;  %v3232_v25 = vshrl.u32 %v15957_v31, 16  ;;  %v3238_v61 = vshll.u32 %v15959_v49, 16  ;;  %v3221_v20 = vrot.slane %v3219_v5, 4  ;;  %v3809_v45 = vld [vmem:[#allocation2 + $0x48] sm:$0xe] }
  0xfc   : > { %13741 = vmatprep.mubr.bf16.mxu0 %v20917_v4  ;;  %v3211_v46 = vor.u32 %v3210_v11, %v3206_v21  ;;  %v3224_v37 = vrot.slane %v3222_v59, 5  ;;  %v3230_v32 = vrot.slane %v3228_v42, 5  ;;  %v12491_v22 = vrot.slane %v3808_v40, 9  ;;  %v3068_v35 = vld [vmem:[#allocation2 + $0x54] sm:$0xf] }
  0xfd   : > { %v3202_v6 = vrot.slane %v3201_v13, 4  ;;  %v3234_v10 = vrot.slane %v3232_v25, 4  ;;  %v3240_v29 = vrot.slane %v3238_v61, 5  ;;  %v3898_v24 = vrot.slane %v15929_v23, 5  ;;  %v15990_v25 = vld [vmem:[#allocation2 + $0x58] sm:$0xf] }
  0xfe   : > { %v3212_v19 = vrot.slane %v3211_v46, 4  ;;  %v3225_v57 = vor.u32 %v3224_v37, %v3221_v20  ;;  %v3901_v52 = vrot.slane %v15948_v39, 5  ;;  %v12492_v5 = vrot.slane %v3809_v45, 9  ;;  %v3071_v46 = vld [vmem:[#allocation2 + $0x60] sm:$0xf] }
  0xff   : > { %v3207_v56 = vsel %vm15021_vm12, %v3202_v6, %v3206_v21  ;;  %v3235_v11 = vor.u32 %v3234_v10, %v3230_v32  ;;  %v3905_v59 = vrot.slane %v15957_v31, 5  ;;  %v12522_v42 = vcombine.low %v15954_v62, %v15969_v0  ;;  %v15998_v31 = vld [vmem:[#allocation2 + $0x5c] sm:$0x1]  ;;  %v16012_v6 = vld [vmem:[#allocation2 + $0x68] sm:$0x1] }
 0x100   : > { %v3217_v40 = vsel %vm15021_vm12, %v3212_v19, %v3216_v14  ;;  %v3226_v4 = vrot.slane %v3225_v57, 4  ;;  %v3900_v13 = vrot.slane %v3898_v24, 4  ;;  %v15996_v21 = vsel %vm15512_vm15, %v12491_v22, %v3898_v24 }
 0x101   : > { %v15992_v23 = vcombine.low %v3207_v56, %v3217_v40  ;;  %v3236_v39 = vrot.slane %v3235_v11, 4  ;;  %v3907_v61 = vrot.slane %v3905_v59, 4  ;;  %v20918_v20 = vcombine.low %v15698_v53, %v15711_v16 }
 0x102   : > { %13794 = vmatmul.mubr.bf16.gmra.mxu1 %v14553_v55  ;;  %v3231_v19 = vsel %vm15021_vm12, %v3226_v4, %v3230_v32  ;;  %v16007_v14 = vsel %vm15512_vm15, %v3900_v13, %v3901_v52  ;;  %v3908_v37 = vrot.slane %v15959_v49, 5  ;;  %v3243_v45 = vshrl.u32 %v3068_v35, 16  ;;  %v16010_v55 = vld [vmem:[#allocation2 + $0x64] sm:$0xf]  ;;  %v3811_v4 = vld [vmem:[#allocation2 + $0x60] sm:$0xe] }
 0x103   : > { %13742 = vmatmul.mubr.bf16.gmra.mxu0 %v20918_v20  ;;  %13797 = vmatprep.mubr.bf16.mxu1 %v14557_v30  ;;  %v20919_v10 = vcombine.low %v15705_v58, %v15721_v15  ;;  %v3241_v53 = vsel %vm15021_vm12, %v3236_v39, %v3240_v29  ;;  %v16021_v16 = vsel %vm15512_vm15, %v12492_v5, %v3905_v59  ;;  %v3246_v30 = vshll.u32 %v3068_v35, 16  ;;  %v3810_v58 = vld [vmem:[#allocation2 + $0x54] sm:$0xe]  ;;  %v14558_v15 = vld [vmem:[#allocation2 + $0xc0] sm:$0xff]  }
 0x104   : > { %v3252_v32 = vshll.u32 %v15990_v25, 16  ;;  %v16024_v49 = vcombine.low %v3231_v19, %v3241_v53  ;;  %v12523_v22 = vcombine.low %v15996_v21, %v16007_v14  ;;  %v3245_v57 = vrot.slane %v3243_v45, 4 }
 0x105   : > { %13745 = vmatprep.mubr.bf16.mxu0 %v20919_v10  ;;  %v3256_v24 = vshrl.u32 %v15990_v25, 16  ;;  %v16031_v29 = vsel %vm15512_vm15, %v3907_v61, %v3908_v37  ;;  %v3248_v52 = vrot.slane %v3246_v30, 5  ;;  %v3262_v35 = vshll.u32 %v15998_v31, 16 }
 0x106   : > { %v3254_v56 = vrot.slane %v3252_v32, 5  ;;  %v3267_v5 = vshrl.u32 %v3071_v46, 16  ;;  %v3270_v59 = vshll.u32 %v3071_v46, 16  ;;  %v3276_v40 = vshll.u32 %v16010_v55, 16 }
 0x107   : > { %v3258_v11 = vrot.slane %v3256_v24, 4  ;;  %v3249_v13 = vor.u32 %v3248_v52, %v3245_v57  ;;  %v3264_v39 = vrot.slane %v3262_v35, 5  ;;  %v3280_v20 = vshrl.u32 %v16010_v55, 16 }
 0x108   : > { %v3286_v19 = vshll.u32 %v16012_v6, 16  ;;  %v3269_v10 = vrot.slane %v3267_v5, 4  ;;  %v3272_v61 = vrot.slane %v3270_v59, 5  ;;  %v3278_v37 = vrot.slane %v3276_v40, 5  ;;  %v3074_v59 = vld [vmem:[#allocation2 + $0x6c] sm:$0xf] }
 0x109   : > { %v3259_v45 = vor.u32 %v3258_v11, %v3254_v56  ;;  %v3250_v53 = vrot.slane %v3249_v13, 4  ;;  %v3282_v30 = vrot.slane %v3280_v20, 4  ;;  %v12493_v24 = vrot.slane %v3810_v58, 9  ;;  %v16065_v13 = vld [vmem:[#allocation2 + $0x7c] sm:$0xf] }
 0x10a   : > { %13798 = vmatmul.mubr.bf16.gmra.mxu1 %v14558_v15  ;;  %v3288_v32 = vrot.slane %v3286_v19, 5  ;;  %v20920_v46 = vcombine.low %v15730_v51, %v15741_v43  ;;  %v3273_v52 = vor.u32 %v3272_v61, %v3269_v10  ;;  %v3912_v35 = vrot.slane %v15990_v25, 5  ;;  %v16074_v10 = vld [vmem:[#allocation2 + $0x80] sm:$0x1]  ;;  %v14567_v61 = vld [vmem:[%s20857_s1 + $0x1f0] sm:$0xff]  }
 0x10b   : > { %13865 = vmatprep.mubr.bf16.mxu1 %v12519_v54  ;;  %v3260_v57 = vrot.slane %v3259_v45, 4  ;;  %v3915_v11 = vrot.slane %v15998_v31, 5  ;;  %v20921_v15 = vcombine.low %v15734_v18, %v15753_v63  ;;  %v3255_v58 = vsel %vm15021_vm12, %v3250_v53, %v3254_v56  ;;  %v16055_v31 = vld [vmem:[#allocation2 + $0x70] sm:$0xf]  ;;  %v16057_v18 = vld [vmem:[#allocation2 + $0x74] sm:$0x1] }
 0x10c   : > { %13746 = vmatmul.mubr.bf16.gmra.mxu0 %v20920_v46  ;;  %v3283_v5 = vor.u32 %v3282_v30, %v3278_v37  ;;  %v12494_v51 = vrot.slane %v3811_v4, 9  ;;  %v3919_v43 = vrot.slane %v16010_v55, 5  ;;  %v12524_v26 = vcombine.low %v16021_v16, %v16031_v29  ;;  %v3077_v4 = vld [vmem:[#allocation2 + $0x78] sm:$0xf] }
 0x10d   : > { %13749 = vmatprep.mubr.bf16.mxu0 %v20921_v15  ;;  %v3265_v47 = vsel %vm15021_vm12, %v3260_v57, %v3264_v39  ;;  %v3274_v54 = vrot.slane %v3273_v52, 4  ;;  %v3914_v25 = vrot.slane %v3912_v35, 4  ;;  %v16063_v40 = vsel %vm15512_vm15, %v12493_v24, %v3912_v35 }
 0x10e   : > { %v16059_v63 = vcombine.low %v3255_v58, %v3265_v47  ;;  %v3284_v56 = vrot.slane %v3283_v5, 4  ;;  %v3921_v55 = vrot.slane %v3919_v43, 4  ;;  %v3922_v19 = vrot.slane %v16012_v6, 5 }
 0x10f   : > { %v3279_v39 = vsel %vm15021_vm12, %v3274_v54, %v3278_v37  ;;  %v16071_v20 = vsel %vm15512_vm15, %v3914_v25, %v3915_v11  ;;  %v3291_v45 = vshrl.u32 %v3074_v59, 16  ;;  %v16083_v30 = vsel %vm15512_vm15, %v12494_v51, %v3919_v43 }
 0x110   : > { %v3289_v53 = vsel %vm15021_vm12, %v3284_v56, %v3288_v32  ;;  %v3294_v37 = vshll.u32 %v3074_v59, 16  ;;  %v3300_v24 = vshll.u32 %v16055_v31, 16  ;;  %v12525_v6 = vcombine.low %v16063_v40, %v16071_v20  ;;  %v3813_v56 = vld [vmem:[#allocation2 + $0x78] sm:$0xe] }
 0x111   : > { %v16086_v46 = vcombine.low %v3279_v39, %v3289_v53  ;;  %v3293_v57 = vrot.slane %v3291_v45, 4  ;;  %v3304_v52 = vshrl.u32 %v16055_v31, 16  ;;  %v16096_v32 = vsel %vm15512_vm15, %v3921_v55, %v3922_v19  ;;  %v14569_v55 = vld [vmem:[%s20857_s1 + $0x1e8] sm:$0xff]   ;;  %v3080_v45 = vld [vmem:[#allocation2 + $0x84] sm:$0xf]  ;;  %v14562_v53 = vld [vmem:[%s20857_s1 + $0x1b0] sm:$0xff]  }
 0x112   : > { %13866 = vmatmul.mubr.bf16.vlgmr.msra.gmra.mxu1 %v12520_v1  ;;  %v3296_v35 = vrot.slane %v3294_v37, 5  ;;  %v3302_v11 = vrot.slane %v3300_v24, 5  ;;  %v3310_v15 = vshll.u32 %v16057_v18, 16  ;;  %v20922_v58 = vcombine.low %v15778_v12, %v15788_v2  ;;  %v3812_v1 = vld [vmem:[#allocation2 + $0x6c] sm:$0xe] }
 0x113   : > { %v20923_v5 = vcombine.low %v15939_v3, %v15945_v27  ;;  %v3306_v51 = vrot.slane %v3304_v52, 4  ;;  %v3315_v43 = vshrl.u32 %v3077_v4, 16  ;;  %v3318_v36 = vshll.u32 %v3077_v4, 16  ;;  %13946 = vmatpush3.bf16.msra.mxu1 %v15903_v44  ;;  %v16118_v52 = vld [vmem:[#allocation2 + $0x88] sm:$0xf] }
 0x114   : > { %13750 = vmatmul.mubr.bf16.gmra.mxu0 %v20922_v58  ;;  %v3324_v60 = vshll.u32 %v16065_v13, 16  ;;  %v3297_v59 = vor.u32 %v3296_v35, %v3293_v57  ;;  %v3312_v47 = vrot.slane %v3310_v15, 5  ;;  %v3328_v54 = vshrl.u32 %v16065_v13, 16  ;;  %13947 = vmatprep.subr.bf16.mxu1 %v14567_v61 }
 0x115   : > { %13869 = vmatprep.mubr.bf16.mxu1 %v20923_v5  ;;  %13817 = vmatprep.mubr.bf16.mxu0 %v15868_v9  ;;  %v3334_v25 = vshll.u32 %v16074_v10, 16  ;;  %v3307_v12 = vor.u32 %v3306_v51, %v3302_v11  ;;  %v3317_v2 = vrot.slane %v3315_v43, 4  ;;  %v3320_v3 = vrot.slane %v3318_v36, 5  ;;  %v14570_v51 = vld [vmem:[%s20857_s1 + $0x1e0] sm:$0xff]   ;;  %v16126_v43 = vpop.f32.mrf.mxu1 }
 0x116   : > { %v3326_v27 = vrot.slane %v3324_v60, 5  ;;  %v3298_v4 = vrot.slane %v3297_v59, 4  ;;  %v3330_v9 = vrot.slane %v3328_v54, 4  ;;  %v12495_v19 = vrot.slane %v3812_v1, 9  ;;  %v16145_v59 = vld [vmem:[%s20857_s1 + $0x1a8] sm:$0xff]   ;;  %v16159_v54 = vpop.f32.mrf.mxu0 }
 0x117   : > { %v3336_v39 = vrot.slane %v3334_v25, 5  ;;  %v3308_v44 = vrot.slane %v3307_v12, 4  ;;  %v3321_v37 = vor.u32 %v3320_v3, %v3317_v2  ;;  %v3926_v24 = vrot.slane %v16055_v31, 5  ;;  %13948 = vmatpush3.bf16.msra.mxu1 %v14567_v61  ;;  %v16170_v12 = vld [vmem:[#allocation2 + $0x94] sm:$0xf]  ;;  %v16172_v2 = vpop.f32.mrf.mxu1 }
 0x118   : > { %v3929_v57 = vrot.slane %v16057_v18, 5  ;;  %v3303_v35 = vsel %vm15021_vm12, %v3298_v4, %v3302_v11  ;;  %v3331_v15 = vor.u32 %v3330_v9, %v3326_v27  ;;  %v12496_v58 = vrot.slane %v3813_v56, 9  ;;  %13949 = vmatprep.subr.bf16.mxu1 %v14569_v55  ;;  %v16179_v56 = vld [vmem:[#allocation2 + $0x98] sm:$0x1]  ;;  %v16181_v4 = vld [vmem:[#allocation2 + $0x84] sm:$0xe] }
 0x119   : > { %v3933_v5 = vrot.slane %v16065_v13, 5  ;;  %v12526_v31 = vcombine.low %v16083_v30, %v16096_v32  ;;  %v3313_v18 = vsel %vm15021_vm12, %v3308_v44, %v3312_v47  ;;  %v3322_v36 = vrot.slane %v3321_v37, 4  ;;  %v16157_v47 = vld [vmem:[#allocation2 + $0x8c] sm:$0x1]  ;;  %v14572_v44 = vld [vmem:[%s20857_s1 + $0x1d8] sm:$0xff]  }
 0x11a   : > { %v3928_v60 = vrot.slane %v3926_v24, 4  ;;  %13870 = vmatmul.mubr.bf16.gmra.mxu1 %v12522_v42  ;;  %v16135_v13 = vcombine.low %v3303_v35, %v3313_v18  ;;  %v3332_v61 = vrot.slane %v3331_v15, 4  ;;  %v16139_v11 = vsel %vm15512_vm15, %v12495_v19, %v3926_v24  ;;  %v16192_v15 = vld [vmem:[#allocation2 + $0x90] sm:$0xe] }
 0x11b   : > { %v3935_v1 = vrot.slane %v3933_v5, 4  ;;  %13873 = vmatprep.mubr.bf16.mxu1 %v12523_v22  ;;  %v3327_v62 = vsel %vm15021_vm12, %v3322_v36, %v3326_v27  ;;  %v3936_v42 = vrot.slane %v16074_v10, 5  ;;  %v16167_v14 = vsel %vm15512_vm15, %v12496_v58, %v3933_v5  ;;  %v3083_v10 = vld [vmem:[#allocation2 + $0x90] sm:$0xf]  ;;  %13950 = vmatpush3.bf16.msra.mxu1 %v14569_v55  ;;  %v16194_v55 = vpop.f32.mrf.mxu0  ;;  %v14564_v58 = vld [vmem:[%s20857_s1 + $0x1a0] sm:$0xff]  }
 0x11c   : > { %13818 = vmatmul.mubr.bf16.vlgmr.msra.gmra.mxu0 %v15881_v17  ;;  %v16154_v0 = vsel %vm15512_vm15, %v3928_v60, %v3929_v57  ;;  %v3339_v17 = vshrl.u32 %v3080_v45, 16  ;;  %v3337_v21 = vsel %vm15021_vm12, %v3332_v61, %v3336_v39  ;;  %v3342_v22 = vshll.u32 %v3080_v45, 16  ;;  %13951 = vmatprep.subr.bf16.mxu1 %v14570_v51  ;;  %v16201_v61 = vpop.f32.mrf.mxu1 }
 0x11d   : > { %13898 = vmatpush3.bf16.msra.mxu0 %v15925_v48  ;;  %13821 = vmatprep.mubr.bf16.mxu0 %v15935_v50  ;;  %v3348_v25 = vshll.u32 %v16118_v52, 16  ;;  %v16174_v3 = vcombine.low %v3327_v62, %v3337_v21  ;;  %v12527_v48 = vcombine.low %v16139_v11, %v16154_v0  ;;  %v3352_v27 = vshrl.u32 %v16118_v52, 16  ;;  %v16217_v16 = vpop.f32.mrf.mxu0  ;;  %v14571_v0 = vld [vmem:[%s20857_s1 + $0x188] sm:$0xff]  }
 0x11e   : > { %13899 = vmatprep.subr.bf16.mxu0 %v14562_v53  ;;  %v3341_v50 = vrot.slane %v3339_v17, 4  ;;  %v16185_v9 = vsel %vm15512_vm15, %v3935_v1, %v3936_v42  ;;  %v3344_v39 = vrot.slane %v3342_v22, 5  ;;  %v3358_v45 = vshll.u32 %v16157_v47, 16 }
 0x11f   : > { %v3350_v19 = vrot.slane %v3348_v25, 5  ;;  %v3354_v37 = vrot.slane %v3352_v27, 4  ;;  %v3363_v24 = vshrl.u32 %v3083_v10, 16  ;;  %v3366_v57 = vshll.u32 %v3083_v10, 16  ;;  %13952 = vmatpush3.bf16.msra.mxu1 %v14570_v51 }
 0x120   : > { %v3372_v35 = vshll.u32 %v16170_v12, 16  ;;  %v3345_v5 = vor.u32 %v3344_v39, %v3341_v50  ;;  %v3360_v18 = vrot.slane %v3358_v45, 5  ;;  %v3376_v36 = vshrl.u32 %v16170_v12, 16  ;;  %13953 = vmatprep.subr.bf16.mxu1 %v14572_v44  ;;  %v16239_v45 = vld [vmem:[#allocation2 + $0xa0] sm:$0xf] }
 0x121   : > { %13900 = vmatpush3.bf16.msra.mxu0 %v14562_v53  ;;  %v3382_v60 = vshll.u32 %v16179_v56, 16  ;;  %v3355_v1 = vor.u32 %v3354_v37, %v3350_v19  ;;  %v3365_v62 = vrot.slane %v3363_v24, 4  ;;  %v3368_v42 = vrot.slane %v3366_v57, 5  ;;  %v14573_v53 = vld [vmem:[%s20857_s1 + $0x1d0] sm:$0xff]  }
 0x122   : > { %13901 = vmatprep.subr.bf16.mxu0 %v16145_v59  ;;  %v3374_v17 = vrot.slane %v3372_v35, 5  ;;  %13874 = vmatmul.mubr.bf16.gmra.mxu1 %v12524_v26  ;;  %v3346_v21 = vrot.slane %v3345_v5, 4  ;;  %v3378_v22 = vrot.slane %v3376_v36, 4  ;;  %v12497_v10 = vrot.slane %v16181_v4, 9  ;;  %v16249_v5 = vld [vmem:[#allocation2 + $0xac] sm:$0xf] }
 0x123   : > { %v3384_v25 = vrot.slane %v3382_v60, 5  ;;  %13877 = vmatprep.mubr.bf16.mxu1 %v12525_v6  ;;  %v3356_v51 = vrot.slane %v3355_v1, 4  ;;  %v3369_v50 = vor.u32 %v3368_v42, %v3365_v62  ;;  %v3940_v27 = vrot.slane %v16118_v52, 5  ;;  %v3086_v6 = vld [vmem:[#allocation2 + $0x9c] sm:$0xf]  ;;  %v16231_v52 = vld [vmem:[%s20857_s1 + $0x1c8] sm:$0xff]   ;;  %13954 = vmatpush3.bf16.msra.mxu1 %v14572_v44  ;;  %v16263_v42 = vpop.f32.mrf.mxu0 }
 0x124   : > { %13822 = vmatmul.mubr.bf16.gmra.mxu0 %v15962_v7  ;;  %v3943_v39 = vrot.slane %v16157_v47, 5  ;;  %v14565_v7 = vld [vmem:[%s20857_s1 + $0x198] sm:$0xff]   ;;  %v3351_v29 = vsel %vm15021_vm12, %v3346_v21, %v3350_v19  ;;  %v3379_v26 = vor.u32 %v3378_v22, %v3374_v17  ;;  %v12498_v40 = vrot.slane %v16192_v15, 9  ;;  %v3089_v15 = vld [vmem:[#allocation2 + $0xa8] sm:$0xf]  ;;  %13955 = vmatprep.subr.bf16.mxu1 %v14573_v53  ;;  %20925 = vst [vmem:[#allocation10_spill] sm:$0xff] %v16263_v42 }
 0x125   : > { %13825 = vmatprep.mubr.bf16.mxu0 %v15992_v23  ;;  %13902 = vmatpush3.bf16.msra.mxu0 %v16145_v59  ;;  %v3947_v20 = vrot.slane %v16170_v12, 5  ;;  %v16233_v23 = vpop.f32.mrf.mxu1  ;;  %v12528_v59 = vcombine.low %v16167_v14, %v16185_v9  ;;  %v3361_v47 = vsel %vm15021_vm12, %v3356_v51, %v3360_v18  ;;  %v3370_v4 = vrot.slane %v3369_v50, 4  ;;  %v16241_v12 = vld [vmem:[#allocation2 + $0xa4] sm:$0x1]  ;;  %v14568_v18 = vld [vmem:[%s20857_s1 + $0x190] sm:$0xff]  }
 0x126   : > { %20924 = vst [vmem:[#allocation9_spill] sm:$0xff] %v16233_v23  ;;  %13903 = vmatprep.subr.bf16.mxu0 %v14564_v58  ;;  %v3942_v19 = vrot.slane %v3940_v27, 4  ;;  %v16243_v37 = vcombine.low %v3351_v29, %v3361_v47  ;;  %v3380_v24 = vrot.slane %v3379_v26, 4  ;;  %v16247_v57 = vsel %vm15512_vm15, %v12497_v10, %v3940_v27  ;;  %v16261_v62 = vld [vmem:[#allocation2 + $0xb0] sm:$0x1] }
 0x127   : > { %v3949_v35 = vrot.slane %v3947_v20, 4  ;;  %v3375_v36 = vsel %vm15021_vm12, %v3370_v4, %v3374_v17  ;;  %v3950_v60 = vrot.slane %v16179_v56, 5  ;;  %v3387_v1 = vshrl.u32 %v3086_v6, 16  ;;  %v16272_v51 = vpop.f32.mrf.mxu1  ;;  %13956 = vmatpush3.bf16.msra.mxu1 %v14573_v53 }
 0x128   : > { %v16258_v44 = vsel %vm15512_vm15, %v3942_v19, %v3943_v39  ;;  %v3385_v21 = vsel %vm15021_vm12, %v3380_v24, %v3384_v25  ;;  %v16269_v22 = vsel %vm15512_vm15, %v12498_v40, %v3947_v20  ;;  %v3390_v17 = vshll.u32 %v3086_v6, 16  ;;  %13957 = vmatprep.subr.bf16.mxu1 %v16231_v52  ;;  %v14576_v40 = vld [vmem:[%s20857_s1 + $0x1c0] sm:$0xff]   ;;  %v3816_v20 = vld [vmem:[#allocation2 + $0x9c] sm:$0xe]  ;;  %v16296_v6 = vpop.f32.mrf.mxu0 }
 0x129   : > { %13904 = vmatpush3.bf16.msra.mxu0 %v14564_v58  ;;  %v3396_v10 = vshll.u32 %v16239_v45, 16  ;;  %v16274_v56 = vcombine.low %v3375_v36, %v3385_v21  ;;  %v12529_v50 = vcombine.low %v16247_v57, %v16258_v44  ;;  %v3389_v27 = vrot.slane %v3387_v1, 4  ;;  %v16301_v24 = vpop.f32.mrf.mxu1  ;;  %v3817_v36 = vld [vmem:[#allocation2 + $0xa8] sm:$0xe]  ;;  %v3092_v21 = vld [vmem:[#allocation2 + $0xb4] sm:$0xf] }
 0x12a   : > { %13905 = vmatprep.subr.bf16.mxu0 %v14565_v7  ;;  %v3400_v58 = vshrl.u32 %v16239_v45, 16  ;;  %13878 = vmatmul.mubr.bf16.gmra.mxu1 %v12526_v31  ;;  %v16284_v25 = vsel %vm15512_vm15, %v3949_v35, %v3950_v60  ;;  %v3392_v39 = vrot.slane %v3390_v17, 5  ;;  %v3406_v26 = vshll.u32 %v16241_v12, 16 }
 0x12b   : > { %v3398_v29 = vrot.slane %v3396_v10, 5  ;;  %13881 = vmatprep.mubr.bf16.mxu1 %v12527_v48  ;;  %v3411_v32 = vshrl.u32 %v3089_v15, 16  ;;  %v3414_v31 = vshll.u32 %v3089_v15, 16  ;;  %v3420_v53 = vshll.u32 %v16249_v5, 16  ;;  %13958 = vmatpush3.bf16.msra.mxu1 %v16231_v52 }
 0x12c   : > { %13826 = vmatmul.mubr.bf16.gmra.mxu0 %v16024_v49  ;;  %v3402_v30 = vrot.slane %v3400_v58, 4  ;;  %v3393_v47 = vor.u32 %v3392_v39, %v3389_v27  ;;  %v3408_v4 = vrot.slane %v3406_v26, 5  ;;  %v3424_v19 = vshrl.u32 %v16249_v5, 16  ;;  %13959 = vmatprep.subr.bf16.mxu1 %v14576_v40  ;;  %v16309_v39 = vld [vmem:[#allocation2 + $0xb8] sm:$0xf]  ;;  %v14574_v26 = vld [vmem:[%s20857_s1 + $0x180] sm:$0xff]  }
 0x12d   : > { %13829 = vmatprep.mubr.bf16.mxu0 %v16059_v63  ;;  %13906 = vmatpush3.bf16.msra.mxu0 %v14565_v7  ;;  %v3430_v49 = vshll.u32 %v16261_v62, 16  ;;  %v3413_v48 = vrot.slane %v3411_v32, 4  ;;  %v3416_v35 = vrot.slane %v3414_v31, 5  ;;  %v3422_v15 = vrot.slane %v3420_v53, 5 }
 0x12e   : > { %13907 = vmatprep.subr.bf16.mxu0 %v14568_v18  ;;  %v3403_v11 = vor.u32 %v3402_v30, %v3398_v29  ;;  %v3394_v63 = vrot.slane %v3393_v47, 4  ;;  %v3426_v7 = vrot.slane %v3424_v19, 4  ;;  %v12499_v1 = vrot.slane %v3816_v20, 9  ;;  %v16314_v30 = vpop.f32.mrf.mxu0  ;;  %v16319_v20 = vpop.f32.mrf.mxu1 }
 0x12f   : > { %v3432_v60 = vrot.slane %v3430_v49, 5  ;;  %v3417_v10 = vor.u32 %v3416_v35, %v3413_v48  ;;  %v3954_v27 = vrot.slane %v16239_v45, 5  ;;  %v3957_v58 = vrot.slane %v16241_v12, 5  ;;  %13960 = vmatpush3.bf16.msra.mxu1 %v14576_v40  ;;  %v1004_v40 = vld [vmem:[#allocation2 + $0xc4] sm:$0x8] }
 0x130   : > { %v3404_v17 = vrot.slane %v3403_v11, 4  ;;  %v3399_v52 = vsel %vm15021_vm12, %v3394_v63, %v3398_v29  ;;  %v3427_v32 = vor.u32 %v3426_v7, %v3422_v15  ;;  %v12500_v31 = vrot.slane %v3817_v36, 9  ;;  %v1127_v11 = vld [vmem:[#allocation2 + $0xc8] sm:$0x1]  ;;  %v3095_v48 = vld [vmem:[#allocation2 + $0xc0] sm:$0xf]  ;;  %v16358_v35 = vpop.f32.mrf.mxu1 }
 0x131   : > { %13908 = vmatpush3.bf16.msra.mxu0 %v14568_v18  ;;  %v3961_v53 = vrot.slane %v16249_v5, 5  ;;  %v12530_v45 = vcombine.low %v16269_v22, %v16284_v25  ;;  %v3418_v47 = vrot.slane %v3417_v10, 4  ;;  %v3956_v19 = vrot.slane %v3954_v27, 4  ;;  %20926 = vst [vmem:[#allocation11_spill] sm:$0xff] %v16358_v35  ;;  %v3096_v7 = vld [vmem:[#allocation2 + $0xc4] sm:$0xf] }
 0x132   : > { %v3409_v12 = vsel %vm15021_vm12, %v3404_v17, %v3408_v4  ;;  %13909 = vmatprep.subr.bf16.mxu0 %v14571_v0  ;;  %13882 = vmatmul.mubr.bf16.gmra.mxu1 %v12528_v59  ;;  %v3428_v29 = vrot.slane %v3427_v32, 4  ;;  %v3955_v5 = vsel %vm15512_vm15, %v12499_v1, %v3954_v27  ;;  %v3964_v9 = vrot.slane %v16261_v62, 5  ;;  %v16341_v59 = vld [vmem:[#allocation2 + $0xbc] sm:$0x1]  ;;  %v16348_v4 = vpop.f32.mrf.mxu0  ;;  %v3819_v32 = vld [vmem:[#allocation2 + $0xc0] sm:$0xe] }
 0x133   : > { %v16328_v18 = vcombine.low %v3399_v52, %v3409_v12  ;;  %v3963_v49 = vrot.slane %v3961_v53, 4  ;;  %13885 = vmatprep.mubr.bf16.mxu1 %v12529_v50  ;;  %v3423_v22 = vsel %vm15021_vm12, %v3418_v47, %v3422_v15  ;;  %v3958_v14 = vsel %vm15512_vm15, %v3956_v19, %v3957_v58 }
 0x134   : > { %13830 = vmatmul.mubr.bf16.gmra.mxu0 %v16086_v46  ;;  %v3435_v25 = vshrl.u32 %v3092_v21, 16  ;;  %v16346_v46 = vld [vmem:[%s20857_s1 + $0x238] sm:$0xff]   ;;  %v3433_v57 = vsel %vm15021_vm12, %v3428_v29, %v3432_v60  ;;  %v16355_v44 = vsel %vm15512_vm15, %v12500_v31, %v3961_v53  ;;  %v3438_v62 = vshll.u32 %v3092_v21, 16  ;;  %v16370_v31 = vpop.f32.mrf.mxu0  ;;  %v16374_v29 = vpop.f32.mrf.mxu1 }
 0x135   : > { %13833 = vmatprep.mubr.bf16.mxu0 %v16135_v13  ;;  %13910 = vmatpush3.bf16.msra.mxu0 %v14571_v0  ;;  %v3444_v50 = vshll.u32 %v16309_v39, 16  ;;  %v16360_v15 = vcombine.low %v3423_v22, %v3433_v57  ;;  %v12531_v36 = vcombine.low %v3955_v5, %v3958_v14  ;;  %v3448_v13 = vshrl.u32 %v16309_v39, 16  ;;  %v3818_v0 = vld [vmem:[#allocation2 + $0xb4] sm:$0xe]  ;;  %20927 = vst [vmem:[#allocation12_spill] sm:$0xff] %v16370_v31 }
 0x136   : > { %v3437_v63 = vrot.slane %v3435_v25, 4  ;;  %13911 = vmatprep.subr.bf16.mxu0 %v14574_v26  ;;  %v16365_v60 = vsel %vm15512_vm15, %v3963_v49, %v3964_v9  ;;  %v3440_v1 = vrot.slane %v3438_v62, 5  ;;  %v3454_v17 = vshll.u32 %v16341_v59, 16 }
 0x137   : > { %v16367_v21 = vrot.slane %v3444_v50, 5  ;;  %v3450_v10 = vrot.slane %v3448_v13, 4  ;;  %v12285_v27 = vrot.slane %v1004_v40, 11  ;;  %v3459_v58 = vshrl.u32 %v3095_v48, 16 }
 0x138   : > { %v3462_v52 = vshll.u32 %v3095_v48, 16  ;;  %v3441_v53 = vor.u32 %v3440_v1, %v3437_v63  ;;  %v16372_v12 = vrot.slane %v3454_v17, 5  ;;  %v3468_v47 = vshll.u32 %v3096_v7, 16  ;;  %v16389_v48 = vpop.f32.mrf.mxu0  ;;  %v4689_v17 = vld [vmem:[#allocation2 + $0x1c] sm:$0xf] }
 0x139   : > { %v3472_v19 = vshrl.u32 %v3096_v7, 16  ;;  %13912 = vmatpush3.bf16.msra.mxu0 %v14574_v26  ;;  %v3451_v5 = vor.u32 %v3450_v10, %v16367_v21  ;;  %v1128_v49 = vsel %vm14925_vm9, %v12285_v27, %v1127_v11  ;;  %v3461_v22 = vrot.slane %v3459_v58, 4 }
 0x13a   : > { %v3464_v14 = vrot.slane %v3462_v52, 5  ;;  %13993 = vmatprep.subr.bf16.mxu0 %v16346_v46  ;;  %13886 = vmatmul.mubr.bf16.gmra.mxu1 %v12530_v45  ;;  %v16380_v9 = vrot.slane %v3441_v53, 4  ;;  %1129 = vst [vmem:[#allocation2 + $0xc8] sm:$0x1] %v1128_v49  ;;  %v16382_v25 = vrot.slane %v3468_v47, 5  ;;  %v12501_v57 = vrot.slane %v3818_v0, 9  ;;  %v16423_v47 = vpop.f32.mrf.mxu0 }
 0x13b   : > { %v3474_v40 = vrot.slane %v3472_v19, 4  ;;  %13889 = vmatprep.mubr.bf16.mxu1 %v12531_v36  ;;  %v16385_v26 = vrot.slane %v3451_v5, 4  ;;  %v3968_v50 = vrot.slane %v16309_v39, 5  ;;  %v3971_v11 = vrot.slane %v16341_v59, 5  ;;  %v16395_v36 = vpop.f32.mrf.mxu1 }
 0x13c   : > { %13834 = vmatmul.mubr.bf16.gmra.mxu0 %v16174_v3  ;;  %v3465_v62 = vor.u32 %v3464_v14, %v3461_v22  ;;  %v12532_v45 = vcombine.low %v16355_v44, %v16365_v60  ;;  %v12502_v13 = vrot.slane %v3819_v32, 9  ;;  %v3975_v0 = vrot.slane %v3096_v7, 5  ;;  %v4688_v3 = vld [vmem:[#allocation2 + $0x18] sm:$0xf]  ;;  %v4690_v44 = vld [vmem:[#allocation2 + $0x20] sm:$0x1] }
 0x13d   : > { %13837 = vmatprep.mubr.bf16.mxu0 %v16243_v37  ;;  %v3475_v63 = vor.u32 %v3474_v40, %v16382_v25  ;;  %v3447_v39 = vsel %vm15021_vm12, %v16380_v9, %v16367_v21  ;;  %v3969_v37 = vsel %vm15512_vm15, %v12501_v57, %v3968_v50  ;;  %v3970_v1 = vrot.slane %v3968_v50, 4  ;;  %v4691_v21 = vld [vmem:[#allocation2 + $0x24] sm:$0xf]  ;;  %v16425_v14 = vpop.f32.mrf.mxu1 }
 0x13e   : > { %v16401_v59 = vrot.slane %v3465_v62, 4  ;;  %v3457_v7 = vsel %vm15021_vm12, %v16385_v26, %v16372_v12  ;;  %v16411_v10 = vsel %vm15512_vm15, %v12502_v13, %v3975_v0  ;;  %v3977_v27 = vrot.slane %v3975_v0, 4  ;;  %v4692_v12 = vld [vmem:[#allocation2 + $0x28] sm:$0xf]  ;;  %v4693_v0 = vld [vmem:[#allocation2 + $0x2c] sm:$0x1] }
 0x13f   : > { %v3476_v60 = vrot.slane %v3475_v63, 4  ;;  %v3972_v52 = vsel %vm15512_vm15, %v3970_v1, %v3971_v11  ;;  %v16421_v32 = vadd.f32 %v16126_v43, %v16159_v54  ;;  %v4737_v53 = vshrl.u32 %v4688_v3, 16  ;;  %v838_v11 = vld [vmem:[#allocation2 + $0xb8] sm:$0xf] }
 0x140   : > { %v3471_v58 = vsel %vm15021_vm12, %v16401_v59, %v16382_v25  ;;  %v12533_v19 = vcombine.low %v3969_v37, %v3972_v52  ;;  %v4740_v5 = vshll.u32 %v4688_v3, 16  ;;  %v4746_v49 = vshll.u32 %v4689_v17, 16  ;;  %v16432_v37 = vpop.f32.mrf.mxu0  ;;  %842 = vst [vmem:[#allocation2 + $0xd0] sm:$0xf] %v838_v11 }
 0x141   : > { %v4750_v22 = vshrl.u32 %v4689_v17, 16  ;;  %v3097_v9 = vld [vmem:[#allocation2 + $0xc8] sm:$0x1]  ;;  %v4739_v40 = vrot.slane %v4737_v53, 4  ;;  %v4756_v25 = vshll.u32 %v4690_v44, 16  ;;  %v16429_v57 = vadd.f32 %v16172_v2, %v16194_v55  ;;  %v16437_v17 = vpop.f32.mrf.mxu1 }
 0x142   : > { %v4761_v26 = vshrl.u32 %v4691_v21, 16  ;;  %13890 = vmatmul.mubr.bf16.gmra.mxu1 %v12532_v45  ;;  %v3478_v43 = vshll.u32 %v3097_v9, 16  ;;  %v3978_v54 = vrot.slane %v3097_v9, 5  ;;  %v4742_v62 = vrot.slane %v4740_v5, 5  ;;  %20928 = vst [vmem:[#allocation13_spill] sm:$0xff] %v16437_v17 }
 0x143   : > { %v4748_v50 = vrot.slane %v4746_v49, 5  ;;  %13893 = vmatprep.mubr.bf16.mxu1 %v12533_v19  ;;  %v4752_v63 = vrot.slane %v4750_v22, 4  ;;  %v4758_v13 = vrot.slane %v4756_v25, 5  ;;  %v4764_v59 = vshll.u32 %v4691_v21, 16 }
 0x144   : > { %13838 = vmatmul.mubr.bf16.gmra.mxu0 %v16274_v56  ;;  %v4763_v3 = vrot.slane %v4761_v26, 4  ;;  %v3480_v2 = vrot.slane %v3478_v43, 5  ;;  %v3979_v55 = vsel %vm15512_vm15, %v3977_v27, %v3978_v54  ;;  %v4743_v45 = vor.u32 %v4742_v62, %v4739_v40  ;;  %v4694_v27 = vld [vmem:[#allocation2 + $0x30] sm:$0xf]  ;;  %v4695_v40 = vld [vmem:[#allocation2 + $0x34] sm:$0xf]  ;;  %v16442_v26 = vpop.f32.mrf.mxu0  ;;  %v16450_v62 = vpop.f32.mrf.mxu1 }
 0x145   : > { %13841 = vmatprep.mubr.bf16.mxu0 %v16328_v18  ;;  %v4770_v1 = vshll.u32 %v4692_v12, 16  ;;  %v12534_v56 = vcombine.low %v16411_v10, %v3979_v55  ;;  %v4753_v44 = vor.u32 %v4752_v63, %v4748_v50  ;;  %v4766_v52 = vrot.slane %v4764_v59, 5  ;;  %20929 = vst [vmem:[#allocation14_spill] sm:$0xff] %v16442_v26  ;;  %v4698_v55 = vld [vmem:[#allocation2 + $0x40] sm:$0xf] }
 0x146   : > { %v4774_v53 = vshrl.u32 %v4692_v12, 16  ;;  %v3481_v21 = vsel %vm15021_vm12, %v3476_v60, %v3480_v2  ;;  %v4744_v19 = vrot.slane %v4743_v45, 4  ;;  %v4780_v49 = vshll.u32 %v4693_v0, 16  ;;  %v4696_v60 = vld [vmem:[#allocation2 + $0x38] sm:$0x1]  ;;  %v16461_v45 = vpop.f32.mrf.mxu0 }
 0x147   : > { %v4772_v5 = vrot.slane %v4770_v1, 5  ;;  %v12477_v18 = vcombine.low %v3447_v39, %v3457_v7  ;;  %v4754_v22 = vrot.slane %v4753_v44, 4  ;;  %v4767_v9 = vor.u32 %v4766_v52, %v4763_v3  ;;  %v4699_v44 = vld [vmem:[#allocation2 + $0x44] sm:$0x1] }
 0x148   : > { %v4776_v25 = vrot.slane %v4774_v53, 4  ;;  %v12478_v43 = vcombine.low %v3471_v58, %v3481_v21  ;;  %v4749_v10 = vsel %vm15021_vm12, %v4744_v19, %v4748_v50  ;;  %v4782_v54 = vrot.slane %v4780_v49, 5  ;;  %v4697_v58 = vld [vmem:[#allocation2 + $0x3c] sm:$0xf] }
 0x149   : > { %v16448_v12 = vadd.f32 %v16201_v61, %v16217_v16  ;;  %v4759_v39 = vsel %vm15021_vm12, %v4754_v22, %v4758_v13  ;;  %v4768_v7 = vrot.slane %v4767_v9, 4  ;;  %v16456_v63 = vadd.f32 %v16272_v51, %v16296_v6 }
 0x14a   : > { %v4777_v11 = vor.u32 %v4776_v25, %v4772_v5  ;;  %13894 = vmatmul.mubr.bf16.gmra.mxu1 %v12534_v56  ;;  %v12599_v50 = vcombine.low %v4749_v10, %v4759_v39  ;;  %v4785_v0 = vshrl.u32 %v4694_v27, 16  ;;  %v4788_v3 = vshll.u32 %v4694_v27, 16  ;;  %v4700_v10 = vld [vmem:[#allocation2 + $0x48] sm:$0xf] }
 0x14b   : > { %v4794_v59 = vshll.u32 %v4695_v40, 16  ;;  %v4773_v61 = vsel %vm15021_vm12, %v4768_v7, %v4772_v5  ;;  %v4798_v2 = vshrl.u32 %v4695_v40, 16  ;;  %v4804_v13 = vshll.u32 %v4696_v60, 16 }
 0x14c   : > { %13842 = vmatmul.mubr.bf16.gmra.mxu0 %v16360_v15  ;;  %v4778_v16 = vrot.slane %v4777_v11, 4  ;;  %13961 = vmatprep.mubr.bf16.mxu1 %v12599_v50  ;;  %v4787_v51 = vrot.slane %v4785_v0, 4  ;;  %v4790_v6 = vrot.slane %v4788_v3, 5  ;;  %v16465_v56 = vadd.f32 %v16301_v24, %v16314_v30  ;;  %v16467_v15 = vpop.f32.mrf.mxu1  ;;  %v16471_v24 = vpop.f32.mrf.mxu0  ;;  %v14577_v30 = vld [vmem:[#allocation2 + $0x18] sm:$0xff]   ;;  %v16477_v11 = vld [vmem:[#allocation2 + $0x4c] sm:$0xf] }
 0x14d   : > { %13845 = vmatprep.mubr.bf16.mxu0 %v12477_v18  ;;  %v4796_v1 = vrot.slane %v4794_v59, 5  ;;  %v4800_v53 = vrot.slane %v4798_v2, 4  ;;  %v4806_v21 = vrot.slane %v4804_v13, 5  ;;  %v4809_v19 = vshrl.u32 %v4697_v58, 16  ;;  %v4702_v2 = vld [vmem:[#allocation2 + $0x50] sm:$0x1] }
 0x14e   : > { %v4783_v52 = vsel %vm15021_vm12, %v4778_v16, %v4782_v54  ;;  %v4791_v49 = vor.u32 %v4790_v6, %v4787_v51  ;;  %v4812_v18 = vshll.u32 %v4697_v58, 16  ;;  %v4818_v22 = vshll.u32 %v4698_v55, 16  ;;  %v16479_v50 = vpop.f32.mrf.mxu1  ;;  %v4703_v6 = vld [vmem:[#allocation2 + $0x54] sm:$0xf] }
 0x14f   : > { %v12600_v5 = vcombine.low %v4773_v61, %v4783_v52  ;;  %v4801_v9 = vor.u32 %v4800_v53, %v4796_v1  ;;  %v4811_v25 = vrot.slane %v4809_v19, 4  ;;  %v4822_v27 = vshrl.u32 %v4698_v55, 16  ;;  %v16490_v52 = vpop.f32.mrf.mxu0 }
 0x150   : > { %v4828_v40 = vshll.u32 %v4699_v44, 16  ;;  %v4792_v60 = vrot.slane %v4791_v49, 4  ;;  %v4814_v39 = vrot.slane %v4812_v18, 5  ;;  %v4820_v7 = vrot.slane %v4818_v22, 5  ;;  %v4704_v44 = vld [vmem:[#allocation2 + $0x58] sm:$0xf] }
 0x151   : > { %v16475_v54 = vadd.f32 %v16319_v20, %v16348_v4  ;;  %v4802_v58 = vrot.slane %v4801_v9, 4  ;;  %v4824_v0 = vrot.slane %v4822_v27, 4  ;;  %v16485_v16 = vadd.f32 %v16374_v29, %v16389_v48  ;;  %v4705_v48 = vld [vmem:[#allocation2 + $0x5c] sm:$0x1]  ;;  %v14580_v9 = vld [vmem:[#allocation2 + $0x30] sm:$0xff]  }
 0x152   : > { %v4830_v3 = vrot.slane %v4828_v40, 5  ;;  %13962 = vmatmul.mubr.bf16.vlgmr.msra.gmra.mxu1 %v12600_v5  ;;  %v4797_v59 = vsel %vm15021_vm12, %v4792_v60, %v4796_v1  ;;  %v4815_v61 = vor.u32 %v4814_v39, %v4811_v25  ;;  %v4833_v13 = vshrl.u32 %v4700_v10, 16  ;;  %v16493_v5 = vpop.f32.mrf.mxu1 }
 0x153   : > { %v4807_v20 = vsel %vm15021_vm12, %v4802_v58, %v4806_v21  ;;  %v4825_v4 = vor.u32 %v4824_v0, %v4820_v7  ;;  %v4836_v55 = vshll.u32 %v4700_v10, 16  ;;  %v4842_v51 = vshll.u32 %v16477_v11, 16 }
 0x154   : > { %13846 = vmatmul.mubr.bf16.gmra.mxu0 %v12478_v43  ;;  %v12601_v1 = vcombine.low %v4797_v59, %v4807_v20  ;;  %v4816_v53 = vrot.slane %v4815_v61, 4  ;;  %v4835_v19 = vrot.slane %v4833_v13, 4  ;;  %v4846_v29 = vshrl.u32 %v16477_v11, 16  ;;  %v14579_v43 = vld [vmem:[#allocation2 + $0x24] sm:$0xff]   ;;  %v4706_v59 = vld [vmem:[#allocation2 + $0x60] sm:$0xf]  ;;  %v16506_v61 = vpop.f32.mrf.mxu0 }
 0x155   : > { %13913 = vmatprep.mubr.bf16.mxu0 %v14577_v30  ;;  %v4826_v49 = vrot.slane %v4825_v4, 4  ;;  %v4838_v21 = vrot.slane %v4836_v55, 5  ;;  %v4844_v18 = vrot.slane %v4842_v51, 5  ;;  %v4852_v22 = vshll.u32 %v4702_v2, 16  ;;  %v14581_v30 = vld [vmem:[%s20857_s1 + $0x230] sm:$0xff]  }
 0x156   : > { %13965 = vmatprep.mubr.bf16.mxu1 %v12601_v1  ;;  %v4821_v25 = vsel %vm15021_vm12, %v4816_v53, %v4820_v7  ;;  %v4848_v27 = vrot.slane %v4846_v29, 4  ;;  %v16499_v40 = vadd.f32 %v16395_v36, %v16423_v47  ;;  %v4857_v10 = vshrl.u32 %v4703_v6, 16  ;;  %v16508_v36 = vld [vmem:[#allocation2 + $0x64] sm:$0xf]  ;;  %v16510_v47 = vpop.f32.mrf.mxu1  ;;  %v16512_v53 = vld [vmem:[#allocation2 + $0x68] sm:$0x1] }
 0x157   : > { %v4831_v60 = vsel %vm15021_vm12, %v4826_v49, %v4830_v3  ;;  %v4839_v39 = vor.u32 %v4838_v21, %v4835_v19  ;;  %v4854_v58 = vrot.slane %v4852_v22, 5  ;;  %v4860_v0 = vshll.u32 %v4703_v6, 16  ;;  %v14584_v29 = vld [vmem:[%s20857_s1 + $0x228] sm:$0xff]  }
 0x158   : > { %v12602_v7 = vcombine.low %v4821_v25, %v4831_v60  ;;  %v4849_v2 = vor.u32 %v4848_v27, %v4844_v18  ;;  %v4859_v13 = vrot.slane %v4857_v10, 4  ;;  %v4866_v20 = vshll.u32 %v4704_v44, 16  ;;  %v4709_v22 = vld [vmem:[#allocation2 + $0x6c] sm:$0xf]  ;;  %v16523_v25 = vpop.f32.mrf.mxu0  ;;  %v16532_v10 = vld [vmem:[#allocation2 + $0x70] sm:$0xf] }
 0x159   : > { %v4840_v4 = vrot.slane %v4839_v39, 4  ;;  %v4862_v55 = vrot.slane %v4860_v0, 5  ;;  %v4870_v51 = vshrl.u32 %v4704_v44, 16  ;;  %v4876_v1 = vshll.u32 %v4705_v48, 16  ;;  %v14582_v60 = vld [vmem:[#allocation2 + $0x3c] sm:$0xff]  }
 0x15a   : > { %13966 = vmatmul.mubr.bf16.gmra.mxu1 %v12602_v7  ;;  %v4850_v3 = vrot.slane %v4849_v2, 4  ;;  %v4868_v6 = vrot.slane %v4866_v20, 5  ;;  %v16516_v19 = vadd.f32 %v16425_v14, %v16432_v37  ;;  %v16530_v37 = vadd.f32 %v16450_v62, %v16461_v45  ;;  %v16539_v45 = vld [vmem:[#allocation2 + $0x74] sm:$0x1] }
 0x15b   : > { %v4845_v49 = vsel %vm15021_vm12, %v4840_v4, %v4844_v18  ;;  %v4863_v21 = vor.u32 %v4862_v55, %v4859_v13  ;;  %v4872_v44 = vrot.slane %v4870_v51, 4  ;;  %v4878_v48 = vrot.slane %v4876_v1, 5  ;;  %v16534_v18 = vpop.f32.mrf.mxu1  ;;  %v16547_v55 = vpop.f32.mrf.mxu0  ;;  %v14583_v51 = vld [vmem:[#allocation2 + $0x48] sm:$0xff]  }
 0x15c   : > { %13914 = vmatmul.mubr.bf16.vlgmr.msra.gmra.mxu0 %v14579_v43  ;;  %v4855_v14 = vsel %vm15021_vm12, %v4850_v3, %v4854_v58  ;;  %v4881_v43 = vshrl.u32 %v4706_v59, 16  ;;  %v4884_v27 = vshll.u32 %v4706_v59, 16  ;;  %v4894_v58 = vshrl.u32 %v16508_v36, 16 }
 0x15d   : > { %13994 = vmatpush3.bf16.msra.mxu0 %v16346_v46  ;;  %13917 = vmatprep.mubr.bf16.mxu0 %v14580_v9  ;;  %v12603_v39 = vcombine.low %v4845_v49, %v4855_v14  ;;  %v4864_v0 = vrot.slane %v4863_v21, 4  ;;  %v4873_v7 = vor.u32 %v4872_v44, %v4868_v6  ;;  %v4890_v46 = vshll.u32 %v16508_v36, 16  ;;  %v16549_v44 = vpop.f32.mrf.mxu1  ;;  %v14587_v14 = vld [vmem:[%s20857_s1 + $0x220] sm:$0xff]  }
 0x15e   : > { %13995 = vmatprep.subr.bf16.mxu0 %v14581_v30  ;;  %v4883_v9 = vrot.slane %v4881_v43, 4  ;;  %v4886_v2 = vrot.slane %v4884_v27, 5  ;;  %v4900_v62 = vshll.u32 %v16512_v53, 16  ;;  %v16545_v4 = vadd.f32 %v16467_v15, %v16471_v24  ;;  %v4712_v43 = vld [vmem:[#allocation2 + $0x78] sm:$0xf] }
 0x15f   : > { %13969 = vmatprep.mubr.bf16.mxu1 %v12603_v39  ;;  %v4869_v59 = vsel %vm15021_vm12, %v4864_v0, %v4868_v6  ;;  %v4874_v13 = vrot.slane %v4873_v7, 4  ;;  %v4892_v20 = vrot.slane %v4890_v46, 5  ;;  %v4896_v3 = vrot.slane %v4894_v58, 4  ;;  %v16558_v27 = vld [vmem:[#allocation2 + $0x7c] sm:$0xf] }
 0x160   : > { %v4887_v1 = vor.u32 %v4886_v2, %v4883_v9  ;;  %v4902_v49 = vrot.slane %v4900_v62, 5  ;;  %v4905_v21 = vshrl.u32 %v4709_v22, 16  ;;  %v4908_v15 = vshll.u32 %v4709_v22, 16  ;;  %v16561_v62 = vld [vmem:[#allocation2 + $0x80] sm:$0x1]  ;;  %v13644_v22 = vpop.f32.mrf.mxu0 }
 0x161   : > { %13996 = vmatpush3.bf16.msra.mxu0 %v14581_v30  ;;  %v4879_v6 = vsel %vm15021_vm12, %v4874_v13, %v4878_v48  ;;  %v4914_v24 = vshll.u32 %v16532_v10, 16  ;;  %v4918_v30 = vshrl.u32 %v16532_v10, 16  ;;  %v4897_v7 = vor.u32 %v4896_v3, %v4892_v20 }
 0x162   : > { %13997 = vmatprep.subr.bf16.mxu0 %v14584_v29  ;;  %v12604_v39 = vcombine.low %v4869_v59, %v4879_v6  ;;  %v4888_v0 = vrot.slane %v4887_v1, 4  ;;  %v4907_v46 = vrot.slane %v4905_v21, 4  ;;  %v4910_v9 = vrot.slane %v4908_v15, 5  ;;  %v16569_v1 = vpop.f32.mrf.mxu1  ;;  %v14585_v6 = vld [vmem:[#allocation2 + $0x54] sm:$0xff]  }
 0x163   : > { %v4916_v2 = vrot.slane %v4914_v24, 5  ;;  %v4920_v48 = vrot.slane %v4918_v30, 4  ;;  %v4924_v58 = vshll.u32 %v16539_v45, 16  ;;  %v4898_v34 = vrot.slane %v4897_v7, 4  ;;  %20930 = vst [vmem:[#allocation15_spill] sm:$0xff] %v16569_v1 }
 0x164   : > { %13918 = vmatmul.mubr.bf16.gmra.mxu0 %v14582_v60  ;;  %v4893_v13 = vsel %vm15021_vm12, %v4888_v0, %v4892_v20  ;;  %v16567_v59 = vadd.f32 %v16479_v50, %v16490_v52  ;;  %13970 = vmatmul.mubr.bf16.gmra.mxu1 %v12604_v39  ;;  %v4911_v60 = vor.u32 %v4910_v9, %v4907_v46  ;;  %v4715_v20 = vld [vmem:[#allocation2 + $0x84] sm:$0xf]  ;;  %v4929_v52 = vshrl.u32 %v4712_v43, 16  ;;  %v16581_v30 = vld [vmem:[#allocation2 + $0x88] sm:$0xf] }
 0x165   : > { %13921 = vmatprep.mubr.bf16.mxu0 %v14583_v51  ;;  %13998 = vmatpush3.bf16.msra.mxu0 %v14584_v29  ;;  %v4921_v3 = vor.u32 %v4920_v48, %v4916_v2  ;;  %v4926_v21 = vrot.slane %v4924_v58, 5  ;;  %v14590_v51 = vld [vmem:[%s20857_s1 + $0x218] sm:$0xff]   ;;  %v16576_v29 = vadd.f32 %v16510_v47, %v16523_v25  ;;  %v4903_v50 = vsel %vm15021_vm12, %v4898_v34, %v4902_v49  ;;  %v14586_v39 = vld [vmem:[#allocation2 + $0x60] sm:$0xff]   ;;  %v16584_v48 = vld [vmem:[#allocation2 + $0x8c] sm:$0x1]  ;;  %v16586_v47 = vpop.f32.mrf.mxu0 }
 0x166   : > { %13999 = vmatprep.subr.bf16.mxu0 %v14587_v14  ;;  %v4932_v15 = vshll.u32 %v4712_v43, 16  ;;  %v4938_v24 = vshll.u32 %v16558_v27, 16  ;;  %v12605_v0 = vcombine.low %v4893_v13, %v4903_v50  ;;  %v4912_v7 = vrot.slane %v4911_v60, 4  ;;  %20932 = vst [vmem:[#allocation17_spill] sm:$0xff] %v16586_v47  ;;  %v13695_v43 = vpop.f32.mrf.mxu1  ;;  %v16602_v1 = vld [vmem:[#allocation2 + $0x94] sm:$0xf] }
 0x167   : > { %20931 = vst [vmem:[#allocation16_spill] sm:$0xff] %v16576_v29  ;;  %v4922_v46 = vrot.slane %v4921_v3, 4  ;;  %v4942_v9 = vshrl.u32 %v16558_v27, 16  ;;  %v4931_v25 = vrot.slane %v4929_v52, 4  ;;  %v4948_v49 = vshll.u32 %v16561_v62, 16  ;;  %v14589_v47 = vld [vmem:[#allocation2 + $0x78] sm:$0xff]  }
 0x168   : > { %v4934_v58 = vrot.slane %v4932_v15, 5  ;;  %v4940_v34 = vrot.slane %v4938_v24, 5  ;;  %13973 = vmatprep.mubr.bf16.mxu1 %v12605_v0  ;;  %v4917_v28 = vsel %vm15021_vm12, %v4912_v7, %v4916_v2  ;;  %v16595_v3 = vadd.f32 %v16534_v18, %v16547_v55  ;;  %v4718_v0 = vld [vmem:[#allocation2 + $0x90] sm:$0xf] }
 0x169   : > { %14000 = vmatpush3.bf16.msra.mxu0 %v14587_v14  ;;  %v4927_v13 = vsel %vm15021_vm12, %v4922_v46, %v4926_v21  ;;  %v4944_v60 = vrot.slane %v4942_v9, 4  ;;  %v14593_v14 = vld [vmem:[%s20857_s1 + $0x210] sm:$0xff]   ;;  %v4950_v15 = vrot.slane %v4948_v49, 5  ;;  %v4953_v24 = vshrl.u32 %v4715_v20, 16  ;;  %v13647_v9 = vpop.f32.mrf.mxu0 }
 0x16a   : > { %14001 = vmatprep.subr.bf16.mxu0 %v14590_v51  ;;  %20933 = vst [vmem:[#allocation18_spill] sm:$0xff] %v16595_v3  ;;  %v12606_v50 = vcombine.low %v4917_v28, %v4927_v13  ;;  %v4935_v52 = vor.u32 %v4934_v58, %v4931_v25  ;;  %v4956_v7 = vshll.u32 %v4715_v20, 16  ;;  %v4962_v21 = vshll.u32 %v16581_v30, 16  ;;  %v16608_v58 = vld [vmem:[#allocation2 + $0x98] sm:$0x1]  ;;  %v14596_v20 = vld [vmem:[%s20857_s1 + $0x208] sm:$0xff]  }
 0x16b   : > { %v4945_v2 = vor.u32 %v4944_v60, %v4940_v34  ;;  %v4966_v46 = vshrl.u32 %v16581_v30, 16  ;;  %v4955_v55 = vrot.slane %v4953_v24, 4  ;;  %v4972_v28 = vshll.u32 %v16584_v48, 16 }
 0x16c   : > { %13922 = vmatmul.mubr.bf16.gmra.mxu0 %v14585_v6  ;;  %v4936_v18 = vrot.slane %v4935_v52, 4  ;;  %v16606_v25 = vadd.f32 %v16549_v44, %v13644_v22  ;;  %v2132_v6 = vpop.f32.mrf.mxu1  ;;  %13974 = vmatmul.mubr.bf16.gmra.mxu1 %v12606_v50  ;;  %v4958_v13 = vrot.slane %v4956_v7, 5  ;;  %v4964_v60 = vrot.slane %v4962_v21, 5  ;;  %v4721_v22 = vld [vmem:[#allocation2 + $0x9c] sm:$0xf] }
 0x16d   : > { %13925 = vmatprep.mubr.bf16.mxu0 %v14586_v39  ;;  %14002 = vmatpush3.bf16.msra.mxu0 %v14590_v51  ;;  %v4946_v49 = vrot.slane %v4945_v2, 4  ;;  %v4968_v39 = vrot.slane %v4966_v46, 4  ;;  %v14588_v51 = vld [vmem:[#allocation2 + $0x6c] sm:$0xff]   ;;  %v4974_v24 = vrot.slane %v4972_v28, 5  ;;  %v16615_v44 = vadd.f32 %v13695_v43, %v13647_v9  ;;  %v1827_v2 = vpop.f32.mrf.mxu0  ;;  %v16623_v43 = vld [vmem:[#allocation2 + $0xa4] sm:$0x1] }
 0x16e   : > { %20934 = vst [vmem:[#allocation19_spill] sm:$0xff] %v16606_v25  ;;  %14003 = vmatprep.subr.bf16.mxu0 %v14593_v14  ;;  %v4941_v52 = vsel %vm15021_vm12, %v4936_v18, %v4940_v34  ;;  %v4959_v26 = vor.u32 %v4958_v13, %v4955_v55  ;;  %v4977_v50 = vshrl.u32 %v4718_v0, 16  ;;  %v4980_v21 = vshll.u32 %v4718_v0, 16  ;;  %v16621_v34 = vld [vmem:[#allocation2 + $0xa0] sm:$0xf]  ;;  %v13696_v9 = vpop.f32.mrf.mxu1 }
 0x16f   : > { %20935 = vst [vmem:[#allocation20_spill] sm:$0xff] %v16615_v44  ;;  %v4951_v17 = vsel %vm15021_vm12, %v4946_v49, %v4950_v15  ;;  %v4969_v35 = vor.u32 %v4968_v39, %v4964_v60  ;;  %v4986_v46 = vshll.u32 %v16602_v1, 16  ;;  %v4990_v31 = vshrl.u32 %v16602_v1, 16  ;;  %v14599_v15 = vld [vmem:[%s20857_s1 + $0x200] sm:$0xff]  }
 0x170   : > { %v12607_v7 = vcombine.low %v4941_v52, %v4951_v17  ;;  %v4960_v18 = vrot.slane %v4959_v26, 4  ;;  %v4979_v28 = vrot.slane %v4977_v50, 4  ;;  %v4996_v17 = vshll.u32 %v16608_v58, 16  ;;  %v4724_v50 = vld [vmem:[#allocation2 + $0xa8] sm:$0xf] }
 0x171   : > { %14004 = vmatpush3.bf16.msra.mxu0 %v14593_v14  ;;  %v4970_v55 = vrot.slane %v4969_v35, 4  ;;  %v4982_v14 = vrot.slane %v4980_v21, 5  ;;  %v4988_v0 = vrot.slane %v4986_v46, 5  ;;  %v4992_v49 = vrot.slane %v4990_v31, 4  ;;  %v13648_v35 = vpop.f32.mrf.mxu0  ;;  %v16635_v46 = vpop.f32.mrf.mxu1  ;;  %v16637_v31 = vld [vmem:[#allocation2 + $0xac] sm:$0xf] }
 0x172   : > { %14005 = vmatprep.subr.bf16.mxu0 %v14596_v20  ;;  %13977 = vmatprep.mubr.bf16.mxu1 %v12607_v7  ;;  %v16629_v13 = vadd.f32 %v2132_v6, %v1827_v2  ;;  %v4965_v39 = vsel %vm15021_vm12, %v4960_v18, %v4964_v60  ;;  %v4998_v23 = vrot.slane %v4996_v17, 5  ;;  %v5001_v26 = vshrl.u32 %v4721_v22, 16  ;;  %20937 = vst [vmem:[#allocation22_spill] sm:$0xff] %v16635_v46  ;;  %v16642_v2 = vld [vmem:[#allocation2 + $0xb0] sm:$0x1] }
 0x173   : > { %v4975_v52 = vsel %vm15021_vm12, %v4970_v55, %v4974_v24  ;;  %v4983_v44 = vor.u32 %v4982_v14, %v4979_v28  ;;  %v4993_v7 = vor.u32 %v4992_v49, %v4988_v0  ;;  %v5004_v21 = vshll.u32 %v4721_v22, 16  ;;  %20938 = vst [vmem:[#allocation23_spill] sm:$0xff] %v16642_v2  ;;  %v4727_v28 = vld [vmem:[#allocation2 + $0xb4] sm:$0xf] }
 0x174   : > { %20936 = vst [vmem:[#allocation21_spill] sm:$0xff] %v16629_v13  ;;  %13926 = vmatmul.mubr.bf16.gmra.mxu0 %v14588_v51  ;;  %v12608_v42 = vcombine.low %v4965_v39, %v4975_v52  ;;  %v5003_v6 = vrot.slane %v5001_v26, 4  ;;  %v5010_v60 = vshll.u32 %v16621_v34, 16  ;;  %v5014_v51 = vshrl.u32 %v16621_v34, 16  ;;  %v14592_v39 = vld [vmem:[#allocation2 + $0x90] sm:$0xff]   ;;  %v13699_v13 = vpop.f32.mrf.mxu1 }
 0x175   : > { %13929 = vmatprep.mubr.bf16.mxu0 %v14589_v47  ;;  %14006 = vmatpush3.bf16.msra.mxu0 %v14596_v20  ;;  %v5020_v24 = vshll.u32 %v16623_v43, 16  ;;  %v4984_v47 = vrot.slane %v4983_v44, 4  ;;  %v4994_v18 = vrot.slane %v4993_v7, 4  ;;  %v5006_v55 = vrot.slane %v5004_v21, 5  ;;  %v14591_v20 = vld [vmem:[#allocation2 + $0x84] sm:$0xff]  }
 0x176   : > { %14007 = vmatprep.subr.bf16.mxu0 %v14599_v15  ;;  %13978 = vmatmul.mubr.bf16.gmra.mxu1 %v12608_v42  ;;  %v16644_v22 = vadd.f32 %v13696_v9, %v13648_v35  ;;  %v5012_v17 = vrot.slane %v5010_v60, 5  ;;  %v5016_v14 = vrot.slane %v5014_v51, 4  ;;  %v5025_v42 = vshrl.u32 %v4724_v50, 16  ;;  %v16650_v44 = vld [vmem:[#allocation2 + $0xb8] sm:$0xf]  ;;  %v16653_v51 = vpop.f32.mrf.mxu0 }
 0x177   : > { %v5022_v49 = vrot.slane %v5020_v24, 5  ;;  %v4989_v52 = vsel %vm15021_vm12, %v4984_v47, %v4988_v0  ;;  %v4999_v26 = vsel %vm15021_vm12, %v4994_v18, %v4998_v23  ;;  %v5007_v46 = vor.u32 %v5006_v55, %v5003_v6  ;;  %20940 = vst [vmem:[#allocation25_spill] sm:$0xff] %v16650_v44  ;;  %20941 = vst [vmem:[#allocation26_spill] sm:$0xff] %v16653_v51  ;;  %v16657_v23 = vld [vmem:[#allocation2 + $0xbc] sm:$0x1] }
 0x178   : > { %20939 = vst [vmem:[#allocation24_spill] sm:$0xff] %v16644_v22  ;;  %v12609_v9 = vcombine.low %v4989_v52, %v4999_v26  ;;  %v5017_v35 = vor.u32 %v5016_v14, %v5012_v17  ;;  %v5028_v7 = vshll.u32 %v4724_v50, 16  ;;  %v5034_v21 = vshll.u32 %v16637_v31, 16  ;;  %20942 = vst [vmem:[#allocation27_spill] sm:$0xff] %v16657_v23  ;;  %v861_v14 = vld [vmem:[#allocation2 + $0xcc] sm:$0x2]  ;;  %v2148_v26 = vpop.f32.mrf.mxu1 }
 0x179   : > { %14008 = vmatpush3.bf16.msra.mxu0 %v14599_v15  ;;  %v5008_v60 = vrot.slane %v5007_v46, 4  ;;  %v5027_v24 = vrot.slane %v5025_v42, 4  ;;  %v5038_v0 = vshrl.u32 %v16637_v31, 16  ;;  %v5044_v47 = vshll.u32 %v16642_v2, 16  ;;  %v4730_v51 = vld [vmem:[#allocation2 + $0xc0] sm:$0xf] }
 0x17a   : > { %13981 = vmatprep.mubr.bf16.mxu1 %v12609_v9  ;;  %v5018_v6 = vrot.slane %v5017_v35, 4  ;;  %v5030_v18 = vrot.slane %v5028_v7, 5  ;;  %v5036_v15 = vrot.slane %v5034_v21, 5  ;;  %v5049_v55 = vshrl.u32 %v4727_v28, 16  ;;  %v985_v35 = vld [vmem:[#allocation2 + $0xcc] sm:$0x1] }
 0x17b   : > { %v5013_v50 = vsel %vm15021_vm12, %v5008_v60, %v5012_v17  ;;  %v5040_v46 = vrot.slane %v5038_v0, 4  ;;  %v5046_v52 = vrot.slane %v5044_v47, 5  ;;  %v5052_v42 = vshll.u32 %v4727_v28, 16  ;;  %v14594_v17 = vld [vmem:[#allocation2 + $0x9c] sm:$0xff]   ;;  %v16668_v2 = vld [vmem:[#allocation2 + $0xc4] sm:$0xf] }
 0x17c   : > { %13930 = vmatmul.mubr.bf16.gmra.mxu0 %v14591_v20  ;;  %v5023_v22 = vsel %vm15021_vm12, %v5018_v6, %v5022_v49  ;;  %v5031_v25 = vor.u32 %v5030_v18, %v5027_v24  ;;  %v5051_v20 = vrot.slane %v5049_v55, 4  ;;  %v5058_v9 = vshll.u32 %v16650_v44, 16  ;;  %v13651_v21 = vpop.f32.mrf.mxu0  ;;  %v14595_v49 = vld [vmem:[#allocation2 + $0xa8] sm:$0xff]   ;;  %v13700_v55 = vpop.f32.mrf.mxu1 }
 0x17d   : > { %13933 = vmatprep.mubr.bf16.mxu0 %v14592_v39  ;;  %v12610_v7 = vcombine.low %v5013_v50, %v5023_v22  ;;  %v5041_v3 = vor.u32 %v5040_v46, %v5036_v15  ;;  %v5054_v39 = vrot.slane %v5052_v42, 5  ;;  %v5062_v29 = vshrl.u32 %v16650_v44, 16  ;;  %v16670_v46 = vld [vmem:[#allocation2 + $0xc8] sm:$0x1]  ;;  %v1005_v42 = vld [vmem:[#allocation2 + $0xd0] sm:$0x8] }
 0x17e   : > { %v16665_v60 = vadd.f32 %v13699_v13, %v13651_v21  ;;  %v5032_v0 = vrot.slane %v5031_v25, 4  ;;  %v5060_v28 = vrot.slane %v5058_v9, 5  ;;  %v5068_v47 = vshll.u32 %v16657_v23, 16  ;;  %v1843_v6 = vpop.f32.mrf.mxu0 }
 0x17f   : > { %13982 = vmatmul.mubr.bf16.gmra.mxu1 %v12610_v7  ;;  %v5042_v24 = vrot.slane %v5041_v3, 4  ;;  %v5055_v18 = vor.u32 %v5054_v39, %v5051_v20  ;;  %v5064_v22 = vrot.slane %v5062_v29, 4  ;;  %v12268_v50 = vrot.slane %v861_v14, 9  ;;  %v1130_v39 = vld [vmem:[#allocation2 + $0xd4] sm:$0x1] }
 0x180   : > { %20943 = vst [vmem:[#allocation28_spill] sm:$0xff] %v16665_v60  ;;  %v5037_v13 = vsel %vm15021_vm12, %v5032_v0, %v5036_v15  ;;  %v16674_v25 = vadd.f32 %v2148_v26, %v1843_v6  ;;  %v5070_v9 = vrot.slane %v5068_v47, 5  ;;  %v5073_v21 = vshrl.u32 %v4730_v51, 16  ;;  %v16676_v60 = vld [vmem:[#allocation2 + $0xd0] sm:$0xf]  ;;  %v13652_v29 = vpop.f32.mrf.mxu0 }
 0x181   : > { %20945 = vst [vmem:[#allocation30_spill] sm:$0xff] %v16676_v60  ;;  %v5047_v3 = vsel %vm15021_vm12, %v5042_v24, %v5046_v52  ;;  %v5056_v7 = vrot.slane %v5055_v18, 4  ;;  %v5065_v20 = vor.u32 %v5064_v22, %v5060_v28  ;;  %v986_v14 = vsel %vm14891_vm8, %v12268_v50, %v985_v35  ;;  %v5442_v0 = vld [vmem:[#allocation2 + $0x18] sm:$0xe] }
 0x182   : > { %20944 = vst [vmem:[#allocation29_spill] sm:$0xff] %v16674_v25  ;;  %v12611_v23 = vcombine.low %v5037_v13, %v5047_v3  ;;  %v16682_v44 = vadd.f32 %v13700_v55, %v13652_v29  ;;  %987 = vst [vmem:[#allocation2 + $0xcc] sm:$0x1] %v986_v14  ;;  %v5075_v15 = vrot.slane %v5073_v21, 4  ;;  %v5076_v26 = vshll.u32 %v4730_v51, 16  ;;  %v16691_v55 = vpop.f32.mrf.mxu1 }
 0x183   : > { %v5061_v47 = vsel %vm15021_vm12, %v5056_v7, %v5060_v28  ;;  %v5066_v52 = vrot.slane %v5065_v20, 4  ;;  %v5082_v24 = vshll.u32 %v16668_v2, 16  ;;  %v5086_v6 = vshrl.u32 %v16668_v2, 16  ;;  %20947 = vst [vmem:[#allocation32_spill] sm:$0xff] %v16691_v55  ;;  %v14597_v28 = vld [vmem:[#allocation2 + $0xb4] sm:$0xff]  }
 0x184   : > { %13934 = vmatmul.mubr.bf16.gmra.mxu0 %v14594_v17  ;;  %20946 = vst [vmem:[#allocation31_spill] sm:$0xff] %v16682_v44  ;;  %13985 = vmatprep.mubr.bf16.mxu1 %v12611_v23  ;;  %v5078_v35 = vrot.slane %v5076_v26, 5  ;;  %v5092_v17 = vshll.u32 %v16670_v46, 16  ;;  %v12286_v18 = vrot.slane %v1005_v42, 11  ;;  %v5106_v50 = vshll.u32 %v16676_v60, 16  ;;  %v14598_v23 = vld [vmem:[#allocation2 + $0xc0] sm:$0xff]  }
 0x185   : > { %13937 = vmatprep.mubr.bf16.mxu0 %v14595_v49  ;;  %v5071_v22 = vsel %vm15021_vm12, %v5066_v52, %v5070_v9  ;;  %v5084_v51 = vrot.slane %v5082_v24, 5  ;;  %v5088_v49 = vrot.slane %v5086_v6, 4  ;;  %v5110_v42 = vshrl.u32 %v16676_v60, 16  ;;  %v14743_v26 = vld [vmem:[#allocation2 + $0x1c] sm:$0xf] }
 0x186   : > { %v12612_v13 = vcombine.low %v5061_v47, %v5071_v22  ;;  %v5079_v21 = vor.u32 %v5078_v35, %v5075_v15  ;;  %v1131_v3 = vsel %vm14925_vm9, %v12286_v18, %v1130_v39  ;;  %v5094_v20 = vrot.slane %v5092_v17, 5  ;;  %v5443_v24 = vld [vmem:[#allocation2 + $0x24] sm:$0xe]  ;;  %v14744_v35 = vld [vmem:[#allocation2 + $0x20] sm:$0x1] }
 0x187   : > { %v5089_v7 = vor.u32 %v5088_v49, %v5084_v51  ;;  %1132 = vst [vmem:[#allocation2 + $0xd4] sm:$0x1] %v1131_v3  ;;  %v12623_v29 = vrot.slane %v5442_v0, 9  ;;  %v16697_v14 = vrot.slane %v5106_v50, 5  ;;  %v5508_v52 = vrot.slane %v14743_v26, 5 }
 0x188   : > { %13986 = vmatmul.mubr.bf16.gmra.mxu1 %v12612_v13  ;;  %v5080_v9 = vrot.slane %v5079_v21, 4  ;;  %v5511_v22 = vrot.slane %v14744_v35, 5  ;;  %v5112_v49 = vrot.slane %v5110_v42, 4  ;;  %v14745_v3 = vld [vmem:[#allocation2 + $0x28] sm:$0xf]  ;;  %v12624_v42 = vrot.slane %v5443_v24, 9 }
 0x189   : > { %v5090_v47 = vrot.slane %v5089_v7, 4  ;;  %v4733_v15 = vld [vmem:[#allocation2 + $0xcc] sm:$0xf]  ;;  %v5509_v13 = vsel %vm15512_vm15, %v12623_v29, %v5508_v52  ;;  %v5510_v21 = vrot.slane %v5508_v52, 4  ;;  %v5515_v7 = vrot.slane %v14745_v3, 5 }
 0x18a   : > { %v13703_v6 = vpop.f32.mrf.mxu1  ;;  %v5085_v39 = vsel %vm15021_vm12, %v5080_v9, %v5084_v51  ;;  %v5097_v17 = vshrl.u32 %v4733_v15, 16  ;;  %v5100_v18 = vshll.u32 %v4733_v15, 16  ;;  %v5444_v26 = vld [vmem:[#allocation2 + $0x30] sm:$0xe]  ;;  %v5113_v51 = vor.u32 %v5112_v49, %v16697_v14  ;;  %v14746_v3 = vld [vmem:[#allocation2 + $0x2c] sm:$0x1] }
 0x18b   : > { %v5095_v0 = vsel %vm15021_vm12, %v5090_v47, %v5094_v20  ;;  %v14600_v9 = vld [vmem:[#allocation2 + $0xcc] sm:$0xff]   ;;  %v16708_v20 = vpop.f32.mrf.mxu0  ;;  %v5517_v52 = vrot.slane %v5515_v7, 4  ;;  %v5518_v38 = vrot.slane %v14746_v3, 5  ;;  %v14748_v24 = vld [vmem:[#allocation2 + $0x38] sm:$0x1] }
 0x18c   : > { %13938 = vmatmul.mubr.bf16.gmra.mxu0 %v14597_v28  ;;  %v2164_v50 = vpop.f32.mrf.mxu1  ;;  %v12613_v35 = vcombine.low %v5085_v39, %v5095_v0  ;;  %v5099_v28 = vrot.slane %v5097_v17, 4  ;;  %v5102_v33 = vrot.slane %v5100_v18, 5  ;;  %20948 = vst [vmem:[#allocation33_spill] sm:$0xff] %v16708_v20  ;;  %v5114_v39 = vrot.slane %v5113_v51, 4  ;;  %v14747_v0 = vld [vmem:[#allocation2 + $0x34] sm:$0xf] }
 0x18d   : > { %13941 = vmatprep.mubr.bf16.mxu0 %v14598_v23  ;;  %v5512_v23 = vsel %vm15512_vm15, %v5510_v21, %v5511_v22  ;;  %v5522_v55 = vrot.slane %v14747_v0, 5  ;;  %v12625_v22 = vrot.slane %v5444_v26, 9  ;;  %v5525_v21 = vrot.slane %v14748_v24, 5  ;;  %v5445_v60 = vld [vmem:[#allocation2 + $0x3c] sm:$0xe] }
 0x18e   : > { %v13704_v15 = vpop.f32.mrf.mxu1  ;;  %13989 = vmatprep.mubr.bf16.mxu1 %v12613_v35  ;;  %v16710_v47 = vld [vmem:[#allocation2 + $0xd4] sm:$0x1]  ;;  %v5103_v29 = vor.u32 %v5102_v33, %v5099_v28  ;;  %v12655_v49 = vcombine.low %v5509_v13, %v5512_v23  ;;  %v14749_v51 = vld [vmem:[#allocation2 + $0x40] sm:$0xf]  ;;  %v5516_v26 = vsel %vm15512_vm15, %v12624_v42, %v5515_v7  ;;  %v5519_v23 = vsel %vm15512_vm15, %v5517_v52, %v5518_v38  ;;  %v14750_v52 = vld [vmem:[#allocation2 + $0x44] sm:$0x1] }
 0x18f   : > { %v5116_v17 = vshll.u32 %v16710_v47, 16  ;;  %v5524_v25 = vrot.slane %v5522_v55, 4  ;;  %v5529_v3 = vrot.slane %v14749_v51, 5  ;;  %v12656_v42 = vcombine.low %v5516_v26, %v5519_v23  ;;  %v14752_v26 = vld [vmem:[#allocation2 + $0x58] sm:$0xf] }
 0x190   : > { %v16713_v18 = vpop.f32.mrf.mxu1  ;;  %v5104_v44 = vrot.slane %v5103_v29, 4  ;;  %v5532_v24 = vrot.slane %v14750_v52, 5  ;;  %v5543_v23 = vrot.slane %v14752_v26, 5  ;;  %v5550_v52 = vrot.slane %v16508_v36, 5 }
 0x191   : > { %20949 = vst [vmem:[#allocation34_spill] sm:$0xff] %v16713_v18  ;;  %v5118_v20 = vrot.slane %v5116_v17, 5  ;;  %v5531_v38 = vrot.slane %v5529_v3, 4 }
 0x192   : > { %v13771_v35 = vpop.f32.mrf.mxu1  ;;  %v5109_v28 = vsel %vm15021_vm12, %v5104_v44, %v16697_v14  ;;  %v5523_v44 = vsel %vm15512_vm15, %v12625_v22, %v5522_v55  ;;  %v5526_v14 = vsel %vm15512_vm15, %v5524_v25, %v5525_v21 }
 0x193   : > { %v13655_v33 = vpop.f32.mrf.mxu0  ;;  %v5119_v13 = vsel %vm15021_vm12, %v5114_v39, %v5118_v20 }
 0x194   : > { %13942 = vmatmul.mubr.bf16.gmra.mxu0 %v14600_v9  ;;  %v16718_v18 = vadd.f32 %v13703_v6, %v13655_v33  ;;  %v2891_v29 = vpop.f32.mrf.mxu1  ;;  %v5446_v9 = vld [vmem:[#allocation2 + $0x48] sm:$0xe]  ;;  %v12614_v0 = vcombine.low %v5109_v28, %v5119_v13  ;;  %v5536_v6 = vrot.slane %v16477_v11, 5  ;;  %v12657_v28 = vcombine.low %v5523_v44, %v5526_v14  ;;  %v14751_v11 = vld [vmem:[#allocation2 + $0x50] sm:$0x1] }
 0x195   : > { %14009 = vmatprep.mubr.bf16.mxu0 %v12655_v49  ;;  %v1859_v17 = vpop.f32.mrf.mxu0  ;;  %v12626_v49 = vrot.slane %v5445_v60, 9  ;;  %v12627_v55 = vrot.slane %v5446_v9, 9  ;;  %v5447_v13 = vld [vmem:[#allocation2 + $0x54] sm:$0xe] }
 0x196   : > { %v16731_v20 = vadd.f32 %v2164_v50, %v1859_v17  ;;  %v13772_v39 = vpop.f32.mrf.mxu1  ;;  %13990 = vmatmul.mubr.bf16.gmra.mxu1 %v12614_v0  ;;  %v5538_v25 = vrot.slane %v5536_v6, 4  ;;  %v5539_v50 = vrot.slane %v14751_v11, 5  ;;  %v5448_v0 = vld [vmem:[#allocation2 + $0x60] sm:$0xe]  ;;  %v12628_v26 = vrot.slane %v5447_v13, 9 }
 0x197   : > { %v13656_v7 = vpop.f32.mrf.mxu0  ;;  %v5530_v60 = vsel %vm15512_vm15, %v12626_v49, %v5529_v3  ;;  %v12629_v8 = vrot.slane %v5448_v0, 9 }
 0x198   : > { %v16733_v33 = vadd.f32 %v13704_v15, %v13656_v7  ;;  %v16735_v51 = vpop.f32.mrf.mxu1  ;;  %v5533_v15 = vsel %vm15512_vm15, %v5531_v38, %v5532_v24  ;;  %v5537_v7 = vsel %vm15512_vm15, %v12627_v55, %v5536_v6 }
 0x199   : > { %v16737_v22 = vpop.f32.mrf.mxu0  ;;  %v12658_v38 = vcombine.low %v5530_v60, %v5533_v15  ;;  %v5557_v15 = vrot.slane %v16532_v10, 5  ;;  %v5564_v10 = vrot.slane %v16558_v27, 5 }
 0x19a   : > { %20950 = vst [vmem:[#allocation35_spill] sm:$0xff] %v16737_v22  ;;  %v13775_v21 = vpop.f32.mrf.mxu1 }
 0x19b   : > { %v13723_v17 = vpop.f32.mrf.mxu0 }
 0x19c   : > { %14010 = vmatmul.mubr.bf16.vlgmr.msra.gmra.mxu0 %v12656_v42  ;;  %v2634_v9 = vadd.f32 %v13723_v17, %v16421_v32  ;;  %v2907_v44 = vpop.f32.mrf.mxu1  ;;  %v5540_v42 = vsel %vm15512_vm15, %v5538_v25, %v5539_v50  ;;  %v5545_v32 = vrot.slane %v5543_v23, 4 }
 0x19d   : > { %14013 = vmatprep.mubr.bf16.mxu0 %v12657_v28  ;;  %v2505_v14 = vpop.f32.mrf.mxu0  ;;  %v14753_v28 = vld [vmem:[#allocation2 + $0x5c] sm:$0x1]  ;;  %v12659_v55 = vcombine.low %v5537_v7, %v5540_v42 }
 0x19e   : > { %v2632_v3 = vadd.f32 %v2505_v14, %v16429_v57  ;;  %v16750_v49 = vadd.f32 %v13771_v35, %v2634_v9  ;;  %v13776_v24 = vpop.f32.mrf.mxu1  ;;  %v5546_v17 = vrot.slane %v14753_v28, 5  ;;  %v5552_v57 = vrot.slane %v5550_v52, 4  ;;  %v5449_v14 = vld [vmem:[#allocation2 + $0x6c] sm:$0xe] }
 0x19f   : > { %v13724_v11 = vpop.f32.mrf.mxu0  ;;  %v5553_v35 = vrot.slane %v16512_v53, 5  ;;  %v5551_v53 = vsel %vm15512_vm15, %v12629_v8, %v5550_v52 }
 0x1a0   : > { %v2635_v22 = vadd.f32 %v13724_v11, %v16448_v12  ;;  %v16753_v6 = vadd.f32 %v2891_v29, %v2632_v3  ;;  %v16755_v25 = vpop.f32.mrf.mxu1  ;;  %v5544_v12 = vsel %vm15512_vm15, %v12628_v26, %v5543_v23  ;;  %v5547_v29 = vsel %vm15512_vm15, %v5545_v32, %v5546_v17  ;;  %v5450_v23 = vld [vmem:[#allocation2 + $0x78] sm:$0xe] }
 0x1a1   : > { %v16757_v36 = vpop.f32.mrf.mxu0  ;;  %v12630_v11 = vrot.slane %v5449_v14, 9  ;;  %v5559_v26 = vrot.slane %v5557_v15, 4  ;;  %v5560_v32 = vrot.slane %v16539_v45, 5  ;;  %v5571_v45 = vrot.slane %v16581_v30, 5 }
 0x1a2   : > { %v16760_v50 = vadd.f32 %v13772_v39, %v2635_v22  ;;  %v13779_v60 = vpop.f32.mrf.mxu1  ;;  %v5554_v39 = vsel %vm15512_vm15, %v5552_v57, %v5553_v35 }
 0x1a3   : > { %v13727_v13 = vpop.f32.mrf.mxu0  ;;  %v12661_v52 = vcombine.low %v5551_v53, %v5554_v39  ;;  %v5452_v39 = vld [vmem:[#allocation2 + $0x90] sm:$0xe] }
 0x1a4   : > { %14014 = vmatmul.mubr.bf16.gmra.mxu0 %v12658_v38  ;;  %v2638_v0 = vadd.f32 %v13727_v13, %v16456_v63  ;;  %v2923_v9 = vpop.f32.mrf.mxu1  ;;  %v12660_v38 = vcombine.low %v5544_v12, %v5547_v29  ;;  %v5451_v13 = vld [vmem:[#allocation2 + $0x84] sm:$0xe]  ;;  %v5561_v12 = vsel %vm15512_vm15, %v5559_v26, %v5560_v32  ;;  %v5573_v32 = vrot.slane %v5571_v45, 4 }
 0x1a5   : > { %14017 = vmatprep.mubr.bf16.mxu0 %v12659_v55  ;;  %v2521_v7 = vpop.f32.mrf.mxu0  ;;  %v5567_v55 = vrot.slane %v16561_v62, 5 }
 0x1a6   : > { %v2636_v63 = vadd.f32 %v2521_v7, %v16465_v56  ;;  %v16774_v22 = vadd.f32 %v13775_v21, %v2638_v0  ;;  %v13780_v42 = vpop.f32.mrf.mxu1  ;;  %v12631_v56 = vrot.slane %v5450_v23, 9  ;;  %v5566_v21 = vrot.slane %v5564_v10, 4 }
 0x1a7   : > { %v13728_v3 = vpop.f32.mrf.mxu0  ;;  %v5578_v7 = vrot.slane %v16602_v1, 5  ;;  %v12632_v23 = vrot.slane %v5451_v13, 9  ;;  %v5453_v13 = vld [vmem:[#allocation2 + $0x9c] sm:$0xe] }
 0x1a8   : > { %v2639_v28 = vadd.f32 %v13728_v3, %v16475_v54  ;;  %v16778_v8 = vadd.f32 %v2907_v44, %v2636_v63  ;;  %v16780_v17 = vpop.f32.mrf.mxu1  ;;  %v5558_v44 = vsel %vm15512_vm15, %v12630_v11, %v5557_v15  ;;  %v5565_v62 = vsel %vm15512_vm15, %v12631_v56, %v5564_v10 }
 0x1a9   : > { %v16782_v27 = vpop.f32.mrf.mxu0  ;;  %v12662_v63 = vcombine.low %v5558_v44, %v5561_v12  ;;  %v5574_v3 = vrot.slane %v16584_v48, 5 }
 0x1aa   : > { %v16785_v57 = vadd.f32 %v13776_v24, %v2639_v28  ;;  %v13783_v35 = vpop.f32.mrf.mxu1  ;;  %v5568_v24 = vsel %vm15512_vm15, %v5566_v21, %v5567_v55  ;;  %v5581_v28 = vrot.slane %v16608_v58, 5 }
 0x1ab   : > { %v13731_v0 = vpop.f32.mrf.mxu0  ;;  %v12663_v10 = vcombine.low %v5565_v62, %v5568_v24  ;;  %v2104_v62 = vadd.f32 %v16493_v5, %v16506_v61 }
 0x1ac   : > { %14018 = vmatmul.mubr.bf16.gmra.mxu0 %v12660_v38  ;;  %v2642_v54 = vadd.f32 %v13731_v0, %v16485_v16  ;;  %v2939_v29 = vpop.f32.mrf.mxu1  ;;  %v5585_v0 = vrot.slane %v16621_v34, 5 }
 0x1ad   : > { %14021 = vmatprep.mubr.bf16.mxu0 %v12661_v52  ;;  %v2537_v14 = vpop.f32.mrf.mxu0 }
 0x1ae   : > { %v2640_v30 = vadd.f32 %v2537_v14, %v16499_v40  ;;  %v16799_v16 = vadd.f32 %v13779_v60, %v2642_v54  ;;  %v13784_v53 = vpop.f32.mrf.mxu1  ;;  %v12633_v40 = vrot.slane %v5452_v39, 9  ;;  %v5580_v60 = vrot.slane %v5578_v7, 4  ;;  %v5454_v14 = vld [vmem:[#allocation2 + $0xa8] sm:$0xe] }
 0x1af   : > { %v13732_v15 = vpop.f32.mrf.mxu0  ;;  %v5588_v39 = vrot.slane %v16623_v43, 5  ;;  %v20953_v43 = vld [vmem:[#allocation25_spill] sm:$0xff] }
 0x1b0   : > { %v2643_v38 = vadd.f32 %v13732_v15, %v16516_v19  ;;  %v16803_v11 = vadd.f32 %v2923_v9, %v2640_v30  ;;  %v16805_v26 = vpop.f32.mrf.mxu1  ;;  %v5572_v19 = vsel %vm15512_vm15, %v12632_v23, %v5571_v45  ;;  %v5575_v9 = vsel %vm15512_vm15, %v5573_v32, %v5574_v3 }
 0x1b1   : > { %v16807_v1 = vpop.f32.mrf.mxu0  ;;  %v5579_v58 = vsel %vm15512_vm15, %v12633_v40, %v5578_v7  ;;  %v12664_v34 = vcombine.low %v5572_v19, %v5575_v9  ;;  %v12634_v30 = vrot.slane %v5453_v13, 9  ;;  %v12635_v23 = vrot.slane %v5454_v14, 9  ;;  %v5455_v19 = vld [vmem:[#allocation2 + $0xb4] sm:$0xe] }
 0x1b2   : > { %v16810_v52 = vadd.f32 %v13780_v42, %v2643_v38  ;;  %v13787_v56 = vpop.f32.mrf.mxu1  ;;  %v5582_v42 = vsel %vm15512_vm15, %v5580_v60, %v5581_v28  ;;  %v20952_v38 = vld [vmem:[#allocation23_spill] sm:$0xff] }
 0x1b3   : > { %v13735_v21 = vpop.f32.mrf.mxu0  ;;  %v5586_v28 = vsel %vm15512_vm15, %v12634_v30, %v5585_v0 }
 0x1b4   : > { %14022 = vmatmul.mubr.bf16.gmra.mxu0 %v12662_v63  ;;  %v2646_v48 = vadd.f32 %v13735_v21, %v16530_v37  ;;  %v2955_v55 = vpop.f32.mrf.mxu1  ;;  %v5592_v37 = vrot.slane %v16637_v31, 5  ;;  %v12665_v63 = vcombine.low %v5579_v58, %v5582_v42  ;;  %v20955_v58 = vld [vmem:[#allocation18_spill] sm:$0xff] }
 0x1b5   : > { %14025 = vmatprep.mubr.bf16.mxu0 %v12663_v10  ;;  %v2553_v54 = vpop.f32.mrf.mxu0  ;;  %v5595_v10 = vrot.slane %v20952_v38, 5  ;;  %v5609_v38 = vrot.slane %v16670_v46, 5 }
 0x1b6   : > { %v2644_v44 = vadd.f32 %v2553_v54, %v16545_v4  ;;  %v16824_v12 = vadd.f32 %v13783_v35, %v2646_v48  ;;  %v13788_v45 = vpop.f32.mrf.mxu1  ;;  %v5587_v4 = vrot.slane %v5585_v0, 4  ;;  %v5594_v3 = vrot.slane %v5592_v37, 4  ;;  %v5456_v0 = vld [vmem:[#allocation2 + $0xc0] sm:$0xe] }
 0x1b7   : > { %v13736_v24 = vpop.f32.mrf.mxu0  ;;  %v5606_v54 = vrot.slane %v16668_v2, 5 }
 0x1b8   : > { %v2647_v7 = vadd.f32 %v13736_v24, %v16567_v59  ;;  %v16830_v15 = vadd.f32 %v2939_v29, %v2644_v44  ;;  %v16832_v31 = vpop.f32.mrf.mxu1  ;;  %v5599_v59 = vrot.slane %v20953_v43, 5  ;;  %v20954_v29 = vld [vmem:[#allocation16_spill] sm:$0xff]  ;;  %v5589_v21 = vsel %vm15512_vm15, %v5587_v4, %v5588_v39  ;;  %v20956_v39 = vld [vmem:[#allocation19_spill] sm:$0xff] }
 0x1b9   : > { %20951 = vst [vmem:[#allocation36_spill] sm:$0xff] %v16832_v31  ;;  %v2556_v35 = vpop.f32.mrf.mxu0  ;;  %v5596_v13 = vsel %vm15512_vm15, %v5594_v3, %v5595_v10  ;;  %v12666_v24 = vcombine.low %v5586_v28, %v5589_v21  ;;  %v12637_v3 = vrot.slane %v5456_v0, 9 }
 0x1ba   : > { %v16835_v32 = vadd.f32 %v2556_v35, %v2104_v62  ;;  %v16837_v5 = vadd.f32 %v13784_v53, %v2647_v7  ;;  %v13791_v61 = vpop.f32.mrf.mxu1  ;;  %v5593_v53 = vsel %vm15512_vm15, %v12635_v23, %v5592_v37  ;;  %v5601_v30 = vrot.slane %v5599_v59, 4  ;;  %v20958_v35 = vld [vmem:[#allocation27_spill] sm:$0xff] }
 0x1bb   : > { %v13739_v40 = vpop.f32.mrf.mxu0  ;;  %v12667_v37 = vcombine.low %v5593_v53, %v5596_v13  ;;  %v5602_v23 = vrot.slane %v20958_v35, 5  ;;  %v5607_v46 = vsel %vm15512_vm15, %v12637_v3, %v5606_v54 }
 0x1bc   : > { %14026 = vmatmul.mubr.bf16.gmra.mxu0 %v12664_v34  ;;  %v2650_v60 = vadd.f32 %v13739_v40, %v20954_v29  ;;  %v2971_v48 = vpop.f32.mrf.mxu1  ;;  %v12636_v34 = vrot.slane %v5455_v19, 9  ;;  %v20959_v29 = vld [vmem:[#allocation20_spill] sm:$0xff]  ;;  %v5457_v19 = vld [vmem:[#allocation2 + $0xcc] sm:$0xe] }
 0x1bd   : > { %14029 = vmatprep.mubr.bf16.mxu0 %v12665_v63  ;;  %v2569_v9 = vpop.f32.mrf.mxu0  ;;  %v5603_v28 = vsel %vm15512_vm15, %v5601_v30, %v5602_v23  ;;  %v5616_v30 = vrot.slane %v16710_v47, 5 }
 0x1be   : > { %v2648_v42 = vadd.f32 %v2569_v9, %v20955_v58  ;;  %v16851_v44 = vadd.f32 %v13787_v56, %v2650_v60  ;;  %v13792_v14 = vpop.f32.mrf.mxu1  ;;  %v5608_v56 = vrot.slane %v5606_v54, 4  ;;  %v20960_v9 = vld [vmem:[#allocation30_spill] sm:$0xff]  ;;  %v20961_v58 = vld [vmem:[#allocation21_spill] sm:$0xff] }
 0x1bf   : > { %v13740_v62 = vpop.f32.mrf.mxu0  ;;  %v5613_v53 = vrot.slane %v20960_v9, 5 }
 0x1c0   : > { %v2651_v7 = vadd.f32 %v13740_v62, %v20956_v39  ;;  %v16854_v63 = vadd.f32 %v2955_v55, %v2648_v42  ;;  %v16856_v4 = vpop.f32.mrf.mxu1  ;;  %v5600_v55 = vsel %vm15512_vm15, %v12636_v34, %v5599_v59  ;;  %v12638_v34 = vrot.slane %v5457_v19, 9  ;;  %v20962_v39 = vld [vmem:[#allocation24_spill] sm:$0xff] }
 0x1c1   : > { %20957 = vst [vmem:[#allocation23_spill] sm:$0xff] %v16856_v4  ;;  %v16859_v2 = vpop.f32.mrf.mxu0  ;;  %v5615_v54 = vrot.slane %v5613_v53, 4 }
 0x1c2   : > { %v16862_v10 = vadd.f32 %v13788_v45, %v2651_v7  ;;  %v13795_v40 = vpop.f32.mrf.mxu1  ;;  %v5610_v45 = vsel %vm15512_vm15, %v5608_v56, %v5609_v38  ;;  %v5614_v47 = vsel %vm15512_vm15, %v12638_v34, %v5613_v53 }
 0x1c3   : > { %v13743_v43 = vpop.f32.mrf.mxu0  ;;  %v12669_v35 = vcombine.low %v5607_v46, %v5610_v45  ;;  %v20967_v45 = vld [vmem:[#allocation31_spill] sm:$0xff] }
 0x1c4   : > { %14030 = vmatmul.mubr.bf16.gmra.mxu0 %v12666_v24  ;;  %v2654_v60 = vadd.f32 %v13743_v43, %v20959_v29  ;;  %v2987_v21 = vpop.f32.mrf.mxu1  ;;  %v12668_v24 = vcombine.low %v5600_v55, %v5603_v28  ;;  %v20965_v43 = vld [vmem:[#allocation28_spill] sm:$0xff]  ;;  %v20966_v28 = vld [vmem:[#allocation29_spill] sm:$0xff] }
 0x1c5   : > { %14033 = vmatprep.mubr.bf16.mxu0 %v12667_v37  ;;  %v2585_v13 = vpop.f32.mrf.mxu0 }
 0x1c6   : > { %v2652_v42 = vadd.f32 %v2585_v13, %v20961_v58  ;;  %v16875_v0 = vadd.f32 %v13791_v61, %v2654_v60  ;;  %v13796_v62 = vpop.f32.mrf.mxu1 }
 0x1c7   : > { %v13744_v59 = vpop.f32.mrf.mxu0 }
 0x1c8   : > { %v2655_v7 = vadd.f32 %v13744_v59, %v20962_v39  ;;  %v16879_v37 = vadd.f32 %v2971_v48, %v2652_v42  ;;  %v16881_v23 = vpop.f32.mrf.mxu1  ;;  %v5617_v48 = vsel %vm15512_vm15, %v5615_v54, %v5616_v30 }
 0x1c9   : > { %20963 = vst [vmem:[#allocation25_spill] sm:$0xff] %v16881_v23  ;;  %v16883_v3 = vpop.f32.mrf.mxu0  ;;  %v12670_v46 = vcombine.low %v5614_v47, %v5617_v48 }
 0x1ca   : > { %20964 = vst [vmem:[#allocation16_spill] sm:$0xff] %v16883_v3  ;;  %v16885_v56 = vadd.f32 %v13792_v14, %v2655_v7  ;;  %v13799_v61 = vpop.f32.mrf.mxu1 }
 0x1cc   : > { %v13747_v38 = vpop.f32.mrf.mxu0  ;;  %14034 = vmatmul.mubr.bf16.gmra.mxu0 %v12668_v24  ;;  %v3003_v60 = vpop.f32.mrf.mxu1 }
 0x1cd   : > { %v2658_v29 = vadd.f32 %v13747_v38, %v20965_v43  ;;  %14037 = vmatprep.mubr.bf16.mxu0 %v12669_v35 }
 0x1ce   : > { %v2601_v55 = vpop.f32.mrf.mxu0  ;;  %v13800_v14 = vpop.f32.mrf.mxu1 }
 0x1cf   : > { %v2656_v19 = vadd.f32 %v2601_v55, %v20966_v28  ;;  %v16893_v9 = vadd.f32 %v13795_v40, %v2658_v29 }
 0x1d0   : > { %v13748_v13 = vpop.f32.mrf.mxu0  ;;  %v16898_v59 = vpop.f32.mrf.mxu1 }
 0x1d1   : > { %v2659_v58 = vadd.f32 %v13748_v13, %v20967_v45  ;;  %v16896_v42 = vadd.f32 %v2987_v21, %v2656_v19  ;;  %20968 = vst [vmem:[#allocation18_spill] sm:$0xff] %v16898_v59 }
 0x1d2   : > { %v16900_v24 = vpop.f32.mrf.mxu0  ;;  %v13867_v34 = vpop.f32.mrf.mxu1 }
 0x1d3   : > { %20969 = vst [vmem:[#allocation19_spill] sm:$0xff] %v16900_v24  ;;  %v16902_v53 = vadd.f32 %v13796_v62, %v2659_v58 }
 0x1d4   : > { %v13751_v30 = vpop.f32.mrf.mxu0  ;;  %14038 = vmatmul.mubr.bf16.gmra.mxu0 %v12670_v46  ;;  %v4143_v40 = vpop.f32.mrf.mxu1 }
 0x1d5   : > { %v2662_v39 = vadd.f32 %v13751_v30, %v16718_v18 }
 0x1d6   : > { %v2617_v7 = vpop.f32.mrf.mxu0  ;;  %v13868_v38 = vpop.f32.mrf.mxu1 }
 0x1d7   : > { %v2660_v35 = vadd.f32 %v2617_v7, %v16731_v20  ;;  %v16906_v54 = vadd.f32 %v13799_v61, %v2662_v39 }
 0x1d8   : > { %v13752_v21 = vpop.f32.mrf.mxu0  ;;  %v16911_v47 = vpop.f32.mrf.mxu1 }
 0x1d9   : > { %v2663_v43 = vadd.f32 %v13752_v21, %v16733_v33  ;;  %v16909_v29 = vadd.f32 %v3003_v60, %v2660_v35 }
 0x1da   : > { %v16913_v62 = vpop.f32.mrf.mxu0  ;;  %v13871_v55 = vpop.f32.mrf.mxu1 }
 0x1db   : > { %20970 = vst [vmem:[#allocation27_spill] sm:$0xff] %v16913_v62  ;;  %v16915_v48 = vadd.f32 %v13800_v14, %v2663_v43 }
 0x1dc   : > { %v13819_v18 = vpop.f32.mrf.mxu0  ;;  %v16918_v19 = vpop.f32.mrf.mxu1 }
 0x1dd   : > { %v3774_v28 = vadd.f32 %v13819_v18, %v16750_v49 }
 0x1de   : > { %v3645_v20 = vpop.f32.mrf.mxu0  ;;  %v13872_v33 = vpop.f32.mrf.mxu1 }
 0x1df   : > { %v3772_v61 = vadd.f32 %v3645_v20, %v16753_v6  ;;  %v16921_v13 = vadd.f32 %v13867_v34, %v3774_v28 }
 0x1e0   : > { %v13820_v60 = vpop.f32.mrf.mxu0  ;;  %v16926_v58 = vpop.f32.mrf.mxu1 }
 0x1e1   : > { %v3775_v46 = vadd.f32 %v13820_v60, %v16760_v50  ;;  %v16924_v45 = vadd.f32 %v4143_v40, %v3772_v61 }
 0x1e2   : > { %v16928_v14 = vpop.f32.mrf.mxu0  ;;  %v13875_v49 = vpop.f32.mrf.mxu1 }
 0x1e3   : > { %v16930_v30 = vadd.f32 %v13868_v38, %v3775_v46 }
 0x1e4   : > { %v13823_v39 = vpop.f32.mrf.mxu0  ;;  %v16933_v35 = vpop.f32.mrf.mxu1 }
 0x1e5   : > { %v3778_v7 = vadd.f32 %v13823_v39, %v16774_v22 }
 0x1e6   : > { %v3661_v6 = vpop.f32.mrf.mxu0  ;;  %v13876_v50 = vpop.f32.mrf.mxu1 }
 0x1e7   : > { %v16936_v34 = vadd.f32 %v3661_v6, %v16778_v8  ;;  %v16938_v21 = vadd.f32 %v13871_v55, %v3778_v7 }
 0x1e8   : > { %v13824_v40 = vpop.f32.mrf.mxu0  ;;  %v16941_v18 = vpop.f32.mrf.mxu1 }
 0x1e9   : > { %v3779_v43 = vadd.f32 %v13824_v40, %v16785_v57 }
 0x1ea   : > { %v16943_v38 = vpop.f32.mrf.mxu0  ;;  %v13879_v20 = vpop.f32.mrf.mxu1 }
 0x1eb   : > { %v16945_v28 = vadd.f32 %v13872_v33, %v3779_v43 }
 0x1ec   : > { %v13827_v22 = vpop.f32.mrf.mxu0  ;;  %v16948_v60 = vpop.f32.mrf.mxu1 }
 0x1ed   : > { %v3782_v61 = vadd.f32 %v13827_v22, %v16799_v16 }
 0x1ee   : > { %v3677_v8 = vpop.f32.mrf.mxu0  ;;  %v13880_v39 = vpop.f32.mrf.mxu1 }
 0x1ef   : > { %v16951_v55 = vadd.f32 %v3677_v8, %v16803_v11  ;;  %v16953_v46 = vadd.f32 %v13875_v49, %v3782_v61 }
 0x1f0   : > { %v13828_v57 = vpop.f32.mrf.mxu0  ;;  %v16956_v6 = vpop.f32.mrf.mxu1 }
 0x1f1   : > { %v3783_v7 = vadd.f32 %v13828_v57, %v16810_v52 }
 0x1f2   : > { %v16958_v33 = vpop.f32.mrf.mxu0  ;;  %v13883_v43 = vpop.f32.mrf.mxu1 }
 0x1f3   : > { %v16960_v40 = vadd.f32 %v13876_v50, %v3783_v7 }
 0x1f4   : > { %v13831_v16 = vpop.f32.mrf.mxu0  ;;  %v16963_v41 = vpop.f32.mrf.mxu1 }
 0x1f5   : > { %v3786_v22 = vadd.f32 %v13831_v16, %v16824_v12  ;;  %20971 = vst [vmem:[#allocation20_spill] sm:$0xff] %v16963_v41 }
 0x1f6   : > { %v3693_v11 = vpop.f32.mrf.mxu0  ;;  %v13884_v8 = vpop.f32.mrf.mxu1 }
 0x1f7   : > { %v16966_v49 = vadd.f32 %v3693_v11, %v16830_v15  ;;  %v16968_v61 = vadd.f32 %v13879_v20, %v3786_v22 }
 0x1f8   : > { %v13832_v52 = vpop.f32.mrf.mxu0  ;;  %v16971_v59 = vpop.f32.mrf.mxu1 }
 0x1f9   : > { %v3787_v57 = vadd.f32 %v13832_v52, %v16837_v5  ;;  %20972 = vst [vmem:[#allocation30_spill] sm:$0xff] %v16971_v59 }
 0x1fa   : > { %v16973_v50 = vpop.f32.mrf.mxu0  ;;  %v13887_v62 = vpop.f32.mrf.mxu1 }
 0x1fb   : > { %v16975_v7 = vadd.f32 %v13880_v39, %v3787_v57 }
 0x1fc   : > { %v13835_v12 = vpop.f32.mrf.mxu0  ;;  %v16978_v23 = vpop.f32.mrf.mxu1 }
 0x1fd   : > { %v3790_v16 = vadd.f32 %v13835_v12, %v16851_v44  ;;  %20973 = vst [vmem:[#allocation21_spill] sm:$0xff] %v16978_v23 }
 0x1fe   : > { %v3709_v15 = vpop.f32.mrf.mxu0  ;;  %v13888_v11 = vpop.f32.mrf.mxu1 }
 0x1ff   : > { %v16981_v20 = vadd.f32 %v3709_v15, %v16854_v63  ;;  %v16983_v22 = vadd.f32 %v13883_v43, %v3790_v16 }
 0x200   : > { %v13836_v5 = vpop.f32.mrf.mxu0  ;;  %v16986_v24 = vpop.f32.mrf.mxu1 }
 0x201   : > { %20974 = vst [vmem:[#allocation24_spill] sm:$0xff] %v16981_v20  ;;  %v3791_v52 = vadd.f32 %v13836_v5, %v16862_v10  ;;  %20975 = vst [vmem:[#allocation28_spill] sm:$0xff] %v16986_v24 }
 0x202   : > { %v16988_v39 = vpop.f32.mrf.mxu0  ;;  %v13891_v4 = vpop.f32.mrf.mxu1 }
 0x203   : > { %20976 = vst [vmem:[#allocation29_spill] sm:$0xff] %v16988_v39  ;;  %v16990_v57 = vadd.f32 %v13884_v8, %v3791_v52 }
 0x204   : > { %v13839_v44 = vpop.f32.mrf.mxu0  ;;  %v16993_v23 = vpop.f32.mrf.mxu1 }
 0x205   : > { %v3794_v12 = vadd.f32 %v13839_v44, %v16875_v0  ;;  %20977 = vst [vmem:[#allocation31_spill] sm:$0xff] %v16993_v23 }
 0x206   : > { %v3725_v63 = vpop.f32.mrf.mxu0  ;;  %v13892_v15 = vpop.f32.mrf.mxu1 }
 0x207   : > { %v16996_v43 = vadd.f32 %v3725_v63, %v16879_v37  ;;  %v16998_v16 = vadd.f32 %v13887_v62, %v3794_v12 }
 0x208   : > { %v13840_v10 = vpop.f32.mrf.mxu0  ;;  %v17001_v24 = vpop.f32.mrf.mxu1 }
 0x209   : > { %20978 = vst [vmem:[#allocation37_spill] sm:$0xff] %v16996_v43  ;;  %v3795_v5 = vadd.f32 %v13840_v10, %v16885_v56  ;;  %20979 = vst [vmem:[#allocation38_spill] sm:$0xff] %v17001_v24 }
 0x20a   : > { %v17003_v8 = vpop.f32.mrf.mxu0  ;;  %v13895_v59 = vpop.f32.mrf.mxu1 }
 0x20b   : > { %20980 = vst [vmem:[#allocation39_spill] sm:$0xff] %v17003_v8  ;;  %v17005_v52 = vadd.f32 %v13888_v11, %v3795_v5 }
 0x20c   : > { %v13843_v0 = vpop.f32.mrf.mxu0  ;;  %v17008_v3 = vpop.f32.mrf.mxu1 }
 0x20d   : > { %v3798_v44 = vadd.f32 %v13843_v0, %v16893_v9  ;;  %20981 = vst [vmem:[#allocation40_spill] sm:$0xff] %v17008_v3 }
 0x20e   : > { %v3741_v23 = vpop.f32.mrf.mxu0  ;;  %v13896_v10 = vpop.f32.mrf.mxu1 }
 0x20f   : > { %v17011_v37 = vadd.f32 %v3741_v23, %v16896_v42  ;;  %v17013_v62 = vadd.f32 %v13891_v4, %v3798_v44 }
 0x210   : > { %v13844_v12 = vpop.f32.mrf.mxu0  ;;  %v17021_v0 = vpop.f32.mrf.mxu1 }
 0x211   : > { %20982 = vst [vmem:[#allocation41_spill] sm:$0xff] %v17011_v37  ;;  %v3799_v56 = vadd.f32 %v13844_v12, %v16902_v53  ;;  %20984 = vst [vmem:[#allocation43_spill] sm:$0xff] %v17021_v0 }
 0x212   : > { %v17016_v63 = vpop.f32.mrf.mxu0  ;;  %v17031_v44 = vpop.f32.mrf.mxu1 }
 0x213   : > { %20983 = vst [vmem:[#allocation42_spill] sm:$0xff] %v17016_v63  ;;  %v17018_v11 = vadd.f32 %v13892_v15, %v3799_v56 }
 0x214   : > { %v13847_v5 = vpop.f32.mrf.mxu0 }
 0x215   : > { %v3802_v24 = vadd.f32 %v13847_v5, %v16906_v54  ;;  %v17038_v5 = vpop.f32.mrf.mxu1 }
 0x216   : > { %v3757_v9 = vpop.f32.mrf.mxu0 }
 0x217   : > { %v17024_v3 = vadd.f32 %v3757_v9, %v16909_v29  ;;  %v17026_v23 = vadd.f32 %v13895_v59, %v3802_v24  ;;  %v17048_v9 = vpop.f32.mrf.mxu1 }
 0x218   : > { %v13848_v4 = vpop.f32.mrf.mxu0 }
 0x219   : > { %20985 = vst [vmem:[#allocation44_spill] sm:$0xff] %v17024_v3  ;;  %v3803_v42 = vadd.f32 %v13848_v4, %v16915_v48 }
 0x21a   : > { %v17029_v53 = vpop.f32.mrf.mxu0 }
 0x21b   : > { %20986 = vst [vmem:[#allocation45_spill] sm:$0xff] %v17029_v53  ;;  %v17033_v15 = vadd.f32 %v13896_v10, %v3803_v42 }
 0x21c   : > { %v13915_v12 = vpop.f32.mrf.mxu0 }
 0x21d   : > { %v17036_v54 = vadd.f32 %v13915_v12, %v16921_v13  ;;  %v17053_v13 = vpop.f32.mrf.mxu1 }
 0x21e   : > { %v4529_v56 = vpop.f32.mrf.mxu0 }
 0x21f   : > { %v17041_v29 = vadd.f32 %v4529_v56, %v16924_v45  ;;  %v17060_v56 = vpop.f32.mrf.mxu1 }
 0x220   : > { %v13916_v59 = vpop.f32.mrf.mxu0 }
 0x221   : > { %v17044_v24 = vadd.f32 %v13916_v59, %v16930_v30  ;;  %v17067_v53 = vpop.f32.mrf.mxu1 }
 0x222   : > { %v17046_v48 = vpop.f32.mrf.mxu0 }
 0x223   : > { %v17074_v63 = vpop.f32.mrf.mxu1 }
 0x224   : > { %v13919_v10 = vpop.f32.mrf.mxu0 }
 0x225   : > { %v17051_v4 = vadd.f32 %v13919_v10, %v16938_v21  ;;  %v17081_v8 = vpop.f32.mrf.mxu1 }
 0x226   : > { %v17055_v42 = vpop.f32.mrf.mxu0 }
 0x227   : > { %v17088_v39 = vpop.f32.mrf.mxu1 }
 0x228   : > { %v13920_v12 = vpop.f32.mrf.mxu0 }
 0x229   : > { %v17058_v45 = vadd.f32 %v13920_v12, %v16945_v28  ;;  %v17095_v20 = vpop.f32.mrf.mxu1 }
 0x22a   : > { %v17062_v30 = vpop.f32.mrf.mxu0 }
 0x22b   : > { %v17102_v31 = vpop.f32.mrf.mxu1 }
 0x22c   : > { %v13923_v59 = vpop.f32.mrf.mxu0  ;;  %20994 = vst [vmem:[#allocation53_spill] sm:$0xff] %v17102_v31 }
 0x22d   : > { %v17065_v0 = vadd.f32 %v13923_v59, %v16953_v46 }
 0x22e   : > { %v17069_v21 = vpop.f32.mrf.mxu0 }
 0x230   : > { %v13924_v10 = vpop.f32.mrf.mxu0 }
 0x231   : > { %v17072_v3 = vadd.f32 %v13924_v10, %v16960_v40 }
 0x232   : > { %v17076_v28 = vpop.f32.mrf.mxu0 }
 0x233   : > { %20987 = vst [vmem:[#allocation46_spill] sm:$0xff] %v17072_v3 }
 0x234   : > { %v13927_v12 = vpop.f32.mrf.mxu0 }
 0x235   : > { %v17079_v37 = vadd.f32 %v13927_v12, %v16968_v61 }
 0x236   : > { %v17083_v46 = vpop.f32.mrf.mxu0 }
 0x237   : > { %20988 = vst [vmem:[#allocation47_spill] sm:$0xff] %v17079_v37 }
 0x238   : > { %v13928_v59 = vpop.f32.mrf.mxu0 }
 0x239   : > { %v17086_v43 = vadd.f32 %v13928_v59, %v16975_v7 }
 0x23a   : > { %v17090_v40 = vpop.f32.mrf.mxu0 }
 0x23b   : > { %20989 = vst [vmem:[#allocation48_spill] sm:$0xff] %v17086_v43  ;;  %20990 = vst [vmem:[#allocation49_spill] sm:$0xff] %v17090_v40  ;;  %v17109_v40 = vpop.f32.mrf.mxu1 }
 0x23c   : > { %v13931_v10 = vpop.f32.mrf.mxu0 }
 0x23d   : > { %v17093_v41 = vadd.f32 %v13931_v10, %v16983_v22 }
 0x23e   : > { %v17097_v61 = vpop.f32.mrf.mxu0 }
 0x23f   : > { %20991 = vst [vmem:[#allocation50_spill] sm:$0xff] %v17093_v41  ;;  %20992 = vst [vmem:[#allocation51_spill] sm:$0xff] %v17097_v61  ;;  %v17116_v61 = vpop.f32.mrf.mxu1 }
 0x240   : > { %v13932_v12 = vpop.f32.mrf.mxu0 }
 0x241   : > { %v17100_v37 = vadd.f32 %v13932_v12, %v16990_v57 }
 0x242   : > { %v17104_v7 = vpop.f32.mrf.mxu0 }
 0x243   : > { %20993 = vst [vmem:[#allocation52_spill] sm:$0xff] %v17100_v37  ;;  %20995 = vst [vmem:[#allocation54_spill] sm:$0xff] %v17104_v7  ;;  %v17123_v7 = vpop.f32.mrf.mxu1 }
 0x244   : > { %v13935_v59 = vpop.f32.mrf.mxu0 }
 0x245   : > { %v17107_v43 = vadd.f32 %v13935_v59, %v16998_v16  ;;  %v21002_v59 = vld [vmem:[#allocation10_spill] sm:$0xff] }
 0x246   : > { %v17111_v22 = vpop.f32.mrf.mxu0 }
 0x247   : > { %20996 = vst [vmem:[#allocation55_spill] sm:$0xff] %v17107_v43  ;;  %20997 = vst [vmem:[#allocation56_spill] sm:$0xff] %v17111_v22  ;;  %v21003_v43 = vld [vmem:[#allocation9_spill] sm:$0xff] }
 0x248   : > { %v13936_v10 = vpop.f32.mrf.mxu0  ;;  %v2056_v31 = vadd.f32 %v21003_v43, %v21002_v59  ;;  %v21007_v43 = vld [vmem:[#allocation12_spill] sm:$0xff]  ;;  %v21008_v59 = vld [vmem:[#allocation11_spill] sm:$0xff] }
 0x249   : > { %v17114_v41 = vadd.f32 %v13936_v10, %v17005_v52  ;;  %v17133_v10 = vpop.f32.mrf.mxu1 }
 0x24a   : > { %v17118_v57 = vpop.f32.mrf.mxu0  ;;  %v2633_v3 = vadd.f32 %v16757_v36, %v2056_v31  ;;  %v2072_v36 = vadd.f32 %v21008_v59, %v21007_v43  ;;  %v21009_v43 = vld [vmem:[#allocation14_spill] sm:$0xff]  ;;  %v21010_v59 = vld [vmem:[#allocation13_spill] sm:$0xff] }
 0x24b   : > { %20998 = vst [vmem:[#allocation57_spill] sm:$0xff] %v17114_v41  ;;  %20999 = vst [vmem:[#allocation58_spill] sm:$0xff] %v17118_v57 }
 0x24c   : > { %v13939_v12 = vpop.f32.mrf.mxu0 }
 0x24d   : > { %v17121_v37 = vadd.f32 %v13939_v12, %v17013_v62  ;;  %v3019_v62 = vadd.f32 %v16735_v51, %v2633_v3 }
 0x24e   : > { %v17125_v16 = vpop.f32.mrf.mxu0 }
 0x24f   : > { %21000 = vst [vmem:[#allocation59_spill] sm:$0xff] %v17121_v37  ;;  %21001 = vst [vmem:[#allocation60_spill] sm:$0xff] %v17125_v16  ;;  %v17141_v37 = vpop.f32.mrf.mxu1  ;;  %v3773_v31 = vadd.f32 %v16928_v14, %v3019_v62  ;;  %v2088_v14 = vadd.f32 %v21010_v59, %v21009_v43 }
 0x250   : > { %v13940_v22 = vpop.f32.mrf.mxu0 }
 0x251   : > { %v17131_v52 = vadd.f32 %v13940_v22, %v17018_v11  ;;  %v2637_v22 = vadd.f32 %v16782_v27, %v2072_v36  ;;  %v4271_v3 = vadd.f32 %v16911_v47, %v3773_v31  ;;  %v4274_v27 = vadd.f32 %v16918_v19, %v16936_v34 }
 0x252   : > { %v17135_v41 = vpop.f32.mrf.mxu0  ;;  %v2641_v47 = vadd.f32 %v16807_v1, %v2088_v14 }
 0x253   : > { %21004 = vst [vmem:[#allocation10_spill] sm:$0xff] %v17131_v52  ;;  %21005 = vst [vmem:[#allocation9_spill] sm:$0xff] %v17135_v41  ;;  %v17152_v41 = vpop.f32.mrf.mxu1 }
 0x254   : > { %v13943_v57 = vpop.f32.mrf.mxu0  ;;  %v3027_v1 = vadd.f32 %v16780_v17, %v2641_v47  ;;  %v4278_v17 = vadd.f32 %v16933_v35, %v16951_v55 }
 0x255   : > { %v17139_v12 = vadd.f32 %v13943_v57, %v17026_v23  ;;  %v3023_v57 = vadd.f32 %v16755_v25, %v2637_v22  ;;  %v17163_v62 = vpop.f32.mrf.mxu1  ;;  %v4660_v25 = vadd.f32 %v17055_v42, %v4274_v27 }
 0x256   : > { %v17143_v16 = vpop.f32.mrf.mxu0  ;;  %v4664_v14 = vadd.f32 %v17069_v21, %v4278_v17 }
 0x257   : > { %21006 = vst [vmem:[#allocation61_spill] sm:$0xff] %v17139_v12  ;;  %v4657_v12 = vadd.f32 %v17046_v48, %v4271_v3  ;;  %v3777_v36 = vadd.f32 %v16943_v38, %v3023_v57  ;;  %v5412_v48 = vadd.f32 %v17031_v44, %v17036_v54  ;;  %v17173_v19 = vpop.f32.mrf.mxu1  ;;  %v5413_v38 = vadd.f32 %v17048_v9, %v17044_v24  ;;  %v17183_v44 = vld [vmem:[%s20858_s2] ss:$0 sm:$0xff] }
 0x258   : > { %v13944_v11 = vpop.f32.mrf.mxu0  ;;  %v5414_v42 = vadd.f32 %v17067_v53, %v4660_v25  ;;  %v3781_v53 = vadd.f32 %v16958_v33, %v3027_v1 }
 0x259   : > { %v17150_v52 = vadd.f32 %v13944_v11, %v17033_v15  ;;  %v5410_v11 = vadd.f32 %v17038_v5, %v17041_v29  ;;  %v5411_v22 = vadd.f32 %v17053_v13, %v4657_v12  ;;  %v4275_v43 = vadd.f32 %v16926_v58, %v3777_v36  ;;  %v17195_v9 = vpop.f32.mrf.mxu1 }
 0x25a   : > { %v17154_v51 = vpop.f32.mrf.mxu0  ;;  %v4279_v36 = vadd.f32 %v16941_v18, %v3781_v53  ;;  %v21013_v53 = vld [vmem:[#allocation46_spill] sm:$0xff] }
 0x25b   : > { %v4661_v13 = vadd.f32 %v17062_v30, %v4275_v43  ;;  %v17213_v47 = vpop.f32.mrf.mxu1  ;;  %v21012_v43 = vld [vmem:[#allocation15_spill] sm:$0xff] }
 0x25c   : > { %v14011_v23 = vpop.f32.mrf.mxu0  ;;  %v4665_v18 = vadd.f32 %v17076_v28, %v4279_v36 }
 0x25d   : > { %v5910_v5 = vadd.f32 %v14011_v23, %v5412_v48  ;;  %v5415_v35 = vadd.f32 %v17081_v8, %v4661_v13  ;;  %v5418_v48 = vadd.f32 %v17095_v20, %v4664_v14 }
 0x25e   : > { %v5781_v15 = vpop.f32.mrf.mxu0 }
 0x25f   : > { %v5908_v3 = vadd.f32 %v5781_v15, %v5410_v11  ;;  %v17198_v57 = vadd.f32 %v17183_v44, %v5910_v5  ;;  %v5416_v15 = vadd.f32 %v17060_v56, %v17051_v4  ;;  %v5417_v11 = vadd.f32 %v17074_v63, %v17058_v45 }
 0x260   : > { %v14012_v31 = vpop.f32.mrf.mxu0  ;;  %v3031_v56 = vadd.f32 %v16805_v26, %v16835_v32  ;;  %v4282_v5 = vadd.f32 %v16948_v60, %v16966_v49  ;;  %v17232_v26 = vpop.f32.mrf.mxu1  ;;  %v5419_v60 = vadd.f32 %v17109_v40, %v4665_v18  ;;  %v21015_v40 = vld [vmem:[#allocation36_spill] sm:$0xff]  ;;  %v21021_v18 = vld [vmem:[#allocation29_spill] sm:$0xff] }
 0x261   : > { %v17187_v12 = vadd.f32 %v17183_v44, %v5908_v3  ;;  %v5911_v58 = vadd.f32 %v14012_v31, %v5413_v38 }
 0x262   : > { %v5784_v34 = vpop.f32.mrf.mxu0 }
 0x263   : > { %v5909_v29 = vadd.f32 %v5784_v34, %v5411_v22  ;;  %v17207_v55 = vadd.f32 %v17183_v44, %v5911_v58  ;;  %v21011_v34 = vld [vmem:[#allocation17_spill] sm:$0xff]  ;;  %v5420_v58 = vadd.f32 %v17088_v39, %v17065_v0 }
 0x264   : > { %v14015_v54 = vpop.f32.mrf.mxu0  ;;  %v2120_v38 = vadd.f32 %v21012_v43, %v21011_v34 }
 0x265   : > { %v17190_v24 = vadd.f32 %v17183_v44, %v5909_v29  ;;  %v5914_v21 = vadd.f32 %v14015_v54, %v5416_v15  ;;  %v3785_v29 = vadd.f32 %v16973_v50, %v3031_v56  ;;  %v4668_v54 = vadd.f32 %v17083_v46, %v4282_v5  ;;  %v21019_v56 = vld [vmem:[#allocation24_spill] sm:$0xff] }
 0x266   : > { %v5797_v23 = vpop.f32.mrf.mxu0  ;;  %v21022_v5 = vld [vmem:[#allocation16_spill] sm:$0xff] }
 0x267   : > { %v5979_v30 = vadd.f32 %v17190_v24, %v17187_v12  ;;  %v5912_v59 = vadd.f32 %v5797_v23, %v5414_v42  ;;  %v17235_v20 = vadd.f32 %v17183_v44, %v5914_v21  ;;  %v2649_v42 = vadd.f32 %v16859_v2, %v2120_v38  ;;  %v21014_v23 = vld [vmem:[#allocation53_spill] sm:$0xff]  ;;  %v21017_v21 = vld [vmem:[#allocation26_spill] sm:$0xff] }
 0x268   : > { %v14016_v27 = vpop.f32.mrf.mxu0  ;;  %v4283_v17 = vadd.f32 %v16956_v6, %v3785_v29  ;;  %v5422_v15 = vadd.f32 %v17123_v7, %v4668_v54 }
 0x269   : > { %v5980_v33 = vadd.f32 %v5979_v30, %v17198_v57  ;;  %v17216_v31 = vadd.f32 %v17183_v44, %v5912_v59  ;;  %v5915_v45 = vadd.f32 %v14016_v27, %v5417_v11  ;;  %v5421_v30 = vadd.f32 %v21014_v23, %v21013_v53  ;;  %v17250_v59 = vpop.f32.mrf.mxu1  ;;  %v21026_v53 = vld [vmem:[#allocation48_spill] sm:$0xff] }
 0x26a   : > { %v5800_v25 = vpop.f32.mrf.mxu0  ;;  %v3035_v27 = vadd.f32 %v21015_v40, %v2649_v42  ;;  %v21024_v42 = vld [vmem:[#allocation47_spill] sm:$0xff]  ;;  %v5425_v23 = vadd.f32 %v17133_v10, %v21026_v53 }
 0x26b   : > { %v5981_v4 = vadd.f32 %v5980_v33, %v17207_v55  ;;  %v5913_v8 = vadd.f32 %v5800_v25, %v5415_v35  ;;  %v17244_v49 = vadd.f32 %v17183_v44, %v5915_v45  ;;  %v21016_v33 = vld [vmem:[#allocation49_spill] sm:$0xff]  ;;  %v17268_v45 = vpop.f32.mrf.mxu1  ;;  %v5424_v54 = vadd.f32 %v17116_v61, %v21024_v42  ;;  %v21036_v42 = vld [vmem:[#allocation50_spill] sm:$0xff] }
 0x26c   : > { %v14019_v22 = vpop.f32.mrf.mxu0  ;;  %v4669_v6 = vadd.f32 %v21016_v33, %v4283_v17  ;;  %v21028_v33 = vld [vmem:[#allocation54_spill] sm:$0xff] }
 0x26d   : > { %v5982_v63 = vadd.f32 %v5981_v4, %v17216_v31  ;;  %v17225_v3 = vadd.f32 %v17183_v44, %v5913_v8  ;;  %v5918_v46 = vadd.f32 %v14019_v22, %v5420_v58  ;;  %v21018_v4 = vld [vmem:[#allocation22_spill] sm:$0xff] }
 0x26e   : > { %v5813_v32 = vpop.f32.mrf.mxu0  ;;  %v2136_v8 = vadd.f32 %v21018_v4, %v21017_v21  ;;  %v21030_v21 = vld [vmem:[#allocation32_spill] sm:$0xff] }
 0x26f   : > { %v5983_v28 = vadd.f32 %v5982_v63, %v17225_v3  ;;  %v5916_v1 = vadd.f32 %v5813_v32, %v5418_v48  ;;  %v21020_v48 = vld [vmem:[#allocation20_spill] sm:$0xff]  ;;  %v3789_v63 = vadd.f32 %v21021_v18, %v3035_v27  ;;  %v17271_v34 = vadd.f32 %v17183_v44, %v5918_v46  ;;  %v21023_v32 = vld [vmem:[#allocation51_spill] sm:$0xff] }
 0x270   : > { %v14020_v13 = vpop.f32.mrf.mxu0  ;;  %v4286_v22 = vadd.f32 %v21020_v48, %v21019_v56  ;;  %v2653_v29 = vadd.f32 %v21022_v5, %v2136_v8  ;;  %v21031_v8 = vld [vmem:[#allocation37_spill] sm:$0xff]  ;;  %v21034_v5 = vld [vmem:[#allocation19_spill] sm:$0xff] }
 0x271   : > { %v5984_v50 = vadd.f32 %v5983_v28, %v17235_v20  ;;  %v17253_v14 = vadd.f32 %v17183_v44, %v5916_v1  ;;  %v5919_v11 = vadd.f32 %v14020_v13, %v5421_v30  ;;  %v5423_v13 = vadd.f32 %v17141_v37, %v4669_v6  ;;  %v17286_v30 = vpop.f32.mrf.mxu1  ;;  %v21032_v56 = vld [vmem:[#allocation21_spill] sm:$0xff] }
 0x272   : > { %v5816_v2 = vpop.f32.mrf.mxu0  ;;  %v4672_v28 = vadd.f32 %v21023_v32, %v4286_v22  ;;  %v4290_v48 = vadd.f32 %v21032_v56, %v21031_v8  ;;  %v21033_v22 = vld [vmem:[#allocation39_spill] sm:$0xff]  ;;  %v21035_v32 = vld [vmem:[#allocation56_spill] sm:$0xff]  ;;  %v21043_v56 = vld [vmem:[#allocation41_spill] sm:$0xff] }
 0x273   : > { %v5985_v39 = vadd.f32 %v5984_v50, %v17244_v49  ;;  %v5917_v0 = vadd.f32 %v5816_v2, %v5419_v60  ;;  %v17280_v58 = vadd.f32 %v17183_v44, %v5919_v11  ;;  %v21025_v50 = vld [vmem:[#allocation30_spill] sm:$0xff] }
 0x274   : > { %v14023_v35 = vpop.f32.mrf.mxu0  ;;  %v4287_v17 = vadd.f32 %v21025_v50, %v3789_v63  ;;  %v5426_v27 = vadd.f32 %v17163_v62, %v4672_v28  ;;  %v5379_v63 = vpop.f32.mrf.mxu1  ;;  %v4676_v28 = vadd.f32 %v21035_v32, %v4290_v48  ;;  %v21044_v48 = vld [vmem:[#allocation31_spill] sm:$0xff] }
 0x275   : > { %v5986_v36 = vadd.f32 %v5985_v39, %v17253_v14  ;;  %v17261_v25 = vadd.f32 %v17183_v44, %v5917_v0  ;;  %v5922_v46 = vadd.f32 %v14023_v35, %v5424_v54  ;;  %v21027_v0 = vld [vmem:[#allocation23_spill] sm:$0xff]  ;;  %v21029_v35 = vld [vmem:[#allocation33_spill] sm:$0xff]  ;;  %v5428_v54 = vadd.f32 %v17152_v41, %v21036_v42 }
 0x276   : > { %v5829_v7 = vpop.f32.mrf.mxu0  ;;  %v3039_v40 = vadd.f32 %v21027_v0, %v2653_v29  ;;  %v4673_v6 = vadd.f32 %v21028_v33, %v4287_v17  ;;  %v2152_v4 = vadd.f32 %v21030_v21, %v21029_v35  ;;  %v21037_v17 = vld [vmem:[#allocation28_spill] sm:$0xff]  ;;  %v5430_v33 = vadd.f32 %v17232_v26, %v4676_v28  ;;  %v21046_v32 = vld [vmem:[#allocation27_spill] sm:$0xff] }
 0x277   : > { %v5987_v43 = vadd.f32 %v5986_v36, %v17261_v25  ;;  %v5920_v38 = vadd.f32 %v5829_v7, %v5422_v15  ;;  %v17305_v62 = vadd.f32 %v17183_v44, %v5922_v46  ;;  %v13988_v46 = vpop.f32.mrf.mxu1 }
 0x278   : > { %v14024_v1 = vpop.f32.mrf.mxu0  ;;  %v3793_v18 = vadd.f32 %v21033_v22, %v3039_v40  ;;  %v2657_v29 = vadd.f32 %v21034_v5, %v2152_v4  ;;  %v21042_v4 = vld [vmem:[#allocation34_spill] sm:$0xff]  ;;  %v4294_v22 = vadd.f32 %v21044_v48, %v21043_v56  ;;  %v21053_v48 = vld [vmem:[#allocation44_spill] sm:$0xff] }
 0x279   : > { %v5988_v60 = vadd.f32 %v5987_v43, %v17271_v34  ;;  %v17289_v39 = vadd.f32 %v17183_v44, %v5920_v38  ;;  %v5923_v10 = vadd.f32 %v14024_v1, %v5425_v23  ;;  %v21038_v23 = vld [vmem:[#allocation52_spill] sm:$0xff] }
 0x27a   : > { %v5832_v2 = vpop.f32.mrf.mxu0  ;;  %v4291_v53 = vadd.f32 %v21037_v17, %v3793_v18  ;;  %v21045_v18 = vld [vmem:[#allocation42_spill] sm:$0xff] }
 0x27b   : > { %v5989_v61 = vadd.f32 %v5988_v60, %v17280_v58  ;;  %v5921_v37 = vadd.f32 %v5832_v2, %v5423_v13  ;;  %v5427_v13 = vadd.f32 %v17195_v9, %v4673_v6  ;;  %v17314_v60 = vadd.f32 %v17183_v44, %v5923_v10  ;;  %v21039_v9 = vld [vmem:[#allocation25_spill] sm:$0xff] }
 0x27c   : > { %v14027_v15 = vpop.f32.mrf.mxu0  ;;  %v5429_v2 = vadd.f32 %v17173_v19, %v21038_v23 }
 0x27d   : > { %v5990_v36 = vadd.f32 %v5989_v61, %v17289_v39  ;;  %v17297_v11 = vadd.f32 %v17183_v44, %v5921_v37  ;;  %v5926_v37 = vadd.f32 %v14027_v15, %v5428_v54  ;;  %v21041_v15 = vld [vmem:[#allocation35_spill] sm:$0xff] }
 0x27e   : > { %v5845_v7 = vpop.f32.mrf.mxu0  ;;  %v2168_v8 = vadd.f32 %v21042_v4, %v21041_v15  ;;  %v21052_v15 = vld [vmem:[#allocation9_spill] sm:$0xff] }
 0x27f   : > { %v5991_v43 = vadd.f32 %v5990_v36, %v17297_v11  ;;  %v5924_v38 = vadd.f32 %v5845_v7, %v5426_v27  ;;  %v3043_v27 = vadd.f32 %v21039_v9, %v2657_v29  ;;  %v21040_v36 = vld [vmem:[#allocation58_spill] sm:$0xff]  ;;  %v17337_v26 = vadd.f32 %v17183_v44, %v5926_v37  ;;  %v21050_v37 = vld [vmem:[#allocation57_spill] sm:$0xff] }
 0x280   : > { %v14028_v1 = vpop.f32.mrf.mxu0  ;;  %v4677_v10 = vadd.f32 %v21040_v36, %v4291_v53  ;;  %v2661_v28 = vadd.f32 %v21046_v32, %v2168_v8 }
 0x281   : > { %v5992_v50 = vadd.f32 %v5991_v43, %v17305_v62  ;;  %v17321_v0 = vadd.f32 %v17183_v44, %v5924_v38  ;;  %v5927_v21 = vadd.f32 %v14028_v1, %v5429_v2  ;;  %v3797_v7 = vadd.f32 %v21045_v18, %v3043_v27  ;;  %v5382_v43 = vpop.f32.mrf.mxu1  ;;  %v21047_v1 = vld [vmem:[#allocation60_spill] sm:$0xff]  ;;  %v21049_v2 = vld [vmem:[#allocation38_spill] sm:$0xff]  ;;  %v21055_v18 = vld [vmem:[#allocation45_spill] sm:$0xff] }
 0x282   : > { %v5848_v61 = vpop.f32.mrf.mxu0  ;;  %v4680_v42 = vadd.f32 %v21047_v1, %v4294_v22  ;;  %v5431_v17 = vadd.f32 %v17268_v45, %v4677_v10  ;;  %v21051_v45 = vld [vmem:[#allocation18_spill] sm:$0xff] }
 0x283   : > { %v5993_v41 = vadd.f32 %v5992_v50, %v17314_v60  ;;  %v5925_v40 = vadd.f32 %v5848_v61, %v5427_v13  ;;  %v21048_v13 = vld [vmem:[#allocation55_spill] sm:$0xff]  ;;  %v17346_v53 = vadd.f32 %v17183_v44, %v5927_v21  ;;  %v4295_v61 = vadd.f32 %v21049_v2, %v3797_v7 }
 0x284   : > { %v14031_v6 = vpop.f32.mrf.mxu0  ;;  %v5432_v50 = vadd.f32 %v17213_v47, %v21048_v13  ;;  %v3047_v10 = vadd.f32 %v21051_v45, %v2661_v28 }
 0x285   : > { %v5994_v35 = vadd.f32 %v5993_v41, %v17321_v0  ;;  %v17329_v19 = vadd.f32 %v17183_v44, %v5925_v40  ;;  %v5433_v41 = vadd.f32 %v17250_v59, %v21050_v37  ;;  %v13991_v40 = vpop.f32.mrf.mxu1  ;;  %v4681_v4 = vadd.f32 %v21052_v15, %v4295_v61  ;;  %v21058_v61 = vld [vmem:[#allocation10_spill] sm:$0xff] }
 0x286   : > { %v5861_v38 = vpop.f32.mrf.mxu0  ;;  %v5930_v27 = vadd.f32 %v14031_v6, %v5432_v50  ;;  %v21054_v6 = vld [vmem:[#allocation40_spill] sm:$0xff]  ;;  %v3801_v7 = vadd.f32 %v21055_v18, %v3047_v10  ;;  %v5437_v37 = vadd.f32 %v13988_v46, %v21058_v61 }
 0x287   : > { %v5995_v5 = vadd.f32 %v5994_v35, %v17329_v19  ;;  %v5928_v29 = vadd.f32 %v5861_v38, %v5430_v33  ;;  %v5434_v35 = vadd.f32 %v5379_v63, %v4680_v42  ;;  %v4298_v22 = vadd.f32 %v21054_v6, %v21053_v48  ;;  %v5395_v38 = vpop.f32.mrf.mxu1  ;;  %v21056_v42 = vld [vmem:[#allocation59_spill] sm:$0xff] }
 0x288   : > { %v14032_v54 = vpop.f32.mrf.mxu0  ;;  %v5435_v13 = vadd.f32 %v5382_v43, %v4681_v4 }
 0x289   : > { %v5996_v23 = vadd.f32 %v5995_v5, %v17337_v26  ;;  %v17353_v33 = vadd.f32 %v17183_v44, %v5928_v29  ;;  %v5931_v56 = vadd.f32 %v14032_v54, %v5433_v41  ;;  %v17366_v29 = vadd.f32 %v17183_v44, %v5930_v27  ;;  %v13992_v41 = vpop.f32.mrf.mxu1 }
 0x28a   : > { %v5864_v9 = vpop.f32.mrf.mxu0  ;;  %v4684_v28 = vadd.f32 %v17143_v16, %v4298_v22  ;;  %v5436_v54 = vadd.f32 %v17286_v30, %v21056_v42 }
 0x28b   : > { %v5997_v47 = vadd.f32 %v5996_v23, %v17346_v53  ;;  %v5929_v36 = vadd.f32 %v5864_v9, %v5431_v17  ;;  %v5970_v50 = vadd.f32 %v17183_v44, %v5931_v56  ;;  %v21057_v23 = vld [vmem:[#allocation43_spill] sm:$0xff]  ;;  %v5398_v4 = vpop.f32.mrf.mxu1 }
 0x28c   : > { %v14035_v21 = vpop.f32.mrf.mxu0  ;;  %v4299_v2 = vadd.f32 %v21057_v23, %v3801_v7  ;;  %v5438_v45 = vadd.f32 %v5395_v38, %v4684_v28 }
 0x28d   : > { %v5998_v8 = vadd.f32 %v5997_v47, %v17353_v33  ;;  %v17360_v59 = vadd.f32 %v17183_v44, %v5929_v36  ;;  %v5934_v27 = vadd.f32 %v14035_v21, %v5436_v54  ;;  %v21059_v21 = vld [vmem:[#allocation61_spill] sm:$0xff] }
 0x28e   : > { %v5877_v5 = vpop.f32.mrf.mxu0  ;;  %v4685_v30 = vadd.f32 %v17154_v51, %v4299_v2  ;;  %v5440_v22 = vadd.f32 %v13991_v40, %v21059_v21 }
 0x28f   : > { %v5999_v63 = vadd.f32 %v5998_v8, %v17360_v59  ;;  %v5932_v32 = vadd.f32 %v5877_v5, %v5434_v35  ;;  %v5973_v56 = vadd.f32 %v17183_v44, %v5934_v27  ;;  %v5441_v5 = vadd.f32 %v13992_v41, %v17150_v52 }
 0x290   : > { %v14036_v1 = vpop.f32.mrf.mxu0  ;;  %v5439_v18 = vadd.f32 %v5398_v4, %v4685_v30 }
 0x291   : > { %v6000_v17 = vadd.f32 %v5999_v63, %v17366_v29  ;;  %v5971_v47 = vadd.f32 %v17183_v44, %v5932_v32  ;;  %v5935_v35 = vadd.f32 %v14036_v1, %v5437_v37 }
 0x292   : > { %v5880_v9 = vpop.f32.mrf.mxu0 }
 0x293   : > { %v6001_v36 = vadd.f32 %v6000_v17, %v5970_v50  ;;  %v5933_v16 = vadd.f32 %v5880_v9, %v5435_v13  ;;  %v5974_v7 = vadd.f32 %v17183_v44, %v5935_v35 }
 0x294   : > { %v14039_v10 = vpop.f32.mrf.mxu0 }
 0x295   : > { %v6002_v43 = vadd.f32 %v6001_v36, %v5971_v47  ;;  %v5972_v15 = vadd.f32 %v17183_v44, %v5933_v16  ;;  %v5938_v63 = vadd.f32 %v14039_v10, %v5440_v22 }
 0x296   : > { %v5893_v8 = vpop.f32.mrf.mxu0 }
 0x297   : > { %v6003_v46 = vadd.f32 %v6002_v43, %v5972_v15  ;;  %v5936_v48 = vadd.f32 %v5893_v8, %v5438_v45  ;;  %v5977_v17 = vadd.f32 %v17183_v44, %v5938_v63 }
 0x298   : > { %v14040_v6 = vpop.f32.mrf.mxu0 }
 0x299   : > { %v6004_v38 = vadd.f32 %v6003_v46, %v5973_v56  ;;  %v5975_v32 = vadd.f32 %v17183_v44, %v5936_v48  ;;  %v5939_v54 = vadd.f32 %v14040_v6, %v5441_v5 }
 0x29a   : > { %v5896_v51 = vpop.f32.mrf.mxu0 }
 0x29b   : > { %v6005_v28 = vadd.f32 %v6004_v38, %v5974_v7  ;;  %v5937_v1 = vadd.f32 %v5896_v51, %v5439_v18  ;;  %v5978_v40 = vadd.f32 %v17183_v44, %v5939_v54 }
 0x29d   : > { %v6006_v42 = vadd.f32 %v6005_v28, %v5975_v32  ;;  %v5976_v13 = vadd.f32 %v17183_v44, %v5937_v1 }
 0x29f   : > { %v6007_v23 = vadd.f32 %v6006_v42, %v5976_v13 }
 0x2a1   : > { %v6008_v2 = vadd.f32 %v6007_v23, %v5977_v17 }
 0x2a3   : > { %v6009_v61 = vadd.f32 %v6008_v2, %v5978_v40 }
 0x2a5   : > { %v6010_v37 = vrot.slane %v6009_v61, 4 }
 0x2a7   : > { %v6011_v9 = vadd.f32 %v6010_v37, %v6009_v61 }
 0x2a9   : > { %v6012_v52 = vrot.slane %v6011_v9, 2 }
 0x2ab   : > { %v6013_v41 = vadd.f32 %v6012_v52, %v6011_v9 }
 0x2ad   : > { %v6014_v27 = vrot.slane %v6013_v41, 1 }
 0x2af   : > { %v6015_v36 = vadd.f32 %v6014_v27, %v6013_v41 }
 0x2b1   : > { %v6017_v16 = vmul.f32 0.00390625, %v6015_v36 }
 0x2b3   : > { %v17388_v45 = vsub.f32 %v17253_v14, %v6017_v16  ;;  %v17391_v10 = vsub.f32 %v17261_v25, %v6017_v16  ;;  %v17394_v30 = vsub.f32 %v17271_v34, %v6017_v16  ;;  %v17397_v44 = vsub.f32 %v17280_v58, %v6017_v16 }
 0x2b4   : > { %v17400_v43 = vsub.f32 %v17289_v39, %v6017_v16  ;;  %v17403_v35 = vsub.f32 %v17297_v11, %v6017_v16  ;;  %v17406_v4 = vsub.f32 %v17305_v62, %v6017_v16  ;;  %v17409_v14 = vsub.f32 %v17314_v60, %v6017_v16 }
 0x2b5   : > { %v17412_v25 = vsub.f32 %v17321_v0, %v6017_v16  ;;  %v17415_v34 = vsub.f32 %v17329_v19, %v6017_v16  ;;  %v17418_v58 = vsub.f32 %v17337_v26, %v6017_v16  ;;  %v17421_v39 = vsub.f32 %v17346_v53, %v6017_v16 }
 0x2b6   : > { %v17424_v11 = vsub.f32 %v17353_v33, %v6017_v16  ;;  %v17427_v62 = vsub.f32 %v17360_v59, %v6017_v16  ;;  %v17430_v60 = vsub.f32 %v17366_v29, %v6017_v16  ;;  %v17432_v0 = vsub.f32 %v5970_v50, %v6017_v16 }
 0x2b7   : > { %v17434_v8 = vsub.f32 %v5971_v47, %v6017_v16  ;;  %v17436_v19 = vsub.f32 %v5972_v15, %v6017_v16  ;;  %v17438_v26 = vsub.f32 %v5973_v56, %v6017_v16  ;;  %v17440_v46 = vsub.f32 %v5974_v7, %v6017_v16 }
 0x2b8   : > { %v17442_v53 = vsub.f32 %v5975_v32, %v6017_v16  ;;  %v17444_v33 = vsub.f32 %v5976_v13, %v6017_v16  ;;  %v17446_v48 = vsub.f32 %v5977_v17, %v6017_v16  ;;  %v17448_v59 = vsub.f32 %v5978_v40, %v6017_v16 }
 0x2b9   : > { %v17451_v29 = vsub.f32 %v17187_v12, %v6017_v16  ;;  %v17454_v50 = vsub.f32 %v17190_v24, %v6017_v16  ;;  %v17457_v47 = vsub.f32 %v17198_v57, %v6017_v16  ;;  %v17464_v6 = vsub.f32 %v17207_v55, %v6017_v16 }
 0x2ba   : > { %v17467_v21 = vsub.f32 %v17216_v31, %v6017_v16  ;;  %v17472_v22 = vsub.f32 %v17225_v3, %v6017_v16  ;;  %v17477_v7 = vsub.f32 %v17235_v20, %v6017_v16  ;;  %v17482_v31 = vsub.f32 %v17244_v49, %v6017_v16 }
 0x2bb   : > { %v6050_v15 = vmul.f32 %v17451_v29, %v17451_v29  ;;  %v6051_v56 = vmul.f32 %v17454_v50, %v17454_v50  ;;  %v6052_v12 = vmul.f32 %v17457_v47, %v17457_v47  ;;  %v6053_v57 = vmul.f32 %v17464_v6, %v17464_v6 }
 0x2bc   : > { %v6054_v55 = vmul.f32 %v17467_v21, %v17467_v21  ;;  %v6055_v5 = vmul.f32 %v17472_v22, %v17472_v22  ;;  %v6056_v3 = vmul.f32 %v17477_v7, %v17477_v7  ;;  %v6057_v32 = vmul.f32 %v17482_v31, %v17482_v31 }
 0x2bd   : > { %v6082_v24 = vadd.f32 %v6051_v56, %v6050_v15  ;;  %v6058_v28 = vmul.f32 %v17388_v45, %v17388_v45  ;;  %v6059_v49 = vmul.f32 %v17391_v10, %v17391_v10  ;;  %v6060_v54 = vmul.f32 %v17394_v30, %v17394_v30 }
 0x2be   : > { %v6061_v17 = vmul.f32 %v17397_v44, %v17397_v44  ;;  %v6062_v40 = vmul.f32 %v17400_v43, %v17400_v43  ;;  %v6063_v61 = vmul.f32 %v17403_v35, %v17403_v35  ;;  %v6064_v9 = vmul.f32 %v17406_v4, %v17406_v4 }
 0x2bf   : > { %v6083_v18 = vadd.f32 %v6082_v24, %v6052_v12  ;;  %v6065_v41 = vmul.f32 %v17409_v14, %v17409_v14  ;;  %v6066_v36 = vmul.f32 %v17412_v25, %v17412_v25  ;;  %v6067_v15 = vmul.f32 %v17415_v34, %v17415_v34 }
 0x2c0   : > { %v6068_v12 = vmul.f32 %v17418_v58, %v17418_v58 }
 0x2c1   : > { %v6084_v38 = vadd.f32 %v6083_v18, %v6053_v57  ;;  %v6069_v57 = vmul.f32 %v17421_v39, %v17421_v39 }
 0x2c3   : > { %v6085_v51 = vadd.f32 %v6084_v38, %v6054_v55  ;;  %v6070_v55 = vmul.f32 %v17424_v11, %v17424_v11 }
 0x2c5   : > { %v6086_v63 = vadd.f32 %v6085_v51, %v6055_v5  ;;  %v14605_v5 = vld [vmem:[%s20859_s3 + $0x38] sm:$0xff]   ;;  %v6071_v51 = vmul.f32 %v17427_v62, %v17427_v62 }
 0x2c6   : > { %14089 = vmatprep.subr.bf16.mxu0 %v14605_v5 }
 0x2c7   : > { %v6087_v20 = vadd.f32 %v6086_v63, %v6056_v3  ;;  %v6072_v63 = vmul.f32 %v17430_v60, %v17430_v60  ;;  %14090 = vmatpush3.bf16.msra.mxu0 %v14605_v5 }
 0x2c9   : > { %v6088_v1 = vadd.f32 %v6087_v20, %v6057_v32  ;;  %v14606_v20 = vld [vmem:[%s20859_s3 + $0x30] sm:$0xff]  }
 0x2ca   : > { %14091 = vmatprep.subr.bf16.mxu0 %v14606_v20 }
 0x2cb   : > { %v6089_v42 = vadd.f32 %v6088_v1, %v6058_v28  ;;  %v6073_v28 = vmul.f32 %v17432_v0, %v17432_v0  ;;  %14092 = vmatpush3.bf16.msra.mxu0 %v14606_v20  ;;  %v14610_v20 = vld [vmem:[%s20859_s3 + $0x50] sm:$0xff]  }
 0x2cd   : > { %v6090_v13 = vadd.f32 %v6089_v42, %v6059_v49  ;;  %v6074_v49 = vmul.f32 %v17434_v8, %v17434_v8 }
 0x2cf   : > { %v6091_v23 = vadd.f32 %v6090_v13, %v6060_v54  ;;  %v14608_v54 = vld [vmem:[%s20859_s3 + $0x28] sm:$0xff]   ;;  %v6075_v13 = vmul.f32 %v17436_v19, %v17436_v19 }
 0x2d0   : > { %14093 = vmatprep.subr.bf16.mxu0 %v14608_v54 }
 0x2d1   : > { %v6092_v2 = vadd.f32 %v6091_v23, %v6061_v17  ;;  %v14601_v23 = vld [vmem:[%s20859_s3 + $0x78] sm:$0xff]   ;;  %14094 = vmatpush3.bf16.msra.mxu0 %v14608_v54 }
 0x2d2   : > { %14041 = vmatprep.subr.bf16.mxu1 %v14601_v23 }
 0x2d3   : > { %v6093_v37 = vadd.f32 %v6092_v2, %v6062_v40  ;;  %v6076_v40 = vmul.f32 %v17438_v26, %v17438_v26  ;;  %14042 = vmatpush3.bf16.msra.mxu1 %v14601_v23 }
 0x2d5   : > { %v6094_v52 = vadd.f32 %v6093_v37, %v6063_v61  ;;  %v14609_v61 = vld [vmem:[%s20859_s3 + $0x20] sm:$0xff]   ;;  %v6077_v37 = vmul.f32 %v17440_v46, %v17440_v46 }
 0x2d6   : > { %14095 = vmatprep.subr.bf16.mxu0 %v14609_v61 }
 0x2d7   : > { %v6095_v27 = vadd.f32 %v6094_v52, %v6064_v9  ;;  %v14602_v52 = vld [vmem:[%s20859_s3 + $0x70] sm:$0xff]   ;;  %14096 = vmatpush3.bf16.msra.mxu0 %v14609_v61 }
 0x2d8   : > { %14043 = vmatprep.subr.bf16.mxu1 %v14602_v52 }
 0x2d9   : > { %v6096_v16 = vadd.f32 %v6095_v27, %v6065_v41  ;;  %v14603_v41 = vld [vmem:[%s20859_s3 + $0x68] sm:$0xff]   ;;  %v14611_v27 = vld [vmem:[%s20859_s3 + $0x18] sm:$0xff]   ;;  %14044 = vmatpush3.bf16.msra.mxu1 %v14602_v52 }
 0x2da   : > { %14097 = vmatprep.subr.bf16.mxu0 %v14611_v27  ;;  %14045 = vmatprep.subr.bf16.mxu1 %v14603_v41 }
 0x2db   : > { %v6097_v56 = vadd.f32 %v6096_v16, %v6066_v36  ;;  %v6078_v36 = vmul.f32 %v17442_v53, %v17442_v53  ;;  %14098 = vmatpush3.bf16.msra.mxu0 %v14611_v27 }
 0x2dd   : > { %v6098_v24 = vadd.f32 %v6097_v56, %v6067_v15  ;;  %v14612_v15 = vld [vmem:[%s20859_s3 + $0x10] sm:$0xff]   ;;  %v6079_v56 = vmul.f32 %v17444_v33, %v17444_v33  ;;  %14046 = vmatpush3.bf16.msra.mxu1 %v14603_v41 }
 0x2de   : > { %14099 = vmatprep.subr.bf16.mxu0 %v14612_v15 }
 0x2df   : > { %v6099_v18 = vadd.f32 %v6098_v24, %v6068_v12  ;;  %v14604_v24 = vld [vmem:[%s20859_s3 + $0x60] sm:$0xff]   ;;  %14100 = vmatpush3.bf16.msra.mxu0 %v14612_v15 }
 0x2e0   : > { %14047 = vmatprep.subr.bf16.mxu1 %v14604_v24 }
 0x2e1   : > { %v6100_v38 = vadd.f32 %v6099_v18, %v6069_v57  ;;  %v6080_v57 = vmul.f32 %v17446_v48, %v17446_v48  ;;  %14048 = vmatpush3.bf16.msra.mxu1 %v14604_v24 }
 0x2e3   : > { %v6101_v3 = vadd.f32 %v6100_v38, %v6070_v55  ;;  %v14614_v55 = vld [vmem:[%s20859_s3 + $0x8] sm:$0xff]   ;;  %v6081_v38 = vmul.f32 %v17448_v59, %v17448_v59 }
 0x2e4   : > { %14101 = vmatprep.subr.bf16.mxu0 %v14614_v55 }
 0x2e5   : > { %v6102_v32 = vadd.f32 %v6101_v3, %v6071_v51  ;;  %v14607_v51 = vld [vmem:[%s20859_s3 + $0x58] sm:$0xff]   ;;  %14102 = vmatpush3.bf16.msra.mxu0 %v14614_v55 }
 0x2e6   : > { %14049 = vmatprep.subr.bf16.mxu1 %v14607_v51 }
 0x2e7   : > { %v6103_v1 = vadd.f32 %v6102_v32, %v6072_v63  ;;  %v14615_v63 = vld [vmem:[%s20859_s3] sm:$0xff]   ;;  %14050 = vmatpush3.bf16.msra.mxu1 %v14607_v51 }
 0x2e8   : > { %14103 = vmatprep.subr.bf16.mxu0 %v14615_v63  ;;  %14051 = vmatprep.subr.bf16.mxu1 %v14610_v20 }
 0x2e9   : > { %v6104_v42 = vadd.f32 %v6103_v1, %v6073_v28  ;;  %14104 = vmatpush3.bf16.msra.mxu0 %v14615_v63 }
 0x2eb   : > { %v6105_v17 = vadd.f32 %v6104_v42, %v6074_v49  ;;  %v14613_v49 = vld [vmem:[%s20859_s3 + $0x48] sm:$0xff]   ;;  %14052 = vmatpush3.bf16.msra.mxu1 %v14610_v20 }
 0x2ec   : > { %14053 = vmatprep.subr.bf16.mxu1 %v14613_v49 }
 0x2ed   : > { %v6106_v2 = vadd.f32 %v6105_v17, %v6075_v13  ;;  %v14617_v13 = vld [vmem:[%s20859_s3 + $0x40] sm:$0xff]  }
 0x2ef   : > { %v6107_v9 = vadd.f32 %v6106_v2, %v6076_v40  ;;  %14054 = vmatpush3.bf16.msra.mxu1 %v14613_v49  ;;  %v14621_v40 = vld [vmem:[%s20859_s3 + $0xb8] sm:$0xff]  }
 0x2f0   : > { %14055 = vmatprep.subr.bf16.mxu1 %v14617_v13 }
 0x2f1   : > { %v6108_v16 = vadd.f32 %v6107_v9, %v6077_v37 }
 0x2f3   : > { %v6109_v12 = vadd.f32 %v6108_v16, %v6078_v36  ;;  %14056 = vmatpush3.bf16.msra.mxu1 %v14617_v13 }
 0x2f4   : > { %14137 = vmatprep.subr.bf16.mxu1 %v14621_v40 }
 0x2f5   : > { %v6110_v18 = vadd.f32 %v6109_v12, %v6079_v56 }
 0x2f7   : > { %v6111_v5 = vadd.f32 %v6110_v18, %v6080_v57 }
 0x2f9   : > { %v6112_v3 = vadd.f32 %v6111_v5, %v6081_v38 }
 0x2fb   : > { %v6113_v32 = vrot.slane %v6112_v3, 4 }
 0x2fd   : > { %v6114_v28 = vadd.f32 %v6113_v32, %v6112_v3 }
 0x2ff   : > { %v6115_v1 = vrot.slane %v6114_v28, 2 }
 0x301   : > { %v6116_v42 = vadd.f32 %v6115_v1, %v6114_v28 }
 0x303   : > { %v6117_v54 = vrot.slane %v6116_v42, 1 }
 0x305   : > { %v6118_v17 = vadd.f32 %v6117_v54, %v6116_v42 }
 0x307   : > { %v6119_v23 = vmul.f32 0.00390625, %v6118_v17 }
 0x309   : > { %v6120_v2 = vadd.f32 1e-05, %v6119_v23 }
 0x30b   : > { %14721 = vrsqrt.f32 %v6120_v2 }
 0x318   : > { %v14722_v61 = vpop.eup %14721 }
 0x319   : > { %v6150_v37 = vmul.f32 %v14722_v61, %v17442_v53  ;;  %v6151_v9 = vmul.f32 %v14722_v61, %v17444_v33  ;;  %v17592_v52 = vmul.f32 %v14722_v61, %v17451_v29  ;;  %v17595_v41 = vmul.f32 %v14722_v61, %v17454_v50 }
 0x31a   : > { %v17598_v27 = vmul.f32 %v14722_v61, %v17457_v47  ;;  %v17601_v36 = vmul.f32 %v14722_v61, %v17464_v6  ;;  %v17604_v16 = vmul.f32 %v14722_v61, %v17467_v21  ;;  %v17607_v15 = vmul.f32 %v14722_v61, %v17472_v22 }
 0x31b   : > { %v6182_v53 = vmax.f32 %v6150_v37, 0.0  ;;  %v6183_v33 = vmax.f32 %v6151_v9, 0.0  ;;  %v17610_v29 = vmul.f32 %v14722_v61, %v17477_v7  ;;  %v17613_v50 = vmul.f32 %v14722_v61, %v17482_v31 }
 0x31c   : > { %v17616_v47 = vmul.f32 %v14722_v61, %v17388_v45  ;;  %v17619_v6 = vmul.f32 %v14722_v61, %v17391_v10  ;;  %v17622_v21 = vmul.f32 %v14722_v61, %v17394_v30  ;;  %v17625_v22 = vmul.f32 %v14722_v61, %v17397_v44  ;;  %v14631_v45 = vld [vmem:[%s20859_s3 + $0xf8] sm:$0xff]  }
 0x31d   : > { %v17627_v56 = vpack.c.bf16 %v6182_v53, %v6182_v53  ;;  %v13174_v12 = vpack.c.bf16 %v6183_v33, %v6183_v33  ;;  %v17630_v7 = vmul.f32 %v14722_v61, %v17400_v43  ;;  %v17633_v31 = vmul.f32 %v14722_v61, %v17403_v35  ;;  %14185 = vmatprep.subr.bf16.mxu0 %v14631_v45 }
 0x31e   : > { %v17639_v10 = vmul.f32 %v14722_v61, %v17406_v4  ;;  %v17642_v30 = vmul.f32 %v14722_v61, %v17409_v14  ;;  %v17645_v44 = vmul.f32 %v14722_v61, %v17412_v25  ;;  %v17648_v24 = vmul.f32 %v14722_v61, %v17415_v34 }
 0x31f   : > { %v6521_v43 = vshrl.u32 %v17627_v56, 16  ;;  %v6529_v35 = vshrl.u32 %v13174_v12, 16  ;;  %v6532_v57 = vshll.u32 %v13174_v12, 16  ;;  %v17652_v18 = vmul.f32 %v14722_v61, %v17418_v58 }
 0x320   : > { %v17655_v4 = vmul.f32 %v14722_v61, %v17421_v39  ;;  %v17658_v14 = vmul.f32 %v14722_v61, %v17424_v11  ;;  %v17661_v25 = vmul.f32 %v14722_v61, %v17427_v62  ;;  %v17664_v34 = vmul.f32 %v14722_v61, %v17430_v60  ;;  %v6703_v39 = vld [vmem:[#allocation2 + $0xbc] sm:$0x1] }
 0x321   : > { %v17666_v55 = vrot.slane %v6521_v43, 7  ;;  %v6531_v38 = vrot.slane %v6529_v35, 7  ;;  %v17669_v5 = vmul.f32 %v14722_v61, %v17432_v0  ;;  %v17672_v58 = vmul.f32 %v14722_v61, %v17434_v8 }
 0x322   : > { %v17675_v51 = vmul.f32 %v14722_v61, %v17436_v19  ;;  %v17678_v11 = vmul.f32 %v14722_v61, %v17438_v26  ;;  %v17681_v62 = vmul.f32 %v14722_v61, %v17440_v46  ;;  %v17684_v60 = vmul.f32 %v14722_v61, %v17446_v48 }
 0x323   : > { %v6527_v3 = vrot.slane %v17666_v55, 4  ;;  %v6534_v0 = vor.u32 %v6532_v57, %v6531_v38  ;;  %v6536_v63 = vrot.slane %v6531_v38, 4  ;;  %v17688_v8 = vmul.f32 %v14722_v61, %v17448_v59 }
 0x324   : > { %v6524_v32 = vshll.u32 %v17627_v56, 16  ;;  %v6154_v19 = vmax.f32 %v17592_v52, 0.0  ;;  %v6155_v26 = vmax.f32 %v17595_v41, 0.0  ;;  %v6156_v20 = vmax.f32 %v17598_v27, 0.0 }
 0x325   : > { %v6535_v28 = vsel %vm14873_vm6, %v6527_v3, %v6534_v0  ;;  %v6704_v1 = vsel %vm14891_vm8, %v6536_v63, %v6703_v39  ;;  %v6157_v49 = vmax.f32 %v17601_v36, 0.0  ;;  %v6158_v42 = vmax.f32 %v17604_v16, 0.0 }
 0x326   : > { %6702 = vst [vmem:[#allocation2 + $0xb8] sm:$0xf] %v6535_v28  ;;  %6705 = vst [vmem:[#allocation2 + $0xbc] sm:$0x1] %v6704_v1  ;;  %v6159_v59 = vmax.f32 %v17607_v15, 0.0  ;;  %v6160_v54 = vmax.f32 %v17610_v29, 0.0  ;;  %v13147_v45 = vpack.c.bf16 %v6156_v20, %v6156_v20 }
 0x327   : > { %v6161_v13 = vmax.f32 %v17613_v50, 0.0  ;;  %v6162_v17 = vmax.f32 %v17616_v47, 0.0  ;;  %v6163_v23 = vmax.f32 %v17619_v6, 0.0  ;;  %v6164_v40 = vmax.f32 %v17622_v21, 0.0 }
 0x328   : > { %v6165_v2 = vmax.f32 %v17625_v22, 0.0  ;;  %v6166_v61 = vmax.f32 %v17630_v7, 0.0  ;;  %v6167_v37 = vmax.f32 %v17633_v31, 0.0  ;;  %v6168_v9 = vmax.f32 %v17639_v10, 0.0 }
 0x329   : > { %v6169_v52 = vmax.f32 %v17642_v30, 0.0  ;;  %v6170_v41 = vmax.f32 %v17645_v44, 0.0  ;;  %v6171_v27 = vmax.f32 %v17648_v24, 0.0  ;;  %v6172_v36 = vmax.f32 %v17652_v18, 0.0 }
 0x32a   : > { %v6173_v16 = vmax.f32 %v17655_v4, 0.0  ;;  %v6174_v15 = vmax.f32 %v17658_v14, 0.0  ;;  %v6175_v53 = vmax.f32 %v17661_v25, 0.0  ;;  %v6176_v33 = vmax.f32 %v17664_v34, 0.0 }
 0x32b   : > { %v6177_v29 = vmax.f32 %v17669_v5, 0.0  ;;  %v6178_v50 = vmax.f32 %v17672_v58, 0.0  ;;  %v6179_v47 = vmax.f32 %v17675_v51, 0.0  ;;  %v6180_v6 = vmax.f32 %v17678_v11, 0.0 }
 0x32c   : > { %v6181_v21 = vmax.f32 %v17681_v62, 0.0  ;;  %v6184_v22 = vmax.f32 %v17684_v60, 0.0  ;;  %v6185_v12 = vmax.f32 %v17688_v8, 0.0  ;;  %v13145_v7 = vpack.c.bf16 %v6154_v19, %v6154_v19 }
 0x32d   : > { %v13146_v31 = vpack.c.bf16 %v6155_v26, %v6155_v26  ;;  %v6721_v10 = vld [vmem:[#allocation2 + $0xbc] sm:$0x1]  ;;  %v6884_v30 = vld [vmem:[#allocation2 + $0xb8] sm:$0x8]  ;;  %v13148_v44 = vpack.c.bf16 %v6157_v49, %v6157_v49  ;;  %v17725_v24 = vpack.c.bf16 %v6158_v42, %v6158_v42  ;;  %v17727_v43 = vpack.c.bf16 %v6159_v59, %v6159_v59 }
 0x32e   : > { %v17729_v35 = vpack.c.bf16 %v6160_v54, %v6160_v54  ;;  %v12745_v57 = vrot.slane %v6884_v30, 11  ;;  %6724 = vst [vmem:[#allocation2 + $0xd4] sm:$0x1] %v6721_v10  ;;  %v17731_v18 = vpack.c.bf16 %v6161_v13, %v6161_v13  ;;  %v17733_v4 = vpack.c.bf16 %v6162_v17, %v6162_v17  ;;  %v7004_v25 = vld [vmem:[#allocation2 + $0xbc] sm:$0x1] }
 0x32f   : > { %v17735_v14 = vpack.c.bf16 %v6163_v23, %v6163_v23  ;;  %v17737_v34 = vpack.c.bf16 %v6164_v40, %v6164_v40  ;;  %v17739_v38 = vpack.c.bf16 %v6165_v2, %v6165_v2  ;;  %v17741_v5 = vpack.c.bf16 %v6166_v61, %v6166_v61 }
 0x330   : > { %v17743_v58 = vpack.c.bf16 %v6167_v37, %v6167_v37  ;;  %v7005_v51 = vsel %vm14925_vm9, %v12745_v57, %v7004_v25  ;;  %v17747_v11 = vpack.c.bf16 %v6168_v9, %v6168_v9  ;;  %v17749_v62 = vpack.c.bf16 %v6169_v52, %v6169_v52 }
 0x331   : > { %v17751_v60 = vpack.c.bf16 %v6170_v41, %v6170_v41  ;;  %7006 = vst [vmem:[#allocation2 + $0xbc] sm:$0x1] %v7005_v51  ;;  %v17753_v3 = vpack.c.bf16 %v6171_v27, %v6171_v27  ;;  %v17755_v0 = vpack.c.bf16 %v6172_v36, %v6172_v36  ;;  %v17757_v63 = vpack.c.bf16 %v6173_v16, %v6173_v16 }
 0x332   : > { %v17759_v8 = vpack.c.bf16 %v6174_v15, %v6174_v15  ;;  %v17761_v19 = vpack.c.bf16 %v6175_v53, %v6175_v53  ;;  %v17763_v26 = vpack.c.bf16 %v6176_v33, %v6176_v33  ;;  %v17765_v20 = vpack.c.bf16 %v6177_v29, %v6177_v29 }
 0x333   : > { %v17767_v28 = vpack.c.bf16 %v6178_v50, %v6178_v50  ;;  %v17769_v1 = vpack.c.bf16 %v6179_v47, %v6179_v47  ;;  %v17771_v49 = vpack.c.bf16 %v6180_v6, %v6180_v6  ;;  %v17773_v42 = vpack.c.bf16 %v6181_v21, %v6181_v21 }
 0x334   : > { %v17775_v59 = vpack.c.bf16 %v6184_v22, %v6184_v22  ;;  %v17777_v54 = vpack.c.bf16 %v6185_v12, %v6185_v12  ;;  %v6283_v13 = vshrl.u32 %v13145_v7, 16  ;;  %v6286_v17 = vshll.u32 %v13145_v7, 16 }
 0x335   : > { %v6291_v23 = vshrl.u32 %v13146_v31, 16  ;;  %v6294_v40 = vshll.u32 %v13146_v31, 16  ;;  %v6300_v2 = vshrl.u32 %v13147_v45, 16  ;;  %v6303_v61 = vshll.u32 %v13147_v45, 16 }
 0x336   : > { %v6308_v37 = vshrl.u32 %v13148_v44, 16  ;;  %v6285_v9 = vrot.slane %v6283_v13, 7  ;;  %v6311_v41 = vshll.u32 %v13148_v44, 16  ;;  %v6317_v27 = vshrl.u32 %v17725_v24, 16 }
 0x337   : > { %v17779_v52 = vrot.slane %v6291_v23, 7  ;;  %v6302_v36 = vrot.slane %v6300_v2, 7  ;;  %v6320_v15 = vshll.u32 %v17725_v24, 16  ;;  %v6325_v53 = vshrl.u32 %v17727_v43, 16 }
 0x338   : > { %v17782_v16 = vrot.slane %v6308_v37, 7  ;;  %v17786_v33 = vor.u32 %v6286_v17, %v6285_v9  ;;  %v6289_v29 = vrot.slane %v6285_v9, 4  ;;  %v6319_v31 = vrot.slane %v6317_v27, 7 }
 0x339   : > { %v6296_v50 = vor.u32 %v6294_v40, %v17779_v52  ;;  %v6298_v47 = vrot.slane %v17779_v52, 4  ;;  %v17790_v6 = vor.u32 %v6303_v61, %v6302_v36  ;;  %v6306_v21 = vrot.slane %v6302_v36, 4 }
 0x33a   : > { %v6313_v22 = vor.u32 %v6311_v41, %v17782_v16  ;;  %v17796_v45 = vrot.slane %v6325_v53, 7  ;;  %v6328_v10 = vshll.u32 %v17727_v43, 16  ;;  %v6334_v44 = vshrl.u32 %v17729_v35, 16 }
 0x33b   : > { %v6297_v7 = vsel %vm14873_vm6, %v6289_v29, %v6296_v50  ;;  %v6337_v24 = vshll.u32 %v17729_v35, 16  ;;  %v6342_v57 = vshrl.u32 %v17731_v18, 16  ;;  %v17804_v25 = vor.u32 %v6320_v15, %v6319_v31  ;;  %v14754_v15 = vld [vmem:[#allocation2 + $0xc] sm:$0xf] }
 0x33c   : > { %v6314_v30 = vsel %vm14873_vm6, %v6306_v21, %v6313_v22  ;;  %6604 = vst [vmem:[#allocation2 + $0x10] sm:$0xf] %v6297_v7  ;;  %v6323_v51 = vrot.slane %v6319_v31, 4  ;;  %v6330_v13 = vor.u32 %v6328_v10, %v17796_v45  ;;  %v6336_v23 = vrot.slane %v6334_v44, 7 }
 0x33d   : > { %6611 = vst [vmem:[#allocation2 + $0x1c] sm:$0xf] %v6314_v30  ;;  %v17808_v43 = vrot.slane %v6342_v57, 7  ;;  %v6345_v40 = vshll.u32 %v17731_v18, 16  ;;  %v6351_v2 = vshrl.u32 %v17733_v4, 16  ;;  %v6354_v61 = vshll.u32 %v17733_v4, 16 }
 0x33e   : > { %v6331_v35 = vsel %vm14873_vm6, %v6323_v51, %v6330_v13  ;;  %v6359_v37 = vshrl.u32 %v17735_v14, 16  ;;  %v6362_v9 = vshll.u32 %v17735_v14, 16  ;;  %v17817_v41 = vor.u32 %v6337_v24, %v6336_v23  ;;  %v17954_v30 = vld [vmem:[#allocation2 + $0x60] sm:$0xf] }
 0x33f   : > { %v6340_v27 = vrot.slane %v6336_v23, 4  ;;  %v6347_v36 = vor.u32 %v6345_v40, %v17808_v43  ;;  %6618 = vst [vmem:[#allocation2 + $0x28] sm:$0xf] %v6331_v35  ;;  %v6353_v18 = vrot.slane %v6351_v2, 7  ;;  %v6368_v29 = vshrl.u32 %v17737_v34, 16 }
 0x340   : > { %v17821_v53 = vrot.slane %v6359_v37, 7  ;;  %v6371_v50 = vshll.u32 %v17737_v34, 16  ;;  %v6376_v14 = vshrl.u32 %v17739_v38, 16  ;;  %v6379_v21 = vshll.u32 %v17739_v38, 16 }
 0x341   : > { %v6348_v4 = vsel %vm14873_vm6, %v6340_v27, %v6347_v36  ;;  %v6385_v22 = vshrl.u32 %v17741_v5, 16  ;;  %v17830_v7 = vor.u32 %v6354_v61, %v6353_v18  ;;  %v6357_v31 = vrot.slane %v6353_v18, 4 }
 0x342   : > { %v6364_v10 = vor.u32 %v6362_v9, %v17821_v53  ;;  %6625 = vst [vmem:[#allocation2 + $0x34] sm:$0xf] %v6348_v4  ;;  %v6370_v44 = vrot.slane %v6368_v29, 7  ;;  %v17834_v24 = vrot.slane %v6376_v14, 7  ;;  %v6388_v57 = vshll.u32 %v17741_v5, 16 }
 0x343   : > { %v6387_v34 = vrot.slane %v6385_v22, 7  ;;  %v6393_v38 = vshrl.u32 %v17743_v58, 16  ;;  %v6396_v13 = vshll.u32 %v17743_v58, 16  ;;  %v6402_v23 = vshrl.u32 %v17747_v11, 16 }
 0x344   : > { %v6365_v51 = vsel %vm14873_vm6, %v6357_v31, %v6364_v10  ;;  %v6714_v40 = vld [vmem:[#allocation2 + $0x1c] sm:$0xf]  ;;  %v17842_v2 = vor.u32 %v6371_v50, %v6370_v44  ;;  %v6374_v35 = vrot.slane %v6370_v44, 4  ;;  %v6381_v61 = vor.u32 %v6379_v21, %v17834_v24 }
 0x345   : > { %6632 = vst [vmem:[#allocation2 + $0x40] sm:$0xf] %v6365_v51  ;;  %6717 = vst [vmem:[#allocation2 + $0x4] sm:$0xf] %v6714_v40  ;;  %v17846_v5 = vor.u32 %v6388_v57, %v6387_v34  ;;  %v6391_v9 = vrot.slane %v6387_v34, 4  ;;  %v17848_v27 = vrot.slane %v6393_v38, 7  ;;  %v6602_v12 = vsel %vm14884_vm7, %v17786_v33, %v14754_v15 }
 0x346   : > { %v6404_v36 = vrot.slane %v6402_v23, 7  ;;  %v6382_v58 = vsel %vm14873_vm6, %v6374_v35, %v6381_v61  ;;  %v6405_v18 = vshll.u32 %v17747_v11, 16  ;;  %v6410_v29 = vshrl.u32 %v17749_v62, 16  ;;  %6603 = vst [vmem:[#allocation2 + $0xc] sm:$0xf] %v6602_v12 }
 0x347   : > { %v6413_v50 = vshll.u32 %v17749_v62, 16  ;;  %v6398_v4 = vor.u32 %v6396_v13, %v17848_v27  ;;  %v6419_v22 = vshrl.u32 %v17751_v60, 16  ;;  %6639 = vst [vmem:[#allocation2 + $0x4c] sm:$0xf] %v6382_v58  ;;  %v6422_v44 = vshll.u32 %v17751_v60, 16 }
 0x348   : > { %v6408_v21 = vrot.slane %v6404_v36, 4  ;;  %v17858_v31 = vor.u32 %v6405_v18, %v6404_v36  ;;  %v17860_v10 = vrot.slane %v6410_v29, 7  ;;  %v6427_v11 = vshrl.u32 %v17753_v3, 16  ;;  %v17949_v58 = vld [vmem:[#allocation2 + $0x54] sm:$0xf] }
 0x349   : > { %v6399_v34 = vsel %vm14873_vm6, %v6391_v9, %v6398_v4  ;;  %v6421_v62 = vrot.slane %v6419_v22, 7  ;;  %v6430_v57 = vshll.u32 %v17753_v3, 16  ;;  %v6436_v51 = vshrl.u32 %v17755_v0, 16  ;;  %v6661_v13 = vld [vmem:[#allocation2 + $0x74] sm:$0x1] }
 0x34a   : > { %v6415_v38 = vor.u32 %v6413_v50, %v17860_v10  ;;  %v17870_v23 = vrot.slane %v6427_v11, 7  ;;  %v6439_v40 = vshll.u32 %v17755_v0, 16  ;;  %6646 = vst [vmem:[#allocation2 + $0x58] sm:$0xf] %v6399_v34  ;;  %v6444_v9 = vshrl.u32 %v17757_v63, 16 }
 0x34b   : > { %v17873_v60 = vor.u32 %v6422_v44, %v6421_v62  ;;  %v6425_v35 = vrot.slane %v6421_v62, 4  ;;  %v6438_v61 = vrot.slane %v6436_v51, 7  ;;  %v6447_v18 = vshll.u32 %v17757_v63, 16  ;;  %v6682_v15 = vld [vmem:[#allocation2 + $0x98] sm:$0x1] }
 0x34c   : > { %v6416_v3 = vsel %vm14873_vm6, %v6408_v21, %v6415_v38  ;;  %v6432_v36 = vor.u32 %v6430_v57, %v17870_v23  ;;  %v17883_v0 = vrot.slane %v6444_v9, 7  ;;  %v6453_v4 = vshrl.u32 %v17759_v8, 16 }
 0x34d   : > { %v17881_v29 = vor.u32 %v6439_v40, %v6438_v61  ;;  %v6442_v50 = vrot.slane %v6438_v61, 4  ;;  %6653 = vst [vmem:[#allocation2 + $0x64] sm:$0xf] %v6416_v3  ;;  %v6456_v44 = vshll.u32 %v17759_v8, 16  ;;  %v6461_v21 = vshrl.u32 %v17761_v19, 16 }
 0x34e   : > { %v6433_v22 = vsel %vm14873_vm6, %v6425_v35, %v6432_v36  ;;  %v6464_v11 = vshll.u32 %v17761_v19, 16  ;;  %v6449_v34 = vor.u32 %v6447_v18, %v17883_v0  ;;  %v6455_v62 = vrot.slane %v6453_v4, 7 }
 0x34f   : > { %v6470_v57 = vshrl.u32 %v17763_v26, 16  ;;  %6660 = vst [vmem:[#allocation2 + $0x70] sm:$0xf] %v6433_v22  ;;  %v17894_v51 = vrot.slane %v6461_v21, 7  ;;  %v6473_v38 = vshll.u32 %v17763_v26, 16  ;;  %v6478_v40 = vshrl.u32 %v17765_v20, 16 }
 0x350   : > { %v6481_v8 = vshll.u32 %v17765_v20, 16  ;;  %v6450_v35 = vsel %vm14873_vm6, %v6442_v50, %v6449_v34  ;;  %v17901_v19 = vor.u32 %v6456_v44, %v6455_v62  ;;  %v6459_v61 = vrot.slane %v6455_v62, 4 }
 0x351   : > { %v6472_v9 = vrot.slane %v6470_v57, 7  ;;  %v6466_v3 = vor.u32 %v6464_v11, %v17894_v51  ;;  %v17905_v18 = vrot.slane %v6478_v40, 7  ;;  %v6487_v4 = vshrl.u32 %v17767_v28, 16  ;;  %6667 = vst [vmem:[#allocation2 + $0x7c] sm:$0xf] %v6450_v35 }
 0x352   : > { %v6490_v20 = vshll.u32 %v17767_v28, 16  ;;  %v6495_v50 = vshrl.u32 %v17769_v1, 16  ;;  %v6498_v57 = vshll.u32 %v17769_v1, 16  ;;  %v6507_v40 = vshll.u32 %v17771_v49, 16  ;;  %v6608_v28 = vld [vmem:[#allocation2 + $0x18] sm:$0xf] }
 0x353   : > { %v17908_v26 = vor.u32 %v6473_v38, %v6472_v9  ;;  %v6476_v22 = vrot.slane %v6472_v9, 4  ;;  %v6467_v44 = vsel %vm14873_vm6, %v6459_v61, %v6466_v3  ;;  %v6483_v21 = vor.u32 %v6481_v8, %v17905_v18  ;;  %v6605_v35 = vld [vmem:[#allocation2 + $0x14] sm:$0x1] }
 0x354   : > { %v6489_v34 = vrot.slane %v6487_v4, 7  ;;  %v17916_v62 = vrot.slane %v6495_v50, 7  ;;  %v6504_v38 = vshrl.u32 %v17771_v49, 16  ;;  %6674 = vst [vmem:[#allocation2 + $0x88] sm:$0xf] %v6467_v44  ;;  %v6512_v3 = vshrl.u32 %v17773_v42, 16 }
 0x355   : > { %v6484_v9 = vsel %vm14873_vm6, %v6476_v22, %v6483_v21  ;;  %v6612_v4 = vld [vmem:[#allocation2 + $0x20] sm:$0x1]  ;;  %v6515_v36 = vshll.u32 %v17773_v42, 16  ;;  %v6615_v49 = vld [vmem:[#allocation2 + $0x24] sm:$0xf]  ;;  %v17934_v22 = vor.u32 %v6524_v32, %v17666_v55  ;;  %v6541_v21 = vshll.u32 %v17775_v59, 16 }
 0x356   : > { %v17923_v61 = vor.u32 %v6490_v20, %v6489_v34  ;;  %v6493_v8 = vrot.slane %v6489_v34, 4  ;;  %v6500_v50 = vor.u32 %v6498_v57, %v17916_v62  ;;  %v6506_v11 = vrot.slane %v6504_v38, 7  ;;  %6681 = vst [vmem:[#allocation2 + $0x94] sm:$0xf] %v6484_v9  ;;  %v6619_v44 = vld [vmem:[#allocation2 + $0x2c] sm:$0x1] }
 0x357   : > { %v17929_v63 = vrot.slane %v6512_v3, 7  ;;  %21064 = vst [vmem:[#allocation11_spill] sm:$0xff] %v17934_v22  ;;  %v6538_v20 = vshrl.u32 %v17775_v59, 16  ;;  %v17938_v34 = vld [vmem:[#allocation2 + $0x30] sm:$0xf]  ;;  %v6546_v56 = vshrl.u32 %v17777_v54, 16  ;;  %v6616_v12 = vsel %vm14884_vm7, %v17804_v25, %v6615_v49 }
 0x358   : > { %v6626_v57 = vld [vmem:[#allocation2 + $0x38] sm:$0x1]  ;;  %v17940_v38 = vld [vmem:[#allocation2 + $0x3c] sm:$0xf]  ;;  %v6633_v42 = vld [vmem:[#allocation2 + $0x44] sm:$0x1]  ;;  %v6501_v9 = vsel %vm14873_vm6, %v6493_v8, %v6500_v50  ;;  %v17944_v3 = vor.u32 %v6507_v40, %v6506_v11 }
 0x359   : > { %21063 = vst [vmem:[#allocation12_spill] sm:$0xff] %v17929_v63  ;;  %v6510_v1 = vrot.slane %v6506_v11, 4  ;;  %v17947_v55 = vld [vmem:[#allocation2 + $0x48] sm:$0xf]  ;;  %v6640_v32 = vld [vmem:[#allocation2 + $0x50] sm:$0x1]  ;;  %v6517_v59 = vor.u32 %v6515_v36, %v17929_v63  ;;  %v6606_v36 = vsel %vm14891_vm8, %v6298_v47, %v6605_v35 }
 0x35a   : > { %v6540_v14 = vrot.slane %v6538_v20, 7  ;;  %v6549_v37 = vshll.u32 %v17777_v54, 16  ;;  %6688 = vst [vmem:[#allocation2 + $0xa0] sm:$0xf] %v6501_v9  ;;  %v6654_v40 = vld [vmem:[#allocation2 + $0x68] sm:$0x1]  ;;  %v6609_v54 = vsel %vm14884_vm7, %v17790_v6, %v6608_v28 }
 0x35b   : > { %v6647_v8 = vld [vmem:[#allocation2 + $0x5c] sm:$0x1]  ;;  %v17956_v11 = vld [vmem:[#allocation2 + $0x6c] sm:$0xf]  ;;  %v17958_v50 = vrot.slane %v6546_v56, 7  ;;  %v6518_v39 = vsel %vm14873_vm6, %v6510_v1, %v6517_v59  ;;  %v21066_v52 = vrot.slane %v17782_v16, 4 }
 0x35c   : > { %v17970_v20 = vld [vmem:[#allocation2 + $0x78] sm:$0xf]  ;;  %v6668_v9 = vld [vmem:[#allocation2 + $0x80] sm:$0x1]  ;;  %v17972_v56 = vld [vmem:[#allocation2 + $0x84] sm:$0xf]  ;;  %v17976_v22 = vor.u32 %v6541_v21, %v6540_v14 }
 0x35d   : > { %v6544_v33 = vrot.slane %v6540_v14, 4  ;;  %6607 = vst [vmem:[#allocation2 + $0x14] sm:$0x1] %v6606_v36  ;;  %6610 = vst [vmem:[#allocation2 + $0x18] sm:$0xf] %v6609_v54  ;;  %v6613_v47 = vsel %vm14891_vm8, %v21066_v52, %v6612_v4  ;;  %v6551_v63 = vor.u32 %v6549_v37, %v17958_v50  ;;  %v6553_v1 = vrot.slane %v17958_v50, 4 }
 0x35e   : > { %v17982_v6 = vld [vmem:[#allocation2 + $0x90] sm:$0xf]  ;;  %v6675_v28 = vld [vmem:[#allocation2 + $0x8c] sm:$0x1]  ;;  %v17984_v35 = vld [vmem:[#allocation2 + $0x9c] sm:$0xf]  ;;  %v6623_v37 = vsel %vm14884_vm7, %v17817_v41, %v17938_v34  ;;  %v6637_v41 = vsel %vm14884_vm7, %v17842_v2, %v17947_v55  ;;  %v6644_v34 = vsel %vm14884_vm7, %v17846_v5, %v17949_v58  ;;  %v6658_v58 = vsel %vm14884_vm7, %v17873_v60, %v17956_v11 }
 0x35f   : > { %6614 = vst [vmem:[#allocation2 + $0x20] sm:$0x1] %v6613_v47  ;;  %v21067_v16 = vrot.slane %v17796_v45, 4  ;;  %6695 = vst [vmem:[#allocation2 + $0xac] sm:$0xf] %v6518_v39  ;;  %v21068_v25 = vrot.slane %v17808_v43, 4  ;;  %v6630_v39 = vsel %vm14884_vm7, %v17830_v7, %v17940_v38  ;;  %v6552_v43 = vsel %vm14873_vm6, %v6544_v33, %v6551_v63 }
 0x360   : > { %v17995_v4 = vld [vmem:[#allocation2 + $0xa8] sm:$0xf]  ;;  %v6696_v21 = vld [vmem:[#allocation2 + $0xb0] sm:$0x1]  ;;  %v6689_v59 = vld [vmem:[#allocation2 + $0xa4] sm:$0x1] }
 0x361   : > { %v6620_v14 = vsel %vm14891_vm8, %v21067_v16, %v6619_v44  ;;  %v17997_v36 = vld [vmem:[#allocation2 + $0xb4] sm:$0xf]  ;;  %v6627_v45 = vsel %vm14891_vm8, %v21068_v25, %v6626_v57  ;;  %v21069_v49 = vrot.slane %v17821_v53, 4  ;;  %6617 = vst [vmem:[#allocation2 + $0x24] sm:$0xf] %v6616_v12  ;;  %v21070_v7 = vrot.slane %v17834_v24, 4 }
 0x362   : > { %6621 = vst [vmem:[#allocation2 + $0x2c] sm:$0x1] %v6620_v14  ;;  %v18015_v54 = vld [vmem:[#allocation2 + $0xc0] sm:$0xf]  ;;  %v6710_v52 = vld [vmem:[#allocation2 + $0xc8] sm:$0x1]  ;;  %v6651_v24 = vsel %vm14884_vm7, %v17858_v31, %v17954_v30 }
 0x363   : > { %v6634_v44 = vsel %vm14891_vm8, %v21069_v49, %v6633_v42  ;;  %6628 = vst [vmem:[#allocation2 + $0x38] sm:$0x1] %v6627_v45  ;;  %v6641_v53 = vsel %vm14891_vm8, %v21070_v7, %v6640_v32  ;;  %v18031_v57 = vld [vmem:[#allocation2 + $0x10] sm:$0x8]  ;;  %6624 = vst [vmem:[#allocation2 + $0x30] sm:$0xf] %v6623_v37  ;;  %v6711_v16 = vsel %vm14891_vm8, %v6553_v1, %v6710_v52 }
 0x364   : > { %6635 = vst [vmem:[#allocation2 + $0x44] sm:$0x1] %v6634_v44  ;;  %6631 = vst [vmem:[#allocation2 + $0x3c] sm:$0xf] %v6630_v39  ;;  %v21071_v46 = vrot.slane %v17848_v27, 4  ;;  %v21072_v63 = vrot.slane %v17860_v10, 4  ;;  %v6665_v10 = vsel %vm14884_vm7, %v17881_v29, %v17970_v20 }
 0x365   : > { %6642 = vst [vmem:[#allocation2 + $0x50] sm:$0x1] %v6641_v53  ;;  %6709 = vst [vmem:[#allocation2 + $0xc4] sm:$0xf] %v6552_v43  ;;  %v18049_v27 = vld [vmem:[#allocation2 + $0x28] sm:$0x8] }
 0x366   : > { %v6648_v2 = vsel %vm14891_vm8, %v21071_v46, %v6647_v8  ;;  %v6655_v5 = vsel %vm14891_vm8, %v21072_v63, %v6654_v40  ;;  %v18051_v38 = vld [vmem:[#allocation2 + $0x34] sm:$0x8]  ;;  %v18053_v42 = vld [vmem:[#allocation2 + $0x40] sm:$0x8]  ;;  %v18055_v55 = vld [vmem:[#allocation2 + $0x4c] sm:$0x8]  ;;  %v6672_v40 = vsel %vm14884_vm7, %v17901_v19, %v17972_v56  ;;  %v6679_v19 = vsel %vm14884_vm7, %v17908_v26, %v17982_v6 }
 0x367   : > { %6638 = vst [vmem:[#allocation2 + $0x48] sm:$0xf] %v6637_v41  ;;  %6645 = vst [vmem:[#allocation2 + $0x54] sm:$0xf] %v6644_v34  ;;  %v21073_v30 = vrot.slane %v17870_v23, 4  ;;  %v21074_v60 = vrot.slane %v17883_v0, 4  ;;  %v6686_v56 = vsel %vm14884_vm7, %v17923_v61, %v17984_v35 }
 0x368   : > { %6649 = vst [vmem:[#allocation2 + $0x5c] sm:$0x1] %v6648_v2  ;;  %6656 = vst [vmem:[#allocation2 + $0x68] sm:$0x1] %v6655_v5  ;;  %v18073_v8 = vld [vmem:[#allocation2 + $0x1c] sm:$0x8] }
 0x369   : > { %v6662_v31 = vsel %vm14891_vm8, %v21073_v30, %v6661_v13  ;;  %v6669_v32 = vsel %vm14891_vm8, %v21074_v60, %v6668_v9  ;;  %v18075_v23 = vld [vmem:[#allocation2 + $0x58] sm:$0x8]  ;;  %v18077_v13 = vld [vmem:[#allocation2 + $0x64] sm:$0x8]  ;;  %v18079_v11 = vld [vmem:[#allocation2 + $0x70] sm:$0x8] }
 0x36a   : > { %6652 = vst [vmem:[#allocation2 + $0x60] sm:$0xf] %v6651_v24  ;;  %6659 = vst [vmem:[#allocation2 + $0x6c] sm:$0xf] %v6658_v58  ;;  %v21075_v29 = vrot.slane %v17894_v51, 4  ;;  %v21076_v20 = vrot.slane %v17905_v18, 4  ;;  %v6693_v18 = vsel %vm14884_vm7, %v17944_v3, %v17995_v4  ;;  %v6707_v3 = vsel %vm14884_vm7, %v17976_v22, %v18015_v54 }
 0x36b   : > { %6663 = vst [vmem:[#allocation2 + $0x74] sm:$0x1] %v6662_v31  ;;  %6670 = vst [vmem:[#allocation2 + $0x80] sm:$0x1] %v6669_v32  ;;  %v18097_v33 = vld [vmem:[#allocation2 + $0x7c] sm:$0x8] }
 0x36c   : > { %v6676_v0 = vsel %vm14891_vm8, %v21075_v29, %v6675_v28  ;;  %v6683_v9 = vsel %vm14891_vm8, %v21076_v20, %v6682_v15  ;;  %6666 = vst [vmem:[#allocation2 + $0x78] sm:$0xf] %v6665_v10  ;;  %6673 = vst [vmem:[#allocation2 + $0x84] sm:$0xf] %v6672_v40  ;;  %v21077_v51 = vrot.slane %v17916_v62, 4  ;;  %v21078_v47 = vld [vmem:[#allocation12_spill] sm:$0xff] }
 0x36d   : > { %6677 = vst [vmem:[#allocation2 + $0x8c] sm:$0x1] %v6676_v0  ;;  %6684 = vst [vmem:[#allocation2 + $0x98] sm:$0x1] %v6683_v9  ;;  %v21079_v6 = vrot.slane %v21078_v47, 4  ;;  %v21080_v15 = vld [vmem:[#allocation11_spill] sm:$0xff] }
 0x36e   : > { %v6690_v26 = vsel %vm14891_vm8, %v21077_v51, %v6689_v59  ;;  %v6700_v28 = vsel %vm14884_vm7, %v21080_v15, %v17997_v36  ;;  %v18115_v35 = vld [vmem:[#allocation2 + $0x88] sm:$0x8]  ;;  %v18117_v62 = vld [vmem:[#allocation2 + $0x94] sm:$0x8]  ;;  %6680 = vst [vmem:[#allocation2 + $0x90] sm:$0xf] %v6679_v19 }
 0x36f   : > { %v6697_v61 = vsel %vm14891_vm8, %v21079_v6, %v6696_v21  ;;  %6687 = vst [vmem:[#allocation2 + $0x9c] sm:$0xf] %v6686_v56  ;;  %v6713_v12 = vld [vmem:[#allocation2 + $0x18] sm:$0xf]  ;;  %6691 = vst [vmem:[#allocation2 + $0xa4] sm:$0x1] %v6690_v26 }
 0x370   : > { %6698 = vst [vmem:[#allocation2 + $0xb0] sm:$0x1] %v6697_v61  ;;  %v18127_v14 = vld [vmem:[#allocation2 + $0xa0] sm:$0x8]  ;;  %v18129_v4 = vld [vmem:[#allocation2 + $0xac] sm:$0x8] }
 0x371   : > { %v12731_v21 = vrot.slane %v18031_v57, 11  ;;  %6694 = vst [vmem:[#allocation2 + $0xa8] sm:$0xf] %v6693_v18  ;;  %6701 = vst [vmem:[#allocation2 + $0xb4] sm:$0xf] %v6700_v28  ;;  %v12733_v59 = vrot.slane %v18049_v27, 11 }
 0x372   : > { %6716 = vst [vmem:[#allocation2] sm:$0xf] %v6713_v12  ;;  %6712 = vst [vmem:[#allocation2 + $0xc8] sm:$0x1] %v6711_v16  ;;  %v12734_v17 = vrot.slane %v18051_v38, 11  ;;  %v12735_v22 = vrot.slane %v18053_v42, 11 }
 0x373   : > { %v12736_v50 = vrot.slane %v18055_v55, 11  ;;  %v6962_v36 = vld [vmem:[#allocation2 + $0x14] sm:$0x1]  ;;  %v6968_v1 = vld [vmem:[#allocation2 + $0x2c] sm:$0x1]  ;;  %v12732_v37 = vrot.slane %v18073_v8, 11 }
 0x374   : > { %6708 = vst [vmem:[#allocation2 + $0xc0] sm:$0xf] %v6707_v3  ;;  %v12737_v25 = vrot.slane %v18075_v23, 11  ;;  %v12738_v45 = vrot.slane %v18077_v13, 11  ;;  %v12739_v39 = vrot.slane %v18079_v11, 11  ;;  %v12740_v54 = vrot.slane %v18097_v33, 11 }
 0x375   : > { %v6971_v49 = vld [vmem:[#allocation2 + $0x38] sm:$0x1]  ;;  %v6885_v44 = vld [vmem:[#allocation2 + $0xc4] sm:$0x8]  ;;  %v12741_v52 = vrot.slane %v18115_v35, 11  ;;  %v12742_v43 = vrot.slane %v18117_v62, 11  ;;  %v6963_v46 = vsel %vm14925_vm9, %v12731_v21, %v6962_v36  ;;  %v6969_v24 = vsel %vm14925_vm9, %v12733_v59, %v6968_v1 }
 0x376   : > { %v12743_v41 = vrot.slane %v18127_v14, 11  ;;  %v18144_v7 = vld [vmem:[#allocation2 + $0x4] sm:$0xf]  ;;  %v12744_v53 = vrot.slane %v18129_v4, 11  ;;  %v12746_v34 = vrot.slane %v6885_v44, 11  ;;  %v6972_v38 = vsel %vm14925_vm9, %v12734_v17, %v6971_v49 }
 0x377   : > { %v6965_v2 = vld [vmem:[#allocation2 + $0x20] sm:$0x1]  ;;  %v6974_v63 = vld [vmem:[#allocation2 + $0x44] sm:$0x1]  ;;  %v6977_v5 = vld [vmem:[#allocation2 + $0x50] sm:$0x1] }
 0x378   : > { %v6726_v58 = vld [vmem:[#allocation2 + $0xc] sm:$0x2]  ;;  %v18151_v27 = vld [vmem:[#allocation2 + $0x10] sm:$0xf]  ;;  %6964 = vst [vmem:[#allocation2 + $0x14] sm:$0x1] %v6963_v46  ;;  %v6975_v42 = vsel %vm14925_vm9, %v12735_v22, %v6974_v63  ;;  %v6978_v55 = vsel %vm14925_vm9, %v12736_v50, %v6977_v5  ;;  %v6966_v29 = vsel %vm14925_vm9, %v12732_v37, %v6965_v2 }
 0x379   : > { %6970 = vst [vmem:[#allocation2 + $0x2c] sm:$0x1] %v6969_v24  ;;  %v6980_v30 = vld [vmem:[#allocation2 + $0x5c] sm:$0x1]  ;;  %v6983_v31 = vld [vmem:[#allocation2 + $0x68] sm:$0x1] }
 0x37a   : > { %v6986_v10 = vld [vmem:[#allocation2 + $0x74] sm:$0x1]  ;;  %6973 = vst [vmem:[#allocation2 + $0x38] sm:$0x1] %v6972_v38  ;;  %6976 = vst [vmem:[#allocation2 + $0x44] sm:$0x1] %v6975_v42  ;;  %v6981_v60 = vsel %vm14925_vm9, %v12737_v25, %v6980_v30  ;;  %v6984_v32 = vsel %vm14925_vm9, %v12738_v45, %v6983_v31 }
 0x37b   : > { %6979 = vst [vmem:[#allocation2 + $0x50] sm:$0x1] %v6978_v55  ;;  %v6987_v40 = vsel %vm14925_vm9, %v12739_v39, %v6986_v10  ;;  %v6989_v8 = vld [vmem:[#allocation2 + $0x80] sm:$0x1]  ;;  %v6992_v23 = vld [vmem:[#allocation2 + $0x8c] sm:$0x1] }
 0x37c   : > { %v6995_v13 = vld [vmem:[#allocation2 + $0x98] sm:$0x1]  ;;  %v18165_v11 = vld [vmem:[#allocation2 + $0x1c] sm:$0xf]  ;;  %6982 = vst [vmem:[#allocation2 + $0x5c] sm:$0x1] %v6981_v60  ;;  %v6990_v0 = vsel %vm14925_vm9, %v12740_v54, %v6989_v8  ;;  %v6993_v19 = vsel %vm14925_vm9, %v12741_v52, %v6992_v23 }
 0x37d   : > { %6985 = vst [vmem:[#allocation2 + $0x68] sm:$0x1] %v6984_v32  ;;  %6988 = vst [vmem:[#allocation2 + $0x74] sm:$0x1] %v6987_v40  ;;  %v6996_v20 = vsel %vm14925_vm9, %v12742_v43, %v6995_v13  ;;  %v6998_v9 = vld [vmem:[#allocation2 + $0xa4] sm:$0x1] }
 0x37e   : > { %v7001_v56 = vld [vmem:[#allocation2 + $0xb0] sm:$0x1]  ;;  %v6725_v33 = vld [vmem:[#allocation2] sm:$0x2]  ;;  %v18175_v51 = vld [vmem:[#allocation2 + $0x4] sm:$0x8]  ;;  %v6999_v26 = vsel %vm14925_vm9, %v12743_v41, %v6998_v9 }
 0x37f   : > { %6991 = vst [vmem:[#allocation2 + $0x80] sm:$0x1] %v6990_v0  ;;  %6994 = vst [vmem:[#allocation2 + $0x8c] sm:$0x1] %v6993_v19  ;;  %v7002_v18 = vsel %vm14925_vm9, %v12744_v53, %v7001_v56  ;;  %v7007_v47 = vld [vmem:[#allocation2 + $0xc8] sm:$0x1] }
 0x380   : > { %6997 = vst [vmem:[#allocation2 + $0x98] sm:$0x1] %v6996_v20  ;;  %v12712_v6 = vrot.slane %v6725_v33, 9  ;;  %v6815_v61 = vld [vmem:[#allocation2] sm:$0x1]  ;;  %v7091_v15 = vshrl.u32 %v18144_v7, 16  ;;  %v7008_v28 = vsel %vm14925_vm9, %v12746_v34, %v7007_v47 }
 0x381   : > { %7000 = vst [vmem:[#allocation2 + $0xa4] sm:$0x1] %v6999_v26  ;;  %7003 = vst [vmem:[#allocation2 + $0xb0] sm:$0x1] %v7002_v18  ;;  %v12713_v35 = vrot.slane %v6726_v58, 9  ;;  %v7115_v12 = vshrl.u32 %v18151_v27, 16 }
 0x382   : > { %v6818_v62 = vld [vmem:[#allocation2 + $0xc] sm:$0x1]  ;;  %v6727_v3 = vld [vmem:[#allocation2 + $0x18] sm:$0x2]  ;;  %v18185_v16 = vld [vmem:[#allocation2 + $0x28] sm:$0xf]  ;;  %v6816_v14 = vsel %vm14891_vm8, %v12712_v6, %v6815_v61 }
 0x383   : > { %7009 = vst [vmem:[#allocation2 + $0xc8] sm:$0x1] %v7008_v28  ;;  %v12714_v4 = vrot.slane %v6727_v3, 9  ;;  %v6821_v21 = vld [vmem:[#allocation2 + $0x18] sm:$0x1]  ;;  %v6819_v17 = vsel %vm14891_vm8, %v12713_v35, %v6818_v62  ;;  %v7139_v22 = vshrl.u32 %v18165_v11, 16 }
 0x384   : > { %v6715_v59 = vld [vmem:[#allocation2 + $0x20] sm:$0x1]  ;;  %6817 = vst [vmem:[#allocation2] sm:$0x1] %v6816_v14  ;;  %v7087_v50 = vshll.u32 %v18144_v7, 16  ;;  %v7093_v36 = vrot.slane %v7091_v15, 4 }
 0x385   : > { %6718 = vst [vmem:[#allocation2 + $0x8] sm:$0x1] %v6715_v59  ;;  %6967 = vst [vmem:[#allocation2 + $0x20] sm:$0x1] %v6966_v29  ;;  %v6728_v1 = vld [vmem:[#allocation2 + $0x24] sm:$0x2]  ;;  %v6822_v25 = vsel %vm14891_vm8, %v12714_v4, %v6821_v21 }
 0x386   : > { %v18193_v37 = vld [vmem:[#allocation2 + $0x34] sm:$0xf]  ;;  %6820 = vst [vmem:[#allocation2 + $0xc] sm:$0x1] %v6819_v17  ;;  %v12730_v45 = vrot.slane %v18175_v51, 11  ;;  %v12715_v39 = vrot.slane %v6728_v1, 9 }
 0x387   : > { %v6824_v49 = vld [vmem:[#allocation2 + $0x24] sm:$0x1]  ;;  %v18198_v44 = vld [vmem:[#allocation2 + $0x14] sm:$0x1]  ;;  %6823 = vst [vmem:[#allocation2 + $0x18] sm:$0x1] %v6822_v25 }
 0x388   : > { %v18200_v54 = vrot.slane %v7087_v50, 5  ;;  %v7111_v52 = vshll.u32 %v18151_v27, 16  ;;  %v7117_v43 = vrot.slane %v7115_v12, 4  ;;  %v7121_v41 = vshll.u32 %v18198_v44, 16  ;;  %v6729_v53 = vld [vmem:[#allocation2 + $0x30] sm:$0x2] }
 0x389   : > { %v6825_v34 = vsel %vm14891_vm8, %v12715_v39, %v6824_v49  ;;  %v7163_v46 = vshrl.u32 %v18185_v16, 16  ;;  %v12716_v2 = vrot.slane %v6729_v53, 9  ;;  %v7135_v24 = vshll.u32 %v18165_v11, 16  ;;  %v18208_v63 = vld [vmem:[#allocation2 + $0x40] sm:$0xf]  ;;  %v14633_v62 = vld [vmem:[%s20859_s3 + $0xf0] sm:$0xff]  }
 0x38a   : > { %v7094_v5 = vor.u32 %v7093_v36, %v18200_v54  ;;  %6826 = vst [vmem:[#allocation2 + $0x24] sm:$0x1] %v6825_v34  ;;  %v18211_v58 = vrot.slane %v7111_v52, 5  ;;  %v6827_v38 = vld [vmem:[#allocation2 + $0x30] sm:$0x1]  ;;  %v7141_v42 = vrot.slane %v7139_v22, 4 }
 0x38b   : > { %v6730_v55 = vld [vmem:[#allocation2 + $0x3c] sm:$0x2]  ;;  %v6828_v30 = vsel %vm14891_vm8, %v12716_v2, %v6827_v38  ;;  %v7187_v31 = vshrl.u32 %v18193_v37, 16  ;;  %v18216_v10 = vrot.slane %v7135_v24, 5  ;;  %v18221_v8 = vrot.slane %v7121_v41, 5  ;;  %v14636_v39 = vld [vmem:[%s20859_s3 + $0xe8] sm:$0xff]  }
 0x38c   : > { %v12717_v60 = vrot.slane %v6730_v55, 9  ;;  %v18218_v32 = vrot.slane %v7094_v5, 4  ;;  %v7118_v40 = vor.u32 %v7117_v43, %v18211_v58  ;;  %6829 = vst [vmem:[#allocation2 + $0x30] sm:$0x1] %v6828_v30  ;;  %v6830_v23 = vld [vmem:[#allocation2 + $0x3c] sm:$0x1] }
 0x38d   : > { %v7211_v13 = vshrl.u32 %v18208_v63, 16  ;;  %v7013_v29 = vld [vmem:[#allocation2] sm:$0xf]  ;;  %v6959_v0 = vld [vmem:[#allocation2 + $0x8] sm:$0x1]  ;;  %v7142_v19 = vor.u32 %v7141_v42, %v18216_v10  ;;  %v7159_v9 = vshll.u32 %v18185_v16, 16 }
 0x38e   : > { %v6831_v20 = vsel %vm14891_vm8, %v12717_v60, %v6830_v23  ;;  %v18228_v56 = vrot.slane %v7163_v46, 4  ;;  %v7078_v33 = vshrl.u32 %v7013_v29, 16  ;;  %v7081_v51 = vshll.u32 %v7013_v29, 16  ;;  %v7015_v18 = vld [vmem:[#allocation2 + $0xc] sm:$0xf] }
 0x38f   : > { %v12788_v26 = vcombine.low %v7013_v29, %v18144_v7  ;;  %v6960_v47 = vsel %vm14925_vm9, %v12730_v45, %v6959_v0  ;;  %6832 = vst [vmem:[#allocation2 + $0x3c] sm:$0x1] %v6831_v20  ;;  %v7102_v6 = vshrl.u32 %v7015_v18, 16  ;;  %v7105_v61 = vshll.u32 %v7015_v18, 16  ;;  %v7017_v28 = vld [vmem:[#allocation2 + $0x18] sm:$0xf] }
 0x390   : > { %v12789_v15 = vcombine.low %v7015_v18, %v18151_v27  ;;  %6961 = vst [vmem:[#allocation2 + $0x8] sm:$0x1] %v6960_v47  ;;  %v7119_v35 = vrot.slane %v7118_v40, 4  ;;  %v7080_v12 = vrot.slane %v7078_v33, 4  ;;  %v7083_v3 = vrot.slane %v7081_v51, 5  ;;  %v14755_v45 = vld [vmem:[%s20859_s3 + $0xf8] sm:$0xff]  }
 0x391   : > { %14105 = vmatprep.mubr.bf16.mxu0 %v12788_v26  ;;  %v7126_v7 = vshrl.u32 %v7017_v28, 16  ;;  %v7129_v14 = vshll.u32 %v7017_v28, 16  ;;  %v7104_v4 = vrot.slane %v7102_v6, 4  ;;  %v7107_v21 = vrot.slane %v7105_v61, 5  ;;  %v7019_v17 = vld [vmem:[#allocation2 + $0x24] sm:$0xf] }
 0x392   : > { %14106 = vmatmul.mubr.bf16.vlgmr.msra.gmra.mxu0 %v12789_v15  ;;  %v12790_v59 = vcombine.low %v7017_v28, %v18165_v11  ;;  %v7124_v22 = vsel %vm15021_vm12, %v7119_v35, %v18221_v8  ;;  %v7084_v1 = vor.u32 %v7083_v3, %v7080_v12  ;;  %v7150_v25 = vshrl.u32 %v7019_v17, 16  ;;  %v18248_v41 = vld [vmem:[#allocation2 + $0x20] sm:$0x1]  ;;  %v18264_v51 = vld [vmem:[#allocation2 + $0x2c] sm:$0x1] }
 0x393   : > { %v7128_v50 = vrot.slane %v7126_v7, 4  ;;  %v7131_v36 = vrot.slane %v7129_v14, 5  ;;  %14186 = vmatpush3.bf16.msra.mxu0 %v14755_v45  ;;  %v7153_v11 = vshll.u32 %v7019_v17, 16  ;;  %v12791_v49 = vcombine.low %v7019_v17, %v18185_v16  ;;  %v7021_v43 = vld [vmem:[#allocation2 + $0x30] sm:$0xf] }
 0x394   : > { %14109 = vmatprep.mubr.bf16.mxu0 %v12790_v59  ;;  %v7108_v52 = vor.u32 %v7107_v21, %v7104_v4  ;;  %v7143_v53 = vrot.slane %v7142_v19, 4  ;;  %14187 = vmatprep.subr.bf16.mxu0 %v14633_v62  ;;  %v7085_v34 = vrot.slane %v7084_v1, 4  ;;  %v7152_v46 = vrot.slane %v7150_v25, 4  ;;  %v6731_v61 = vld [vmem:[#allocation2 + $0x48] sm:$0x2]  ;;  %v14641_v4 = vld [vmem:[%s20859_s3 + $0xd8] sm:$0xff]  }
 0x395   : > { %v7174_v2 = vshrl.u32 %v7021_v43, 16  ;;  %v7177_v24 = vshll.u32 %v7021_v43, 16  ;;  %v7155_v5 = vrot.slane %v7153_v11, 5  ;;  %v12792_v42 = vcombine.low %v7021_v43, %v18193_v37  ;;  %v6833_v1 = vld [vmem:[#allocation2 + $0x48] sm:$0x1] }
 0x396   : > { %v7109_v38 = vrot.slane %v7108_v52, 4  ;;  %v7132_v55 = vor.u32 %v7131_v36, %v7128_v50  ;;  %v18251_v30 = vld [vmem:[#allocation2 + $0x3c] sm:$0xf]  ;;  %v7090_v40 = vsel %vm15021_vm12, %v7085_v34, %v18200_v54  ;;  %v7145_v29 = vshll.u32 %v18248_v41, 16  ;;  %v14638_v54 = vld [vmem:[%s20859_s3 + $0xe0] sm:$0xff]  }
 0x397   : > { %v18253_v60 = vld [vmem:[#allocation2 + $0x8] sm:$0x1]  ;;  %v7176_v8 = vrot.slane %v7174_v2, 4  ;;  %v7179_v23 = vrot.slane %v7177_v24, 5  ;;  %14188 = vmatpush3.bf16.msra.mxu0 %v14633_v62  ;;  %v7198_v33 = vshrl.u32 %v18251_v30, 16  ;;  %v7201_v47 = vshll.u32 %v18251_v30, 16 }
 0x398   : > { %v7097_v0 = vshll.u32 %v18253_v60, 16  ;;  %v7114_v19 = vsel %vm15021_vm12, %v7109_v38, %v18211_v58  ;;  %v7133_v20 = vrot.slane %v7132_v55, 4  ;;  %14189 = vmatprep.subr.bf16.mxu0 %v14636_v39  ;;  %v7147_v18 = vrot.slane %v7145_v29, 5  ;;  %v18275_v62 = vld [vmem:[#allocation2 + $0x4c] sm:$0xf] }
 0x399   : > { %v12765_v26 = vcombine.low %v7114_v19, %v7124_v22  ;;  %v12793_v6 = vcombine.low %v18251_v30, %v18208_v63  ;;  %v7200_v28 = vrot.slane %v7198_v33, 4  ;;  %v7156_v35 = vor.u32 %v7155_v5, %v7152_v46  ;;  %v18288_v22 = vld [vmem:[#allocation2 + $0x38] sm:$0x1]  ;;  %v6732_v50 = vld [vmem:[#allocation2 + $0x54] sm:$0x2]  ;;  %v14627_v33 = vld [vmem:[%s20859_s3 + $0xa8] sm:$0xff]  }
 0x39a   : > { %v7099_v15 = vrot.slane %v7097_v0, 5  ;;  %14110 = vmatmul.mubr.bf16.gmra.mxu0 %v12791_v49  ;;  %v7138_v58 = vsel %vm15021_vm12, %v7133_v20, %v18216_v10  ;;  %v7148_v12 = vsel %vm15021_vm12, %v7143_v53, %v7147_v18  ;;  %v7203_v3 = vrot.slane %v7201_v47, 5  ;;  %v18292_v45 = vld [vmem:[#allocation2 + $0x58] sm:$0xf]  ;;  %v18305_v2 = vld [vmem:[#allocation2 + $0x44] sm:$0x1] }
 0x39b   : > { %14113 = vmatprep.mubr.bf16.mxu0 %v12792_v42  ;;  %v7161_v7 = vrot.slane %v7159_v9, 5  ;;  %v7169_v14 = vshll.u32 %v18264_v51, 16  ;;  %14190 = vmatpush3.bf16.msra.mxu0 %v14636_v39  ;;  %v12766_v21 = vcombine.low %v7138_v58, %v7148_v12  ;;  %v7157_v59 = vrot.slane %v7156_v35, 4  ;;  %v6733_v55 = vld [vmem:[#allocation2 + $0x60] sm:$0x2]  ;;  %v14643_v30 = vld [vmem:[%s20859_s3 + $0xd0] sm:$0xff]  }
 0x39c   : > { %v7100_v10 = vsel %vm15021_vm12, %v18218_v32, %v7099_v15  ;;  %v12718_v17 = vrot.slane %v6731_v61, 9  ;;  %14191 = vmatprep.subr.bf16.mxu0 %v14638_v54  ;;  %v7235_v25 = vshrl.u32 %v18275_v62, 16  ;;  %v14624_v32 = vld [vmem:[%s20859_s3 + $0xb0] sm:$0xff]   ;;  %v7180_v49 = vor.u32 %v7179_v23, %v7176_v8  ;;  %v18319_v29 = vld [vmem:[#allocation2 + $0x64] sm:$0xf]  ;;  %v18331_v18 = vld [vmem:[%s20859_s3 + $0xc8] sm:$0xff]  }
 0x39d   : > { %v12764_v16 = vcombine.low %v7090_v40, %v7100_v10  ;;  %v7166_v9 = vor.u32 %v18228_v56, %v7161_v7  ;;  %v7171_v36 = vrot.slane %v7169_v14, 5  ;;  %v7162_v39 = vsel %vm15021_vm12, %v7157_v59, %v7161_v7  ;;  %v6836_v56 = vld [vmem:[#allocation2 + $0x54] sm:$0x1]  ;;  %v6734_v58 = vld [vmem:[#allocation2 + $0x6c] sm:$0x2] }
 0x39e   : > { %v6834_v11 = vsel %vm14891_vm8, %v12718_v17, %v6833_v1  ;;  %v7183_v52 = vshll.u32 %v18193_v37, 16  ;;  %v7189_v53 = vrot.slane %v7187_v31, 4  ;;  %v7193_v34 = vshll.u32 %v18288_v22, 16  ;;  %v14756_v37 = vld [vmem:[%s20859_s3 + $0xb8] sm:$0xff]   ;;  %v6839_v35 = vld [vmem:[#allocation2 + $0x60] sm:$0x1] }
 0x39f   : > { %14057 = vmatprep.mubr.bf16.mxu1 %v12764_v16  ;;  %v7167_v43 = vrot.slane %v7166_v9, 4  ;;  %6835 = vst [vmem:[#allocation2 + $0x48] sm:$0x1] %v6834_v11  ;;  %v12719_v46 = vrot.slane %v6732_v50, 9  ;;  %14192 = vmatpush3.bf16.msra.mxu0 %v14638_v54  ;;  %v7181_v24 = vrot.slane %v7180_v49, 4  ;;  %v7259_v38 = vshrl.u32 %v18292_v45, 16 }
 0x3a0   : > { %14058 = vmatmul.mubr.bf16.vlgmr.msra.gmra.mxu1 %v12765_v26  ;;  %v7185_v5 = vrot.slane %v7183_v52, 5  ;;  %v7204_v42 = vor.u32 %v7203_v3, %v7200_v28  ;;  %14193 = vmatprep.subr.bf16.mxu0 %v14641_v4  ;;  %v7195_v40 = vrot.slane %v7193_v34, 5  ;;  %v7207_v23 = vshll.u32 %v18208_v63, 16  ;;  %v18326_v26 = vld [vmem:[#allocation2 + $0x50] sm:$0x1]  ;;  %v14630_v11 = vld [vmem:[%s20859_s3 + $0xa0] sm:$0xff]  }
 0x3a1   : > { %14138 = vmatpush3.bf16.msra.mxu1 %v14756_v37  ;;  %14061 = vmatprep.mubr.bf16.mxu1 %v12766_v21  ;;  %v7172_v31 = vsel %vm15021_vm12, %v7167_v43, %v7171_v36  ;;  %v6837_v8 = vsel %vm14891_vm8, %v12719_v46, %v6836_v56  ;;  %v7217_v61 = vshll.u32 %v18305_v2, 16  ;;  %v12720_v15 = vrot.slane %v6733_v55, 9  ;;  %v18342_v21 = vld [vmem:[#allocation2 + $0x70] sm:$0xf]  ;;  %v14648_v49 = vld [vmem:[%s20859_s3 + $0xc0] sm:$0xff]  }
 0x3a2   : > { %14114 = vmatmul.mubr.bf16.gmra.mxu0 %v12793_v6  ;;  %14139 = vmatprep.subr.bf16.mxu1 %v14624_v32  ;;  %v12767_v0 = vcombine.low %v7162_v39, %v7172_v31  ;;  %v7186_v19 = vsel %vm15021_vm12, %v7181_v24, %v7185_v5  ;;  %v7190_v20 = vor.u32 %v7189_v53, %v7185_v5  ;;  %v7205_v54 = vrot.slane %v7204_v42, 4  ;;  %v6842_v39 = vld [vmem:[#allocation2 + $0x6c] sm:$0x1]  ;;  %v18359_v34 = vld [vmem:[#allocation2 + $0x5c] sm:$0x1] }
 0x3a3   : > { %6838 = vst [vmem:[#allocation2 + $0x54] sm:$0x1] %v6837_v8  ;;  %v7209_v47 = vrot.slane %v7207_v23, 5  ;;  %v7213_v6 = vrot.slane %v7211_v13, 4  ;;  %14194 = vmatpush3.bf16.msra.mxu0 %v14641_v4  ;;  %v7283_v12 = vshrl.u32 %v18319_v29, 16  ;;  %v7231_v3 = vshll.u32 %v18275_v62, 16 }
 0x3a4   : > { %v7191_v28 = vrot.slane %v7190_v20, 4  ;;  %v7237_v7 = vrot.slane %v7235_v25, 4  ;;  %14195 = vmatprep.subr.bf16.mxu0 %v14643_v30  ;;  %v7219_v63 = vrot.slane %v7217_v61, 5  ;;  %v6840_v13 = vsel %vm14891_vm8, %v12720_v15, %v6839_v35  ;;  %v6719_v4 = vld [vmem:[#allocation2 + $0xb4] sm:$0xf] }
 0x3a5   : > { %14140 = vmatpush3.bf16.msra.mxu1 %v14624_v32  ;;  %v7210_v14 = vsel %vm15021_vm12, %v7205_v54, %v7209_v47  ;;  %v7214_v10 = vor.u32 %v7213_v6, %v7209_v47  ;;  %6841 = vst [vmem:[#allocation2 + $0x60] sm:$0x1] %v6840_v13  ;;  %v18346_v50 = vrot.slane %v7231_v3, 5  ;;  %v7241_v16 = vshll.u32 %v18326_v26, 16  ;;  %6722 = vst [vmem:[#allocation2 + $0xcc] sm:$0xf] %v6719_v4 }
 0x3a6   : > { %v7025_v59 = vld [vmem:[#allocation2 + $0x48] sm:$0xf]  ;;  %v7196_v17 = vsel %vm15021_vm12, %v7191_v28, %v7195_v40  ;;  %14141 = vmatprep.subr.bf16.mxu1 %v14627_v33  ;;  %v12721_v9 = vrot.slane %v6734_v58, 9  ;;  %v18361_v46 = vld [vmem:[#allocation2 + $0x7c] sm:$0xf]  ;;  %v7307_v55 = vshrl.u32 %v18342_v21, 16 }
 0x3a7   : > { %v7222_v36 = vshrl.u32 %v7025_v59, 16  ;;  %v7225_v1 = vshll.u32 %v7025_v59, 16  ;;  %v12794_v25 = vcombine.low %v7025_v59, %v18275_v62  ;;  %v12768_v32 = vcombine.low %v7186_v19, %v7196_v17  ;;  %14196 = vmatpush3.bf16.msra.mxu0 %v14643_v30  ;;  %v6735_v23 = vld [vmem:[#allocation2 + $0x78] sm:$0x2]  ;;  %v6845_v13 = vld [vmem:[#allocation2 + $0x78] sm:$0x1] }
 0x3a8   : > { %14062 = vmatmul.mubr.bf16.gmra.mxu1 %v12767_v0  ;;  %v7215_v52 = vrot.slane %v7214_v10, 4  ;;  %v7238_v56 = vor.u32 %v7237_v7, %v18346_v50  ;;  %v7243_v43 = vrot.slane %v7241_v16, 5  ;;  %v6843_v53 = vsel %vm14891_vm8, %v12721_v9, %v6842_v39  ;;  %14197 = vmatprep.subr.bf16.mxu0 %v18331_v18  ;;  %v14635_v47 = vld [vmem:[%s20859_s3 + $0x98] sm:$0xff]   ;;  %v18390_v9 = vld [vmem:[#allocation2 + $0x68] sm:$0x1] }
 0x3a9   : > { %v7224_v24 = vrot.slane %v7222_v36, 4  ;;  %v7227_v5 = vrot.slane %v7225_v1, 5  ;;  %14117 = vmatprep.mubr.bf16.mxu0 %v12794_v25  ;;  %14065 = vmatprep.mubr.bf16.mxu1 %v12768_v32  ;;  %6844 = vst [vmem:[#allocation2 + $0x6c] sm:$0x1] %v6843_v53  ;;  %v7255_v30 = vshll.u32 %v18292_v45, 16  ;;  %v7261_v15 = vrot.slane %v7259_v38, 4 }
 0x3aa   : > { %v7027_v42 = vld [vmem:[#allocation2 + $0x54] sm:$0xf]  ;;  %v7220_v8 = vsel %vm15021_vm12, %v7215_v52, %v7219_v63  ;;  %14142 = vmatpush3.bf16.msra.mxu1 %v14627_v33  ;;  %v7239_v20 = vrot.slane %v7238_v56, 4  ;;  %v7265_v33 = vshll.u32 %v18359_v34, 16  ;;  %v12722_v3 = vrot.slane %v6735_v23, 9 }
 0x3ab   : > { %v7246_v37 = vshrl.u32 %v7027_v42, 16  ;;  %v7249_v31 = vshll.u32 %v7027_v42, 16  ;;  %v12795_v40 = vcombine.low %v7027_v42, %v18292_v45  ;;  %v12769_v0 = vcombine.low %v7210_v14, %v7220_v8  ;;  %14143 = vmatprep.subr.bf16.mxu1 %v14630_v11  ;;  %14198 = vmatpush3.bf16.msra.mxu0 %v18331_v18  ;;  %v18382_v18 = vld [vmem:[%s20859_s3 + $0x178] sm:$0xff]   ;;  %v14640_v36 = vld [vmem:[%s20859_s3 + $0x90] sm:$0xff]  }
 0x3ac   : > { %v7228_v19 = vor.u32 %v7227_v5, %v7224_v24  ;;  %v7257_v54 = vrot.slane %v7255_v30, 5  ;;  %14199 = vmatprep.subr.bf16.mxu0 %v14648_v49  ;;  %v7029_v58 = vld [vmem:[#allocation2 + $0x60] sm:$0xf]  ;;  %v7244_v35 = vsel %vm15021_vm12, %v7239_v20, %v7243_v43  ;;  %v7331_v7 = vshrl.u32 %v18361_v46, 16  ;;  %v6736_v24 = vld [vmem:[#allocation2 + $0x84] sm:$0x2] }
 0x3ad   : > { %v7248_v6 = vrot.slane %v7246_v37, 4  ;;  %v7251_v61 = vrot.slane %v7249_v31, 5  ;;  %14118 = vmatmul.mubr.bf16.gmra.mxu0 %v12795_v40  ;;  %v7270_v14 = vshrl.u32 %v7029_v58, 16  ;;  %v7273_v10 = vshll.u32 %v7029_v58, 16  ;;  %v18404_v37 = vld [vmem:[#allocation2 + $0x74] sm:$0x1] }
 0x3ae   : > { %v7229_v28 = vrot.slane %v7228_v19, 4  ;;  %v12796_v38 = vcombine.low %v7029_v58, %v18319_v29  ;;  %14144 = vmatpush3.bf16.msra.mxu1 %v14630_v11  ;;  %v7262_v59 = vor.u32 %v7261_v15, %v7257_v54  ;;  %v7267_v17 = vrot.slane %v7265_v33, 5  ;;  %v18395_v11 = vld [vmem:[#allocation2 + $0x88] sm:$0xf] }
 0x3af   : > { %v7252_v63 = vor.u32 %v7251_v61, %v7248_v6  ;;  %v6846_v16 = vsel %vm14891_vm8, %v12722_v3, %v6845_v13  ;;  %14145 = vmatprep.subr.bf16.mxu1 %v14635_v47  ;;  %14200 = vmatpush3.bf16.msra.mxu0 %v14648_v49  ;;  %v7272_v1 = vrot.slane %v7270_v14, 4  ;;  %v7275_v25 = vrot.slane %v7273_v10, 5  ;;  %v14645_v19 = vld [vmem:[%s20859_s3 + $0x88] sm:$0xff]   ;;  %v6737_v61 = vld [vmem:[#allocation2 + $0x90] sm:$0x2] }
 0x3b0   : > { %v7234_v4 = vsel %vm15021_vm12, %v7229_v28, %v18346_v50  ;;  %14066 = vmatmul.mubr.bf16.gmra.mxu1 %v12769_v0  ;;  %14121 = vmatprep.mubr.bf16.mxu0 %v12796_v38  ;;  %v7031_v39 = vld [vmem:[#allocation2 + $0x6c] sm:$0xf]  ;;  %6847 = vst [vmem:[#allocation2 + $0x78] sm:$0x1] %v6846_v16  ;;  %v7263_v53 = vrot.slane %v7262_v59, 4  ;;  %v7279_v42 = vshll.u32 %v18319_v29, 16 }
 0x3b1   : > { %v12770_v32 = vcombine.low %v7234_v4, %v7244_v35  ;;  %v7253_v50 = vrot.slane %v7252_v63, 4  ;;  %v7294_v52 = vshrl.u32 %v7031_v39, 16  ;;  %v7297_v56 = vshll.u32 %v7031_v39, 16  ;;  %14281 = vmatprep.subr.bf16.mxu0 %v18382_v18  ;;  %v6848_v0 = vld [vmem:[#allocation2 + $0x84] sm:$0x1] }
 0x3b2   : > { %v12797_v43 = vcombine.low %v7031_v39, %v18342_v21  ;;  %v7276_v5 = vor.u32 %v7275_v25, %v7272_v1  ;;  %v7285_v30 = vrot.slane %v7283_v12, 4  ;;  %14146 = vmatpush3.bf16.msra.mxu1 %v14635_v47  ;;  %v7268_v8 = vsel %vm15021_vm12, %v7263_v53, %v7267_v17  ;;  %v6851_v10 = vld [vmem:[#allocation2 + $0x90] sm:$0x1]  ;;  %v18420_v38 = vld [vmem:[#allocation2 + $0x94] sm:$0xf]  ;;  %v14649_v63 = vld [vmem:[%s20859_s3 + $0x80] sm:$0xff]  }
 0x3b3   : > { %14069 = vmatprep.mubr.bf16.mxu1 %v12770_v32  ;;  %v7258_v49 = vsel %vm15021_vm12, %v7253_v50, %v7257_v54  ;;  %v7296_v31 = vrot.slane %v7294_v52, 4  ;;  %v7299_v40 = vrot.slane %v7297_v56, 5  ;;  %v7289_v23 = vshll.u32 %v18390_v9, 16  ;;  %14147 = vmatprep.subr.bf16.mxu1 %v14640_v36  ;;  %v18426_v1 = vld [vmem:[#allocation2 + $0xa0] sm:$0xf] }
 0x3b4   : > { %v12771_v20 = vcombine.low %v7258_v49, %v7268_v8  ;;  %v7277_v54 = vrot.slane %v7276_v5, 4  ;;  %v7281_v12 = vrot.slane %v7279_v42, 5  ;;  %v12723_v6 = vrot.slane %v6736_v24, 9  ;;  %v6738_v53 = vld [vmem:[#allocation2 + $0x9c] sm:$0x2] }
 0x3b5   : > { %14122 = vmatmul.mubr.bf16.gmra.mxu0 %v12797_v43  ;;  %v7291_v47 = vrot.slane %v7289_v23, 5  ;;  %v7355_v15 = vshrl.u32 %v18395_v11, 16  ;;  %v7300_v33 = vor.u32 %v7299_v40, %v7296_v31  ;;  %v7303_v58 = vshll.u32 %v18342_v21, 16  ;;  %v18433_v43 = vld [vmem:[#allocation2 + $0x80] sm:$0x1] }
 0x3b6   : > { %v7282_v28 = vsel %vm15021_vm12, %v7277_v54, %v7281_v12  ;;  %v7286_v35 = vor.u32 %v7285_v30, %v7281_v12  ;;  %v6849_v3 = vsel %vm14891_vm8, %v12723_v6, %v6848_v0  ;;  %v7309_v14 = vrot.slane %v7307_v55, 4  ;;  %14148 = vmatpush3.bf16.msra.mxu1 %v14640_v36  ;;  %v6854_v23 = vld [vmem:[#allocation2 + $0x9c] sm:$0x1]  ;;  %v18441_v0 = vld [vmem:[#allocation2 + $0x8c] sm:$0x1] }
 0x3b7   : > { %v7033_v13 = vld [vmem:[#allocation2 + $0x78] sm:$0xf]  ;;  %6850 = vst [vmem:[#allocation2 + $0x84] sm:$0x1] %v6849_v3  ;;  %v7301_v4 = vrot.slane %v7300_v33, 4  ;;  %v7305_v59 = vrot.slane %v7303_v58, 5  ;;  %14149 = vmatprep.subr.bf16.mxu1 %v14645_v19 }
 0x3b8   : > { %v7313_v17 = vshll.u32 %v18404_v37, 16  ;;  %v12724_v16 = vrot.slane %v6737_v61, 9  ;;  %14070 = vmatmul.mubr.bf16.gmra.mxu1 %v12771_v20  ;;  %v7318_v55 = vshrl.u32 %v7033_v13, 16  ;;  %v7321_v25 = vshll.u32 %v7033_v13, 16  ;;  %v18446_v20 = vld [vmem:[%s20859_s3 + $0x138] sm:$0xff]  }
 0x3b9   : > { %v12798_v32 = vcombine.low %v7033_v13, %v18361_v46  ;;  %v7287_v36 = vrot.slane %v7286_v35, 4  ;;  %v7306_v39 = vsel %vm15021_vm12, %v7301_v4, %v7305_v59  ;;  %v7310_v50 = vor.u32 %v7309_v14, %v7305_v59  ;;  %v6739_v61 = vld [vmem:[#allocation2 + $0xa8] sm:$0x2] }
 0x3ba   : > { %v7315_v52 = vrot.slane %v7313_v17, 5  ;;  %v6852_v56 = vsel %vm14891_vm8, %v12724_v16, %v6851_v10  ;;  %v7320_v24 = vrot.slane %v7318_v55, 4  ;;  %v7323_v49 = vrot.slane %v7321_v25, 5  ;;  %14150 = vmatpush3.bf16.msra.mxu1 %v14645_v19 }
 0x3bb   : > { %14125 = vmatprep.mubr.bf16.mxu0 %v12798_v32  ;;  %v7292_v5 = vsel %vm15021_vm12, %v7287_v36, %v7291_v47  ;;  %6853 = vst [vmem:[#allocation2 + $0x90] sm:$0x1] %v6852_v56  ;;  %v7379_v42 = vshrl.u32 %v18420_v38, 16  ;;  %v7311_v31 = vrot.slane %v7310_v50, 4  ;;  %v7327_v40 = vshll.u32 %v18361_v46, 16  ;;  %14151 = vmatprep.subr.bf16.mxu1 %v14649_v63 }
 0x3bc   : > { %v12772_v30 = vcombine.low %v7282_v28, %v7292_v5  ;;  %v7333_v8 = vrot.slane %v7331_v7, 4  ;;  %v7324_v54 = vor.u32 %v7323_v49, %v7320_v24  ;;  %v7337_v12 = vshll.u32 %v18433_v43, 16  ;;  %v18453_v28 = vld [vmem:[#allocation2 + $0xac] sm:$0xf]  ;;  %v6857_v36 = vld [vmem:[#allocation2 + $0xa8] sm:$0x1] }
 0x3bd   : > { %v12725_v19 = vrot.slane %v6738_v53, 9  ;;  %v7403_v6 = vshrl.u32 %v18426_v1, 16  ;;  %v7316_v7 = vsel %vm15021_vm12, %v7311_v31, %v7315_v52  ;;  %v7329_v47 = vrot.slane %v7327_v40, 5  ;;  %v18463_v53 = vld [vmem:[#allocation2 + $0xb8] sm:$0xf] }
 0x3be   : > { %14073 = vmatprep.mubr.bf16.mxu1 %v12772_v30  ;;  %v7351_v33 = vshll.u32 %v18395_v11, 16  ;;  %v7357_v58 = vrot.slane %v7355_v15, 4  ;;  %v7035_v35 = vld [vmem:[#allocation2 + $0x84] sm:$0xf]  ;;  %v12773_v3 = vcombine.low %v7306_v39, %v7316_v7  ;;  %v7325_v14 = vrot.slane %v7324_v54, 4  ;;  %14152 = vmatpush3.bf16.msra.mxu1 %v14649_v63 }
 0x3bf   : > { %v7339_v10 = vrot.slane %v7337_v12, 5  ;;  %v6855_v13 = vsel %vm14891_vm8, %v12725_v19, %v6854_v23  ;;  %v7342_v4 = vshrl.u32 %v7035_v35, 16  ;;  %v7345_v59 = vshll.u32 %v7035_v35, 16  ;;  %14233 = vmatprep.subr.bf16.mxu1 %v18446_v20  ;;  %v18466_v31 = vld [vmem:[#allocation2 + $0x98] sm:$0x1] }
 0x3c0   : > { %v12799_v17 = vcombine.low %v7035_v35, %v18395_v11  ;;  %v7334_v16 = vor.u32 %v7333_v8, %v7329_v47  ;;  %6856 = vst [vmem:[#allocation2 + $0x9c] sm:$0x1] %v6855_v13  ;;  %14074 = vmatmul.mubr.bf16.gmra.mxu1 %v12773_v3  ;;  %v7330_v15 = vsel %vm15021_vm12, %v7325_v14, %v7329_v47  ;;  %v7353_v55 = vrot.slane %v7351_v33, 5  ;;  %v6740_v12 = vld [vmem:[#allocation2 + $0xb4] sm:$0x2] }
 0x3c1   : > { %v7361_v25 = vshll.u32 %v18441_v0, 16  ;;  %v12726_v32 = vrot.slane %v6739_v61, 9  ;;  %v7344_v39 = vrot.slane %v7342_v4, 4  ;;  %v7347_v50 = vrot.slane %v7345_v59, 5 }
 0x3c2   : > { %14126 = vmatmul.mubr.bf16.gmra.mxu0 %v12799_v17  ;;  %v7037_v63 = vld [vmem:[#allocation2 + $0x90] sm:$0xf]  ;;  %v7335_v52 = vrot.slane %v7334_v16, 4  ;;  %v7427_v56 = vshrl.u32 %v18453_v28, 16  ;;  %v7358_v30 = vor.u32 %v7357_v58, %v7353_v55  ;;  %v7375_v58 = vshll.u32 %v18420_v38, 16 }
 0x3c3   : > { %v7366_v24 = vshrl.u32 %v7037_v63, 16  ;;  %v7369_v49 = vshll.u32 %v7037_v63, 16  ;;  %v12800_v5 = vcombine.low %v7037_v63, %v18420_v38  ;;  %v7348_v8 = vor.u32 %v7347_v50, %v7344_v39  ;;  %v6860_v63 = vld [vmem:[#allocation2 + $0xb4] sm:$0x1] }
 0x3c4   : > { %v7340_v40 = vsel %vm15021_vm12, %v7335_v52, %v7339_v10  ;;  %v7363_v23 = vrot.slane %v7361_v25, 5  ;;  %v6858_v54 = vsel %vm14891_vm8, %v12726_v32, %v6857_v36  ;;  %v7359_v47 = vrot.slane %v7358_v30, 4  ;;  %v18482_v32 = vld [vmem:[#allocation2 + $0xa4] sm:$0x1] }
 0x3c5   : > { %v7368_v19 = vrot.slane %v7366_v24, 4  ;;  %v7371_v61 = vrot.slane %v7369_v49, 5  ;;  %14129 = vmatprep.mubr.bf16.mxu0 %v12800_v5  ;;  %v12774_v7 = vcombine.low %v7330_v15, %v7340_v40  ;;  %6859 = vst [vmem:[#allocation2 + $0xa8] sm:$0x1] %v6858_v54  ;;  %v7349_v33 = vrot.slane %v7348_v8, 4 }
 0x3c6   : > { %v7381_v35 = vrot.slane %v7379_v42, 4  ;;  %v7385_v3 = vshll.u32 %v18466_v31, 16  ;;  %v7364_v10 = vsel %vm15021_vm12, %v7359_v47, %v7363_v23  ;;  %v12727_v4 = vrot.slane %v6740_v12, 9  ;;  %v18492_v23 = vld [vmem:[#allocation2 + $0xb0] sm:$0x1] }
 0x3c7   : > { %14077 = vmatprep.mubr.bf16.mxu1 %v12774_v7  ;;  %v7039_v14 = vld [vmem:[#allocation2 + $0x9c] sm:$0xf]  ;;  %v7372_v13 = vor.u32 %v7371_v61, %v7368_v19  ;;  %v7451_v59 = vshrl.u32 %v18463_v53, 16  ;;  %v7354_v25 = vsel %vm15021_vm12, %v7349_v33, %v7353_v55  ;;  %v7377_v39 = vrot.slane %v7375_v58, 5 }
 0x3c8   : > { %v7390_v17 = vshrl.u32 %v7039_v14, 16  ;;  %v7393_v16 = vshll.u32 %v7039_v14, 16  ;;  %v12801_v15 = vcombine.low %v7039_v14, %v18426_v1  ;;  %v12775_v42 = vcombine.low %v7354_v25, %v7364_v10 }
 0x3c9   : > { %v7373_v36 = vrot.slane %v7372_v13, 4  ;;  %v7387_v50 = vrot.slane %v7385_v3, 5  ;;  %v6861_v49 = vsel %vm14891_vm8, %v12727_v4, %v6860_v63  ;;  %v7399_v5 = vshll.u32 %v18426_v1, 16 }
 0x3ca   : > { %v7392_v52 = vrot.slane %v7390_v17, 4  ;;  %v7395_v24 = vrot.slane %v7393_v16, 5  ;;  %14130 = vmatmul.mubr.bf16.gmra.mxu0 %v12801_v15  ;;  %14078 = vmatmul.mubr.bf16.gmra.mxu1 %v12775_v42  ;;  %v7382_v55 = vor.u32 %v7381_v35, %v7377_v39  ;;  %6862 = vst [vmem:[#allocation2 + $0xb4] sm:$0x1] %v6861_v49  ;;  %v7405_v40 = vrot.slane %v7403_v6, 4 }
 0x3cb   : > { %v7378_v30 = vsel %vm15021_vm12, %v7373_v36, %v7377_v39  ;;  %v7409_v8 = vshll.u32 %v18482_v32, 16  ;;  %v7401_v19 = vrot.slane %v7399_v5, 5  ;;  %v7423_v61 = vshll.u32 %v18453_v28, 16  ;;  %v18496_v6 = vld [vmem:[#allocation2 + $0xbc] sm:$0x1] }
 0x3cc   : > { %v7041_v54 = vld [vmem:[#allocation2 + $0xa8] sm:$0xf]  ;;  %v7396_v12 = vor.u32 %v7395_v24, %v7392_v52  ;;  %v7429_v7 = vrot.slane %v7427_v56, 4  ;;  %v7383_v3 = vrot.slane %v7382_v55, 4  ;;  %v7433_v15 = vshll.u32 %v18492_v23, 16 }
 0x3cd   : > { %v7414_v47 = vshrl.u32 %v7041_v54, 16  ;;  %v7417_v33 = vshll.u32 %v7041_v54, 16  ;;  %v12802_v58 = vcombine.low %v7041_v54, %v18453_v28  ;;  %v7406_v14 = vor.u32 %v7405_v40, %v7401_v19  ;;  %v8056_v56 = vld [vmem:[#allocation2] sm:$0xe] }
 0x3ce   : > { %v7397_v35 = vrot.slane %v7396_v12, 4  ;;  %v7411_v10 = vrot.slane %v7409_v8, 5  ;;  %v7425_v13 = vrot.slane %v7423_v61, 5  ;;  %v7388_v16 = vsel %vm15021_vm12, %v7383_v3, %v7387_v50  ;;  %v8057_v61 = vld [vmem:[#allocation2 + $0xc] sm:$0xe] }
 0x3cf   : > { %v7416_v4 = vrot.slane %v7414_v47, 4  ;;  %v7419_v17 = vrot.slane %v7417_v33, 5  ;;  %14133 = vmatprep.mubr.bf16.mxu0 %v12802_v58  ;;  %v12776_v25 = vcombine.low %v7378_v30, %v7388_v16  ;;  %v7407_v36 = vrot.slane %v7406_v14, 4  ;;  %v14757_v14 = vld [vmem:[#allocation2 + $0x4] sm:$0xf] }
 0x3d0   : > { %v7402_v42 = vsel %vm15021_vm12, %v7397_v35, %v7401_v19  ;;  %v7430_v39 = vor.u32 %v7429_v7, %v7425_v13  ;;  %v7435_v52 = vrot.slane %v7433_v15, 5  ;;  %v7447_v24 = vshll.u32 %v18463_v53, 16  ;;  %v14647_v7 = vld [vmem:[#allocation2 + $0xc] sm:$0xff]  }
 0x3d1   : > { %v7420_v63 = vor.u32 %v7419_v17, %v7416_v4  ;;  %v7453_v49 = vrot.slane %v7451_v59, 4  ;;  %14081 = vmatprep.mubr.bf16.mxu1 %v12776_v25  ;;  %v7043_v5 = vld [vmem:[#allocation2 + $0xb4] sm:$0xf]  ;;  %v7412_v55 = vsel %vm15021_vm12, %v7407_v36, %v7411_v10  ;;  %v7457_v40 = vshll.u32 %v18496_v6, 16 }
 0x3d2   : > { %v7431_v50 = vrot.slane %v7430_v39, 4  ;;  %v12812_v8 = vrot.slane %v8056_v56, 9  ;;  %v7438_v30 = vshrl.u32 %v7043_v5, 16  ;;  %v7441_v54 = vshll.u32 %v7043_v5, 16  ;;  %v14758_v56 = vld [vmem:[#allocation2 + $0x10] sm:$0xf] }
 0x3d3   : > { %v12803_v12 = vcombine.low %v7043_v5, %v18463_v53  ;;  %v12777_v19 = vcombine.low %v7402_v42, %v7412_v55  ;;  %v7421_v47 = vrot.slane %v7420_v63, 4  ;;  %v7449_v33 = vrot.slane %v7447_v24, 5  ;;  %v8058_v42 = vld [vmem:[#allocation2 + $0x18] sm:$0xe] }
 0x3d4   : > { %v7436_v59 = vsel %vm15021_vm12, %v7431_v50, %v7435_v52  ;;  %v7459_v58 = vrot.slane %v7457_v40, 5  ;;  %v7440_v3 = vrot.slane %v7438_v30, 4  ;;  %v7443_v35 = vrot.slane %v7441_v54, 5  ;;  %v14759_v30 = vld [vmem:[#allocation2 + $0x1c] sm:$0xf] }
 0x3d5   : > { %14134 = vmatmul.mubr.bf16.gmra.mxu0 %v12803_v12  ;;  %14082 = vmatmul.mubr.bf16.gmra.mxu1 %v12777_v19  ;;  %v8106_v10 = vrot.slane %v14757_v14, 5  ;;  %v8109_v4 = vrot.slane %v18253_v60, 5  ;;  %v7426_v17 = vsel %vm15021_vm12, %v7421_v47, %v7425_v13  ;;  %v7454_v16 = vor.u32 %v7453_v49, %v7449_v33  ;;  %v8059_v12 = vld [vmem:[#allocation2 + $0x24] sm:$0xe]  ;;  %v14650_v47 = vld [vmem:[#allocation2 + $0x18] sm:$0xff]  }
 0x3d6   : > { %14201 = vmatprep.mubr.bf16.mxu0 %v14647_v7  ;;  %v12813_v15 = vrot.slane %v8057_v61, 9  ;;  %v8113_v25 = vrot.slane %v14758_v56, 5  ;;  %v12778_v36 = vcombine.low %v7426_v17, %v7436_v59  ;;  %v7444_v39 = vor.u32 %v7443_v35, %v7440_v3  ;;  %v8061_v14 = vld [vmem:[#allocation2 + $0x3c] sm:$0xe] }
 0x3d7   : > { %v8107_v52 = vsel %vm15512_vm15, %v12812_v8, %v8106_v10  ;;  %v8108_v24 = vrot.slane %v8106_v10, 4  ;;  %v7455_v5 = vrot.slane %v7454_v16, 4  ;;  %v8116_v50 = vrot.slane %v18198_v44, 5  ;;  %v8060_v44 = vld [vmem:[#allocation2 + $0x30] sm:$0xe] }
 0x3d8   : > { %v18517_v55 = vsel %vm15512_vm15, %v12813_v15, %v8113_v25  ;;  %v8115_v60 = vrot.slane %v8113_v25, 4  ;;  %14085 = vmatprep.mubr.bf16.mxu1 %v12778_v36  ;;  %v7445_v13 = vrot.slane %v7444_v39, 4  ;;  %v12814_v40 = vrot.slane %v8058_v42, 9  ;;  %v14760_v16 = vld [vmem:[#allocation2 + $0x28] sm:$0xf] }
 0x3d9   : > { %v8110_v49 = vsel %vm15512_vm15, %v8108_v24, %v8109_v4  ;;  %v8120_v54 = vrot.slane %v14759_v30, 5  ;;  %v7460_v8 = vsel %vm15021_vm12, %v7455_v5, %v7459_v58  ;;  %v8123_v7 = vrot.slane %v18248_v41, 5  ;;  %v14651_v4 = vld [vmem:[#allocation2 + $0x24] sm:$0xff]   ;;  %v14761_v42 = vld [vmem:[#allocation2 + $0x34] sm:$0xf] }
 0x3da   : > { %v12844_v19 = vcombine.low %v8107_v52, %v8110_v49  ;;  %v18526_v61 = vsel %vm15512_vm15, %v8115_v60, %v8116_v50  ;;  %v7450_v59 = vsel %vm15021_vm12, %v7445_v13, %v7449_v33  ;;  %v12815_v17 = vrot.slane %v8059_v12, 9  ;;  %v14665_v33 = vld [vmem:[%s20859_s3 + $0x170] sm:$0xff]   ;;  %v8062_v52 = vld [vmem:[#allocation2 + $0x48] sm:$0xe]  ;;  %v14762_v49 = vld [vmem:[#allocation2 + $0x40] sm:$0xf] }
 0x3db   : > { %v12845_v3 = vcombine.low %v18517_v55, %v18526_v61  ;;  %v18535_v35 = vsel %vm15512_vm15, %v12814_v40, %v8120_v54  ;;  %v8122_v58 = vrot.slane %v8120_v54, 4  ;;  %v12779_v10 = vcombine.low %v7450_v59, %v7460_v8  ;;  %v8063_v30 = vld [vmem:[#allocation2 + $0x54] sm:$0xe] }
 0x3dc   : > { %v8127_v15 = vrot.slane %v14760_v16, 5  ;;  %v8130_v41 = vrot.slane %v18264_v51, 5  ;;  %v12816_v25 = vrot.slane %v8060_v44, 9  ;;  %v8134_v36 = vrot.slane %v14761_v42, 5  ;;  %v14668_v44 = vld [vmem:[%s20859_s3 + $0x168] sm:$0xff]  }
 0x3dd   : > { %14202 = vmatmul.mubr.bf16.vlgmr.msra.gmra.mxu0 %v14650_v47  ;;  %v18543_v56 = vsel %vm15512_vm15, %v8122_v58, %v8123_v7  ;;  %v8137_v39 = vrot.slane %v18288_v22, 5  ;;  %14086 = vmatmul.mubr.bf16.gmra.mxu1 %v12779_v10  ;;  %v12817_v60 = vrot.slane %v8061_v14, 9  ;;  %v8141_v22 = vrot.slane %v14762_v49, 5  ;;  %v8064_v7 = vld [vmem:[#allocation2 + $0x60] sm:$0xe]  ;;  %v14652_v10 = vld [vmem:[#allocation2 + $0x30] sm:$0xff]  }
 0x3de   : > { %14205 = vmatprep.mubr.bf16.mxu0 %v14651_v4  ;;  %v12846_v51 = vcombine.low %v18535_v35, %v18543_v56  ;;  %v18550_v24 = vsel %vm15512_vm15, %v12815_v17, %v8127_v15  ;;  %v8129_v5 = vrot.slane %v8127_v15, 4  ;;  %14153 = vmatprep.mubr.bf16.mxu1 %v12844_v19  ;;  %v18554_v50 = vsel %vm15512_vm15, %v12816_v25, %v8134_v36  ;;  %v8065_v14 = vld [vmem:[#allocation2 + $0x6c] sm:$0xe]  ;;  %v14656_v56 = vld [vmem:[%s20859_s3 + $0x130] sm:$0xff]  }
 0x3df   : > { %v8136_v13 = vrot.slane %v8134_v36, 4  ;;  %v8144_v40 = vrot.slane %v18305_v2, 5  ;;  %14282 = vmatpush3.bf16.msra.mxu0 %v18382_v18  ;;  %v12818_v12 = vrot.slane %v8062_v52, 9  ;;  %v8148_v8 = vrot.slane %v18275_v62, 5 }
 0x3e0   : > { %v18560_v54 = vsel %vm15512_vm15, %v8129_v5, %v8130_v41  ;;  %v8151_v19 = vrot.slane %v18326_v26, 5  ;;  %14283 = vmatprep.subr.bf16.mxu0 %v14665_v33  ;;  %v18575_v47 = vsel %vm15512_vm15, %v12817_v60, %v8141_v22  ;;  %v8143_v62 = vrot.slane %v8141_v22, 4  ;;  %v14654_v41 = vld [vmem:[#allocation2 + $0x3c] sm:$0xff]   ;;  %v8067_v22 = vld [vmem:[#allocation2 + $0x84] sm:$0xe] }
 0x3e1   : > { %v12847_v2 = vcombine.low %v18550_v24, %v18560_v54  ;;  %v18571_v18 = vsel %vm15512_vm15, %v8136_v13, %v8137_v39  ;;  %v18581_v59 = vsel %vm15512_vm15, %v12818_v12, %v8148_v8  ;;  %v8150_v35 = vrot.slane %v8148_v8, 4  ;;  %v14670_v60 = vld [vmem:[%s20859_s3 + $0x160] sm:$0xff]  }
 0x3e2   : > { %v12848_v26 = vcombine.low %v18554_v50, %v18571_v18  ;;  %v12819_v58 = vrot.slane %v8063_v30, 9  ;;  %v18585_v4 = vsel %vm15512_vm15, %v8143_v62, %v8144_v40  ;;  %v8155_v17 = vrot.slane %v18292_v45, 5  ;;  %v8068_v30 = vld [vmem:[#allocation2 + $0x90] sm:$0xe]  ;;  %v6741_v62 = vld [vmem:[#allocation2 + $0xc0] sm:$0x2] }
 0x3e3   : > { %v8158_v16 = vrot.slane %v18359_v34, 5  ;;  %v12820_v15 = vrot.slane %v8064_v7, 9  ;;  %14284 = vmatpush3.bf16.msra.mxu0 %v14665_v33  ;;  %v12849_v25 = vcombine.low %v18575_v47, %v18585_v4  ;;  %v18596_v42 = vsel %vm15512_vm15, %v8150_v35, %v8151_v19  ;;  %v8066_v34 = vld [vmem:[#allocation2 + $0x78] sm:$0xe]  ;;  %v18650_v35 = vld [vmem:[%s20859_s3 + $0x120] sm:$0xff]  }
 0x3e4   : > { %v8162_v36 = vrot.slane %v18319_v29, 5  ;;  %v8165_v45 = vrot.slane %v18390_v9, 5  ;;  %14285 = vmatprep.subr.bf16.mxu0 %v14668_v44  ;;  %v12850_v33 = vcombine.low %v18581_v59, %v18596_v42  ;;  %v18604_v39 = vsel %vm15512_vm15, %v12819_v58, %v8155_v17  ;;  %v14673_v19 = vld [vmem:[%s20859_s3 + $0x158] sm:$0xff]  }
 0x3e5   : > { %14206 = vmatmul.mubr.bf16.gmra.mxu0 %v14652_v10  ;;  %v8157_v52 = vrot.slane %v8155_v17, 4  ;;  %v12821_v5 = vrot.slane %v8065_v14, 9  ;;  %14154 = vmatmul.mubr.bf16.vlgmr.msra.gmra.mxu1 %v12845_v3  ;;  %v8169_v13 = vrot.slane %v18342_v21, 5  ;;  %v8172_v49 = vrot.slane %v18404_v37, 5  ;;  %v14659_v21 = vld [vmem:[%s20859_s3 + $0x128] sm:$0xff]   ;;  %v14667_v50 = vld [vmem:[%s20859_s3 + $0x118] sm:$0xff]  }
 0x3e6   : > { %14209 = vmatprep.mubr.bf16.mxu0 %v14654_v41  ;;  %v18614_v29 = vsel %vm15512_vm15, %v12820_v15, %v8162_v36  ;;  %v8164_v9 = vrot.slane %v8162_v36, 4  ;;  %14234 = vmatpush3.bf16.msra.mxu1 %v18446_v20  ;;  %v12822_v55 = vrot.slane %v8066_v34, 9  ;;  %v8176_v61 = vrot.slane %v18361_v46, 5  ;;  %v8069_v17 = vld [vmem:[#allocation2 + $0x9c] sm:$0xe]  ;;  %v14657_v15 = vld [vmem:[#allocation2 + $0x54] sm:$0xff]  }
 0x3e7   : > { %14157 = vmatprep.mubr.bf16.mxu1 %v12846_v51  ;;  %v18621_v40 = vsel %vm15512_vm15, %v8157_v52, %v8158_v16  ;;  %v8179_v3 = vrot.slane %v18433_v43, 5  ;;  %14235 = vmatprep.subr.bf16.mxu1 %v14656_v56  ;;  %v18636_v51 = vsel %vm15512_vm15, %v12821_v5, %v8169_v13  ;;  %v8171_v46 = vrot.slane %v8169_v13, 4  ;;  %v14655_v16 = vld [vmem:[#allocation2 + $0x48] sm:$0xff]   ;;  %v18666_v52 = vld [vmem:[#allocation2 + $0x10] sm:$0xf] }
 0x3e8   : > { %v12851_v37 = vcombine.low %v18604_v39, %v18621_v40  ;;  %v18632_v20 = vsel %vm15512_vm15, %v8164_v9, %v8165_v45  ;;  %14286 = vmatpush3.bf16.msra.mxu0 %v14668_v44  ;;  %v18642_v12 = vsel %vm15512_vm15, %v12822_v55, %v8176_v61  ;;  %v8178_v8 = vrot.slane %v8176_v61, 4  ;;  %v6863_v13 = vld [vmem:[#allocation2 + $0xc0] sm:$0x1]  ;;  %v8070_v61 = vld [vmem:[#allocation2 + $0xa8] sm:$0xe] }
 0x3e9   : > { %v12852_v43 = vcombine.low %v18614_v29, %v18632_v20  ;;  %14287 = vmatprep.subr.bf16.mxu0 %v14670_v60  ;;  %v12823_v7 = vrot.slane %v8067_v22, 9  ;;  %v18654_v44 = vsel %vm15512_vm15, %v8171_v46, %v8172_v49  ;;  %v8183_v58 = vrot.slane %v18395_v11, 5  ;;  %v9678_v11 = vld [vmem:[#allocation2 + $0xc] sm:$0xe]  ;;  %v18674_v49 = vld [vmem:[#allocation2 + $0x14] sm:$0x1] }
 0x3ea   : > { %v8186_v14 = vrot.slane %v18441_v0, 5  ;;  %v12824_v10 = vrot.slane %v8068_v30, 9  ;;  %14236 = vmatpush3.bf16.msra.mxu1 %v14656_v56  ;;  %v12853_v41 = vcombine.low %v18636_v51, %v18654_v44  ;;  %v18662_v36 = vsel %vm15512_vm15, %v8178_v8, %v8179_v3  ;;  %v9682_v18 = vld [vmem:[#allocation2 + $0x3c] sm:$0xe]  ;;  %v8930_v40 = vld [vmem:[#allocation2 + $0x24] sm:$0xf] }
 0x3eb   : > { %v8190_v45 = vrot.slane %v18420_v38, 5  ;;  %v8193_v34 = vrot.slane %v18466_v31, 5  ;;  %14237 = vmatprep.subr.bf16.mxu1 %v14659_v21  ;;  %v12854_v0 = vcombine.low %v18642_v12, %v18662_v36  ;;  %v18672_v56 = vsel %vm15512_vm15, %v12823_v7, %v8183_v58  ;;  %v9679_v7 = vld [vmem:[#allocation2 + $0x18] sm:$0xe] }
 0x3ec   : > { %14288 = vmatpush3.bf16.msra.mxu0 %v14670_v60  ;;  %v8185_v5 = vrot.slane %v8183_v58, 4  ;;  %v12728_v9 = vrot.slane %v6741_v62, 9  ;;  %v14675_v60 = vld [vmem:[%s20859_s3 + $0x150] sm:$0xff]   ;;  %v12825_v22 = vrot.slane %v8069_v17, 9  ;;  %v8197_v55 = vrot.slane %v18426_v1, 5  ;;  %v18854_v20 = vld [vmem:[%s20859_s3 + $0x1b8] sm:$0xff]  }
 0x3ed   : > { %14210 = vmatmul.mubr.bf16.gmra.mxu0 %v14655_v16  ;;  %14289 = vmatprep.subr.bf16.mxu0 %v14673_v19  ;;  %v18678_v38 = vsel %vm15512_vm15, %v12824_v10, %v8190_v45  ;;  %v8192_v31 = vrot.slane %v8190_v45, 4  ;;  %v8200_v46 = vrot.slane %v18482_v32, 5  ;;  %v12948_v8 = vrot.slane %v9678_v11, 9  ;;  %v18709_v62 = vld [vmem:[#allocation2 + $0x20] sm:$0x1]  ;;  %v14678_v10 = vld [vmem:[%s20859_s3 + $0x148] sm:$0xff]  }
 0x3ee   : > { %14158 = vmatmul.mubr.bf16.gmra.mxu1 %v12847_v2  ;;  %14213 = vmatprep.mubr.bf16.mxu0 %v14657_v15  ;;  %v18689_v3 = vsel %vm15512_vm15, %v8185_v5, %v8186_v14  ;;  %v6864_v30 = vsel %vm14891_vm8, %v12728_v9, %v6863_v13  ;;  %v18705_v54 = vsel %vm15512_vm15, %v12825_v22, %v8197_v55  ;;  %v8199_v32 = vrot.slane %v8197_v55, 4  ;;  %v18707_v2 = vld [vmem:[#allocation2 + $0x1c] sm:$0xf]  ;;  %v8071_v14 = vld [vmem:[#allocation2 + $0xb4] sm:$0xe]  ;;  %v14660_v22 = vld [vmem:[#allocation2 + $0x6c] sm:$0xff]  }
 0x3ef   : > { %14161 = vmatprep.mubr.bf16.mxu1 %v12848_v26  ;;  %14238 = vmatpush3.bf16.msra.mxu1 %v14659_v21  ;;  %v12855_v1 = vcombine.low %v18672_v56, %v18689_v3  ;;  %v18701_v24 = vsel %vm15512_vm15, %v8192_v31, %v8193_v34  ;;  %6865 = vst [vmem:[#allocation2 + $0xc0] sm:$0x1] %v6864_v30  ;;  %v9744_v26 = vrot.slane %v18666_v52, 5  ;;  %v9747_v21 = vrot.slane %v18674_v49, 5  ;;  %v18735_v9 = vld [vmem:[#allocation2 + $0x28] sm:$0xf] }
 0x3f0   : > { %14239 = vmatprep.subr.bf16.mxu1 %v18650_v35  ;;  %14290 = vmatpush3.bf16.msra.mxu0 %v14673_v19  ;;  %v12826_v58 = vrot.slane %v8070_v61, 9  ;;  %v18724_v17 = vsel %vm15512_vm15, %v8199_v32, %v8200_v46  ;;  %v8204_v19 = vrot.slane %v18453_v28, 5  ;;  %v8207_v16 = vrot.slane %v18492_v23, 5  ;;  %v9680_v13 = vld [vmem:[#allocation2 + $0x24] sm:$0xe]  ;;  %v14672_v28 = vld [vmem:[%s20859_s3 + $0x110] sm:$0xff]  }
 0x3f1   : > { %14291 = vmatprep.subr.bf16.mxu0 %v14675_v60  ;;  %v12949_v15 = vrot.slane %v9679_v7, 9  ;;  %v18732_v34 = vsel %vm15512_vm15, %v12948_v8, %v9744_v26  ;;  %v9746_v11 = vrot.slane %v9744_v26, 4  ;;  %v9751_v5 = vrot.slane %v18707_v2, 5  ;;  %v14658_v31 = vld [vmem:[#allocation2 + $0x60] sm:$0xff]   ;;  %v18755_v32 = vld [vmem:[#allocation2 + $0x2c] sm:$0x1] }
 0x3f2   : > { %v18743_v23 = vsel %vm15512_vm15, %v12826_v58, %v8204_v19  ;;  %v8206_v55 = vrot.slane %v8204_v19, 4  ;;  %v9754_v61 = vrot.slane %v18709_v62, 5  ;;  %v12827_v30 = vrot.slane %v8071_v14, 9  ;;  %v8924_v26 = vld [vmem:[#allocation2 + $0xc] sm:$0xf] }
 0x3f3   : > { %14240 = vmatpush3.bf16.msra.mxu1 %v18650_v35  ;;  %v18748_v46 = vsel %vm15512_vm15, %v9746_v11, %v9747_v21  ;;  %v18752_v35 = vsel %vm15512_vm15, %v12949_v15, %v9751_v5  ;;  %v9753_v8 = vrot.slane %v9751_v5, 4  ;;  %v8211_v7 = vrot.slane %v18463_v53, 5  ;;  %v14679_v21 = vld [vmem:[%s20859_s3 + $0x140] sm:$0xff]   ;;  %v18780_v5 = vld [vmem:[#allocation2 + $0x34] sm:$0xf] }
 0x3f4   : > { %14241 = vmatprep.subr.bf16.mxu1 %v14667_v50  ;;  %14292 = vmatpush3.bf16.msra.mxu0 %v14675_v60  ;;  %v18761_v60 = vsel %vm15512_vm15, %v8206_v55, %v8207_v16  ;;  %v8214_v14 = vrot.slane %v18496_v6, 5  ;;  %v12950_v19 = vrot.slane %v9680_v13, 9  ;;  %v9758_v47 = vrot.slane %v18735_v9, 5  ;;  %v18789_v13 = vld [vmem:[#allocation2 + $0x38] sm:$0x1]  ;;  %v14664_v53 = vld [vmem:[#allocation2 + $0x84] sm:$0xff]  }
 0x3f5   : > { %14214 = vmatmul.mubr.bf16.gmra.mxu0 %v14658_v31  ;;  %14293 = vmatprep.subr.bf16.mxu0 %v14678_v10  ;;  %v18774_v15 = vsel %vm15512_vm15, %v9753_v8, %v9754_v61  ;;  %v18778_v16 = vsel %vm15512_vm15, %v12827_v30, %v8211_v7  ;;  %v8213_v11 = vrot.slane %v8211_v7, 4  ;;  %v9761_v4 = vrot.slane %v18755_v32, 5  ;;  %v14677_v31 = vld [vmem:[%s20859_s3 + $0x108] sm:$0xff]   ;;  %v18809_v8 = vld [vmem:[%s20859_s3 + $0x1f8] sm:$0xff]   ;;  %v18827_v45 = vld [vmem:[#allocation2 + $0x40] sm:$0xf] }
 0x3f6   : > { %14162 = vmatmul.mubr.bf16.gmra.mxu1 %v12849_v25  ;;  %14217 = vmatprep.mubr.bf16.mxu0 %v14660_v22  ;;  %v8973_v25 = vshrl.u32 %v8924_v26, 16  ;;  %v8976_v42 = vshll.u32 %v8924_v26, 16  ;;  %v9681_v22 = vld [vmem:[#allocation2 + $0x30] sm:$0xe]  ;;  %v18804_v61 = vsel %vm15512_vm15, %v12950_v19, %v9758_v47  ;;  %v9760_v30 = vrot.slane %v9758_v47, 4  ;;  %v14661_v6 = vld [vmem:[#allocation2 + $0x78] sm:$0xff]  }
 0x3f7   : > { %14165 = vmatprep.mubr.bf16.mxu1 %v12850_v33  ;;  %14242 = vmatpush3.bf16.msra.mxu1 %v14667_v50  ;;  %v18796_v59 = vsel %vm15512_vm15, %v8213_v11, %v8214_v14  ;;  %v8982_v33 = vshll.u32 %v18666_v52, 16  ;;  %v8986_v50 = vshrl.u32 %v18666_v52, 16  ;;  %v8992_v52 = vshll.u32 %v18674_v49, 16  ;;  %v8927_v11 = vld [vmem:[#allocation2 + $0x18] sm:$0xf] }
 0x3f8   : > { %14243 = vmatprep.subr.bf16.mxu1 %v14672_v28  ;;  %14294 = vmatpush3.bf16.msra.mxu0 %v14678_v10  ;;  %v8975_v10 = vrot.slane %v8973_v25, 4  ;;  %v8978_v7 = vrot.slane %v8976_v42, 5  ;;  %v18814_v55 = vsel %vm15512_vm15, %v9760_v30, %v9761_v4  ;;  %v12951_v19 = vrot.slane %v9681_v22, 9  ;;  %v14680_v42 = vld [vmem:[%s20859_s3 + $0x100] sm:$0xff]   ;;  %v18927_v56 = vld [vmem:[#allocation2 + $0x68] sm:$0x1] }
 0x3f9   : > { %14295 = vmatprep.subr.bf16.mxu0 %v14679_v21  ;;  %v8984_v26 = vrot.slane %v8982_v33, 5  ;;  %v8988_v14 = vrot.slane %v8986_v50, 4  ;;  %v9765_v47 = vrot.slane %v18780_v5, 5  ;;  %v9768_v25 = vrot.slane %v18789_v13, 5  ;;  %v9685_v3 = vld [vmem:[#allocation2 + $0x60] sm:$0xe] }
 0x3fa   : > { %v12982_v49 = vcombine.low %v18804_v61, %v18814_v55  ;;  %v8994_v50 = vrot.slane %v8992_v52, 5  ;;  %v8997_v30 = vshrl.u32 %v8927_v11, 16  ;;  %v9000_v58 = vshll.u32 %v8927_v11, 16  ;;  %v14688_v61 = vld [vmem:[%s20859_s3 + $0x1e8] sm:$0xff]  }
 0x3fb   : > { %14244 = vmatpush3.bf16.msra.mxu1 %v14672_v28  ;;  %v8979_v28 = vor.u32 %v8978_v7, %v8975_v10  ;;  %v8989_v33 = vor.u32 %v8988_v14, %v8984_v26  ;;  %v18825_v4 = vsel %vm15512_vm15, %v12951_v19, %v9765_v47  ;;  %v9767_v22 = vrot.slane %v9765_v47, 4 }
 0x3fc   : > { %14245 = vmatprep.subr.bf16.mxu1 %v14677_v31  ;;  %14296 = vmatpush3.bf16.msra.mxu0 %v14679_v21  ;;  %v18829_v21 = vld [vmem:[#allocation2 + $0x44] sm:$0x1]  ;;  %v9006_v7 = vshll.u32 %v18707_v2, 16  ;;  %v9010_v14 = vshrl.u32 %v18707_v2, 16  ;;  %v8999_v11 = vrot.slane %v8997_v30, 4  ;;  %v9002_v19 = vrot.slane %v9000_v58, 5 }
 0x3fd   : > { %14218 = vmatmul.mubr.bf16.gmra.mxu0 %v14661_v6  ;;  %14377 = vmatprep.subr.bf16.mxu0 %v18809_v8  ;;  %v8980_v6 = vrot.slane %v8979_v28, 4  ;;  %v8990_v10 = vrot.slane %v8989_v33, 4  ;;  %v18842_v52 = vsel %vm15512_vm15, %v9767_v22, %v9768_v25  ;;  %v9016_v39 = vshll.u32 %v18709_v62, 16  ;;  %v18860_v33 = vld [vmem:[#allocation2 + $0x4c] sm:$0xf] }
 0x3fe   : > { %14166 = vmatmul.mubr.bf16.gmra.mxu1 %v12851_v37  ;;  %14221 = vmatprep.mubr.bf16.mxu0 %v14664_v53  ;;  %v12983_v29 = vcombine.low %v18825_v4, %v18842_v52  ;;  %v9003_v62 = vor.u32 %v9002_v19, %v8999_v11  ;;  %v9012_v53 = vrot.slane %v9010_v14, 4  ;;  %v12952_v47 = vrot.slane %v9682_v18, 9  ;;  %v14683_v4 = vld [vmem:[%s20859_s3 + $0x1a8] sm:$0xff]  }
 0x3ff   : > { %14169 = vmatprep.mubr.bf16.mxu1 %v12852_v43  ;;  %14246 = vmatpush3.bf16.msra.mxu1 %v14677_v31  ;;  %v8985_v37 = vsel %vm15021_vm12, %v8980_v6, %v8984_v26  ;;  %v8995_v2 = vsel %vm15021_vm12, %v8990_v10, %v8994_v50  ;;  %v9008_v43 = vrot.slane %v9006_v7, 5  ;;  %v9018_v31 = vrot.slane %v9016_v39, 5  ;;  %v14666_v50 = vld [vmem:[#allocation2 + $0x90] sm:$0xff]   ;;  %v9683_v7 = vld [vmem:[#allocation2 + $0x48] sm:$0xe] }
 0x400   : > { %14247 = vmatprep.subr.bf16.mxu1 %v14680_v42  ;;  %v18856_v58 = vcombine.low %v8985_v37, %v8995_v2  ;;  %v9772_v26 = vrot.slane %v18827_v45, 5  ;;  %v9775_v25 = vrot.slane %v18829_v21, 5  ;;  %v9021_v28 = vshrl.u32 %v8930_v40, 16  ;;  %v14669_v37 = vld [vmem:[#allocation2 + $0x9c] sm:$0xff]  }
 0x401   : > { %v9004_v22 = vrot.slane %v9003_v62, 4  ;;  %v9013_v30 = vor.u32 %v9012_v53, %v9008_v43  ;;  %v9024_v6 = vshll.u32 %v8930_v40, 16  ;;  %v9030_v10 = vshll.u32 %v18735_v9, 16  ;;  %v18871_v62 = vld [vmem:[#allocation2 + $0x50] sm:$0x1] }
 0x402   : > { %v18866_v18 = vsel %vm15512_vm15, %v12952_v47, %v9772_v26  ;;  %v9774_v14 = vrot.slane %v9772_v26, 4  ;;  %v9023_v11 = vrot.slane %v9021_v28, 4  ;;  %v9034_v19 = vshrl.u32 %v18735_v9, 16  ;;  %v8933_v28 = vld [vmem:[#allocation2 + $0x30] sm:$0xf] }
 0x403   : > { %14248 = vmatpush3.bf16.msra.mxu1 %v14680_v42  ;;  %v9009_v42 = vsel %vm15021_vm12, %v9004_v22, %v9008_v43  ;;  %v9014_v39 = vrot.slane %v9013_v30, 4  ;;  %v9026_v40 = vrot.slane %v9024_v6, 5  ;;  %v9032_v2 = vrot.slane %v9030_v10, 5  ;;  %v14671_v30 = vld [vmem:[#allocation2 + $0xa8] sm:$0xff]   ;;  %v9684_v10 = vld [vmem:[#allocation2 + $0x54] sm:$0xe] }
 0x404   : > { %14329 = vmatprep.subr.bf16.mxu1 %v18854_v20  ;;  %v18878_v53 = vsel %vm15512_vm15, %v9774_v14, %v9775_v25  ;;  %v9036_v47 = vrot.slane %v9034_v19, 4  ;;  %v9040_v9 = vshll.u32 %v18755_v32, 16  ;;  %v12953_v26 = vrot.slane %v9683_v7, 9 }
 0x405   : > { %14222 = vmatmul.mubr.bf16.gmra.mxu0 %v14666_v50  ;;  %v9019_v43 = vsel %vm15021_vm12, %v9014_v39, %v9018_v31  ;;  %v12984_v51 = vcombine.low %v18866_v18, %v18878_v53  ;;  %v9027_v44 = vor.u32 %v9026_v40, %v9023_v11  ;;  %v9782_v32 = vrot.slane %v18871_v62, 5  ;;  %v18896_v31 = vld [vmem:[#allocation2 + $0x58] sm:$0xf] }
 0x406   : > { %14170 = vmatmul.mubr.bf16.gmra.mxu1 %v12853_v41  ;;  %14225 = vmatprep.mubr.bf16.mxu0 %v14669_v37  ;;  %v9779_v41 = vrot.slane %v18860_v33, 5  ;;  %v18889_v25 = vcombine.low %v9009_v42, %v9019_v43  ;;  %v9037_v50 = vor.u32 %v9036_v47, %v9032_v2  ;;  %v9042_v22 = vrot.slane %v9040_v9, 5  ;;  %v18907_v47 = vld [vmem:[#allocation2 + $0x5c] sm:$0x1] }
 0x407   : > { %14173 = vmatprep.mubr.bf16.mxu1 %v12854_v0  ;;  %v9028_v6 = vrot.slane %v9027_v44, 4  ;;  %v9045_v0 = vshrl.u32 %v8933_v28, 16  ;;  %v9048_v37 = vshll.u32 %v8933_v28, 16  ;;  %v9054_v14 = vshll.u32 %v18780_v5, 16  ;;  %v8936_v9 = vld [vmem:[#allocation2 + $0x3c] sm:$0xf] }
 0x408   : > { %v18894_v12 = vsel %vm15512_vm15, %v12953_v26, %v9779_v41  ;;  %v9781_v36 = vrot.slane %v9779_v41, 4  ;;  %v9038_v7 = vrot.slane %v9037_v50, 4  ;;  %v9058_v11 = vshrl.u32 %v18780_v5, 16  ;;  %v14674_v26 = vld [vmem:[#allocation2 + $0xb4] sm:$0xff]  }
 0x409   : > { %v9033_v19 = vsel %vm15021_vm12, %v9028_v6, %v9032_v2  ;;  %v9047_v39 = vrot.slane %v9045_v0, 4  ;;  %v9064_v40 = vshll.u32 %v18789_v13, 16  ;;  %v9050_v43 = vrot.slane %v9048_v37, 5 }
 0x40a   : > { %v18904_v42 = vsel %vm15512_vm15, %v9781_v36, %v9782_v32  ;;  %v9043_v28 = vsel %vm15021_vm12, %v9038_v7, %v9042_v22  ;;  %v9056_v44 = vrot.slane %v9054_v14, 5  ;;  %v9060_v41 = vrot.slane %v9058_v11, 4  ;;  %v18925_v14 = vld [vmem:[#allocation2 + $0x64] sm:$0xf] }
 0x40b   : > { %v12985_v5 = vcombine.low %v18894_v12, %v18904_v42  ;;  %v18913_v2 = vcombine.low %v9033_v19, %v9043_v28  ;;  %v9066_v50 = vrot.slane %v9064_v40, 5  ;;  %v12954_v32 = vrot.slane %v9684_v10, 9 }
 0x40c   : > { %v9051_v13 = vor.u32 %v9050_v43, %v9047_v39  ;;  %v9786_v6 = vrot.slane %v18896_v31, 5  ;;  %v9789_v22 = vrot.slane %v18907_v47, 5  ;;  %v9069_v36 = vshrl.u32 %v8936_v9, 16 }
 0x40d   : > { %14226 = vmatmul.mubr.bf16.gmra.mxu0 %v14671_v30  ;;  %v21084_v0 = vcombine.low %v18678_v38, %v18701_v24  ;;  %v9061_v30 = vor.u32 %v9060_v41, %v9056_v44  ;;  %v9072_v7 = vshll.u32 %v8936_v9, 16  ;;  %v9078_v37 = vshll.u32 %v18827_v45, 16  ;;  %v8939_v41 = vld [vmem:[#allocation2 + $0x48] sm:$0xf] }
 0x40e   : > { %14174 = vmatmul.mubr.bf16.gmra.mxu1 %v12855_v1  ;;  %14229 = vmatprep.mubr.bf16.mxu0 %v14674_v26  ;;  %v9082_v10 = vshrl.u32 %v18827_v45, 16  ;;  %v9052_v1 = vrot.slane %v9051_v13, 4  ;;  %v18931_v11 = vsel %vm15512_vm15, %v12954_v32, %v9786_v6  ;;  %v9788_v19 = vrot.slane %v9786_v6, 4  ;;  %v14676_v13 = vld [vmem:[#allocation2 + $0xc0] sm:$0xff]  }
 0x40f   : > { %14177 = vmatprep.mubr.bf16.mxu1 %v21084_v0  ;;  %v9071_v39 = vrot.slane %v9069_v36, 4  ;;  %v9062_v38 = vrot.slane %v9061_v30, 4  ;;  %v9074_v24 = vrot.slane %v9072_v7, 5  ;;  %v9080_v40 = vrot.slane %v9078_v37, 5 }
 0x410   : > { %v9084_v9 = vrot.slane %v9082_v10, 4  ;;  %v9057_v26 = vsel %vm15021_vm12, %v9052_v1, %v9056_v44  ;;  %v18937_v45 = vsel %vm15512_vm15, %v9788_v19, %v9789_v22  ;;  %v9088_v28 = vshll.u32 %v18829_v21, 16  ;;  %v18948_v1 = vld [vmem:[#allocation2 + $0x70] sm:$0xf]  ;;  %v9686_v19 = vld [vmem:[#allocation2 + $0x6c] sm:$0xe] }
 0x411   : > { %v12955_v43 = vrot.slane %v9685_v3, 9  ;;  %v9067_v32 = vsel %vm15021_vm12, %v9062_v38, %v9066_v50  ;;  %v12986_v6 = vcombine.low %v18931_v11, %v18937_v45  ;;  %v9075_v36 = vor.u32 %v9074_v24, %v9071_v39  ;;  %v18950_v50 = vld [vmem:[#allocation2 + $0x74] sm:$0x1] }
 0x412   : > { %v9085_v0 = vor.u32 %v9084_v9, %v9080_v40  ;;  %v18944_v30 = vcombine.low %v9057_v26, %v9067_v32  ;;  %v9090_v44 = vrot.slane %v9088_v28, 5  ;;  %v9793_v7 = vrot.slane %v18925_v14, 5 }
 0x413   : > { %v9796_v22 = vrot.slane %v18927_v56, 5  ;;  %v9076_v21 = vrot.slane %v9075_v36, 4  ;;  %v9093_v10 = vshrl.u32 %v8939_v41, 16  ;;  %v9096_v3 = vshll.u32 %v8939_v41, 16  ;;  %v8942_v41 = vld [vmem:[#allocation2 + $0x54] sm:$0xf] }
 0x414   : > { %v9086_v37 = vrot.slane %v9085_v0, 4  ;;  %v21085_v39 = vcombine.low %v18705_v54, %v18724_v17  ;;  %v21086_v38 = vcombine.low %v18732_v34, %v18748_v46  ;;  %v18960_v24 = vsel %vm15512_vm15, %v12955_v43, %v9793_v7 }
 0x415   : > { %14230 = vmatmul.mubr.bf16.gmra.mxu0 %v14676_v13  ;;  %v9795_v9 = vrot.slane %v9793_v7, 4  ;;  %v9102_v26 = vshll.u32 %v18860_v33, 16  ;;  %v9106_v28 = vshrl.u32 %v18860_v33, 16  ;;  %v21087_v13 = vcombine.low %v18743_v23, %v18761_v60 }
 0x416   : > { %14178 = vmatmul.mubr.bf16.gmra.mxu1 %v21085_v39  ;;  %14297 = vmatprep.mubr.bf16.mxu0 %v21086_v38  ;;  %v9081_v54 = vsel %vm15021_vm12, %v9076_v21, %v9080_v40  ;;  %v9091_v17 = vsel %vm15021_vm12, %v9086_v37, %v9090_v44  ;;  %v9095_v34 = vrot.slane %v9093_v10, 4  ;;  %v9098_v46 = vrot.slane %v9096_v3, 5  ;;  %v18983_v38 = vld [vmem:[#allocation2 + $0x7c] sm:$0xf] }
 0x417   : > { %14181 = vmatprep.mubr.bf16.mxu1 %v21087_v13  ;;  %v18971_v43 = vcombine.low %v9081_v54, %v9091_v17  ;;  %v18975_v32 = vsel %vm15512_vm15, %v9795_v9, %v9796_v22  ;;  %v9104_v33 = vrot.slane %v9102_v26, 5  ;;  %v9108_v36 = vrot.slane %v9106_v28, 4  ;;  %v9687_v9 = vld [vmem:[#allocation2 + $0x78] sm:$0xe]  ;;  %v18989_v13 = vld [vmem:[#allocation2 + $0x80] sm:$0x1] }
 0x418   : > { %v12987_v23 = vcombine.low %v18960_v24, %v18975_v32  ;;  %v9099_v60 = vor.u32 %v9098_v46, %v9095_v34  ;;  %v9112_v0 = vshll.u32 %v18871_v62, 16  ;;  %v12956_v40 = vrot.slane %v9686_v19, 9  ;;  %v14686_v54 = vld [vmem:[%s20859_s3 + $0x1f0] sm:$0xff]  }
 0x419   : > { %v9109_v7 = vor.u32 %v9108_v36, %v9104_v33  ;;  %v9800_v44 = vrot.slane %v18948_v1, 5  ;;  %v9803_v21 = vrot.slane %v18950_v50, 5  ;;  %v9117_v37 = vshrl.u32 %v8942_v41, 16 }
 0x41a   : > { %v9100_v10 = vrot.slane %v9099_v60, 4  ;;  %v9114_v3 = vrot.slane %v9112_v0, 5  ;;  %v9120_v39 = vshll.u32 %v8942_v41, 16  ;;  %v9126_v22 = vshll.u32 %v18896_v31, 16  ;;  %v8945_v60 = vld [vmem:[#allocation2 + $0x60] sm:$0xf] }
 0x41b   : > { %v9110_v26 = vrot.slane %v9109_v7, 4  ;;  %v18987_v28 = vsel %vm15512_vm15, %v12956_v40, %v9800_v44  ;;  %v9802_v62 = vrot.slane %v9800_v44, 4  ;;  %v9119_v19 = vrot.slane %v9117_v37, 4 }
 0x41c   : > { %v21088_v41 = vcombine.low %v18752_v35, %v18774_v15  ;;  %v9105_v17 = vsel %vm15021_vm12, %v9100_v10, %v9104_v33  ;;  %v9122_v34 = vrot.slane %v9120_v39, 5  ;;  %v9128_v46 = vrot.slane %v9126_v22, 5 }
 0x41d   : > { %v9130_v36 = vshrl.u32 %v18896_v31, 16  ;;  %v21089_v0 = vcombine.low %v18778_v16, %v18796_v59  ;;  %v9115_v35 = vsel %vm15021_vm12, %v9110_v26, %v9114_v3  ;;  %v19010_v15 = vsel %vm15512_vm15, %v9802_v62, %v9803_v21  ;;  %v9688_v21 = vld [vmem:[#allocation2 + $0x84] sm:$0xe] }
 0x41e   : > { %14298 = vmatmul.mubr.bf16.vlgmr.msra.gmra.mxu0 %v21088_v41  ;;  %v9136_v33 = vshll.u32 %v18907_v47, 16  ;;  %v12957_v40 = vrot.slane %v9687_v9, 9  ;;  %v19014_v31 = vcombine.low %v9105_v17, %v9115_v35  ;;  %v12988_v16 = vcombine.low %v18987_v28, %v19010_v15 }
 0x41f   : > { %14182 = vmatmul.mubr.bf16.gmra.mxu1 %v21089_v0  ;;  %14301 = vmatprep.mubr.bf16.mxu0 %v12982_v49  ;;  %v9123_v59 = vor.u32 %v9122_v34, %v9119_v19  ;;  %v9132_v55 = vrot.slane %v9130_v36, 4  ;;  %v9807_v7 = vrot.slane %v18983_v38, 5  ;;  %v9810_v47 = vrot.slane %v18989_v13, 5  ;;  %v6720_v36 = vld [vmem:[#allocation2 + $0xb8] sm:$0xf] }
 0x420   : > { %14249 = vmatprep.mubr.bf16.mxu1 %v18856_v58  ;;  %14378 = vmatpush3.bf16.msra.mxu0 %v18809_v8  ;;  %v9138_v49 = vrot.slane %v9136_v33, 5  ;;  %v9141_v44 = vshrl.u32 %v8945_v60, 16  ;;  %v19024_v58 = vld [vmem:[#allocation2 + $0x88] sm:$0xf]  ;;  %v9144_v3 = vshll.u32 %v8945_v60, 16  ;;  %v9150_v39 = vshll.u32 %v18925_v14, 16 }
 0x421   : > { %14379 = vmatprep.subr.bf16.mxu0 %v14686_v54  ;;  %v9124_v37 = vrot.slane %v9123_v59, 4  ;;  %v9133_v10 = vor.u32 %v9132_v55, %v9128_v46  ;;  %v19027_v8 = vld [vmem:[#allocation2 + $0x8c] sm:$0x1]  ;;  %v19031_v22 = vsel %vm15512_vm15, %v12957_v40, %v9807_v7  ;;  %v9809_v9 = vrot.slane %v9807_v7, 4  ;;  %v14682_v60 = vld [vmem:[%s20859_s3 + $0x1b0] sm:$0xff]  }
 0x422   : > { %v9143_v26 = vrot.slane %v9141_v44, 4  ;;  %v9154_v62 = vshrl.u32 %v18925_v14, 16  ;;  %v9146_v17 = vrot.slane %v9144_v3, 5  ;;  %v9152_v34 = vrot.slane %v9150_v39, 5  ;;  %v8948_v40 = vld [vmem:[#allocation2 + $0x6c] sm:$0xf] }
 0x423   : > { %v9129_v19 = vsel %vm15021_vm12, %v9124_v37, %v9128_v46  ;;  %v9134_v41 = vrot.slane %v9133_v10, 4  ;;  %v19041_v0 = vsel %vm15512_vm15, %v9809_v9, %v9810_v47  ;;  %v9160_v33 = vshll.u32 %v18927_v56, 16  ;;  %6723 = vst [vmem:[#allocation2 + $0xd0] sm:$0xf] %v6720_v36  ;;  %v14689_v56 = vld [vmem:[%s20859_s3 + $0x1e0] sm:$0xff]   ;;  %v14691_v44 = vld [vmem:[%s20859_s3 + $0x1d8] sm:$0xff]  }
 0x424   : > { %14380 = vmatpush3.bf16.msra.mxu0 %v14686_v54  ;;  %v9156_v35 = vrot.slane %v9154_v62, 4  ;;  %v12958_v14 = vrot.slane %v9688_v21, 9  ;;  %v12989_v46 = vcombine.low %v19031_v22, %v19041_v0  ;;  %v9147_v59 = vor.u32 %v9146_v17, %v9143_v26  ;;  %v9689_v10 = vld [vmem:[#allocation2 + $0x90] sm:$0xe]  ;;  %v19085_v62 = vld [vmem:[#allocation2 + $0x98] sm:$0x1] }
 0x425   : > { %14381 = vmatprep.subr.bf16.mxu0 %v14688_v61  ;;  %v9139_v54 = vsel %vm15021_vm12, %v9134_v41, %v9138_v49  ;;  %v9814_v55 = vrot.slane %v19024_v58, 5  ;;  %v9162_v49 = vrot.slane %v9160_v33, 5  ;;  %v9817_v7 = vrot.slane %v19027_v8, 5 }
 0x426   : > { %14302 = vmatmul.mubr.bf16.gmra.mxu0 %v12983_v29  ;;  %v19062_v52 = vcombine.low %v9129_v19, %v9139_v54  ;;  %v9157_v29 = vor.u32 %v9156_v35, %v9152_v34  ;;  %v9148_v47 = vrot.slane %v9147_v59, 4  ;;  %v9165_v53 = vshrl.u32 %v8948_v40, 16  ;;  %v8951_v19 = vld [vmem:[#allocation2 + $0x78] sm:$0xf] }
 0x427   : > { %14250 = vmatmul.mubr.bf16.vlgmr.msra.gmra.mxu1 %v18889_v25  ;;  %14305 = vmatprep.mubr.bf16.mxu0 %v12984_v51  ;;  %v19069_v25 = vsel %vm15512_vm15, %v12958_v14, %v9814_v55  ;;  %v9816_v18 = vrot.slane %v9814_v55, 4  ;;  %v19071_v51 = vld [vmem:[#allocation2 + $0x94] sm:$0xf]  ;;  %v9168_v37 = vshll.u32 %v8948_v40, 16  ;;  %v9184_v26 = vshll.u32 %v18950_v50, 16  ;;  %v14684_v50 = vld [vmem:[%s20859_s3 + $0x1a0] sm:$0xff]  }
 0x428   : > { %14330 = vmatpush3.bf16.msra.mxu1 %v18854_v20  ;;  %14253 = vmatprep.mubr.bf16.mxu1 %v18913_v2  ;;  %v9158_v21 = vrot.slane %v9157_v29, 4  ;;  %v9174_v20 = vshll.u32 %v18948_v1, 16  ;;  %v9178_v2 = vshrl.u32 %v18948_v1, 16  ;;  %v9153_v3 = vsel %vm15021_vm12, %v9148_v47, %v9152_v34  ;;  %v9690_v55 = vld [vmem:[#allocation2 + $0x9c] sm:$0xe]  ;;  %v14692_v47 = vld [vmem:[%s20859_s3 + $0x1d0] sm:$0xff]  }
 0x429   : > { %14331 = vmatprep.subr.bf16.mxu1 %v14682_v60  ;;  %14382 = vmatpush3.bf16.msra.mxu0 %v14688_v61  ;;  %v19082_v39 = vsel %vm15512_vm15, %v9816_v18, %v9817_v7  ;;  %v9167_v9 = vrot.slane %v9165_v53, 4  ;;  %v9170_v61 = vrot.slane %v9168_v37, 5  ;;  %v9186_v35 = vrot.slane %v9184_v26, 5  ;;  %v19114_v18 = vld [vmem:[#allocation2 + $0xa0] sm:$0xf]  ;;  %v14694_v26 = vld [vmem:[%s20859_s3 + $0x1c8] sm:$0xff]  }
 0x42a   : > { %14383 = vmatprep.subr.bf16.mxu0 %v14689_v56  ;;  %v9163_v41 = vsel %vm15021_vm12, %v9158_v21, %v9162_v49  ;;  %v12990_v1 = vcombine.low %v19069_v25, %v19082_v39  ;;  %v9176_v17 = vrot.slane %v9174_v20, 5  ;;  %v9180_v36 = vrot.slane %v9178_v2, 4  ;;  %v19117_v37 = vld [vmem:[#allocation2 + $0xa4] sm:$0x1] }
 0x42b   : > { %v19091_v34 = vcombine.low %v9153_v3, %v9163_v41  ;;  %v12959_v33 = vrot.slane %v9689_v10, 9  ;;  %v9171_v14 = vor.u32 %v9170_v61, %v9167_v9  ;;  %v9821_v40 = vrot.slane %v19071_v51, 5  ;;  %v8954_v20 = vld [vmem:[#allocation2 + $0x84] sm:$0xf]  ;;  %v14690_v61 = vld [vmem:[%s20859_s3 + $0x190] sm:$0xff]  }
 0x42c   : > { %14332 = vmatpush3.bf16.msra.mxu1 %v14682_v60  ;;  %v9824_v54 = vrot.slane %v19085_v62, 5  ;;  %v9189_v59 = vshrl.u32 %v8951_v19, 16  ;;  %v9181_v60 = vor.u32 %v9180_v36, %v9176_v17  ;;  %v9192_v29 = vshll.u32 %v8951_v19, 16 }
 0x42d   : > { %14333 = vmatprep.subr.bf16.mxu1 %v14683_v4  ;;  %14384 = vmatpush3.bf16.msra.mxu0 %v14689_v56  ;;  %v9198_v49 = vshll.u32 %v18983_v38, 16  ;;  %v9202_v7 = vshrl.u32 %v18983_v38, 16  ;;  %v9172_v56 = vrot.slane %v9171_v14, 4  ;;  %v19112_v12 = vsel %vm15512_vm15, %v12959_v33, %v9821_v40  ;;  %v19143_v14 = vld [vmem:[#allocation2 + $0xac] sm:$0xf] }
 0x42e   : > { %14306 = vmatmul.mubr.bf16.gmra.mxu0 %v12985_v5  ;;  %14385 = vmatprep.subr.bf16.mxu0 %v14691_v44  ;;  %v9823_v42 = vrot.slane %v9821_v40, 4  ;;  %v9191_v5 = vrot.slane %v9189_v59, 4  ;;  %v9182_v38 = vrot.slane %v9181_v60, 4  ;;  %v9194_v53 = vrot.slane %v9192_v29, 5  ;;  %v9691_v60 = vld [vmem:[#allocation2 + $0xa8] sm:$0xe] }
 0x42f   : > { %14254 = vmatmul.mubr.bf16.gmra.mxu1 %v18944_v30  ;;  %14309 = vmatprep.mubr.bf16.mxu0 %v12986_v6  ;;  %v9200_v21 = vrot.slane %v9198_v49, 5  ;;  %v9204_v30 = vrot.slane %v9202_v7, 4  ;;  %v9177_v11 = vsel %vm15021_vm12, %v9172_v56, %v9176_v17  ;;  %v14687_v6 = vld [vmem:[%s20859_s3 + $0x198] sm:$0xff]   ;;  %v9216_v33 = vshll.u32 %v8954_v20, 16 }
 0x430   : > { %14257 = vmatprep.mubr.bf16.mxu1 %v18971_v43  ;;  %14334 = vmatpush3.bf16.msra.mxu1 %v14683_v4  ;;  %v19123_v45 = vsel %vm15512_vm15, %v9823_v42, %v9824_v54  ;;  %v9208_v43 = vshll.u32 %v18989_v13, 16  ;;  %v12960_v4 = vrot.slane %v9690_v55, 9  ;;  %v9187_v2 = vsel %vm15021_vm12, %v9182_v38, %v9186_v35  ;;  %v19161_v42 = vld [vmem:[#allocation2 + $0xb0] sm:$0x1] }
 0x431   : > { %14335 = vmatprep.subr.bf16.mxu1 %v14684_v50  ;;  %14386 = vmatpush3.bf16.msra.mxu0 %v14691_v44  ;;  %v12991_v10 = vcombine.low %v19112_v12, %v19123_v45  ;;  %v9195_v3 = vor.u32 %v9194_v53, %v9191_v5  ;;  %v9205_v9 = vor.u32 %v9204_v30, %v9200_v21  ;;  %v9828_v13 = vrot.slane %v19114_v18, 5  ;;  %v14693_v30 = vld [vmem:[%s20859_s3 + $0x188] sm:$0xff]   ;;  %v10562_v45 = vld [vmem:[#allocation2 + $0x18] sm:$0xf] }
 0x432   : > { %14387 = vmatprep.subr.bf16.mxu0 %v14692_v47  ;;  %v19136_v19 = vcombine.low %v9177_v11, %v9187_v2  ;;  %v9210_v41 = vrot.slane %v9208_v43, 5  ;;  %v9831_v44 = vrot.slane %v19117_v37, 5  ;;  %v9213_v35 = vshrl.u32 %v8954_v20, 16 }
 0x433   : > { %v9196_v17 = vrot.slane %v9195_v3, 4  ;;  %v9206_v36 = vrot.slane %v9205_v9, 4  ;;  %v19147_v40 = vsel %vm15512_vm15, %v12960_v4, %v9828_v13  ;;  %v9830_v54 = vrot.slane %v9828_v13, 4  ;;  %v19183_v4 = vld [vmem:[#allocation2 + $0xb8] sm:$0xf] }
 0x434   : > { %14336 = vmatpush3.bf16.msra.mxu1 %v14684_v50  ;;  %v9222_v59 = vshll.u32 %v19024_v58, 16  ;;  %v9226_v55 = vshrl.u32 %v19024_v58, 16  ;;  %v14695_v50 = vld [vmem:[%s20859_s3 + $0x1c0] sm:$0xff]   ;;  %v9215_v7 = vrot.slane %v9213_v35, 4  ;;  %v9218_v56 = vrot.slane %v9216_v33, 5 }
 0x435   : > { %14337 = vmatprep.subr.bf16.mxu1 %v14687_v6  ;;  %14388 = vmatpush3.bf16.msra.mxu0 %v14692_v47  ;;  %v9201_v29 = vsel %vm15021_vm12, %v9196_v17, %v9200_v21  ;;  %v9211_v49 = vsel %vm15021_vm12, %v9206_v36, %v9210_v41  ;;  %v8957_v58 = vld [vmem:[#allocation2 + $0x90] sm:$0xf]  ;;  %v19171_v32 = vsel %vm15512_vm15, %v9830_v54, %v9831_v44  ;;  %v12961_v53 = vrot.slane %v9691_v60, 9  ;;  %v19189_v41 = vld [vmem:[#allocation2 + $0xbc] sm:$0x1] }
 0x436   : > { %14310 = vmatmul.mubr.bf16.gmra.mxu0 %v12987_v23  ;;  %14389 = vmatprep.subr.bf16.mxu0 %v14694_v26  ;;  %v19167_v24 = vcombine.low %v9201_v29, %v9211_v49  ;;  %v9224_v23 = vrot.slane %v9222_v59, 5  ;;  %v9228_v47 = vrot.slane %v9226_v55, 4  ;;  %v12992_v5 = vcombine.low %v19147_v40, %v19171_v32  ;;  %v8960_v36 = vld [vmem:[#allocation2 + $0x9c] sm:$0xf]  ;;  %v14696_v55 = vld [vmem:[%s20859_s3 + $0x180] sm:$0xff]  }
 0x437   : > { %14258 = vmatmul.mubr.bf16.gmra.mxu1 %v19014_v31  ;;  %14313 = vmatprep.mubr.bf16.mxu0 %v12988_v16  ;;  %v9219_v38 = vor.u32 %v9218_v56, %v9215_v7  ;;  %v9232_v31 = vshll.u32 %v19027_v8, 16  ;;  %v9835_v15 = vrot.slane %v19143_v14, 5  ;;  %v9838_v16 = vrot.slane %v19161_v42, 5  ;;  %v9692_v8 = vld [vmem:[#allocation2 + $0xb4] sm:$0xe] }
 0x438   : > { %14261 = vmatprep.mubr.bf16.mxu1 %v19062_v52  ;;  %14338 = vmatpush3.bf16.msra.mxu1 %v14687_v6  ;;  %v9229_v28 = vor.u32 %v9228_v47, %v9224_v23  ;;  %v9237_v21 = vshrl.u32 %v8957_v58, 16  ;;  %v9240_v43 = vshll.u32 %v8957_v58, 16  ;;  %v9246_v6 = vshll.u32 %v19071_v51, 16  ;;  %v9693_v58 = vld [vmem:[#allocation2 + $0xc0] sm:$0xe] }
 0x439   : > { %14339 = vmatprep.subr.bf16.mxu1 %v14690_v61  ;;  %14390 = vmatpush3.bf16.msra.mxu0 %v14694_v26  ;;  %v9220_v52 = vrot.slane %v9219_v38, 4  ;;  %v9234_v11 = vrot.slane %v9232_v31, 5  ;;  %v19187_v2 = vsel %vm15512_vm15, %v12961_v53, %v9835_v15  ;;  %v9837_v3 = vrot.slane %v9835_v15, 4  ;;  %v10563_v40 = vld [vmem:[#allocation2 + $0x1c] sm:$0xf] }
 0x43a   : > { %14391 = vmatprep.subr.bf16.mxu0 %v14695_v50  ;;  %v9230_v20 = vrot.slane %v9229_v28, 4  ;;  %v9239_v9 = vrot.slane %v9237_v21, 4  ;;  %v9242_v13 = vrot.slane %v9240_v43, 5  ;;  %v9248_v44 = vrot.slane %v9246_v6, 5  ;;  %v19231_v28 = vld [vmem:[#allocation2 + $0xc8] sm:$0x1] }
 0x43b   : > { %v9225_v26 = vsel %vm15021_vm12, %v9220_v52, %v9224_v23  ;;  %v9250_v17 = vshrl.u32 %v19071_v51, 16  ;;  %v19198_v33 = vsel %vm15512_vm15, %v9837_v3, %v9838_v16  ;;  %v9256_v54 = vshll.u32 %v19085_v62, 16  ;;  %v19222_v23 = vld [vmem:[#allocation2 + $0xc4] sm:$0xf] }
 0x43c   : > { %14340 = vmatpush3.bf16.msra.mxu1 %v14690_v61  ;;  %v9235_v35 = vsel %vm15021_vm12, %v9230_v20, %v9234_v11  ;;  %v12962_v59 = vrot.slane %v9692_v8, 9  ;;  %v12993_v61 = vcombine.low %v19187_v2, %v19198_v33  ;;  %v9243_v60 = vor.u32 %v9242_v13, %v9239_v9 }
 0x43d   : > { %14341 = vmatprep.subr.bf16.mxu1 %v14693_v30  ;;  %14392 = vmatpush3.bf16.msra.mxu0 %v14695_v50  ;;  %v12934_v51 = vcombine.low %v9225_v26, %v9235_v35  ;;  %v9252_v29 = vrot.slane %v9250_v17, 4  ;;  %v9258_v62 = vrot.slane %v9256_v54, 5  ;;  %v9842_v50 = vrot.slane %v19183_v4, 5 }
 0x43e   : > { %14314 = vmatmul.mubr.bf16.gmra.mxu0 %v12989_v46  ;;  %v9845_v49 = vrot.slane %v19189_v41, 5  ;;  %v9261_v7 = vshrl.u32 %v8960_v36, 16  ;;  %v9244_v22 = vrot.slane %v9243_v60, 4  ;;  %v9264_v46 = vshll.u32 %v8960_v36, 16  ;;  %v8966_v60 = vld [vmem:[#allocation2 + $0xb4] sm:$0xf] }
 0x43f   : > { %14262 = vmatmul.mubr.bf16.gmra.mxu1 %v19091_v34  ;;  %14317 = vmatprep.mubr.bf16.mxu0 %v12990_v1  ;;  %v9253_v0 = vor.u32 %v9252_v29, %v9248_v44  ;;  %v9270_v56 = vshll.u32 %v19114_v18, 16  ;;  %v19219_v34 = vsel %vm15512_vm15, %v12962_v59, %v9842_v50  ;;  %v9844_v25 = vrot.slane %v9842_v50, 4 }
 0x440   : > { %14265 = vmatprep.mubr.bf16.mxu1 %v19136_v19  ;;  %14342 = vmatpush3.bf16.msra.mxu1 %v14693_v30  ;;  %v9263_v39 = vrot.slane %v9261_v7, 4  ;;  %v9274_v1 = vshrl.u32 %v19114_v18, 16  ;;  %v19227_v19 = vld [vmem:[%s20859_s3 + $0x238] sm:$0xff]   ;;  %v9249_v47 = vsel %vm15021_vm12, %v9244_v22, %v9248_v44  ;;  %v9266_v31 = vrot.slane %v9264_v46, 5  ;;  %v8963_v30 = vld [vmem:[#allocation2 + $0xa8] sm:$0xf] }
 0x441   : > { %14343 = vmatprep.subr.bf16.mxu1 %v14696_v55  ;;  %v9254_v38 = vrot.slane %v9253_v0, 4  ;;  %v9272_v53 = vrot.slane %v9270_v56, 5  ;;  %v9846_v15 = vsel %vm15512_vm15, %v9844_v25, %v9845_v49  ;;  %v9280_v16 = vshll.u32 %v19117_v37, 16 }
 0x442   : > { %v9276_v18 = vrot.slane %v9274_v1, 4  ;;  %v12963_v21 = vrot.slane %v9693_v58, 9  ;;  %v12994_v11 = vcombine.low %v19219_v34, %v9846_v15  ;;  %v9267_v43 = vor.u32 %v9266_v31, %v9263_v39 }
 0x443   : > { %v9259_v52 = vsel %vm15021_vm12, %v9254_v38, %v9258_v62  ;;  %v9849_v6 = vrot.slane %v19222_v23, 5  ;;  %v9282_v3 = vrot.slane %v9280_v16, 5  ;;  %v9852_v9 = vrot.slane %v19231_v28, 5 }
 0x444   : > { %14344 = vmatpush3.bf16.msra.mxu1 %v14696_v55  ;;  %v12935_v8 = vcombine.low %v9249_v47, %v9259_v52  ;;  %v9277_v20 = vor.u32 %v9276_v18, %v9272_v53  ;;  %v9268_v37 = vrot.slane %v9267_v43, 4  ;;  %v9285_v44 = vshrl.u32 %v8963_v30, 16  ;;  %v10565_v52 = vld [vmem:[#allocation2 + $0x24] sm:$0xf] }
 0x445   : > { %14425 = vmatprep.subr.bf16.mxu1 %v19227_v19  ;;  %v19247_v26 = vsel %vm15512_vm15, %v12963_v21, %v9849_v6  ;;  %v9851_v13 = vrot.slane %v9849_v6, 4  ;;  %v9288_v36 = vshll.u32 %v8963_v30, 16  ;;  %v9294_v35 = vshll.u32 %v19143_v14, 16  ;;  %v19276_v6 = vld [vmem:[#allocation2 + $0x28] sm:$0xf] }
 0x446   : > { %14318 = vmatmul.mubr.bf16.gmra.mxu0 %v12991_v10  ;;  %v9278_v17 = vrot.slane %v9277_v20, 4  ;;  %v9298_v12 = vshrl.u32 %v19143_v14, 16  ;;  %v9273_v10 = vsel %vm15021_vm12, %v9268_v37, %v9272_v53  ;;  %v9304_v59 = vshll.u32 %v19161_v42, 16 }
 0x447   : > { %14266 = vmatmul.mubr.bf16.gmra.mxu1 %v19167_v24  ;;  %14321 = vmatprep.mubr.bf16.mxu0 %v12992_v5  ;;  %v19259_v54 = vsel %vm15512_vm15, %v9851_v13, %v9852_v9  ;;  %v9287_v24 = vrot.slane %v9285_v44, 4  ;;  %v9290_v14 = vrot.slane %v9288_v36, 5  ;;  %v9296_v55 = vrot.slane %v9294_v35, 5  ;;  %v19278_v13 = vld [vmem:[#allocation2 + $0x2c] sm:$0x1] }
 0x448   : > { %14269 = vmatprep.mubr.bf16.mxu1 %v12934_v51  ;;  %v9283_v32 = vsel %vm15021_vm12, %v9278_v17, %v9282_v3  ;;  %v12995_v5 = vcombine.low %v19247_v26, %v19259_v54  ;;  %v10564_v51 = vld [vmem:[#allocation2 + $0x20] sm:$0x1]  ;;  %v9300_v62 = vrot.slane %v9298_v12, 4  ;;  %v9306_v50 = vrot.slane %v9304_v59, 5 }
 0x449   : > { %v12936_v29 = vcombine.low %v9273_v10, %v9283_v32  ;;  %v10611_v49 = vshrl.u32 %v10562_v45, 16  ;;  %v9291_v7 = vor.u32 %v9290_v14, %v9287_v24  ;;  %v10614_v22 = vshll.u32 %v10562_v45, 16  ;;  %v8969_v35 = vld [vmem:[#allocation2 + $0xc0] sm:$0xf] }
 0x44a   : > { %v10620_v0 = vshll.u32 %v10563_v40, 16  ;;  %v10624_v46 = vshrl.u32 %v10563_v40, 16  ;;  %v9301_v42 = vor.u32 %v9300_v62, %v9296_v55  ;;  %v10630_v58 = vshll.u32 %v10564_v51, 16 }
 0x44b   : > { %v10613_v56 = vrot.slane %v10611_v49, 4  ;;  %v9309_v34 = vshrl.u32 %v8966_v60, 16  ;;  %v9292_v25 = vrot.slane %v9291_v7, 4  ;;  %v10616_v39 = vrot.slane %v10614_v22, 5 }
 0x44c   : > { %v10622_v1 = vrot.slane %v10620_v0, 5  ;;  %v10626_v47 = vrot.slane %v10624_v46, 4  ;;  %v9302_v38 = vrot.slane %v9301_v42, 4  ;;  %v10632_v31 = vrot.slane %v10630_v58, 5  ;;  %v10568_v0 = vld [vmem:[#allocation2 + $0x30] sm:$0xf] }
 0x44d   : > { %v9311_v53 = vrot.slane %v9309_v34, 4  ;;  %v9312_v15 = vshll.u32 %v8966_v60, 16  ;;  %v9297_v18 = vsel %vm15021_vm12, %v9292_v25, %v9296_v55  ;;  %v10617_v16 = vor.u32 %v10616_v39, %v10613_v56  ;;  %v19297_v58 = vld [vmem:[#allocation2 + $0x34] sm:$0xf] }
 0x44e   : > { %14322 = vmatmul.mubr.bf16.gmra.mxu0 %v12993_v61  ;;  %v10627_v21 = vor.u32 %v10626_v47, %v10622_v1  ;;  %v9318_v30 = vshll.u32 %v19183_v4, 16  ;;  %v9307_v43 = vsel %vm15021_vm12, %v9302_v38, %v9306_v50  ;;  %v9322_v33 = vshrl.u32 %v19183_v4, 16 }
 0x44f   : > { %14270 = vmatmul.mubr.bf16.gmra.mxu1 %v12935_v8  ;;  %14325 = vmatprep.mubr.bf16.mxu0 %v12994_v11  ;;  %v9314_v2 = vrot.slane %v9312_v15, 5  ;;  %v9328_v61 = vshll.u32 %v19189_v41, 16  ;;  %v12937_v11 = vcombine.low %v9297_v18, %v9307_v43  ;;  %v10618_v8 = vrot.slane %v10617_v16, 4 }
 0x450   : > { %14273 = vmatprep.mubr.bf16.mxu1 %v12936_v29  ;;  %v10628_v20 = vrot.slane %v10627_v21, 4  ;;  %v9320_v3 = vrot.slane %v9318_v30, 5  ;;  %v9324_v37 = vrot.slane %v9322_v33, 4  ;;  %v10635_v44 = vshrl.u32 %v10565_v52, 16  ;;  %v19306_v21 = vld [vmem:[#allocation2 + $0x38] sm:$0x1] }
 0x451   : > { %v9315_v9 = vor.u32 %v9314_v2, %v9311_v53  ;;  %v9330_v26 = vrot.slane %v9328_v61, 5  ;;  %v10623_v17 = vsel %vm15021_vm12, %v10618_v8, %v10622_v1  ;;  %v10638_v36 = vshll.u32 %v10565_v52, 16 }
 0x452   : > { %v10633_v4 = vsel %vm15021_vm12, %v10628_v20, %v10632_v31  ;;  %v10644_v41 = vshll.u32 %v19276_v6, 16  ;;  %v9325_v10 = vor.u32 %v9324_v37, %v9320_v3  ;;  %v19285_v54 = vpop.f32.mrf.mxu0  ;;  %v10637_v24 = vrot.slane %v10635_v44, 4  ;;  %v19314_v37 = vld [vmem:[#allocation2 + $0x40] sm:$0xf] }
 0x453   : > { %v13060_v12 = vcombine.low %v10623_v17, %v10633_v4  ;;  %v9316_v45 = vrot.slane %v9315_v9, 4  ;;  %v10640_v59 = vrot.slane %v10638_v36, 5  ;;  %v10648_v32 = vshrl.u32 %v19276_v6, 16 }
 0x454   : > { %v10646_v40 = vrot.slane %v10644_v41, 5  ;;  %v10654_v14 = vshll.u32 %v19278_v13, 16  ;;  %v9326_v51 = vrot.slane %v9325_v10, 4  ;;  %v9333_v60 = vshrl.u32 %v8969_v35, 16  ;;  %v19291_v62 = vpop.f32.mrf.mxu0 }
 0x455   : > { %v9321_v55 = vsel %vm15021_vm12, %v9316_v45, %v9320_v3  ;;  %v9336_v29 = vshll.u32 %v8969_v35, 16  ;;  %v10641_v50 = vor.u32 %v10640_v59, %v10637_v24  ;;  %v10650_v49 = vrot.slane %v10648_v32, 4 }
 0x456   : > { %14326 = vmatmul.mubr.bf16.gmra.mxu0 %v12995_v5  ;;  %v10656_v7 = vrot.slane %v10654_v14, 5  ;;  %v9342_v22 = vshll.u32 %v19222_v23, 16  ;;  %v9331_v46 = vsel %vm15021_vm12, %v9326_v51, %v9330_v26  ;;  %v9335_v5 = vrot.slane %v9333_v60, 4  ;;  %v19299_v34 = vpop.f32.mrf.mxu0  ;;  %v10574_v14 = vld [vmem:[#allocation2 + $0x48] sm:$0xf] }
 0x457   : > { %14274 = vmatmul.mubr.bf16.gmra.mxu1 %v12937_v11  ;;  %14393 = vmatprep.mubr.bf16.mxu0 %v13060_v12  ;;  %v9338_v42 = vrot.slane %v9336_v29, 5  ;;  %v9346_v56 = vshrl.u32 %v19222_v23, 16  ;;  %v12938_v25 = vcombine.low %v9321_v55, %v9331_v46  ;;  %v10642_v39 = vrot.slane %v10641_v50, 4  ;;  %v19321_v12 = vld [vmem:[#allocation2 + $0x44] sm:$0x1]  ;;  %v14697_v50 = vld [vmem:[#allocation2 + $0x18] sm:$0xff]  }
 0x458   : > { %v10651_v1 = vor.u32 %v10650_v49, %v10646_v40  ;;  %v9344_v47 = vrot.slane %v9342_v22, 5  ;;  %v9352_v53 = vshll.u32 %v19231_v28, 16  ;;  %v10659_v15 = vshrl.u32 %v10568_v0, 16  ;;  %v19302_v18 = vpop.f32.mrf.mxu0  ;;  %v10571_v28 = vld [vmem:[#allocation2 + $0x3c] sm:$0xf] }
 0x459   : > { %v9339_v38 = vor.u32 %v9338_v42, %v9335_v5  ;;  %v9348_v31 = vrot.slane %v9346_v56, 4  ;;  %14277 = vmatprep.mubr.bf16.mxu1 %v12938_v25  ;;  %v10647_v16 = vsel %vm15021_vm12, %v10642_v39, %v10646_v40  ;;  %v10662_v30 = vshll.u32 %v10568_v0, 16  ;;  %v19330_v42 = vld [vmem:[#allocation2 + $0x4c] sm:$0xf] }
 0x45a   : > { %v10652_v23 = vrot.slane %v10651_v1, 4  ;;  %v10668_v52 = vshll.u32 %v19297_v58, 16  ;;  %v9354_v33 = vrot.slane %v9352_v53, 5  ;;  %v10661_v61 = vrot.slane %v10659_v15, 4  ;;  %v19309_v11 = vpop.f32.mrf.mxu0  ;;  %v19339_v15 = vld [vmem:[#allocation2 + $0x50] sm:$0x1] }
 0x45b   : > { %v9340_v43 = vrot.slane %v9339_v38, 4  ;;  %v9349_v2 = vor.u32 %v9348_v31, %v9344_v47  ;;  %v10664_v20 = vrot.slane %v10662_v30, 5  ;;  %v10672_v9 = vshrl.u32 %v19297_v58, 16 }
 0x45c   : > { %v10657_v8 = vsel %vm15021_vm12, %v10652_v23, %v10656_v7  ;;  %v10670_v3 = vrot.slane %v10668_v52, 5  ;;  %v10678_v4 = vshll.u32 %v19306_v21, 16  ;;  %v19319_v36 = vpop.f32.mrf.mxu0  ;;  %v10683_v45 = vshrl.u32 %v10571_v28, 16 }
 0x45d   : > { %v13061_v26 = vcombine.low %v10647_v16, %v10657_v8  ;;  %v9345_v44 = vsel %vm15021_vm12, %v9340_v43, %v9344_v47  ;;  %v9350_v17 = vrot.slane %v9349_v2, 4  ;;  %v10665_v41 = vor.u32 %v10664_v20, %v10661_v61 }
 0x45e   : > { %v10674_v35 = vrot.slane %v10672_v9, 4  ;;  %v10686_v10 = vshll.u32 %v10571_v28, 16  ;;  %v10680_v59 = vrot.slane %v10678_v4, 5  ;;  %v10692_v40 = vshll.u32 %v19314_v37, 16  ;;  %v19327_v55 = vpop.f32.mrf.mxu0 }
 0x45f   : > { %14394 = vmatmul.mubr.bf16.vlgmr.msra.gmra.mxu0 %v13061_v26  ;;  %v9355_v24 = vsel %vm15021_vm12, %v9350_v17, %v9354_v33  ;;  %v10696_v32 = vshrl.u32 %v19314_v37, 16  ;;  %v10666_v60 = vrot.slane %v10665_v41, 4  ;;  %v10685_v49 = vrot.slane %v10683_v45, 4  ;;  %v19353_v41 = vld [vmem:[#allocation2 + $0x58] sm:$0xf] }
 0x460   : > { %v12939_v51 = vcombine.low %v9345_v44, %v9355_v24  ;;  %v10675_v29 = vor.u32 %v10674_v35, %v10670_v3  ;;  %v10688_v7 = vrot.slane %v10686_v10, 5  ;;  %v10694_v22 = vrot.slane %v10692_v40, 5  ;;  %v14059_v5 = vpop.f32.mrf.mxu1  ;;  %v19332_v56 = vpop.f32.mrf.mxu0  ;;  %v19362_v40 = vld [vmem:[#allocation2 + $0x5c] sm:$0x1] }
 0x461   : > { %v10698_v0 = vrot.slane %v10696_v32, 4  ;;  %v10702_v46 = vshll.u32 %v19321_v12, 16  ;;  %v10671_v25 = vsel %vm15021_vm12, %v10666_v60, %v10670_v3  ;;  %v19337_v1 = vadd.f32 %v19285_v54, %v14059_v5  ;;  %v10577_v3 = vld [vmem:[#allocation2 + $0x54] sm:$0xf]  ;;  %v10580_v5 = vld [vmem:[#allocation2 + $0x60] sm:$0xf] }
 0x462   : > { %14278 = vmatmul.mubr.bf16.gmra.mxu1 %v12939_v51  ;;  %v10676_v39 = vrot.slane %v10675_v29, 4  ;;  %v10707_v47 = vshrl.u32 %v10574_v14, 16  ;;  %v10689_v38 = vor.u32 %v10688_v7, %v10685_v49  ;;  %v10710_v16 = vshll.u32 %v10574_v14, 16  ;;  %v7624_v23 = vpop.f32.mrf.mxu1  ;;  %v19341_v30 = vpop.f32.mrf.mxu0  ;;  %v14699_v14 = vld [vmem:[#allocation2 + $0x24] sm:$0xff]   ;;  %v14700_v29 = vld [vmem:[#allocation2 + $0x30] sm:$0xff]  }
 0x463   : > { %14345 = vmatprep.mubr.bf16.mxu1 %v14697_v50  ;;  %v10699_v31 = vor.u32 %v10698_v0, %v10694_v22  ;;  %v10704_v53 = vrot.slane %v10702_v46, 5  ;;  %v10716_v2 = vshll.u32 %v19330_v42, 16  ;;  %v10720_v54 = vshrl.u32 %v19330_v42, 16  ;;  %v14701_v49 = vld [vmem:[%s20859_s3 + $0x230] sm:$0xff]  }
 0x464   : > { %v10681_v52 = vsel %vm15021_vm12, %v10676_v39, %v10680_v59  ;;  %v10709_v43 = vrot.slane %v10707_v47, 4  ;;  %v10690_v61 = vrot.slane %v10689_v38, 4  ;;  %v10712_v8 = vrot.slane %v10710_v16, 5  ;;  %v14060_v20 = vpop.f32.mrf.mxu1  ;;  %v19347_v9 = vpop.f32.mrf.mxu0 }
 0x465   : > { %v13062_v33 = vcombine.low %v10671_v25, %v10681_v52  ;;  %v10700_v28 = vrot.slane %v10699_v31, 4  ;;  %v10718_v26 = vrot.slane %v10716_v2, 5  ;;  %v10722_v44 = vrot.slane %v10720_v54, 4  ;;  %v19380_v31 = vld [vmem:[#allocation2 + $0x64] sm:$0xf] }
 0x466   : > { %v10726_v17 = vshll.u32 %v19339_v15, 16  ;;  %v19351_v4 = vadd.f32 %v19291_v62, %v7624_v23  ;;  %v10695_v35 = vsel %vm15021_vm12, %v10690_v61, %v10694_v22  ;;  %v10713_v10 = vor.u32 %v10712_v8, %v10709_v43  ;;  %v7627_v59 = vpop.f32.mrf.mxu1  ;;  %v19364_v32 = vpop.f32.mrf.mxu0  ;;  %v19385_v43 = vld [vmem:[#allocation2 + $0x68] sm:$0x1] }
 0x467   : > { %14397 = vmatprep.mubr.bf16.mxu0 %v13062_v33  ;;  %v10705_v45 = vsel %vm15021_vm12, %v10700_v28, %v10704_v53  ;;  %v19360_v24 = vadd.f32 %v19299_v34, %v14060_v20  ;;  %v10723_v51 = vor.u32 %v10722_v44, %v10718_v26  ;;  %v19367_v50 = vadd.f32 %v19302_v18, %v7627_v59  ;;  %v14704_v28 = vld [vmem:[%s20859_s3 + $0x228] sm:$0xff]  }
 0x468   : > { %v13063_v62 = vcombine.low %v10695_v35, %v10705_v45  ;;  %v10728_v60 = vrot.slane %v10726_v17, 5  ;;  %v10714_v7 = vrot.slane %v10713_v10, 4  ;;  %v10731_v34 = vshrl.u32 %v10577_v3, 16  ;;  %v14063_v46 = vpop.f32.mrf.mxu1  ;;  %v19373_v25 = vpop.f32.mrf.mxu0  ;;  %v10583_v59 = vld [vmem:[#allocation2 + $0x6c] sm:$0xf] }
 0x469   : > { %v10734_v22 = vshll.u32 %v10577_v3, 16  ;;  %v10740_v0 = vshll.u32 %v19353_v41, 16  ;;  %v10724_v39 = vrot.slane %v10723_v51, 4  ;;  %v10744_v47 = vshrl.u32 %v19353_v41, 16 }
 0x46a   : > { %14398 = vmatmul.mubr.bf16.gmra.mxu0 %v13063_v62  ;;  %14346 = vmatmul.mubr.bf16.vlgmr.msra.gmra.mxu1 %v14699_v14  ;;  %v10750_v18 = vshll.u32 %v19362_v40, 16  ;;  %v19378_v38 = vadd.f32 %v19309_v11, %v14063_v46  ;;  %v10719_v53 = vsel %vm15021_vm12, %v10714_v7, %v10718_v26  ;;  %v10733_v16 = vrot.slane %v10731_v34, 4  ;;  %v7640_v2 = vpop.f32.mrf.mxu1  ;;  %v19400_v7 = vld [vmem:[#allocation2 + $0x70] sm:$0xf] }
 0x46b   : > { %14426 = vmatpush3.bf16.msra.mxu1 %v19227_v19  ;;  %14349 = vmatprep.mubr.bf16.mxu1 %v14700_v29  ;;  %v10736_v23 = vrot.slane %v10734_v22, 5  ;;  %v10742_v52 = vrot.slane %v10740_v0, 5  ;;  %v10729_v54 = vsel %vm15021_vm12, %v10724_v39, %v10728_v60  ;;  %v10746_v33 = vrot.slane %v10744_v47, 4  ;;  %v14702_v0 = vld [vmem:[#allocation2 + $0x3c] sm:$0xff]  }
 0x46c   : > { %v10752_v11 = vrot.slane %v10750_v18, 5  ;;  %14427 = vmatprep.subr.bf16.mxu1 %v14701_v49  ;;  %v10755_v61 = vshrl.u32 %v10580_v5, 16  ;;  %v13064_v8 = vcombine.low %v10719_v53, %v10729_v54  ;;  %v10758_v20 = vshll.u32 %v10580_v5, 16  ;;  %v14064_v26 = vpop.f32.mrf.mxu1  ;;  %v14703_v18 = vld [vmem:[#allocation2 + $0x48] sm:$0xff]  }
 0x46d   : > { %v10737_v19 = vor.u32 %v10736_v23, %v10733_v16  ;;  %v10764_v3 = vshll.u32 %v19380_v31, 16  ;;  %v19393_v44 = vpop.f32.mrf.mxu0  ;;  %v10747_v17 = vor.u32 %v10746_v33, %v10742_v52  ;;  %v10768_v45 = vshrl.u32 %v19380_v31, 16  ;;  %v19415_v16 = vld [vmem:[#allocation2 + $0x74] sm:$0x1] }
 0x46e   : > { %v10757_v35 = vrot.slane %v10755_v61, 4  ;;  %v10774_v10 = vshll.u32 %v19385_v43, 16  ;;  %14401 = vmatprep.mubr.bf16.mxu0 %v13064_v8  ;;  %v10760_v14 = vrot.slane %v10758_v20, 5  ;;  %v19398_v60 = vadd.f32 %v19319_v36, %v7640_v2  ;;  %v7643_v29 = vpop.f32.mrf.mxu1 }
 0x46f   : > { %v10738_v62 = vrot.slane %v10737_v19, 4  ;;  %v10766_v51 = vrot.slane %v10764_v3, 5  ;;  %14428 = vmatpush3.bf16.msra.mxu1 %v14701_v49  ;;  %v19402_v34 = vpop.f32.mrf.mxu0  ;;  %v10748_v22 = vrot.slane %v10747_v17, 4  ;;  %v10770_v46 = vrot.slane %v10768_v45, 4  ;;  %v14707_v49 = vld [vmem:[%s20859_s3 + $0x220] sm:$0xff]  }
 0x470   : > { %v10776_v5 = vrot.slane %v10774_v10, 5  ;;  %v19405_v39 = vadd.f32 %v19327_v55, %v14064_v26  ;;  %14429 = vmatprep.subr.bf16.mxu1 %v14704_v28  ;;  %v10761_v47 = vor.u32 %v10760_v14, %v10757_v35  ;;  %v19413_v53 = vadd.f32 %v19332_v56, %v7643_v29  ;;  %v14067_v2 = vpop.f32.mrf.mxu1  ;;  %v19423_v26 = vld [vmem:[#allocation2 + $0x7c] sm:$0xf] }
 0x471   : > { %v10743_v36 = vsel %vm15021_vm12, %v10738_v62, %v10742_v52  ;;  %v10779_v23 = vshrl.u32 %v10583_v59, 16  ;;  %v19417_v54 = vpop.f32.mrf.mxu0  ;;  %v10753_v55 = vsel %vm15021_vm12, %v10748_v22, %v10752_v11  ;;  %v10771_v33 = vor.u32 %v10770_v46, %v10766_v51  ;;  %v10586_v52 = vld [vmem:[#allocation2 + $0x78] sm:$0xf]  ;;  %v19436_v22 = vld [vmem:[#allocation2 + $0x80] sm:$0x1] }
 0x472   : > { %21090 = vst [vmem:[#allocation14_spill] sm:$0xff] %v19405_v39  ;;  %21091 = vst [vmem:[#allocation13_spill] sm:$0xff] %v19413_v53  ;;  %14350 = vmatmul.mubr.bf16.gmra.mxu1 %v14702_v0  ;;  %v10782_v61 = vshll.u32 %v10583_v59, 16  ;;  %v10788_v8 = vshll.u32 %v19400_v7, 16  ;;  %v13065_v19 = vcombine.low %v10743_v36, %v10753_v55  ;;  %v10762_v20 = vrot.slane %v10761_v47, 4  ;;  %v7656_v17 = vpop.f32.mrf.mxu1  ;;  %v14710_v62 = vld [vmem:[%s20859_s3 + $0x218] sm:$0xff]  }
 0x473   : > { %14353 = vmatprep.mubr.bf16.mxu1 %v14703_v18  ;;  %v10781_v56 = vrot.slane %v10779_v23, 4  ;;  %v10792_v3 = vshrl.u32 %v19400_v7, 16  ;;  %14430 = vmatpush3.bf16.msra.mxu1 %v14704_v28  ;;  %v19425_v35 = vpop.f32.mrf.mxu0  ;;  %v10772_v45 = vrot.slane %v10771_v33, 4  ;;  %v10798_v59 = vshll.u32 %v19415_v16, 16  ;;  %v14708_v39 = vld [vmem:[#allocation2 + $0x6c] sm:$0xff]  }
 0x474   : > { %v10784_v11 = vrot.slane %v10782_v61, 5  ;;  %v10790_v10 = vrot.slane %v10788_v8, 5  ;;  %14431 = vmatprep.subr.bf16.mxu1 %v14707_v49  ;;  %14402 = vmatmul.mubr.bf16.gmra.mxu0 %v13065_v19  ;;  %v10767_v14 = vsel %vm15021_vm12, %v10762_v20, %v10766_v51  ;;  %v19434_v28 = vadd.f32 %v19341_v30, %v14067_v2  ;;  %v14068_v46 = vpop.f32.mrf.mxu1  ;;  %v10589_v30 = vld [vmem:[#allocation2 + $0x84] sm:$0xf] }
 0x475   : > { %v10794_v29 = vrot.slane %v10792_v3, 4  ;;  %v10803_v0 = vshrl.u32 %v10586_v52, 16  ;;  %v19438_v36 = vpop.f32.mrf.mxu0  ;;  %v10777_v47 = vsel %vm15021_vm12, %v10772_v45, %v10776_v5  ;;  %v10800_v23 = vrot.slane %v10798_v59, 5  ;;  %v14705_v3 = vld [vmem:[#allocation2 + $0x54] sm:$0xff]  }
 0x476   : > { %21092 = vst [vmem:[#allocation17_spill] sm:$0xff] %v19434_v28  ;;  %v10785_v18 = vor.u32 %v10784_v11, %v10781_v56  ;;  %v10806_v55 = vshll.u32 %v10586_v52, 16  ;;  %v13066_v33 = vcombine.low %v10767_v14, %v10777_v47  ;;  %v10812_v51 = vshll.u32 %v19423_v26, 16  ;;  %v7659_v19 = vpop.f32.mrf.mxu1  ;;  %v14713_v52 = vld [vmem:[%s20859_s3 + $0x210] sm:$0xff]   ;;  %v14706_v11 = vld [vmem:[#allocation2 + $0x60] sm:$0xff]  }
 0x477   : > { %v10795_v61 = vor.u32 %v10794_v29, %v10790_v10  ;;  %v10805_v8 = vrot.slane %v10803_v0, 4  ;;  %14432 = vmatpush3.bf16.msra.mxu1 %v14707_v49  ;;  %v19443_v2 = vpop.f32.mrf.mxu0  ;;  %v10816_v53 = vshrl.u32 %v19423_v26, 16  ;;  %v10822_v5 = vshll.u32 %v19436_v22, 16  ;;  %v19456_v14 = vld [vmem:[#allocation2 + $0x88] sm:$0xf] }
 0x478   : > { %v10786_v20 = vrot.slane %v10785_v18, 4  ;;  %v10808_v28 = vrot.slane %v10806_v55, 5  ;;  %14433 = vmatprep.subr.bf16.mxu1 %v14710_v62  ;;  %14405 = vmatprep.mubr.bf16.mxu0 %v13066_v33  ;;  %v10814_v45 = vrot.slane %v10812_v51, 5  ;;  %v19451_v49 = vadd.f32 %v19347_v9, %v7656_v17  ;;  %v14071_v29 = vpop.f32.mrf.mxu1  ;;  %v19460_v33 = vld [vmem:[#allocation2 + $0x8c] sm:$0x1] }
 0x479   : > { %v10796_v56 = vrot.slane %v10795_v61, 4  ;;  %v19454_v59 = vadd.f32 %v19364_v32, %v14068_v46  ;;  %v10818_v18 = vrot.slane %v10816_v53, 4  ;;  %v10824_v55 = vrot.slane %v10822_v5, 5  ;;  %21095 = vst [vmem:[#allocation53_spill] sm:$0xff] %v19460_v33  ;;  %v19462_v61 = vpop.f32.mrf.mxu0 }
 0x47a   : > { %21093 = vst [vmem:[#allocation15_spill] sm:$0xff] %v19451_v49  ;;  %v10791_v0 = vsel %vm15021_vm12, %v10786_v20, %v10790_v10  ;;  %14354 = vmatmul.mubr.bf16.gmra.mxu1 %v14705_v3  ;;  %v10809_v47 = vor.u32 %v10808_v28, %v10805_v8  ;;  %v19467_v32 = vadd.f32 %v19373_v25, %v7659_v19  ;;  %v10827_v17 = vshrl.u32 %v10589_v30, 16  ;;  %v7672_v51 = vpop.f32.mrf.mxu1  ;;  %v10592_v8 = vld [vmem:[#allocation2 + $0x90] sm:$0xf]  ;;  %v14716_v3 = vld [vmem:[%s20859_s3 + $0x208] sm:$0xff]  }
 0x47b   : > { %21094 = vst [vmem:[#allocation46_spill] sm:$0xff] %v19454_v59  ;;  %v10801_v9 = vsel %vm15021_vm12, %v10796_v56, %v10800_v23  ;;  %14357 = vmatprep.mubr.bf16.mxu1 %v14706_v11  ;;  %v10830_v46 = vshll.u32 %v10589_v30, 16  ;;  %14434 = vmatpush3.bf16.msra.mxu1 %v14710_v62  ;;  %v10819_v28 = vor.u32 %v10818_v18, %v10814_v45  ;;  %v10836_v53 = vshll.u32 %v19456_v14, 16  ;;  %v19475_v30 = vld [vmem:[#allocation2 + $0x94] sm:$0xf]  ;;  %v19482_v18 = vpop.f32.mrf.mxu0 }
 0x47c   : > { %21096 = vst [vmem:[#allocation36_spill] sm:$0xff] %v19467_v32  ;;  %v13067_v10 = vcombine.low %v10791_v0, %v10801_v9  ;;  %v10810_v20 = vrot.slane %v10809_v47, 4  ;;  %14435 = vmatprep.subr.bf16.mxu1 %v14713_v52  ;;  %v10829_v23 = vrot.slane %v10827_v17, 4  ;;  %v10840_v25 = vshrl.u32 %v19456_v14, 16  ;;  %21097 = vst [vmem:[#allocation49_spill] sm:$0xff] %v19475_v30  ;;  %v14072_v62 = vpop.f32.mrf.mxu1 }
 0x47d   : > { %v10832_v5 = vrot.slane %v10830_v46, 5  ;;  %v10846_v19 = vshll.u32 %v19460_v33, 16  ;;  %v10820_v11 = vrot.slane %v10819_v28, 4  ;;  %v10838_v0 = vrot.slane %v10836_v53, 5  ;;  %v19484_v32 = vld [vmem:[#allocation2 + $0x98] sm:$0x1] }
 0x47e   : > { %14406 = vmatmul.mubr.bf16.gmra.mxu0 %v13067_v10  ;;  %v10815_v56 = vsel %vm15021_vm12, %v10810_v20, %v10814_v45  ;;  %v19480_v47 = vadd.f32 %v19393_v44, %v14071_v29  ;;  %v10842_v17 = vrot.slane %v10840_v25, 4  ;;  %21099 = vst [vmem:[#allocation22_spill] sm:$0xff] %v19484_v32  ;;  %v10851_v59 = vshrl.u32 %v10592_v8, 16  ;;  %v7675_v49 = vpop.f32.mrf.mxu1  ;;  %v10595_v25 = vld [vmem:[#allocation2 + $0x9c] sm:$0xf] }
 0x47f   : > { %v10833_v9 = vor.u32 %v10832_v5, %v10829_v23  ;;  %v10848_v46 = vrot.slane %v10846_v19, 5  ;;  %14436 = vmatpush3.bf16.msra.mxu1 %v14713_v52  ;;  %v10825_v10 = vsel %vm15021_vm12, %v10820_v11, %v10824_v55  ;;  %v10854_v45 = vshll.u32 %v10592_v8, 16  ;;  %v14709_v5 = vld [vmem:[#allocation2 + $0x78] sm:$0xff]   ;;  %v14719_v52 = vld [vmem:[%s20859_s3 + $0x200] sm:$0xff]  }
 0x480   : > { %21098 = vst [vmem:[#allocation26_spill] sm:$0xff] %v19480_v47  ;;  %v10860_v20 = vshll.u32 %v19475_v30, 16  ;;  %v10864_v44 = vshrl.u32 %v19475_v30, 16  ;;  %14437 = vmatprep.subr.bf16.mxu1 %v14716_v3  ;;  %v13068_v29 = vcombine.low %v10815_v56, %v10825_v10  ;;  %v10843_v53 = vor.u32 %v10842_v17, %v10838_v0  ;;  %v14075_v19 = vpop.f32.mrf.mxu1  ;;  %v19496_v30 = vld [vmem:[#allocation2 + $0xa0] sm:$0xf] }
 0x481   : > { %v10834_v28 = vrot.slane %v10833_v9, 4  ;;  %v10853_v23 = vrot.slane %v10851_v59, 4  ;;  %v10856_v55 = vrot.slane %v10854_v45, 5  ;;  %v10870_v47 = vshll.u32 %v19484_v32, 16  ;;  %21100 = vst [vmem:[#allocation24_spill] sm:$0xff] %v19496_v30 }
 0x482   : > { %14358 = vmatmul.mubr.bf16.gmra.mxu1 %v14708_v39  ;;  %v10862_v11 = vrot.slane %v10860_v20, 5  ;;  %v10866_v8 = vrot.slane %v10864_v44, 4  ;;  %v19494_v33 = vpop.f32.mrf.mxu0  ;;  %14409 = vmatprep.mubr.bf16.mxu0 %v13068_v29  ;;  %v10844_v56 = vrot.slane %v10843_v53, 4  ;;  %v19501_v9 = vadd.f32 %v19402_v34, %v7672_v51  ;;  %v7688_v17 = vpop.f32.mrf.mxu1  ;;  %v19509_v32 = vld [vmem:[#allocation2 + $0xa4] sm:$0x1] }
 0x483   : > { %v10839_v59 = vsel %vm15021_vm12, %v10834_v28, %v10838_v0  ;;  %14361 = vmatprep.mubr.bf16.mxu1 %v14709_v5  ;;  %v19504_v39 = vadd.f32 %v19417_v54, %v14072_v62  ;;  %v10857_v10 = vor.u32 %v10856_v55, %v10853_v23  ;;  %v10872_v20 = vrot.slane %v10870_v47, 5  ;;  %21104 = vst [vmem:[#allocation51_spill] sm:$0xff] %v19509_v32 }
 0x484   : > { %21101 = vst [vmem:[#allocation20_spill] sm:$0xff] %v19501_v9  ;;  %v10867_v45 = vor.u32 %v10866_v8, %v10862_v11  ;;  %v19507_v44 = vadd.f32 %v19425_v35, %v7675_v49  ;;  %v19511_v29 = vpop.f32.mrf.mxu0  ;;  %14438 = vmatpush3.bf16.msra.mxu1 %v14716_v3  ;;  %v10849_v0 = vsel %vm15021_vm12, %v10844_v56, %v10848_v46  ;;  %v10875_v34 = vshrl.u32 %v10595_v25, 16  ;;  %v14076_v62 = vpop.f32.mrf.mxu1  ;;  %v10598_v49 = vld [vmem:[#allocation2 + $0xa8] sm:$0xf]  ;;  %v19520_v46 = vld [vmem:[#allocation2 + $0xac] sm:$0xf] }
 0x485   : > { %21102 = vst [vmem:[#allocation29_spill] sm:$0xff] %v19504_v39  ;;  %v10878_v51 = vshll.u32 %v10595_v25, 16  ;;  %v10884_v54 = vshll.u32 %v19496_v30, 16  ;;  %14439 = vmatprep.subr.bf16.mxu1 %v14719_v52  ;;  %v13069_v28 = vcombine.low %v10839_v59, %v10849_v0  ;;  %v10858_v53 = vrot.slane %v10857_v10, 4  ;;  %21105 = vst [vmem:[#allocation47_spill] sm:$0xff] %v19520_v46  ;;  %v14711_v0 = vld [vmem:[#allocation2 + $0x84] sm:$0xff]  }
 0x486   : > { %21103 = vst [vmem:[#allocation16_spill] sm:$0xff] %v19507_v44  ;;  %v10868_v47 = vrot.slane %v10867_v45, 4  ;;  %v10888_v35 = vshrl.u32 %v19496_v30, 16  ;;  %v19517_v23 = vpop.f32.mrf.mxu0  ;;  %v10877_v5 = vrot.slane %v10875_v34, 4  ;;  %v10894_v8 = vshll.u32 %v19509_v32, 16  ;;  %v7691_v25 = vpop.f32.mrf.mxu1  ;;  %v14712_v9 = vld [vmem:[#allocation2 + $0x90] sm:$0xff]  }
 0x487   : > { %v10880_v55 = vrot.slane %v10878_v51, 5  ;;  %v10886_v3 = vrot.slane %v10884_v54, 5  ;;  %14410 = vmatmul.mubr.bf16.gmra.mxu0 %v13069_v28  ;;  %v10863_v56 = vsel %vm15021_vm12, %v10858_v53, %v10862_v11  ;;  %v19527_v45 = vadd.f32 %v19438_v36, %v14075_v19  ;;  %v19529_v34 = vld [vmem:[#allocation2 + $0xb0] sm:$0x1]  ;;  %v6742_v30 = vld [vmem:[#allocation2 + $0xcc] sm:$0x2] }
 0x488   : > { %v10873_v59 = vsel %vm15021_vm12, %v10868_v47, %v10872_v20  ;;  %v10890_v10 = vrot.slane %v10888_v35, 4  ;;  %21107 = vst [vmem:[#allocation48_spill] sm:$0xff] %v19529_v34  ;;  %v19531_v51 = vpop.f32.mrf.mxu0  ;;  %14440 = vmatpush3.bf16.msra.mxu1 %v14719_v52  ;;  %v10896_v39 = vrot.slane %v10894_v8, 5  ;;  %v10899_v28 = vshrl.u32 %v10598_v49, 16 }
 0x489   : > { %21106 = vst [vmem:[#allocation30_spill] sm:$0xff] %v19527_v45  ;;  %v13070_v54 = vcombine.low %v10863_v56, %v10873_v59  ;;  %v10881_v44 = vor.u32 %v10880_v55, %v10877_v5  ;;  %v10902_v11 = vshll.u32 %v10598_v49, 16  ;;  %v10908_v20 = vshll.u32 %v19520_v46, 16  ;;  %v10601_v5 = vld [vmem:[#allocation2 + $0xb4] sm:$0xf] }
 0x48a   : > { %v10891_v32 = vor.u32 %v10890_v10, %v10886_v3  ;;  %14362 = vmatmul.mubr.bf16.gmra.mxu1 %v14711_v0  ;;  %v10912_v53 = vshrl.u32 %v19520_v46, 16  ;;  %v19535_v36 = vpop.f32.mrf.mxu0  ;;  %v10901_v47 = vrot.slane %v10899_v28, 4  ;;  %v10918_v35 = vshll.u32 %v19529_v34, 16  ;;  %v14079_v55 = vpop.f32.mrf.mxu1  ;;  %v19541_v10 = vld [vmem:[#allocation2 + $0xb8] sm:$0xf] }
 0x48b   : > { %14413 = vmatprep.mubr.bf16.mxu0 %v13070_v54  ;;  %v10882_v19 = vrot.slane %v10881_v44, 4  ;;  %14365 = vmatprep.mubr.bf16.mxu1 %v14712_v9  ;;  %v19539_v52 = vadd.f32 %v19443_v2, %v7688_v17  ;;  %v10904_v56 = vrot.slane %v10902_v11, 5  ;;  %v10910_v49 = vrot.slane %v10908_v20, 5  ;;  %21109 = vst [vmem:[#allocation54_spill] sm:$0xff] %v19541_v10  ;;  %v19553_v9 = vld [vmem:[#allocation2 + $0xbc] sm:$0x1] }
 0x48c   : > { %v10892_v8 = vrot.slane %v10891_v32, 4  ;;  %v10914_v59 = vrot.slane %v10912_v53, 4  ;;  %v19543_v0 = vpop.f32.mrf.mxu0  ;;  %v10920_v54 = vrot.slane %v10918_v35, 5  ;;  %v19548_v28 = vadd.f32 %v19462_v61, %v14076_v62  ;;  %21112 = vst [vmem:[#allocation37_spill] sm:$0xff] %v19553_v9  ;;  %v7704_v32 = vpop.f32.mrf.mxu1  ;;  %v14714_v62 = vld [vmem:[#allocation2 + $0x9c] sm:$0xff]  }
 0x48d   : > { %21108 = vst [vmem:[#allocation23_spill] sm:$0xff] %v19539_v52  ;;  %v10887_v44 = vsel %vm15021_vm12, %v10882_v19, %v10886_v3  ;;  %v19551_v2 = vadd.f32 %v19482_v18, %v7691_v25  ;;  %v10905_v11 = vor.u32 %v10904_v56, %v10901_v47  ;;  %v10923_v53 = vshrl.u32 %v10601_v5, 16  ;;  %v10604_v18 = vld [vmem:[#allocation2 + $0xc0] sm:$0xf] }
 0x48e   : > { %21110 = vst [vmem:[#allocation33_spill] sm:$0xff] %v19548_v28  ;;  %v10897_v17 = vsel %vm15021_vm12, %v10892_v8, %v10896_v39  ;;  %v10915_v20 = vor.u32 %v10914_v59, %v10910_v49  ;;  %v19557_v52 = vpop.f32.mrf.mxu0  ;;  %v10926_v3 = vshll.u32 %v10601_v5, 16  ;;  %v10932_v19 = vshll.u32 %v19541_v10, 16  ;;  %v14080_v25 = vpop.f32.mrf.mxu1  ;;  %v19562_v39 = vld [vmem:[#allocation2 + $0xc4] sm:$0xf] }
 0x48f   : > { %21111 = vst [vmem:[#allocation32_spill] sm:$0xff] %v19551_v2  ;;  %v13071_v45 = vcombine.low %v10887_v44, %v10897_v17  ;;  %v10936_v61 = vshrl.u32 %v19541_v10, 16  ;;  %v10906_v35 = vrot.slane %v10905_v11, 4  ;;  %v10925_v28 = vrot.slane %v10923_v53, 4  ;;  %v19567_v59 = vld [vmem:[#allocation2 + $0xc8] sm:$0x1] }
 0x490   : > { %v10916_v2 = vrot.slane %v10915_v20, 4  ;;  %v10942_v34 = vshll.u32 %v19553_v9, 16  ;;  %v10928_v47 = vrot.slane %v10926_v3, 5  ;;  %v10934_v8 = vrot.slane %v10932_v19, 5  ;;  %v14715_v44 = vld [vmem:[#allocation2 + $0xa8] sm:$0xff]   ;;  %v19569_v17 = vpop.f32.mrf.mxu0  ;;  %v7707_v10 = vpop.f32.mrf.mxu1 }
 0x491   : > { %14414 = vmatmul.mubr.bf16.gmra.mxu0 %v13071_v45  ;;  %v10938_v56 = vrot.slane %v10936_v61, 4  ;;  %v19565_v5 = vadd.f32 %v19494_v33, %v14079_v55  ;;  %v10911_v11 = vsel %vm15021_vm12, %v10906_v35, %v10910_v49  ;;  %v10947_v45 = vshrl.u32 %v10604_v18, 16 }
 0x492   : > { %v10921_v20 = vsel %vm15021_vm12, %v10916_v2, %v10920_v54  ;;  %v10944_v53 = vrot.slane %v10942_v34, 5  ;;  %14366 = vmatmul.mubr.bf16.gmra.mxu1 %v14714_v62  ;;  %v10929_v19 = vor.u32 %v10928_v47, %v10925_v28  ;;  %v10950_v33 = vshll.u32 %v10604_v18, 16  ;;  %v6886_v28 = vld [vmem:[#allocation2 + $0xd0] sm:$0x8] }
 0x493   : > { %21113 = vst [vmem:[#allocation21_spill] sm:$0xff] %v19565_v5  ;;  %v13072_v3 = vcombine.low %v10911_v11, %v10921_v20  ;;  %v10939_v61 = vor.u32 %v10938_v56, %v10934_v8  ;;  %14369 = vmatprep.mubr.bf16.mxu1 %v14715_v44  ;;  %v10949_v55 = vrot.slane %v10947_v45, 4  ;;  %v10956_v5 = vshll.u32 %v19562_v39, 16  ;;  %v19584_v11 = vld [vmem:[#allocation2 + $0xd0] sm:$0xf] }
 0x494   : > { %v10960_v9 = vshrl.u32 %v19562_v39, 16  ;;  %v10966_v46 = vshll.u32 %v19567_v59, 16  ;;  %v10930_v49 = vrot.slane %v10929_v19, 4  ;;  %v10952_v54 = vrot.slane %v10950_v33, 5  ;;  %21116 = vst [vmem:[#allocation56_spill] sm:$0xff] %v19584_v11 }
 0x495   : > { %14417 = vmatprep.mubr.bf16.mxu0 %v13072_v3  ;;  %v10940_v35 = vrot.slane %v10939_v61, 4  ;;  %v19579_v34 = vadd.f32 %v19511_v29, %v7704_v32  ;;  %v14135_v2 = vpop.f32.mrf.mxu0  ;;  %v14083_v62 = vpop.f32.mrf.mxu1  ;;  %v10958_v18 = vrot.slane %v10956_v5, 5  ;;  %v19582_v44 = vadd.f32 %v19517_v23, %v14080_v25  ;;  %v6866_v61 = vld [vmem:[#allocation2 + $0xcc] sm:$0x1]  ;;  %v14717_v25 = vld [vmem:[#allocation2 + $0xb4] sm:$0xff]  }
 0x496   : > { %v10962_v47 = vrot.slane %v10960_v9, 4  ;;  %v10968_v56 = vrot.slane %v10966_v46, 5  ;;  %v10935_v20 = vsel %vm15021_vm12, %v10930_v49, %v10934_v8  ;;  %v10953_v3 = vor.u32 %v10952_v54, %v10949_v55  ;;  %v14718_v55 = vld [vmem:[#allocation2 + $0xc0] sm:$0xff]  }
 0x497   : > { %21114 = vst [vmem:[#allocation39_spill] sm:$0xff] %v19579_v34  ;;  %21115 = vst [vmem:[#allocation19_spill] sm:$0xff] %v19582_v44  ;;  %v10945_v45 = vsel %vm15021_vm12, %v10940_v35, %v10944_v53  ;;  %v19591_v29 = vadd.f32 %v19531_v51, %v7707_v10  ;;  %v8041_v32 = vpop.f32.mrf.mxu0  ;;  %v7720_v19 = vpop.f32.mrf.mxu1  ;;  %v12729_v46 = vrot.slane %v6742_v30, 9  ;;  %v12747_v23 = vrot.slane %v6886_v28, 11  ;;  %v7010_v44 = vld [vmem:[#allocation2 + $0xd4] sm:$0x1] }
 0x498   : > { %v13073_v5 = vcombine.low %v10935_v20, %v10945_v45  ;;  %v10963_v9 = vor.u32 %v10962_v47, %v10958_v18  ;;  %v10954_v33 = vrot.slane %v10953_v3, 4  ;;  %v10980_v34 = vshll.u32 %v19584_v11, 16  ;;  %v11316_v28 = vld [vmem:[#allocation2 + $0x18] sm:$0xe]  ;;  %v14763_v3 = vld [vmem:[#allocation2 + $0x1c] sm:$0xf] }
 0x499   : > { %v10984_v8 = vshrl.u32 %v19584_v11, 16  ;;  %v19596_v53 = vadd.f32 %v19535_v36, %v14083_v62  ;;  %v14136_v51 = vpop.f32.mrf.mxu0  ;;  %v14084_v10 = vpop.f32.mrf.mxu1  ;;  %v6867_v30 = vsel %vm14891_vm8, %v12729_v46, %v6866_v61  ;;  %v7011_v35 = vsel %vm14925_vm9, %v12747_v23, %v7010_v44  ;;  %v11317_v44 = vld [vmem:[#allocation2 + $0x24] sm:$0xe]  ;;  %v14764_v46 = vld [vmem:[#allocation2 + $0x20] sm:$0x1] }
 0x49a   : > { %14418 = vmatmul.mubr.bf16.gmra.mxu0 %v13073_v5  ;;  %v10964_v49 = vrot.slane %v10963_v9, 4  ;;  %14370 = vmatmul.mubr.bf16.gmra.mxu1 %v14717_v25  ;;  %v19603_v54 = vadd.f32 %v19543_v0, %v7720_v19  ;;  %v10959_v36 = vsel %vm15021_vm12, %v10954_v33, %v10958_v18  ;;  %6868 = vst [vmem:[#allocation2 + $0xcc] sm:$0x1] %v6867_v30  ;;  %7012 = vst [vmem:[#allocation2 + $0xd4] sm:$0x1] %v7011_v35 }
 0x49b   : > { %21117 = vst [vmem:[#allocation50_spill] sm:$0xff] %v19596_v53  ;;  %v19607_v62 = vrot.slane %v10980_v34, 5  ;;  %v10986_v47 = vrot.slane %v10984_v8, 4  ;;  %14373 = vmatprep.mubr.bf16.mxu1 %v14718_v55  ;;  %v19610_v48 = vadd.f32 %v19557_v52, %v14084_v10  ;;  %v8044_v20 = vpop.f32.mrf.mxu0  ;;  %v7723_v57 = vpop.f32.mrf.mxu1  ;;  %v11382_v18 = vrot.slane %v14763_v3, 5  ;;  %v11318_v61 = vld [vmem:[#allocation2 + $0x30] sm:$0xe] }
 0x49c   : > { %21118 = vst [vmem:[#allocation28_spill] sm:$0xff] %v19603_v54  ;;  %v10969_v0 = vsel %vm15021_vm12, %v10964_v49, %v10968_v56  ;;  %v19615_v45 = vadd.f32 %v19569_v17, %v7723_v57  ;;  %v13084_v9 = vrot.slane %v11316_v28, 9  ;;  %v11385_v52 = vrot.slane %v14764_v46, 5 }
 0x49d   : > { %21119 = vst [vmem:[#allocation52_spill] sm:$0xff] %v19610_v48  ;;  %v13074_v19 = vcombine.low %v10959_v36, %v10969_v0  ;;  %v10987_v34 = vor.u32 %v10986_v47, %v19607_v62  ;;  %v19618_v5 = vpop.f32.mrf.mxu0  ;;  %v14087_v23 = vpop.f32.mrf.mxu1  ;;  %v11384_v25 = vrot.slane %v11382_v18, 4  ;;  %v13085_v33 = vrot.slane %v11317_v44, 9  ;;  %v11319_v44 = vld [vmem:[#allocation2 + $0x3c] sm:$0xe] }
 0x49e   : > { %21120 = vst [vmem:[#allocation25_spill] sm:$0xff] %v19615_v45  ;;  %v11389_v8 = vrot.slane %v19276_v6, 5  ;;  %v11392_v56 = vrot.slane %v19278_v13, 5  ;;  %v19622_v17 = vadd.f32 %v14135_v2, %v14087_v23  ;;  %v11396_v10 = vrot.slane %v19297_v58, 5 }
 0x49f   : > { %14421 = vmatprep.mubr.bf16.mxu0 %v13074_v19  ;;  %v19624_v55 = vpop.f32.mrf.mxu0  ;;  %v11386_v49 = vsel %vm15512_vm15, %v11384_v25, %v11385_v52  ;;  %v7736_v30 = vpop.f32.mrf.mxu1  ;;  %v13086_v28 = vrot.slane %v11318_v61, 9  ;;  %v11399_v36 = vrot.slane %v19306_v21, 5  ;;  %v19630_v47 = vrot.slane %v10987_v34, 4 }
 0x4a0   : > { %21121 = vst [vmem:[#allocation58_spill] sm:$0xff] %v19622_v17  ;;  %v11391_v35 = vrot.slane %v11389_v8, 4  ;;  %v11383_v6 = vsel %vm15512_vm15, %v13084_v9, %v11382_v18  ;;  %v19634_v13 = vadd.f32 %v8041_v32, %v7736_v30  ;;  %v11398_v57 = vrot.slane %v11396_v10, 4  ;;  %v21136_v17 = vld [vmem:[#allocation15_spill] sm:$0xff] }
 0x4a1   : > { %v19636_v2 = vpop.f32.mrf.mxu0  ;;  %v10607_v58 = vld [vmem:[#allocation2 + $0xcc] sm:$0xf]  ;;  %v19638_v0 = vld [vmem:[#allocation2 + $0xd4] sm:$0x1]  ;;  %v13116_v3 = vcombine.low %v11383_v6, %v11386_v49  ;;  %v14088_v19 = vpop.f32.mrf.mxu1  ;;  %v11390_v46 = vsel %vm15512_vm15, %v13085_v33, %v11389_v8  ;;  %v11397_v25 = vsel %vm15512_vm15, %v13086_v28, %v11396_v10  ;;  %v13087_v33 = vrot.slane %v11319_v44, 9 }
 0x4a2   : > { %21122 = vst [vmem:[#allocation35_spill] sm:$0xff] %v19634_v13  ;;  %21123 = vst [vmem:[#allocation34_spill] sm:$0xff] %v19638_v0  ;;  %v11393_v21 = vsel %vm15512_vm15, %v11391_v35, %v11392_v56  ;;  %v10971_v34 = vshrl.u32 %v10607_v58, 16  ;;  %v10974_v52 = vshll.u32 %v10607_v58, 16  ;;  %v10990_v32 = vshll.u32 %v19638_v0, 16  ;;  %v14720_v18 = vld [vmem:[#allocation2 + $0xcc] sm:$0xff]  }
 0x4a3   : > { %v19645_v9 = vadd.f32 %v14136_v51, %v14088_v19  ;;  %v19647_v61 = vpop.f32.mrf.mxu0  ;;  %v7739_v23 = vpop.f32.mrf.mxu1  ;;  %v11400_v49 = vsel %vm15512_vm15, %v11398_v57, %v11399_v36  ;;  %v11403_v8 = vrot.slane %v19314_v37, 5  ;;  %v11320_v56 = vld [vmem:[#allocation2 + $0x48] sm:$0xe]  ;;  %14374 = vmatmul.mubr.bf16.gmra.mxu1 %v14720_v18  ;;  %v11321_v19 = vld [vmem:[#allocation2 + $0x54] sm:$0xe]  ;;  %v13117_v13 = vcombine.low %v11390_v46, %v11393_v21 }
 0x4a4   : > { %v10973_v30 = vrot.slane %v10971_v34, 4  ;;  %v10976_v35 = vrot.slane %v10974_v52, 5  ;;  %v10992_v6 = vrot.slane %v10990_v32, 5  ;;  %v19654_v58 = vadd.f32 %v8044_v20, %v7739_v23  ;;  %14441 = vmatprep.mubr.bf16.mxu1 %v13116_v3  ;;  %v11322_v52 = vld [vmem:[#allocation2 + $0x60] sm:$0xe]  ;;  %v21137_v0 = vld [vmem:[#allocation54_spill] sm:$0xff] }
 0x4a5   : > { %21124 = vst [vmem:[#allocation41_spill] sm:$0xff] %v19645_v9  ;;  %v19656_v51 = vpop.f32.mrf.mxu0  ;;  %v14155_v9 = vpop.f32.mrf.mxu1  ;;  %v13118_v10 = vcombine.low %v11397_v25, %v11400_v49  ;;  %v11405_v28 = vrot.slane %v11403_v8, 4  ;;  %v11406_v36 = vrot.slane %v19321_v12, 5  ;;  %v19666_v20 = vsel %vm15512_vm15, %v13087_v33, %v11403_v8 }
 0x4a6   : > { %21125 = vst [vmem:[#allocation31_spill] sm:$0xff] %v19654_v58  ;;  %v10977_v57 = vor.u32 %v10976_v35, %v10973_v30  ;;  %v19660_v37 = vadd.f32 %v14155_v9, %v19337_v1  ;;  %v13088_v34 = vrot.slane %v11320_v56, 9  ;;  %v10993_v3 = vsel %vm15021_vm12, %v19630_v47, %v10992_v6  ;;  %v11323_v56 = vld [vmem:[#allocation2 + $0x6c] sm:$0xe]  ;;  %v11330_v58 = vld [vmem:[#allocation2 + $0xc0] sm:$0xe] }
 0x4a7   : > { %v19662_v44 = vpop.f32.mrf.mxu0  ;;  %v8379_v46 = vpop.f32.mrf.mxu1  ;;  %v19673_v12 = vsel %vm15512_vm15, %v11405_v28, %v11406_v36  ;;  %v11410_v1 = vrot.slane %v19330_v42, 5  ;;  %v13089_v21 = vrot.slane %v11321_v19, 9  ;;  %v11413_v23 = vrot.slane %v19339_v15, 5 }
 0x4a8   : > { %v10978_v32 = vrot.slane %v10977_v57, 4  ;;  %v19677_v18 = vadd.f32 %v8379_v46, %v19351_v4  ;;  %v11417_v25 = vrot.slane %v19353_v41, 5  ;;  %v13119_v47 = vcombine.low %v19666_v20, %v19673_v12  ;;  %v11324_v57 = vld [vmem:[#allocation2 + $0x78] sm:$0xe] }
 0x4a9   : > { %v19679_v9 = vpop.f32.mrf.mxu0  ;;  %v14156_v49 = vpop.f32.mrf.mxu1  ;;  %v19687_v33 = vsel %vm15512_vm15, %v13088_v34, %v11410_v1  ;;  %v11420_v42 = vrot.slane %v19362_v40, 5  ;;  %v13090_v8 = vrot.slane %v11322_v52, 9  ;;  %v11412_v30 = vrot.slane %v11410_v1, 4 }
 0x4aa   : > { %v10983_v4 = vsel %vm15021_vm12, %v10978_v32, %v19607_v62  ;;  %v19694_v15 = vadd.f32 %v14156_v49, %v19360_v24  ;;  %v11419_v35 = vrot.slane %v11417_v25, 4  ;;  %v19700_v28 = vsel %vm15512_vm15, %v13089_v21, %v11417_v25  ;;  %v11325_v21 = vld [vmem:[#allocation2 + $0x84] sm:$0xe]  ;;  %v11326_v49 = vld [vmem:[#allocation2 + $0x90] sm:$0xe] }
 0x4ab   : > { %v19696_v41 = vpop.f32.mrf.mxu0  ;;  %v13075_v6 = vcombine.low %v10983_v4, %v10993_v3  ;;  %v8382_v19 = vpop.f32.mrf.mxu1  ;;  %v11424_v40 = vrot.slane %v19380_v31, 5  ;;  %v11427_v36 = vrot.slane %v19385_v43, 5  ;;  %14442 = vmatmul.mubr.bf16.vlgmr.msra.gmra.mxu1 %v13117_v13  ;;  %v11414_v62 = vsel %vm15512_vm15, %v11412_v30, %v11413_v23 }
 0x4ac   : > { %v19705_v27 = vadd.f32 %v8382_v19, %v19367_v50  ;;  %v19713_v20 = vsel %vm15512_vm15, %v11419_v35, %v11420_v42  ;;  %v13091_v34 = vrot.slane %v11323_v56, 9  ;;  %14445 = vmatprep.mubr.bf16.mxu1 %v13118_v10  ;;  %v11431_v52 = vrot.slane %v19400_v7, 5  ;;  %v11327_v19 = vld [vmem:[#allocation2 + $0x9c] sm:$0xe] }
 0x4ad   : > { %v19707_v24 = vpop.f32.mrf.mxu0  ;;  %14422 = vmatmul.mubr.bf16.gmra.mxu0 %v13075_v6  ;;  %v19719_v50 = vsel %vm15512_vm15, %v13090_v8, %v11424_v40  ;;  %v11426_v13 = vrot.slane %v11424_v40, 4  ;;  %v11434_v12 = vrot.slane %v19415_v16, 5  ;;  %v13092_v1 = vrot.slane %v11324_v57, 9  ;;  %v21127_v40 = vld [vmem:[#allocation14_spill] sm:$0xff] }
 0x4ae   : > { %v14159_v31 = vpop.f32.mrf.mxu1  ;;  %v11438_v10 = vrot.slane %v19423_v26, 5  ;;  %v19735_v25 = vsel %vm15512_vm15, %v13091_v34, %v11431_v52  ;;  %v11433_v7 = vrot.slane %v11431_v52, 4  ;;  %v11445_v35 = vrot.slane %v19456_v14, 5  ;;  %v11328_v34 = vld [vmem:[#allocation2 + $0xa8] sm:$0xe] }
 0x4af   : > { %v19723_v3 = vadd.f32 %v14159_v31, %v19378_v38  ;;  %v19725_v46 = vpop.f32.mrf.mxu0  ;;  %v19731_v23 = vsel %vm15512_vm15, %v11426_v13, %v11427_v36  ;;  %v11441_v38 = vrot.slane %v19436_v22, 5  ;;  %v13093_v22 = vrot.slane %v11325_v21, 9  ;;  %v21133_v14 = vld [vmem:[#allocation17_spill] sm:$0xff] }
 0x4b0   : > { %v8395_v32 = vpop.f32.mrf.mxu1  ;;  %v19747_v8 = vsel %vm15512_vm15, %v13092_v1, %v11438_v10  ;;  %v11440_v56 = vrot.slane %v11438_v10, 4  ;;  %v19751_v30 = vsel %vm15512_vm15, %v11433_v7, %v11434_v12  ;;  %v13094_v13 = vrot.slane %v11326_v49, 9  ;;  %v21128_v10 = vld [vmem:[#allocation49_spill] sm:$0xff] }
 0x4b1   : > { %v19739_v42 = vadd.f32 %v8395_v32, %v19398_v60  ;;  %v19741_v16 = vpop.f32.mrf.mxu0  ;;  %v21126_v60 = vld [vmem:[#allocation53_spill] sm:$0xff]  ;;  %v13120_v52 = vcombine.low %v19687_v33, %v11414_v62  ;;  %v11447_v1 = vrot.slane %v11445_v35, 4  ;;  %v11452_v21 = vrot.slane %v21128_v10, 5  ;;  %v21132_v10 = vld [vmem:[#allocation51_spill] sm:$0xff] }
 0x4b2   : > { %v14160_v4 = vpop.f32.mrf.mxu1  ;;  %v11448_v6 = vrot.slane %v21126_v60, 5  ;;  %v19764_v31 = vsel %vm15512_vm15, %v11440_v56, %v11441_v38  ;;  %v21129_v32 = vld [vmem:[#allocation13_spill] sm:$0xff]  ;;  %v21130_v60 = vld [vmem:[#allocation22_spill] sm:$0xff]  ;;  %v13095_v38 = vrot.slane %v11327_v19, 9  ;;  %v21131_v56 = vld [vmem:[#allocation24_spill] sm:$0xff]  ;;  %v19779_v62 = vsel %vm15512_vm15, %v13093_v22, %v11445_v35 }
 0x4b3   : > { %v19756_v36 = vadd.f32 %v14160_v4, %v21127_v40  ;;  %v19758_v57 = vpop.f32.mrf.mxu0  ;;  %14446 = vmatmul.mubr.bf16.gmra.mxu1 %v13119_v47  ;;  %v11455_v40 = vrot.slane %v21130_v60, 5  ;;  %v11459_v49 = vrot.slane %v21131_v56, 5  ;;  %v11329_v35 = vld [vmem:[#allocation2 + $0xb4] sm:$0xe]  ;;  %v13098_v53 = vrot.slane %v11330_v58, 9 }
 0x4b4   : > { %v8398_v12 = vpop.f32.mrf.mxu1  ;;  %14449 = vmatprep.mubr.bf16.mxu1 %v13120_v52  ;;  %v19783_v47 = vsel %vm15512_vm15, %v11447_v1, %v11448_v6  ;;  %v19793_v52 = vsel %vm15512_vm15, %v13094_v13, %v11452_v21  ;;  %v13096_v1 = vrot.slane %v11328_v34, 9  ;;  %v21139_v13 = vld [vmem:[#allocation37_spill] sm:$0xff] }
 0x4b5   : > { %v19771_v7 = vadd.f32 %v8398_v12, %v21129_v32  ;;  %v19773_v4 = vpop.f32.mrf.mxu0  ;;  %v11454_v12 = vrot.slane %v11452_v21, 4  ;;  %v11462_v32 = vrot.slane %v21132_v10, 5  ;;  %v11461_v22 = vrot.slane %v11459_v49, 4  ;;  %v21134_v10 = vld [vmem:[#allocation47_spill] sm:$0xff] }
 0x4b6   : > { %v14163_v33 = vpop.f32.mrf.mxu1  ;;  %v11466_v43 = vrot.slane %v21134_v10, 5  ;;  %v19806_v21 = vsel %vm15512_vm15, %v13095_v38, %v11459_v49  ;;  %v11476_v54 = vrot.slane %v21139_v13, 5  ;;  %v11480_v38 = vrot.slane %v19562_v39, 5  ;;  %v21141_v13 = vld [vmem:[#allocation36_spill] sm:$0xff] }
 0x4b7   : > { %v8516_v26 = vadd.f32 %v14163_v33, %v21133_v14  ;;  %v19787_v60 = vpop.f32.mrf.mxu0  ;;  %v19797_v6 = vsel %vm15512_vm15, %v11454_v12, %v11455_v40  ;;  %v21135_v14 = vld [vmem:[#allocation48_spill] sm:$0xff]  ;;  %v19810_v40 = vsel %vm15512_vm15, %v11461_v22, %v11462_v32 }
 0x4b8   : > { %v8411_v56 = vpop.f32.mrf.mxu1  ;;  %v11469_v33 = vrot.slane %v21135_v14, 5  ;;  %v11468_v10 = vrot.slane %v11466_v43, 4  ;;  %v13097_v14 = vrot.slane %v11329_v35, 9  ;;  %v19820_v32 = vsel %vm15512_vm15, %v13096_v1, %v11466_v43 }
 0x4b9   : > { %v8514_v45 = vadd.f32 %v8411_v56, %v21136_v17  ;;  %v14216_v19 = vpop.f32.mrf.mxu0  ;;  %v11473_v17 = vrot.slane %v21137_v0, 5  ;;  %v21138_v56 = vld [vmem:[#allocation46_spill] sm:$0xff]  ;;  %v11483_v0 = vrot.slane %v19567_v59, 5  ;;  %v11482_v12 = vrot.slane %v11480_v38, 4 }
 0x4ba   : > { %v14164_v34 = vpop.f32.mrf.mxu1  ;;  %v19824_v22 = vsel %vm15512_vm15, %v11468_v10, %v11469_v33  ;;  %v21142_v43 = vcombine.low %v19719_v50, %v19731_v23 }
 0x4bb   : > { %v8517_v48 = vadd.f32 %v14164_v34, %v21138_v56  ;;  %v8816_v11 = vpop.f32.mrf.mxu0  ;;  %v11475_v35 = vrot.slane %v11473_v17, 4  ;;  %v21140_v34 = vcombine.low %v19700_v28, %v19713_v20  ;;  %v13128_v39 = vcombine.low %v19820_v32, %v19824_v22  ;;  %v21143_v20 = vld [vmem:[#allocation26_spill] sm:$0xff]  ;;  %v11331_v32 = vld [vmem:[#allocation2 + $0xcc] sm:$0xe] }
 0x4bc   : > { %v8414_v49 = vpop.f32.mrf.mxu1  ;;  %v19838_v33 = vsel %vm15512_vm15, %v13097_v14, %v11473_v17  ;;  %v19846_v28 = vsel %vm15512_vm15, %v13098_v53, %v11480_v38  ;;  %v19853_v23 = vsel %vm15512_vm15, %v11482_v12, %v11483_v0  ;;  %v19857_v14 = vadd.f32 %v19618_v5, %v19660_v37  ;;  %v21144_v38 = vld [vmem:[#allocation20_spill] sm:$0xff] }
 0x4bd   : > { %14450 = vmatmul.mubr.bf16.gmra.mxu1 %v21140_v34  ;;  %v8515_v58 = vadd.f32 %v8414_v49, %v21141_v13  ;;  %v14219_v56 = vpop.f32.mrf.mxu0  ;;  %v19842_v59 = vsel %vm15512_vm15, %v11475_v35, %v11476_v54  ;;  %v13130_v17 = vcombine.low %v19846_v28, %v19853_v23  ;;  %v19863_v53 = vadd.f32 %v19624_v55, %v19677_v18 }
 0x4be   : > { %14453 = vmatprep.mubr.bf16.mxu1 %v21142_v43  ;;  %v14167_v1 = vpop.f32.mrf.mxu1  ;;  %v13129_v50 = vcombine.low %v19838_v33, %v19842_v59  ;;  %v19868_v13 = vadd.f32 %v19636_v2, %v19694_v15  ;;  %v19872_v12 = vadd.f32 %v19647_v61, %v19705_v27  ;;  %v19876_v5 = vadd.f32 %v19656_v51, %v19723_v3  ;;  %v21145_v15 = vld [vmem:[#allocation29_spill] sm:$0xff]  ;;  %v21150_v43 = vld [vmem:[#allocation23_spill] sm:$0xff] }
 0x4bf   : > { %v8520_v10 = vadd.f32 %v14167_v1, %v21143_v20  ;;  %v8829_v49 = vpop.f32.mrf.mxu0  ;;  %v19880_v55 = vadd.f32 %v19662_v44, %v19739_v42  ;;  %v19884_v18 = vadd.f32 %v19679_v9, %v19756_v36  ;;  %v19888_v2 = vadd.f32 %v19696_v41, %v19771_v7 }
 0x4c0   : > { %v8427_v54 = vpop.f32.mrf.mxu1  ;;  %v19892_v0 = vadd.f32 %v19707_v24, %v8516_v26  ;;  %v19895_v51 = vadd.f32 %v19725_v46, %v8514_v45  ;;  %v19898_v44 = vadd.f32 %v19741_v16, %v8517_v48  ;;  %v19901_v9 = vadd.f32 %v19758_v57, %v8515_v58  ;;  %v21147_v26 = vld [vmem:[#allocation16_spill] sm:$0xff]  ;;  %v21149_v57 = vld [vmem:[#allocation30_spill] sm:$0xff] }
 0x4c1   : > { %v8518_v35 = vadd.f32 %v8427_v54, %v21144_v38  ;;  %v14220_v34 = vpop.f32.mrf.mxu0  ;;  %v19904_v42 = vadd.f32 %v19773_v4, %v8520_v10  ;;  %v21146_v24 = vcombine.low %v19735_v25, %v19751_v30  ;;  %v21148_v48 = vcombine.low %v19747_v8, %v19764_v31  ;;  %v21151_v10 = vld [vmem:[#allocation33_spill] sm:$0xff] }
 0x4c2   : > { %v14168_v37 = vpop.f32.mrf.mxu1  ;;  %v21152_v31 = vcombine.low %v19779_v62, %v19783_v47 }
 0x4c3   : > { %v8521_v61 = vadd.f32 %v14168_v37, %v21145_v15  ;;  %v8832_v27 = vpop.f32.mrf.mxu0  ;;  %v19907_v41 = vadd.f32 %v19787_v60, %v8518_v35  ;;  %v21153_v35 = vld [vmem:[#allocation32_spill] sm:$0xff] }
 0x4c4   : > { %v8430_v3 = vpop.f32.mrf.mxu1 }
 0x4c5   : > { %14454 = vmatmul.mubr.bf16.gmra.mxu1 %v21146_v24  ;;  %v8519_v45 = vadd.f32 %v8430_v3, %v21147_v26  ;;  %v14223_v46 = vpop.f32.mrf.mxu0  ;;  %v19913_v36 = vadd.f32 %v14216_v19, %v8521_v61  ;;  %v21155_v3 = vld [vmem:[#allocation21_spill] sm:$0xff] }
 0x4c6   : > { %14457 = vmatprep.mubr.bf16.mxu1 %v21148_v48  ;;  %v14171_v16 = vpop.f32.mrf.mxu1  ;;  %v21156_v48 = vld [vmem:[#allocation39_spill] sm:$0xff] }
 0x4c7   : > { %v8524_v7 = vadd.f32 %v14171_v16, %v21149_v57  ;;  %v8845_v4 = vpop.f32.mrf.mxu0  ;;  %v19919_v58 = vadd.f32 %v8816_v11, %v8519_v45 }
 0x4c8   : > { %v8443_v60 = vpop.f32.mrf.mxu1 }
 0x4c9   : > { %v8522_v1 = vadd.f32 %v8443_v60, %v21150_v43  ;;  %v14224_v25 = vpop.f32.mrf.mxu0  ;;  %v19922_v30 = vadd.f32 %v14219_v56, %v8524_v7  ;;  %v21154_v56 = vcombine.low %v19793_v52, %v19797_v6  ;;  %v21157_v7 = vld [vmem:[#allocation19_spill] sm:$0xff]  ;;  %v21158_v6 = vcombine.low %v19806_v21, %v19810_v40 }
 0x4ca   : > { %v14172_v20 = vpop.f32.mrf.mxu1 }
 0x4cb   : > { %v8525_v19 = vadd.f32 %v14172_v20, %v21151_v10  ;;  %v8848_v54 = vpop.f32.mrf.mxu0  ;;  %v19925_v38 = vadd.f32 %v8829_v49, %v8522_v1  ;;  %v21159_v10 = vld [vmem:[#allocation50_spill] sm:$0xff] }
 0x4cc   : > { %v8446_v8 = vpop.f32.mrf.mxu1 }
 0x4cd   : > { %14458 = vmatmul.mubr.bf16.gmra.mxu1 %v21152_v31  ;;  %v8523_v11 = vadd.f32 %v8446_v8, %v21153_v35  ;;  %v14227_v37 = vpop.f32.mrf.mxu0  ;;  %v19931_v15 = vadd.f32 %v14220_v34, %v8525_v19  ;;  %v21160_v35 = vld [vmem:[#allocation28_spill] sm:$0xff] }
 0x4ce   : > { %14461 = vmatprep.mubr.bf16.mxu1 %v21154_v56  ;;  %v14175_v61 = vpop.f32.mrf.mxu1  ;;  %v21161_v56 = vld [vmem:[#allocation56_spill] sm:$0xff] }
 0x4cf   : > { %v8528_v24 = vadd.f32 %v14175_v61, %v21155_v3  ;;  %v8861_v26 = vpop.f32.mrf.mxu0  ;;  %v19937_v49 = vadd.f32 %v8832_v27, %v8523_v11  ;;  %v21162_v61 = vld [vmem:[#allocation52_spill] sm:$0xff] }
 0x4d0   : > { %v8459_v45 = vpop.f32.mrf.mxu1 }
 0x4d1   : > { %v8526_v16 = vadd.f32 %v8459_v45, %v21156_v48  ;;  %v14228_v62 = vpop.f32.mrf.mxu0  ;;  %v19940_v47 = vadd.f32 %v14223_v46, %v8528_v24  ;;  %v21163_v45 = vld [vmem:[#allocation34_spill] sm:$0xff] }
 0x4d2   : > { %v14176_v57 = vpop.f32.mrf.mxu1  ;;  %v11490_v48 = vrot.slane %v21163_v45, 5 }
 0x4d3   : > { %v8529_v34 = vadd.f32 %v14176_v57, %v21157_v7  ;;  %v8864_v60 = vpop.f32.mrf.mxu0  ;;  %v19943_v43 = vadd.f32 %v8845_v4, %v8526_v16 }
 0x4d4   : > { %v8462_v52 = vpop.f32.mrf.mxu1 }
 0x4d5   : > { %14462 = vmatmul.mubr.bf16.gmra.mxu1 %v21158_v6  ;;  %v8527_v27 = vadd.f32 %v8462_v52, %v19591_v29  ;;  %v14231_v1 = vpop.f32.mrf.mxu0  ;;  %v19949_v20 = vadd.f32 %v14224_v25, %v8529_v34  ;;  %v11487_v25 = vrot.slane %v21161_v56, 5  ;;  %v13099_v34 = vrot.slane %v11331_v32, 9  ;;  %v21165_v52 = vld [vmem:[#allocation58_spill] sm:$0xff]  ;;  %v21168_v56 = vld [vmem:[#allocation31_spill] sm:$0xff] }
 0x4d6   : > { %14465 = vmatprep.mubr.bf16.mxu1 %v13128_v39  ;;  %v14179_v46 = vpop.f32.mrf.mxu1 }
 0x4d7   : > { %v8532_v19 = vadd.f32 %v14179_v46, %v21159_v10  ;;  %v8877_v8 = vpop.f32.mrf.mxu0  ;;  %v19955_v4 = vadd.f32 %v8848_v54, %v8527_v27  ;;  %v21164_v54 = vld [vmem:[#allocation25_spill] sm:$0xff]  ;;  %v11488_v28 = vsel %vm15512_vm15, %v13099_v34, %v11487_v25 }
 0x4d8   : > { %v8475_v31 = vpop.f32.mrf.mxu1 }
 0x4d9   : > { %v8530_v11 = vadd.f32 %v8475_v31, %v21160_v35  ;;  %v14232_v21 = vpop.f32.mrf.mxu0  ;;  %v19958_v40 = vadd.f32 %v14227_v37, %v8532_v19  ;;  %v21167_v31 = vld [vmem:[#allocation41_spill] sm:$0xff] }
 0x4da   : > { %v14180_v29 = vpop.f32.mrf.mxu1 }
 0x4db   : > { %v8533_v3 = vadd.f32 %v14180_v29, %v21162_v61  ;;  %v8880_v24 = vpop.f32.mrf.mxu0  ;;  %v19962_v22 = vadd.f32 %v8861_v26, %v8530_v11  ;;  %v11489_v26 = vrot.slane %v11487_v25, 4 }
 0x4dc   : > { %v8478_v39 = vpop.f32.mrf.mxu1 }
 0x4dd   : > { %14466 = vmatmul.mubr.bf16.gmra.mxu1 %v13129_v50  ;;  %v8531_v16 = vadd.f32 %v8478_v39, %v21164_v54  ;;  %v19969_v57 = vadd.f32 %v14228_v62, %v8533_v3  ;;  %v11491_v33 = vsel %vm15512_vm15, %v11489_v26, %v11490_v48  ;;  %v21166_v50 = vld [vmem:[#allocation35_spill] sm:$0xff] }
 0x4de   : > { %v14299_v37 = vpop.f32.mrf.mxu0  ;;  %14469 = vmatprep.mubr.bf16.mxu1 %v13130_v17  ;;  %v13131_v17 = vcombine.low %v11488_v28, %v11491_v33 }
 0x4df   : > { %v14183_v7 = vpop.f32.mrf.mxu1  ;;  %v19975_v46 = vadd.f32 %v8864_v60, %v8531_v16 }
 0x4e0   : > { %v8536_v6 = vadd.f32 %v14183_v7, %v21165_v52  ;;  %v10017_v27 = vpop.f32.mrf.mxu0 }
 0x4e1   : > { %v8491_v59 = vpop.f32.mrf.mxu1 }
 0x4e2   : > { %v8534_v10 = vadd.f32 %v8491_v59, %v21166_v50  ;;  %v14300_v62 = vpop.f32.mrf.mxu0  ;;  %v19980_v19 = vadd.f32 %v14231_v1, %v8536_v6 }
 0x4e3   : > { %v14184_v23 = vpop.f32.mrf.mxu1 }
 0x4e4   : > { %v8537_v35 = vadd.f32 %v14184_v23, %v21167_v31  ;;  %v19985_v11 = vpop.f32.mrf.mxu0  ;;  %v19987_v60 = vadd.f32 %v8877_v8, %v8534_v10 }
 0x4e5   : > { %v8494_v29 = vpop.f32.mrf.mxu1  ;;  %14470 = vmatmul.mubr.bf16.gmra.mxu1 %v13131_v17 }
 0x4e6   : > { %v8535_v61 = vadd.f32 %v8494_v29, %v21168_v56  ;;  %v14303_v3 = vpop.f32.mrf.mxu0  ;;  %v19990_v32 = vadd.f32 %v14232_v21, %v8537_v35 }
 0x4e7   : > { %v14251_v1 = vpop.f32.mrf.mxu1 }
 0x4e8   : > { %v9648_v39 = vadd.f32 %v14251_v1, %v19857_v14  ;;  %v19993_v63 = vpop.f32.mrf.mxu0  ;;  %v19995_v25 = vadd.f32 %v8880_v24, %v8535_v61 }
 0x4e9   : > { %v9519_v45 = vpop.f32.mrf.mxu1 }
 0x4ea   : > { %v9646_v48 = vadd.f32 %v9519_v45, %v19863_v53  ;;  %v14304_v54 = vpop.f32.mrf.mxu0  ;;  %v19998_v8 = vadd.f32 %v14299_v37, %v9648_v39 }
 0x4eb   : > { %v14252_v16 = vpop.f32.mrf.mxu1 }
 0x4ec   : > { %v9649_v7 = vadd.f32 %v14252_v16, %v19868_v13  ;;  %v20001_v34 = vpop.f32.mrf.mxu0  ;;  %v20003_v21 = vadd.f32 %v10017_v27, %v9646_v48 }
 0x4ed   : > { %v9522_v26 = vpop.f32.mrf.mxu1 }
 0x4ee   : > { %v20006_v14 = vadd.f32 %v9522_v26, %v19872_v12  ;;  %v14307_v52 = vpop.f32.mrf.mxu0  ;;  %v20008_v24 = vadd.f32 %v14300_v62, %v9649_v7 }
 0x4ef   : > { %v14255_v6 = vpop.f32.mrf.mxu1 }
 0x4f0   : > { %v9652_v53 = vadd.f32 %v14255_v6, %v19876_v5  ;;  %v20011_v33 = vpop.f32.mrf.mxu0 }
 0x4f1   : > { %v9535_v37 = vpop.f32.mrf.mxu1 }
 0x4f2   : > { %v20014_v59 = vadd.f32 %v9535_v37, %v19880_v55  ;;  %v14308_v13 = vpop.f32.mrf.mxu0  ;;  %v20016_v50 = vadd.f32 %v14303_v3, %v9652_v53 }
 0x4f3   : > { %v14256_v27 = vpop.f32.mrf.mxu1 }
 0x4f4   : > { %v9653_v10 = vadd.f32 %v14256_v27, %v19884_v18  ;;  %v20019_v12 = vpop.f32.mrf.mxu0 }
 0x4f5   : > { %v9538_v28 = vpop.f32.mrf.mxu1 }
 0x4f6   : > { %v20022_v62 = vadd.f32 %v9538_v28, %v19888_v2  ;;  %v14311_v23 = vpop.f32.mrf.mxu0  ;;  %v20024_v5 = vadd.f32 %v14304_v54, %v9653_v10 }
 0x4f7   : > { %v14259_v17 = vpop.f32.mrf.mxu1 }
 0x4f8   : > { %v9656_v31 = vadd.f32 %v14259_v17, %v19892_v0  ;;  %v20027_v55 = vpop.f32.mrf.mxu0 }
 0x4f9   : > { %v9551_v35 = vpop.f32.mrf.mxu1 }
 0x4fa   : > { %v20030_v29 = vadd.f32 %v9551_v35, %v19895_v51  ;;  %v14312_v56 = vpop.f32.mrf.mxu0  ;;  %v20032_v18 = vadd.f32 %v14307_v52, %v9656_v31 }
 0x4fb   : > { %v14260_v61 = vpop.f32.mrf.mxu1 }
 0x4fc   : > { %v9657_v3 = vadd.f32 %v14260_v61, %v19898_v44  ;;  %v20035_v2 = vpop.f32.mrf.mxu0 }
 0x4fd   : > { %v9554_v1 = vpop.f32.mrf.mxu1 }
 0x4fe   : > { %v20038_v39 = vadd.f32 %v9554_v1, %v19901_v9  ;;  %v14315_v45 = vpop.f32.mrf.mxu0  ;;  %v20040_v0 = vadd.f32 %v14308_v13, %v9657_v3 }
 0x4ff   : > { %v14263_v48 = vpop.f32.mrf.mxu1 }
 0x500   : > { %v9660_v54 = vadd.f32 %v14263_v48, %v19904_v42  ;;  %v20043_v51 = vpop.f32.mrf.mxu0 }
 0x501   : > { %v9567_v16 = vpop.f32.mrf.mxu1 }
 0x502   : > { %v20046_v7 = vadd.f32 %v9567_v16, %v19907_v41  ;;  %v14316_v26 = vpop.f32.mrf.mxu0  ;;  %v20048_v44 = vadd.f32 %v14311_v23, %v9660_v54 }
 0x503   : > { %v14264_v52 = vpop.f32.mrf.mxu1 }
 0x504   : > { %v9661_v6 = vadd.f32 %v14264_v52, %v19913_v36  ;;  %v20051_v9 = vpop.f32.mrf.mxu0 }
 0x505   : > { %v9570_v53 = vpop.f32.mrf.mxu1 }
 0x506   : > { %v20054_v37 = vadd.f32 %v9570_v53, %v19919_v58  ;;  %v14319_v13 = vpop.f32.mrf.mxu0  ;;  %v20056_v42 = vadd.f32 %v14312_v56, %v9661_v6 }
 0x507   : > { %v14267_v27 = vpop.f32.mrf.mxu1 }
 0x508   : > { %v9664_v10 = vadd.f32 %v14267_v27, %v19922_v30  ;;  %v20059_v41 = vpop.f32.mrf.mxu0 }
 0x509   : > { %21169 = vst [vmem:[#allocation42_spill] sm:$0xff] %v20059_v41  ;;  %v9583_v28 = vpop.f32.mrf.mxu1 }
 0x50a   : > { %v20062_v23 = vadd.f32 %v9583_v28, %v19925_v38  ;;  %v14320_v17 = vpop.f32.mrf.mxu0  ;;  %v20064_v36 = vadd.f32 %v14315_v45, %v9664_v10 }
 0x50b   : > { %v14268_v31 = vpop.f32.mrf.mxu1 }
 0x50c   : > { %v9665_v35 = vadd.f32 %v14268_v31, %v19931_v15  ;;  %v20067_v58 = vpop.f32.mrf.mxu0 }
 0x50d   : > { %21170 = vst [vmem:[#allocation27_spill] sm:$0xff] %v20067_v58  ;;  %v9586_v61 = vpop.f32.mrf.mxu1 }
 0x50e   : > { %v20070_v56 = vadd.f32 %v9586_v61, %v19937_v49  ;;  %v14323_v3 = vpop.f32.mrf.mxu0  ;;  %v20072_v30 = vadd.f32 %v14316_v26, %v9665_v35 }
 0x50f   : > { %v14271_v1 = vpop.f32.mrf.mxu1 }
 0x510   : > { %v9668_v48 = vadd.f32 %v14271_v1, %v19940_v47  ;;  %v20075_v54 = vpop.f32.mrf.mxu0 }
 0x511   : > { %v9599_v38 = vpop.f32.mrf.mxu1  ;;  %21171 = vst [vmem:[#allocation60_spill] sm:$0xff] %v20075_v54 }
 0x512   : > { %v20078_v45 = vadd.f32 %v9599_v38, %v19943_v43  ;;  %v20080_v16 = vadd.f32 %v14319_v13, %v9668_v48  ;;  %v14324_v49 = vpop.f32.mrf.mxu0 }
 0x513   : > { %v14272_v15 = vpop.f32.mrf.mxu1 }
 0x514   : > { %21172 = vst [vmem:[#allocation55_spill] sm:$0xff] %v20078_v45  ;;  %v9669_v52 = vadd.f32 %v14272_v15, %v19949_v20  ;;  %v20089_v28 = vpop.f32.mrf.mxu0 }
 0x515   : > { %v9602_v6 = vpop.f32.mrf.mxu1  ;;  %21174 = vst [vmem:[#allocation57_spill] sm:$0xff] %v20089_v28 }
 0x516   : > { %v20084_v53 = vadd.f32 %v9602_v6, %v19955_v4  ;;  %v20086_v26 = vadd.f32 %v14320_v17, %v9669_v52  ;;  %v14327_v61 = vpop.f32.mrf.mxu0 }
 0x517   : > { %v14275_v27 = vpop.f32.mrf.mxu1 }
 0x518   : > { %21173 = vst [vmem:[#allocation38_spill] sm:$0xff] %v20084_v53  ;;  %v9672_v47 = vadd.f32 %v14275_v27, %v19958_v40  ;;  %v20102_v1 = vpop.f32.mrf.mxu0 }
 0x519   : > { %v9615_v10 = vpop.f32.mrf.mxu1  ;;  %21177 = vst [vmem:[#allocation44_spill] sm:$0xff] %v20102_v1 }
 0x51a   : > { %v20092_v43 = vadd.f32 %v9615_v10, %v19962_v22  ;;  %v20094_v13 = vadd.f32 %v14323_v3, %v9672_v47  ;;  %v14328_v22 = vpop.f32.mrf.mxu0 }
 0x51b   : > { %v14276_v31 = vpop.f32.mrf.mxu1 }
 0x51c   : > { %21175 = vst [vmem:[#allocation18_spill] sm:$0xff] %v20092_v43  ;;  %v9673_v20 = vadd.f32 %v14276_v31, %v19969_v57 }
 0x51d   : > { %v9618_v35 = vpop.f32.mrf.mxu1 }
 0x51e   : > { %v20098_v4 = vadd.f32 %v9618_v35, %v19975_v46  ;;  %v20100_v17 = vadd.f32 %v14324_v49, %v9673_v20  ;;  %v20111_v46 = vpop.f32.mrf.mxu0 }
 0x51f   : > { %21179 = vst [vmem:[#allocation45_spill] sm:$0xff] %v20111_v46 }
 0x520   : > { %21176 = vst [vmem:[#allocation9_spill] sm:$0xff] %v20098_v4 }
 0x522   : > { %v14279_v40 = vpop.f32.mrf.mxu1 }
 0x523   : > { %v9676_v48 = vadd.f32 %v14279_v40, %v19980_v19 }
 0x524   : > { %v9631_v38 = vpop.f32.mrf.mxu1 }
 0x525   : > { %v20106_v3 = vadd.f32 %v9631_v38, %v19987_v60  ;;  %v20108_v15 = vadd.f32 %v14327_v61, %v9676_v48  ;;  %v20121_v60 = vpop.f32.mrf.mxu0 }
 0x526   : > { %v14280_v57 = vpop.f32.mrf.mxu1 }
 0x527   : > { %21178 = vst [vmem:[#allocation40_spill] sm:$0xff] %v20106_v3  ;;  %v9677_v52 = vadd.f32 %v14280_v57, %v19990_v32  ;;  %v20129_v61 = vpop.f32.mrf.mxu0 }
 0x528   : > { %v9634_v6 = vpop.f32.mrf.mxu1 }
 0x529   : > { %v20114_v49 = vadd.f32 %v9634_v6, %v19995_v25  ;;  %v20116_v27 = vadd.f32 %v14328_v22, %v9677_v52 }
 0x52a   : > { %v14347_v47 = vpop.f32.mrf.mxu1 }
 0x52b   : > { %21180 = vst [vmem:[#allocation59_spill] sm:$0xff] %v20114_v49  ;;  %v20119_v19 = vadd.f32 %v14347_v47, %v19998_v8  ;;  %v20134_v8 = vpop.f32.mrf.mxu0 }
 0x52c   : > { %v10403_v10 = vpop.f32.mrf.mxu1 }
 0x52d   : > { %v20124_v31 = vadd.f32 %v10403_v10, %v20003_v21  ;;  %v11160_v57 = vpop.f32.mrf.mxu0 }
 0x52e   : > { %v14348_v20 = vpop.f32.mrf.mxu1 }
 0x52f   : > { %v20127_v32 = vadd.f32 %v14348_v20, %v20008_v24  ;;  %v20146_v47 = vpop.f32.mrf.mxu0 }
 0x530   : > { %v10406_v35 = vpop.f32.mrf.mxu1 }
 0x532   : > { %v14351_v25 = vpop.f32.mrf.mxu1 }
 0x533   : > { %v20132_v40 = vadd.f32 %v14351_v25, %v20016_v50  ;;  %v11173_v25 = vpop.f32.mrf.mxu0 }
 0x534   : > { %v10419_v48 = vpop.f32.mrf.mxu1 }
 0x535   : > { %v20158_v49 = vpop.f32.mrf.mxu0 }
 0x536   : > { %v14352_v38 = vpop.f32.mrf.mxu1 }
 0x537   : > { %v20137_v22 = vadd.f32 %v14352_v38, %v20024_v5  ;;  %v20165_v3 = vpop.f32.mrf.mxu0 }
 0x538   : > { %v20139_v21 = vpop.f32.mrf.mxu1 }
 0x53a   : > { %v14355_v52 = vpop.f32.mrf.mxu1 }
 0x53b   : > { %v20142_v24 = vadd.f32 %v14355_v52, %v20032_v18 }
 0x53c   : > { %v20144_v6 = vpop.f32.mrf.mxu1 }
 0x53e   : > { %v14356_v50 = vpop.f32.mrf.mxu1 }
 0x53f   : > { %v20149_v10 = vadd.f32 %v14356_v50, %v20040_v0 }
 0x540   : > { %v20151_v20 = vpop.f32.mrf.mxu1 }
 0x542   : > { %v14359_v5 = vpop.f32.mrf.mxu1 }
 0x543   : > { %v20154_v38 = vadd.f32 %v14359_v5, %v20048_v44  ;;  %v20172_v44 = vpop.f32.mrf.mxu0 }
 0x544   : > { %v20156_v46 = vpop.f32.mrf.mxu1 }
 0x546   : > { %v14360_v18 = vpop.f32.mrf.mxu1 }
 0x547   : > { %v20161_v52 = vadd.f32 %v14360_v18, %v20056_v42  ;;  %v20179_v42 = vpop.f32.mrf.mxu0 }
 0x548   : > { %v20163_v1 = vpop.f32.mrf.mxu1 }
 0x54a   : > { %v14363_v0 = vpop.f32.mrf.mxu1 }
 0x54b   : > { %v20168_v50 = vadd.f32 %v14363_v0, %v20064_v36  ;;  %v20186_v36 = vpop.f32.mrf.mxu0 }
 0x54c   : > { %v20170_v28 = vpop.f32.mrf.mxu1 }
 0x54d   : > { %21181 = vst [vmem:[#allocation43_spill] sm:$0xff] %v20168_v50 }
 0x54e   : > { %v14364_v5 = vpop.f32.mrf.mxu1 }
 0x54f   : > { %v20175_v4 = vadd.f32 %v14364_v5, %v20072_v30  ;;  %v20193_v30 = vpop.f32.mrf.mxu0 }
 0x550   : > { %v20177_v54 = vpop.f32.mrf.mxu1 }
 0x551   : > { %21182 = vst [vmem:[#allocation10_spill] sm:$0xff] %v20175_v4  ;;  %21183 = vst [vmem:[#allocation61_spill] sm:$0xff] %v20177_v54 }
 0x552   : > { %v14367_v18 = vpop.f32.mrf.mxu1 }
 0x553   : > { %v20182_v43 = vadd.f32 %v14367_v18, %v20080_v16  ;;  %v20200_v16 = vpop.f32.mrf.mxu0 }
 0x554   : > { %v20184_v58 = vpop.f32.mrf.mxu1 }
 0x555   : > { %21184 = vst [vmem:[#allocation3_spill] sm:$0xff] %v20182_v43  ;;  %21185 = vst [vmem:[#allocation5_spill] sm:$0xff] %v20184_v58  ;;  %v20205_v58 = vpop.f32.mrf.mxu0 }
 0x556   : > { %v14368_v0 = vpop.f32.mrf.mxu1 }
 0x557   : > { %v20189_v53 = vadd.f32 %v14368_v0, %v20086_v26  ;;  %v20209_v0 = vpop.f32.mrf.mxu0 }
 0x558   : > { %v20191_v50 = vpop.f32.mrf.mxu1 }
 0x559   : > { %21186 = vst [vmem:[#allocation4_spill] sm:$0xff] %v20189_v53  ;;  %21187 = vst [vmem:[#allocation12_spill] sm:$0xff] %v20191_v50 }
 0x55a   : > { %v14371_v5 = vpop.f32.mrf.mxu1 }
 0x55b   : > { %v20196_v4 = vadd.f32 %v14371_v5, %v20094_v13  ;;  %v20216_v5 = vpop.f32.mrf.mxu0 }
 0x55c   : > { %v20198_v41 = vpop.f32.mrf.mxu1 }
 0x55d   : > { %21188 = vst [vmem:[#allocation11_spill] sm:$0xff] %v20196_v4  ;;  %21189 = vst [vmem:[#allocation6_spill] sm:$0xff] %v20198_v41 }
 0x55e   : > { %v14372_v18 = vpop.f32.mrf.mxu1 }
 0x55f   : > { %v20203_v43 = vadd.f32 %v14372_v18, %v20100_v17  ;;  %v10145_v18 = vadd.f32 %v19985_v11, %v20006_v14 }
 0x560   : > { %v20207_v26 = vpop.f32.mrf.mxu1 }
 0x561   : > { %21190 = vst [vmem:[#allocation7_spill] sm:$0xff] %v20203_v43  ;;  %21191 = vst [vmem:[#allocation8_spill] sm:$0xff] %v20207_v26  ;;  %v20225_v43 = vpop.f32.mrf.mxu0  ;;  %v10531_v45 = vadd.f32 %v10406_v35, %v10145_v18  ;;  %v10149_v35 = vadd.f32 %v20001_v34, %v20022_v62 }
 0x563   : > { %v14375_v53 = vpop.f32.mrf.mxu1  ;;  %v20231_v54 = vpop.f32.mrf.mxu0  ;;  %v11285_v11 = vadd.f32 %v11160_v57, %v10531_v45  ;;  %v10535_v45 = vadd.f32 %v20139_v21, %v10149_v35 }
 0x564   : > { %v20212_v50 = vadd.f32 %v14375_v53, %v20108_v15  ;;  %v10148_v53 = vadd.f32 %v19993_v63, %v20014_v59  ;;  %v11287_v63 = vadd.f32 %v20134_v8, %v20127_v32  ;;  %v10152_v32 = vadd.f32 %v20011_v33, %v20030_v29 }
 0x565   : > { %v20214_v13 = vpop.f32.mrf.mxu1  ;;  %v11290_v33 = vadd.f32 %v20146_v47, %v20132_v40  ;;  %v11289_v29 = vadd.f32 %v20165_v3, %v10535_v45 }
 0x566   : > { %21192 = vst [vmem:[#allocation53_spill] sm:$0xff] %v20212_v50  ;;  %21193 = vst [vmem:[#allocation14_spill] sm:$0xff] %v20214_v13  ;;  %v11284_v50 = vadd.f32 %v20129_v61, %v20124_v31  ;;  %v10534_v13 = vadd.f32 %v10419_v48, %v10148_v53  ;;  %v20244_v31 = vld [vmem:[%s20860_s4] ss:$0 sm:$0xff]  ;;  %v10538_v21 = vadd.f32 %v20144_v6, %v10152_v32 }
 0x567   : > { %v14376_v4 = vpop.f32.mrf.mxu1  ;;  %v10153_v53 = vadd.f32 %v20019_v12, %v20038_v39  ;;  %v10157_v32 = vadd.f32 %v20035_v2, %v20054_v37 }
 0x568   : > { %v20219_v41 = vadd.f32 %v14376_v4, %v20116_v27  ;;  %v11286_v27 = vadd.f32 %v20121_v60, %v20119_v19  ;;  %v11288_v19 = vadd.f32 %v11173_v25, %v10534_v13  ;;  %v11292_v40 = vadd.f32 %v20179_v42, %v10538_v21 }
 0x569   : > { %v20221_v17 = vpop.f32.mrf.mxu1  ;;  %v10539_v3 = vadd.f32 %v20151_v20, %v10153_v53 }
 0x56a   : > { %21194 = vst [vmem:[#allocation49_spill] sm:$0xff] %v20219_v41  ;;  %21195 = vst [vmem:[#allocation13_spill] sm:$0xff] %v20221_v17  ;;  %v20239_v17 = vpop.f32.mrf.mxu0 }
 0x56b   : > { %v14443_v26 = vpop.f32.mrf.mxu1 }
 0x56c   : > { %v11784_v18 = vadd.f32 %v14443_v26, %v11286_v27 }
 0x56d   : > { %v11655_v15 = vpop.f32.mrf.mxu1 }
 0x56e   : > { %v11782_v41 = vadd.f32 %v11655_v15, %v11284_v50  ;;  %v20256_v8 = vadd.f32 %v20244_v31, %v11784_v18  ;;  %v20261_v50 = vpop.f32.mrf.mxu0  ;;  %v11291_v15 = vadd.f32 %v20158_v49, %v20137_v22  ;;  %v10156_v22 = vadd.f32 %v20027_v55, %v20046_v7 }
 0x56f   : > { %v14444_v4 = vpop.f32.mrf.mxu1  ;;  %v11294_v55 = vadd.f32 %v20172_v44, %v20142_v24  ;;  %v11293_v7 = vadd.f32 %v20193_v30, %v10539_v3  ;;  %v10543_v44 = vadd.f32 %v20163_v1, %v10157_v32 }
 0x570   : > { %v20248_v60 = vadd.f32 %v20244_v31, %v11782_v41  ;;  %v11785_v34 = vadd.f32 %v14444_v4, %v11287_v63  ;;  %v20278_v35 = vpop.f32.mrf.mxu0  ;;  %v10542_v42 = vadd.f32 %v20156_v46, %v10156_v22 }
 0x571   : > { %v11658_v14 = vpop.f32.mrf.mxu1 }
 0x572   : > { %v11783_v59 = vadd.f32 %v11658_v14, %v11285_v11  ;;  %v20264_v26 = vadd.f32 %v20244_v31, %v11785_v34  ;;  %v11296_v24 = vadd.f32 %v20205_v58, %v10542_v42 }
 0x573   : > { %v14447_v61 = vpop.f32.mrf.mxu1 }
 0x574   : > { %v20251_v62 = vadd.f32 %v20244_v31, %v11783_v59  ;;  %v11788_v4 = vadd.f32 %v14447_v61, %v11290_v33 }
 0x575   : > { %v11671_v48 = vpop.f32.mrf.mxu1 }
 0x576   : > { %v11853_v57 = vadd.f32 %v20251_v62, %v20248_v60  ;;  %v11786_v25 = vadd.f32 %v11671_v48, %v11288_v19  ;;  %v20289_v63 = vadd.f32 %v20244_v31, %v11788_v4  ;;  %v20293_v19 = vpop.f32.mrf.mxu0  ;;  %v11295_v48 = vadd.f32 %v20186_v36, %v20149_v10 }
 0x577   : > { %v14448_v41 = vpop.f32.mrf.mxu1  ;;  %v10160_v36 = vadd.f32 %v20043_v51, %v20062_v23  ;;  %v11297_v51 = vadd.f32 %v20216_v5, %v10543_v44  ;;  %v10161_v23 = vadd.f32 %v20051_v9, %v20070_v56  ;;  %v21202_v44 = vld [vmem:[#allocation27_spill] sm:$0xff] }
 0x578   : > { %v11854_v13 = vadd.f32 %v11853_v57, %v20256_v8  ;;  %v20275_v27 = vadd.f32 %v20244_v31, %v11786_v25  ;;  %v11789_v39 = vadd.f32 %v14448_v41, %v11291_v15 }
 0x579   : > { %v11674_v6 = vpop.f32.mrf.mxu1  ;;  %v10546_v58 = vadd.f32 %v20170_v28, %v10160_v36 }
 0x57a   : > { %v11855_v11 = vadd.f32 %v11854_v13, %v20264_v26  ;;  %v11787_v14 = vadd.f32 %v11674_v6, %v11289_v29  ;;  %v20296_v45 = vadd.f32 %v20244_v31, %v11789_v39  ;;  %v20310_v13 = vpop.f32.mrf.mxu0 }
 0x57c   : > { %v11856_v12 = vadd.f32 %v11855_v11, %v20275_v27  ;;  %v20284_v49 = vadd.f32 %v20244_v31, %v11787_v14  ;;  %v11240_v6 = vpop.f32.mrf.mxu0  ;;  %v11298_v14 = vadd.f32 %v20200_v16, %v20154_v38  ;;  %v11300_v38 = vadd.f32 %v20231_v54, %v10546_v58  ;;  %v21196_v16 = vld [vmem:[#allocation61_spill] sm:$0xff] }
 0x57d   : > { %v14451_v18 = vpop.f32.mrf.mxu1  ;;  %v10547_v5 = vadd.f32 %v21196_v16, %v10161_v23  ;;  %v21199_v54 = vld [vmem:[#allocation5_spill] sm:$0xff] }
 0x57e   : > { %v11857_v59 = vadd.f32 %v11856_v12, %v20284_v49  ;;  %v11792_v57 = vadd.f32 %v14451_v18, %v11294_v55  ;;  %v11299_v18 = vadd.f32 %v20209_v0, %v20161_v52  ;;  %v20340_v22 = vpop.f32.mrf.mxu0  ;;  %v21197_v0 = vld [vmem:[#allocation55_spill] sm:$0xff] }
 0x57f   : > { %v11687_v47 = vpop.f32.mrf.mxu1 }
 0x580   : > { %v11790_v61 = vadd.f32 %v11687_v47, %v11292_v40  ;;  %v11858_v34 = vadd.f32 %v11857_v59, %v20289_v63  ;;  %v20321_v29 = vadd.f32 %v20244_v31, %v11792_v57  ;;  %v21198_v59 = vld [vmem:[#allocation42_spill] sm:$0xff] }
 0x581   : > { %v14452_v20 = vpop.f32.mrf.mxu1 }
 0x582   : > { %v20307_v25 = vadd.f32 %v20244_v31, %v11790_v61  ;;  %v11859_v21 = vadd.f32 %v11858_v34, %v20296_v45  ;;  %v11793_v37 = vadd.f32 %v14452_v20, %v11295_v48  ;;  %v10164_v61 = vadd.f32 %v21198_v59, %v21197_v0 }
 0x583   : > { %v11690_v46 = vpop.f32.mrf.mxu1 }
 0x584   : > { %v11791_v41 = vadd.f32 %v11690_v46, %v11293_v7  ;;  %v11860_v2 = vadd.f32 %v11859_v21, %v20307_v25  ;;  %v20326_v4 = vadd.f32 %v20244_v31, %v11793_v37  ;;  %v11253_v7 = vpop.f32.mrf.mxu0  ;;  %v10550_v32 = vadd.f32 %v21199_v54, %v10164_v61  ;;  %v21200_v21 = vld [vmem:[#allocation43_spill] sm:$0xff]  ;;  %v21203_v37 = vld [vmem:[#allocation10_spill] sm:$0xff]  ;;  %v21210_v54 = vld [vmem:[#allocation57_spill] sm:$0xff] }
 0x585   : > { %v14455_v33 = vpop.f32.mrf.mxu1  ;;  %v11303_v36 = vadd.f32 %v20239_v17, %v21203_v37  ;;  %v21205_v17 = vld [vmem:[#allocation18_spill] sm:$0xff]  ;;  %v21208_v61 = vld [vmem:[#allocation3_spill] sm:$0xff] }
 0x586   : > { %v20316_v10 = vadd.f32 %v20244_v31, %v11791_v41  ;;  %v11796_v28 = vadd.f32 %v14455_v33, %v11298_v14  ;;  %v11302_v41 = vadd.f32 %v20225_v43, %v21200_v21  ;;  %v11301_v33 = vadd.f32 %v20261_v50, %v10547_v5 }
 0x587   : > { %v11703_v30 = vpop.f32.mrf.mxu1  ;;  %v11304_v43 = vadd.f32 %v20293_v19, %v10550_v32  ;;  %v21207_v19 = vld [vmem:[#allocation6_spill] sm:$0xff] }
 0x588   : > { %v11861_v53 = vadd.f32 %v11860_v2, %v20316_v10  ;;  %v11794_v15 = vadd.f32 %v11703_v30, %v11296_v24  ;;  %v20351_v20 = vadd.f32 %v20244_v31, %v11796_v28  ;;  %v21201_v24 = vld [vmem:[#allocation38_spill] sm:$0xff]  ;;  %v21206_v28 = vld [vmem:[#allocation60_spill] sm:$0xff] }
 0x589   : > { %v14456_v1 = vpop.f32.mrf.mxu1  ;;  %v10165_v2 = vadd.f32 %v21202_v44, %v21201_v24 }
 0x58a   : > { %v11862_v11 = vadd.f32 %v11861_v53, %v20321_v29  ;;  %v20337_v3 = vadd.f32 %v20244_v31, %v11794_v15  ;;  %v11797_v56 = vadd.f32 %v14456_v1, %v11299_v18 }
 0x58b   : > { %v11706_v40 = vpop.f32.mrf.mxu1 }
 0x58c   : > { %v11863_v12 = vadd.f32 %v11862_v11, %v20326_v4  ;;  %v11795_v39 = vadd.f32 %v11706_v40, %v11297_v51  ;;  %v20356_v46 = vadd.f32 %v20244_v31, %v11797_v56  ;;  %v14420_v11 = vpop.f32.mrf.mxu0  ;;  %v21204_v51 = vld [vmem:[#allocation12_spill] sm:$0xff] }
 0x58d   : > { %v14459_v47 = vpop.f32.mrf.mxu1  ;;  %v10551_v50 = vadd.f32 %v21204_v51, %v10165_v2 }
 0x58e   : > { %v11864_v9 = vadd.f32 %v11863_v12, %v20337_v3  ;;  %v20346_v52 = vadd.f32 %v20244_v31, %v11795_v39  ;;  %v11800_v53 = vadd.f32 %v14459_v47, %v11302_v41  ;;  %v10168_v12 = vadd.f32 %v21206_v28, %v21205_v17  ;;  %v11256_v5 = vpop.f32.mrf.mxu0 }
 0x58f   : > { %v11719_v42 = vpop.f32.mrf.mxu1 }
 0x590   : > { %v11865_v34 = vadd.f32 %v11864_v9, %v20346_v52  ;;  %v11798_v55 = vadd.f32 %v11719_v42, %v11300_v38  ;;  %v20379_v47 = vadd.f32 %v20244_v31, %v11800_v53  ;;  %v10554_v9 = vadd.f32 %v21207_v19, %v10168_v12  ;;  %v14423_v2 = vpop.f32.mrf.mxu0  ;;  %v21216_v12 = vld [vmem:[#allocation14_spill] sm:$0xff] }
 0x591   : > { %v14460_v48 = vpop.f32.mrf.mxu1  ;;  %v11306_v42 = vadd.f32 %v20278_v35, %v21208_v61  ;;  %v21219_v61 = vld [vmem:[#allocation7_spill] sm:$0xff] }
 0x592   : > { %v11866_v57 = vadd.f32 %v11865_v34, %v20351_v20  ;;  %v20367_v15 = vadd.f32 %v20244_v31, %v11798_v55  ;;  %v11801_v18 = vadd.f32 %v14460_v48, %v11303_v36  ;;  %v11305_v34 = vadd.f32 %v11240_v6, %v10551_v50  ;;  %v21209_v55 = vld [vmem:[#allocation9_spill] sm:$0xff]  ;;  %v21211_v48 = vld [vmem:[#allocation4_spill] sm:$0xff] }
 0x593   : > { %v11722_v30 = vpop.f32.mrf.mxu1  ;;  %v10169_v32 = vadd.f32 %v21210_v54, %v21209_v55  ;;  %v11308_v36 = vadd.f32 %v11253_v7, %v10554_v9  ;;  %v21215_v7 = vld [vmem:[#allocation11_spill] sm:$0xff] }
 0x594   : > { %v11867_v58 = vadd.f32 %v11866_v57, %v20356_v46  ;;  %v11799_v1 = vadd.f32 %v11722_v30, %v11301_v33  ;;  %v20384_v0 = vadd.f32 %v20244_v31, %v11801_v18  ;;  %v11307_v57 = vadd.f32 %v20310_v13, %v21211_v48  ;;  %v21212_v30 = vld [vmem:[#allocation8_spill] sm:$0xff]  ;;  %v11269_v18 = vpop.f32.mrf.mxu0  ;;  %v21217_v9 = vld [vmem:[#allocation59_spill] sm:$0xff] }
 0x595   : > { %v14463_v14 = vpop.f32.mrf.mxu1  ;;  %v10555_v35 = vadd.f32 %v21212_v30, %v10169_v32  ;;  %v11310_v17 = vadd.f32 %v20340_v22, %v21215_v7 }
 0x596   : > { %v11868_v23 = vadd.f32 %v11867_v58, %v20367_v15  ;;  %v20374_v40 = vadd.f32 %v20244_v31, %v11799_v1  ;;  %v11804_v41 = vadd.f32 %v14463_v14, %v11306_v42  ;;  %v21213_v1 = vld [vmem:[#allocation40_spill] sm:$0xff]  ;;  %v11311_v42 = vadd.f32 %v14420_v11, %v21219_v61  ;;  %v14424_v48 = vpop.f32.mrf.mxu0 }
 0x597   : > { %v11735_v39 = vpop.f32.mrf.mxu1  ;;  %v21214_v14 = vld [vmem:[#allocation44_spill] sm:$0xff]  ;;  %v11309_v19 = vadd.f32 %v11256_v5, %v10555_v35 }
 0x598   : > { %v11869_v38 = vadd.f32 %v11868_v23, %v20374_v40  ;;  %v11802_v16 = vadd.f32 %v11735_v39, %v11304_v43  ;;  %v10172_v43 = vadd.f32 %v21214_v14, %v21213_v1  ;;  %v20405_v51 = vadd.f32 %v20244_v31, %v11804_v41  ;;  %v21221_v14 = vld [vmem:[#allocation53_spill] sm:$0xff] }
 0x599   : > { %v14464_v56 = vpop.f32.mrf.mxu1 }
 0x59a   : > { %v11870_v59 = vadd.f32 %v11869_v38, %v20379_v47  ;;  %v20394_v33 = vadd.f32 %v20244_v31, %v11802_v16  ;;  %v11805_v53 = vadd.f32 %v14464_v56, %v11307_v57  ;;  %v10558_v39 = vadd.f32 %v21216_v12, %v10172_v43  ;;  %v21218_v56 = vld [vmem:[#allocation45_spill] sm:$0xff] }
 0x59b   : > { %v11738_v21 = vpop.f32.mrf.mxu1  ;;  %v21220_v57 = vld [vmem:[#allocation13_spill] sm:$0xff]  ;;  %v11314_v43 = vadd.f32 %v14423_v2, %v21221_v14 }
 0x59c   : > { %v11871_v24 = vadd.f32 %v11870_v59, %v20384_v0  ;;  %v11803_v44 = vadd.f32 %v11738_v21, %v11305_v34  ;;  %v20412_v38 = vadd.f32 %v20244_v31, %v11805_v53  ;;  %v10173_v59 = vadd.f32 %v21218_v56, %v21217_v9 }
 0x59d   : > { %v14467_v37 = vpop.f32.mrf.mxu1 }
 0x59e   : > { %v11872_v6 = vadd.f32 %v11871_v24, %v20394_v33  ;;  %v20400_v58 = vadd.f32 %v20244_v31, %v11803_v44  ;;  %v11808_v55 = vadd.f32 %v14467_v37, %v11310_v17  ;;  %v10559_v21 = vadd.f32 %v21220_v57, %v10173_v59  ;;  %v11272_v37 = vpop.f32.mrf.mxu0 }
 0x59f   : > { %v11751_v13 = vpop.f32.mrf.mxu1 }
 0x5a0   : > { %v11873_v50 = vadd.f32 %v11872_v6, %v20400_v58  ;;  %v11806_v23 = vadd.f32 %v11751_v13, %v11308_v36  ;;  %v11312_v36 = vadd.f32 %v11269_v18, %v10558_v39  ;;  %v11847_v35 = vadd.f32 %v20244_v31, %v11808_v55 }
 0x5a1   : > { %v14468_v28 = vpop.f32.mrf.mxu1 }
 0x5a2   : > { %v11874_v16 = vadd.f32 %v11873_v50, %v20405_v51  ;;  %v11845_v54 = vadd.f32 %v20244_v31, %v11806_v23  ;;  %v11809_v44 = vadd.f32 %v14468_v28, %v11311_v42  ;;  %v11313_v50 = vadd.f32 %v11272_v37, %v10559_v21  ;;  %v21222_v23 = vld [vmem:[#allocation49_spill] sm:$0xff] }
 0x5a3   : > { %v11754_v34 = vpop.f32.mrf.mxu1  ;;  %v11315_v7 = vadd.f32 %v14424_v48, %v21222_v23 }
 0x5a4   : > { %v11875_v22 = vadd.f32 %v11874_v16, %v20412_v38  ;;  %v11807_v32 = vadd.f32 %v11754_v34, %v11309_v19  ;;  %v11848_v13 = vadd.f32 %v20244_v31, %v11809_v44 }
 0x5a5   : > { %v14471_v41 = vpop.f32.mrf.mxu1 }
 0x5a6   : > { %v11876_v24 = vadd.f32 %v11875_v22, %v11845_v54  ;;  %v11846_v5 = vadd.f32 %v20244_v31, %v11807_v32  ;;  %v11812_v28 = vadd.f32 %v14471_v41, %v11314_v43 }
 0x5a7   : > { %v11767_v30 = vpop.f32.mrf.mxu1 }
 0x5a8   : > { %v11877_v11 = vadd.f32 %v11876_v24, %v11846_v5  ;;  %v11810_v6 = vadd.f32 %v11767_v30, %v11312_v36  ;;  %v11851_v56 = vadd.f32 %v20244_v31, %v11812_v28 }
 0x5a9   : > { %v14472_v53 = vpop.f32.mrf.mxu1 }
 0x5aa   : > { %v11878_v1 = vadd.f32 %v11877_v11, %v11847_v35  ;;  %v11849_v12 = vadd.f32 %v20244_v31, %v11810_v6  ;;  %v11813_v19 = vadd.f32 %v14472_v53, %v11315_v7 }
 0x5ab   : > { %v11770_v17 = vpop.f32.mrf.mxu1 }
 0x5ac   : > { %v11879_v18 = vadd.f32 %v11878_v1, %v11848_v13  ;;  %v11811_v39 = vadd.f32 %v11770_v17, %v11313_v50  ;;  %v11852_v61 = vadd.f32 %v20244_v31, %v11813_v19 }
 0x5ae   : > { %v11880_v16 = vadd.f32 %v11879_v18, %v11849_v12  ;;  %v11850_v9 = vadd.f32 %v20244_v31, %v11811_v39 }
 0x5b0   : > { %v11881_v59 = vadd.f32 %v11880_v16, %v11850_v9 }
 0x5b2   : > { %v11882_v42 = vadd.f32 %v11881_v59, %v11851_v56 }
 0x5b4   : > { %v11883_v2 = vadd.f32 %v11882_v42, %v11852_v61 }
 0x5b6   : > { %v11884_v34 = vrot.slane %v11883_v2, 4 }
 0x5b8   : > { %v11885_v55 = vadd.f32 %v11884_v34, %v11883_v2 }
 0x5ba   : > { %v11886_v22 = vrot.slane %v11885_v55, 2 }
 0x5bc   : > { %v11887_v32 = vadd.f32 %v11886_v22, %v11885_v55 }
 0x5be   : > { %v11888_v48 = vrot.slane %v11887_v32, 1 }
 0x5c0   : > { %v11889_v57 = vadd.f32 %v11888_v48, %v11887_v32 }
 0x5c2   : > { %v11890_v21 = vmul.f32 0.00390625, %v11889_v57 }
 0x5c4   : > { %v20431_v41 = vsub.f32 %v20307_v25, %v11890_v21  ;;  %v20434_v24 = vsub.f32 %v20316_v10, %v11890_v21  ;;  %v20437_v44 = vsub.f32 %v20321_v29, %v11890_v21  ;;  %v20440_v31 = vsub.f32 %v20326_v4, %v11890_v21 }
 0x5c5   : > { %v20443_v36 = vsub.f32 %v20337_v3, %v11890_v21  ;;  %v20446_v30 = vsub.f32 %v20346_v52, %v11890_v21  ;;  %v20449_v11 = vsub.f32 %v20351_v20, %v11890_v21  ;;  %v20452_v25 = vsub.f32 %v20356_v46, %v11890_v21 }
 0x5c6   : > { %v20455_v10 = vsub.f32 %v20367_v15, %v11890_v21  ;;  %v20458_v29 = vsub.f32 %v20374_v40, %v11890_v21  ;;  %v20461_v4 = vsub.f32 %v20379_v47, %v11890_v21  ;;  %v20464_v3 = vsub.f32 %v20384_v0, %v11890_v21 }
 0x5c7   : > { %v20467_v52 = vsub.f32 %v20394_v33, %v11890_v21  ;;  %v20470_v20 = vsub.f32 %v20400_v58, %v11890_v21  ;;  %v20473_v46 = vsub.f32 %v20405_v51, %v11890_v21  ;;  %v20476_v15 = vsub.f32 %v20412_v38, %v11890_v21 }
 0x5c8   : > { %v20478_v40 = vsub.f32 %v11845_v54, %v11890_v21  ;;  %v20480_v6 = vsub.f32 %v11846_v5, %v11890_v21  ;;  %v20482_v47 = vsub.f32 %v11847_v35, %v11890_v21  ;;  %v20484_v0 = vsub.f32 %v11848_v13, %v11890_v21 }
 0x5c9   : > { %v20486_v37 = vsub.f32 %v11849_v12, %v11890_v21  ;;  %v20488_v33 = vsub.f32 %v11850_v9, %v11890_v21  ;;  %v20490_v58 = vsub.f32 %v11851_v56, %v11890_v21  ;;  %v20492_v53 = vsub.f32 %v11852_v61, %v11890_v21 }
 0x5ca   : > { %v20495_v51 = vsub.f32 %v20248_v60, %v11890_v21  ;;  %v20498_v38 = vsub.f32 %v20251_v62, %v11890_v21  ;;  %v20501_v54 = vsub.f32 %v20256_v8, %v11890_v21  ;;  %v20508_v13 = vsub.f32 %v20264_v26, %v11890_v21 }
 0x5cb   : > { %v20511_v1 = vsub.f32 %v20275_v27, %v11890_v21  ;;  %v20516_v14 = vsub.f32 %v20284_v49, %v11890_v21  ;;  %v20521_v50 = vsub.f32 %v20289_v63, %v11890_v21  ;;  %v20526_v27 = vsub.f32 %v20296_v45, %v11890_v21 }
 0x5cc   : > { %v11923_v5 = vmul.f32 %v20495_v51, %v20495_v51  ;;  %v11924_v35 = vmul.f32 %v20498_v38, %v20498_v38  ;;  %v11925_v60 = vmul.f32 %v20501_v54, %v20501_v54  ;;  %v11926_v8 = vmul.f32 %v20508_v13, %v20508_v13 }
 0x5cd   : > { %v11927_v26 = vmul.f32 %v20511_v1, %v20511_v1  ;;  %v11928_v7 = vmul.f32 %v20516_v14, %v20516_v14  ;;  %v11929_v49 = vmul.f32 %v20521_v50, %v20521_v50  ;;  %v11930_v12 = vmul.f32 %v20526_v27, %v20526_v27 }
 0x5ce   : > { %v11955_v62 = vadd.f32 %v11924_v35, %v11923_v5  ;;  %v11931_v18 = vmul.f32 %v20431_v41, %v20431_v41  ;;  %v11932_v45 = vmul.f32 %v20434_v24, %v20434_v24  ;;  %v11933_v19 = vmul.f32 %v20437_v44, %v20437_v44 }
 0x5cf   : > { %v11934_v56 = vmul.f32 %v20440_v31, %v20440_v31  ;;  %v11935_v61 = vmul.f32 %v20443_v36, %v20443_v36  ;;  %v11936_v2 = vmul.f32 %v20446_v30, %v20446_v30  ;;  %v11937_v55 = vmul.f32 %v20449_v11, %v20449_v11 }
 0x5d0   : > { %v11956_v43 = vadd.f32 %v11955_v62, %v11925_v60  ;;  %v11938_v32 = vmul.f32 %v20452_v25, %v20452_v25  ;;  %v11939_v57 = vmul.f32 %v20455_v10, %v20455_v10  ;;  %v11940_v5 = vmul.f32 %v20458_v29, %v20458_v29 }
 0x5d1   : > { %v11941_v60 = vmul.f32 %v20461_v4, %v20461_v4 }
 0x5d2   : > { %v11957_v23 = vadd.f32 %v11956_v43, %v11926_v8  ;;  %v11942_v8 = vmul.f32 %v20464_v3, %v20464_v3 }
 0x5d4   : > { %v11958_v17 = vadd.f32 %v11957_v23, %v11927_v26  ;;  %v11943_v26 = vmul.f32 %v20467_v52, %v20467_v52 }
 0x5d6   : > { %v11959_v28 = vadd.f32 %v11958_v17, %v11928_v7  ;;  %v11944_v7 = vmul.f32 %v20470_v20, %v20470_v20 }
 0x5d8   : > { %v11960_v63 = vadd.f32 %v11959_v28, %v11929_v49  ;;  %v11945_v49 = vmul.f32 %v20473_v46, %v20473_v46 }
 0x5da   : > { %v11961_v39 = vadd.f32 %v11960_v63, %v11930_v12  ;;  %v11946_v12 = vmul.f32 %v20476_v15, %v20476_v15 }
 0x5dc   : > { %v11962_v16 = vadd.f32 %v11961_v39, %v11931_v18  ;;  %v11947_v18 = vmul.f32 %v20478_v40, %v20478_v40 }
 0x5de   : > { %v11963_v9 = vadd.f32 %v11962_v16, %v11932_v45  ;;  %v11948_v45 = vmul.f32 %v20480_v6, %v20480_v6 }
 0x5e0   : > { %v11964_v59 = vadd.f32 %v11963_v9, %v11933_v19  ;;  %v11949_v19 = vmul.f32 %v20482_v47, %v20482_v47 }
 0x5e2   : > { %v11965_v42 = vadd.f32 %v11964_v59, %v11934_v56  ;;  %v11950_v56 = vmul.f32 %v20484_v0, %v20484_v0 }
 0x5e4   : > { %v11966_v34 = vadd.f32 %v11965_v42, %v11935_v61  ;;  %v11951_v61 = vmul.f32 %v20486_v37, %v20486_v37 }
 0x5e6   : > { %v11967_v22 = vadd.f32 %v11966_v34, %v11936_v2  ;;  %v11952_v2 = vmul.f32 %v20488_v33, %v20488_v33 }
 0x5e8   : > { %v11968_v48 = vadd.f32 %v11967_v22, %v11937_v55  ;;  %v11953_v55 = vmul.f32 %v20490_v58, %v20490_v58 }
 0x5ea   : > { %v11969_v21 = vadd.f32 %v11968_v48, %v11938_v32  ;;  %v11954_v32 = vmul.f32 %v20492_v53, %v20492_v53 }
 0x5ec   : > { %v11970_v35 = vadd.f32 %v11969_v21, %v11939_v57 }
 0x5ee   : > { %v11971_v62 = vadd.f32 %v11970_v35, %v11940_v5 }
 0x5f0   : > { %v11972_v43 = vadd.f32 %v11971_v62, %v11941_v60 }
 0x5f2   : > { %v11973_v23 = vadd.f32 %v11972_v43, %v11942_v8 }
 0x5f4   : > { %v11974_v17 = vadd.f32 %v11973_v23, %v11943_v26 }
 0x5f6   : > { %v11975_v28 = vadd.f32 %v11974_v17, %v11944_v7 }
 0x5f8   : > { %v11976_v63 = vadd.f32 %v11975_v28, %v11945_v49 }
 0x5fa   : > { %v11977_v39 = vadd.f32 %v11976_v63, %v11946_v12 }
 0x5fc   : > { %v11978_v16 = vadd.f32 %v11977_v39, %v11947_v18 }
 0x5fe   : > { %v11979_v9 = vadd.f32 %v11978_v16, %v11948_v45 }
 0x600   : > { %v11980_v59 = vadd.f32 %v11979_v9, %v11949_v19 }
 0x602   : > { %v11981_v42 = vadd.f32 %v11980_v59, %v11950_v56  ;;  %v12082_v56 = vld [vmem:[%s14849_s20 + $0xb8] sm:$0xff] }
 0x604   : > { %v11982_v34 = vadd.f32 %v11981_v42, %v11951_v61 }
 0x606   : > { %v11983_v22 = vadd.f32 %v11982_v34, %v11952_v2  ;;  %v12059_v2 = vld [vmem:[%s14849_s20] sm:$0xff]  ;;  %v12060_v34 = vld [vmem:[%s14849_s20 + $0x8] sm:$0xff] }
 0x608   : > { %v11984_v48 = vadd.f32 %v11983_v22, %v11953_v55  ;;  %v12061_v55 = vld [vmem:[%s14849_s20 + $0x10] sm:$0xff]  ;;  %v12062_v22 = vld [vmem:[%s14849_s20 + $0x18] sm:$0xff] }
 0x60a   : > { %v11985_v57 = vadd.f32 %v11984_v48, %v11954_v32 }
 0x60c   : > { %v11986_v21 = vrot.slane %v11985_v57, 4 }
 0x60e   : > { %v11987_v5 = vadd.f32 %v11986_v21, %v11985_v57 }
 0x610   : > { %v11988_v35 = vrot.slane %v11987_v5, 2 }
 0x612   : > { %v11989_v60 = vadd.f32 %v11988_v35, %v11987_v5  ;;  %v12063_v5 = vld [vmem:[%s14849_s20 + $0x20] sm:$0xff]  ;;  %v12064_v35 = vld [vmem:[%s14849_s20 + $0x28] sm:$0xff] }
 0x614   : > { %v11990_v62 = vrot.slane %v11989_v60, 1 }
 0x616   : > { %v11991_v8 = vadd.f32 %v11990_v62, %v11989_v60  ;;  %v12065_v60 = vld [vmem:[%s14849_s20 + $0x30] sm:$0xff]  ;;  %v12066_v62 = vld [vmem:[%s14849_s20 + $0x38] sm:$0xff] }
 0x618   : > { %v11992_v43 = vmul.f32 0.00390625, %v11991_v8  ;;  %v12078_v8 = vld [vmem:[%s14849_s20 + $0x98] sm:$0xff] }
 0x61a   : > { %v11993_v26 = vadd.f32 1e-05, %v11992_v43  ;;  %v12077_v43 = vld [vmem:[%s14849_s20 + $0x90] sm:$0xff] }
 0x61c   : > { %14723 = vrsqrt.f32 %v11993_v26  ;;  %v12076_v26 = vld [vmem:[%s14849_s20 + $0x88] sm:$0xff] }
 0x629   : > { %v14724_v23 = vpop.eup %14723 }
 0x62a   : > { %v20583_v7 = vmul.f32 %v14724_v23, %v20495_v51  ;;  %v20586_v17 = vmul.f32 %v14724_v23, %v20498_v38  ;;  %v20589_v49 = vmul.f32 %v14724_v23, %v20501_v54  ;;  %v20592_v28 = vmul.f32 %v14724_v23, %v20508_v13 }
 0x62b   : > { %v20595_v12 = vmul.f32 %v14724_v23, %v20511_v1  ;;  %v20598_v63 = vmul.f32 %v14724_v23, %v20516_v14  ;;  %v20601_v18 = vmul.f32 %v14724_v23, %v20521_v50  ;;  %v20604_v51 = vmul.f32 %v14724_v23, %v20526_v27 }
 0x62c   : > { %v20607_v38 = vmul.f32 %v14724_v23, %v20431_v41  ;;  %v20610_v54 = vmul.f32 %v14724_v23, %v20434_v24  ;;  %v20613_v13 = vmul.f32 %v14724_v23, %v20437_v44  ;;  %v20616_v1 = vmul.f32 %v14724_v23, %v20440_v31 }
 0x62d   : > { %v20619_v14 = vmul.f32 %v14724_v23, %v20443_v36  ;;  %v20622_v50 = vmul.f32 %v14724_v23, %v20446_v30  ;;  %v20625_v27 = vmul.f32 %v14724_v23, %v20449_v11  ;;  %v20628_v41 = vmul.f32 %v14724_v23, %v20452_v25 }
 0x62e   : > { %v20631_v24 = vmul.f32 %v14724_v23, %v20455_v10  ;;  %v20634_v44 = vmul.f32 %v14724_v23, %v20458_v29  ;;  %v20637_v31 = vmul.f32 %v14724_v23, %v20461_v4  ;;  %v20640_v36 = vmul.f32 %v14724_v23, %v20464_v3 }
 0x62f   : > { %v20643_v30 = vmul.f32 %v14724_v23, %v20467_v52  ;;  %v20646_v11 = vmul.f32 %v14724_v23, %v20470_v20  ;;  %v20649_v25 = vmul.f32 %v14724_v23, %v20473_v46  ;;  %v20652_v10 = vmul.f32 %v14724_v23, %v20476_v15 }
 0x630   : > { %v20655_v29 = vmul.f32 %v14724_v23, %v20478_v40  ;;  %v20658_v4 = vmul.f32 %v14724_v23, %v20480_v6  ;;  %v20661_v3 = vmul.f32 %v14724_v23, %v20482_v47  ;;  %v20664_v52 = vmul.f32 %v14724_v23, %v20484_v0 }
 0x631   : > { %v20667_v20 = vmul.f32 %v14724_v23, %v20486_v37  ;;  %v20670_v46 = vmul.f32 %v14724_v23, %v20488_v33  ;;  %v20673_v15 = vmul.f32 %v14724_v23, %v20490_v58  ;;  %v20676_v40 = vmul.f32 %v14724_v23, %v20492_v53  ;;  %v12075_v23 = vld [vmem:[%s14849_s20 + $0x80] sm:$0xff] }
 0x632   : > { %v12027_v6 = vmax.f32 %v20583_v7, 0.0  ;;  %v12028_v47 = vmax.f32 %v20586_v17, 0.0  ;;  %v12029_v0 = vmax.f32 %v20589_v49, 0.0  ;;  %v12030_v37 = vmax.f32 %v20592_v28, 0.0  ;;  %v12067_v7 = vld [vmem:[%s14849_s20 + $0x40] sm:$0xff]  ;;  %v12068_v17 = vld [vmem:[%s14849_s20 + $0x48] sm:$0xff] }
 0x633   : > { %21223 = vst [vmem:[#allocation22_spill] sm:$0xff] %v20676_v40  ;;  %v12031_v33 = vmax.f32 %v20595_v12, 0.0  ;;  %v12032_v58 = vmax.f32 %v20598_v63, 0.0  ;;  %v12033_v39 = vmax.f32 %v20601_v18, 0.0  ;;  %v12034_v53 = vmax.f32 %v20604_v51, 0.0  ;;  %v12069_v49 = vld [vmem:[%s14849_s20 + $0x50] sm:$0xff] }
 0x634   : > { %v12035_v45 = vmax.f32 %v20607_v38, 0.0  ;;  %v12036_v16 = vmax.f32 %v20610_v54, 0.0  ;;  %v12037_v19 = vmax.f32 %v20613_v13, 0.0  ;;  %v12038_v9 = vmax.f32 %v20616_v1, 0.0  ;;  %v12070_v28 = vld [vmem:[%s14849_s20 + $0x58] sm:$0xff]  ;;  %v12071_v38 = vld [vmem:[%s14849_s20 + $0x60] sm:$0xff] }
 0x635   : > { %v12072_v54 = vld [vmem:[%s14849_s20 + $0x68] sm:$0xff]  ;;  %v12073_v13 = vld [vmem:[%s14849_s20 + $0x70] sm:$0xff]  ;;  %v12074_v12 = vld [vmem:[%s14849_s20 + $0x78] sm:$0xff]  ;;  %v12091_v21 = vadd.f32 %v12059_v2, %v12027_v6  ;;  %v12092_v57 = vadd.f32 %v12060_v34, %v12028_v47  ;;  %v12093_v48 = vadd.f32 %v12061_v55, %v12029_v0  ;;  %v12094_v32 = vadd.f32 %v12062_v22, %v12030_v37 }
 0x636   : > { %v12079_v1 = vld [vmem:[%s14849_s20 + $0xa0] sm:$0xff]  ;;  %v12080_v63 = vld [vmem:[%s14849_s20 + $0xa8] sm:$0xff]  ;;  %v12081_v18 = vld [vmem:[%s14849_s20 + $0xb0] sm:$0xff]  ;;  %v12095_v51 = vadd.f32 %v12063_v5, %v12031_v33  ;;  %v12096_v42 = vadd.f32 %v12064_v35, %v12032_v58  ;;  %v12097_v61 = vadd.f32 %v12065_v60, %v12033_v39  ;;  %v12098_v59 = vadd.f32 %v12066_v62, %v12034_v53 }
 0x637   : > { %v12083_v40 = vld [vmem:[%s14849_s20 + $0xc0] sm:$0xff]  ;;  %v12084_v6 = vld [vmem:[%s14849_s20 + $0xc8] sm:$0xff]  ;;  %v12099_v47 = vadd.f32 %v12067_v7, %v12035_v45  ;;  %v12100_v0 = vadd.f32 %v12068_v17, %v12036_v16  ;;  %v12101_v37 = vadd.f32 %v12069_v49, %v12037_v19  ;;  %v12102_v2 = vadd.f32 %v12070_v28, %v12038_v9  ;;  %12123 = vst.msk [vmem:[%s20726_s28] sm:$0xff] %vm274_vm0, %v12091_v21  ;;  %v12085_v33 = vld [vmem:[%s14849_s20 + $0xd0] sm:$0xff] }
 0x638   : > { %12124 = vst.msk [vmem:[%s20726_s28 + $0x8] sm:$0xff] %vm274_vm0, %v12092_v57  ;;  %12125 = vst.msk [vmem:[%s20726_s28 + $0x10] sm:$0xff] %vm274_vm0, %v12093_v48  ;;  %v12086_v58 = vld [vmem:[%s14849_s20 + $0xd8] sm:$0xff]  ;;  %v12087_v39 = vld [vmem:[%s14849_s20 + $0xe0] sm:$0xff]  ;;  %v21224_v53 = vmax.f32 %v20619_v14, 0.0  ;;  %v21225_v16 = vmax.f32 %v20622_v50, 0.0 }
 0x639   : > { %12126 = vst.msk [vmem:[%s20726_s28 + $0x18] sm:$0xff] %vm274_vm0, %v12094_v32  ;;  %v21226_v9 = vmax.f32 %v20625_v27, 0.0  ;;  %v21227_v55 = vmax.f32 %v20628_v41, 0.0  ;;  %12127 = vst.msk [vmem:[%s20726_s28 + $0x20] sm:$0xff] %vm274_vm0, %v12095_v51  ;;  %v12088_v14 = vld [vmem:[%s14849_s20 + $0xe8] sm:$0xff]  ;;  %v12089_v50 = vld [vmem:[%s14849_s20 + $0xf0] sm:$0xff] }
 0x63a   : > { %v12103_v45 = vadd.f32 %v12071_v38, %v21224_v53  ;;  %v12104_v19 = vadd.f32 %v12072_v54, %v21225_v16  ;;  %12128 = vst.msk [vmem:[%s20726_s28 + $0x28] sm:$0xff] %vm274_vm0, %v12096_v42  ;;  %12129 = vst.msk [vmem:[%s20726_s28 + $0x30] sm:$0xff] %vm274_vm0, %v12097_v61  ;;  %v12090_v27 = vld [vmem:[%s14849_s20 + $0xf8] sm:$0xff]  ;;  %v21228_v32 = vmax.f32 %v20631_v24, 0.0  ;;  %v21229_v48 = vmax.f32 %v20634_v44, 0.0  ;;  %v21243_v7 = vld [vmem:[#allocation22_spill] sm:$0xff] }
 0x63b   : > { %v12105_v34 = vadd.f32 %v12073_v13, %v21226_v9  ;;  %v12106_v22 = vadd.f32 %v12074_v12, %v21227_v55  ;;  %12130 = vst.msk [vmem:[%s20726_s28 + $0x38] sm:$0xff] %vm274_vm0, %v12098_v59  ;;  %v21230_v21 = vmax.f32 %v20637_v31, 0.0  ;;  %v21231_v61 = vmax.f32 %v20640_v36, 0.0  ;;  %12131 = vst.msk [vmem:[%s20726_s28 + $0x40] sm:$0xff] %vm274_vm0, %v12099_v47 }
 0x63c   : > { %v12107_v41 = vadd.f32 %v12075_v23, %v21228_v32  ;;  %v12108_v57 = vadd.f32 %v12076_v26, %v21229_v48  ;;  %12132 = vst.msk [vmem:[%s20726_s28 + $0x48] sm:$0xff] %vm274_vm0, %v12100_v0  ;;  %12133 = vst.msk [vmem:[%s20726_s28 + $0x50] sm:$0xff] %vm274_vm0, %v12101_v37  ;;  %v21232_v24 = vmax.f32 %v20643_v30, 0.0  ;;  %v21233_v31 = vmax.f32 %v20646_v11, 0.0 }
 0x63d   : > { %v12109_v42 = vadd.f32 %v12077_v43, %v21230_v21  ;;  %v12110_v5 = vadd.f32 %v12078_v8, %v21231_v61  ;;  %12134 = vst.msk [vmem:[%s20726_s28 + $0x58] sm:$0xff] %vm274_vm0, %v12102_v2  ;;  %v21234_v36 = vmax.f32 %v20649_v25, 0.0  ;;  %v21235_v60 = vmax.f32 %v20652_v10, 0.0  ;;  %12135 = vst.msk [vmem:[%s20726_s28 + $0x60] sm:$0xff] %vm274_vm0, %v12103_v45 }
 0x63e   : > { %v12111_v44 = vadd.f32 %v12079_v1, %v21232_v24  ;;  %v12112_v59 = vadd.f32 %v12080_v63, %v21233_v31  ;;  %12136 = vst.msk [vmem:[%s20726_s28 + $0x68] sm:$0xff] %vm274_vm0, %v12104_v19  ;;  %12137 = vst.msk [vmem:[%s20726_s28 + $0x70] sm:$0xff] %vm274_vm0, %v12105_v34  ;;  %v21236_v30 = vmax.f32 %v20655_v29, 0.0  ;;  %v21237_v25 = vmax.f32 %v20658_v4, 0.0 }
 0x63f   : > { %v12113_v35 = vadd.f32 %v12081_v18, %v21234_v36  ;;  %v12114_v62 = vadd.f32 %v12082_v56, %v21235_v60  ;;  %12138 = vst.msk [vmem:[%s20726_s28 + $0x78] sm:$0xff] %vm274_vm0, %v12106_v22  ;;  %v21238_v56 = vmax.f32 %v20661_v3, 0.0  ;;  %v21239_v43 = vmax.f32 %v20664_v52, 0.0  ;;  %12139 = vst.msk [vmem:[%s20726_s28 + $0x80] sm:$0xff] %vm274_vm0, %v12107_v41 }
 0x640   : > { %v12115_v11 = vadd.f32 %v12083_v40, %v21236_v30  ;;  %v12116_v10 = vadd.f32 %v12084_v6, %v21237_v25  ;;  %12140 = vst.msk [vmem:[%s20726_s28 + $0x88] sm:$0xff] %vm274_vm0, %v12108_v57  ;;  %12141 = vst.msk [vmem:[%s20726_s28 + $0x90] sm:$0xff] %vm274_vm0, %v12109_v42  ;;  %v21240_v29 = vmax.f32 %v20667_v20, 0.0  ;;  %v21241_v3 = vmax.f32 %v20670_v46, 0.0 }
 0x641   : > { %v12117_v8 = vadd.f32 %v12085_v33, %v21238_v56  ;;  %v12118_v26 = vadd.f32 %v12086_v58, %v21239_v43  ;;  %12142 = vst.msk [vmem:[%s20726_s28 + $0x98] sm:$0xff] %vm274_vm0, %v12110_v5  ;;  %v21242_v40 = vmax.f32 %v20673_v15, 0.0  ;;  %v21244_v17 = vmax.f32 %v21243_v7, 0.0  ;;  %12143 = vst.msk [vmem:[%s20726_s28 + $0xa0] sm:$0xff] %vm274_vm0, %v12111_v44 }
 0x642   : > { %v12119_v4 = vadd.f32 %v12087_v39, %v21240_v29  ;;  %v12120_v52 = vadd.f32 %v12088_v14, %v21241_v3  ;;  %12144 = vst.msk [vmem:[%s20726_s28 + $0xa8] sm:$0xff] %vm274_vm0, %v12112_v59  ;;  %12145 = vst.msk [vmem:[%s20726_s28 + $0xb0] sm:$0xff] %vm274_vm0, %v12113_v35 }
 0x643   : > { %v12121_v23 = vadd.f32 %v12089_v50, %v21242_v40  ;;  %v12122_v49 = vadd.f32 %v12090_v27, %v21244_v17  ;;  %12146 = vst.msk [vmem:[%s20726_s28 + $0xb8] sm:$0xff] %vm274_vm0, %v12114_v62  ;;  %12147 = vst.msk [vmem:[%s20726_s28 + $0xc0] sm:$0xff] %vm274_vm0, %v12115_v11 }
 0x644   : > { %12148 = vst.msk [vmem:[%s20726_s28 + $0xc8] sm:$0xff] %vm274_vm0, %v12116_v10  ;;  %12149 = vst.msk [vmem:[%s20726_s28 + $0xd0] sm:$0xff] %vm274_vm0, %v12117_v8 }
 0x645   : > { %12150 = vst.msk [vmem:[%s20726_s28 + $0xd8] sm:$0xff] %vm274_vm0, %v12118_v26  ;;  %12151 = vst.msk [vmem:[%s20726_s28 + $0xe0] sm:$0xff] %vm274_vm0, %v12119_v4 }
 0x646   : > { %12152 = vst.msk [vmem:[%s20726_s28 + $0xe8] sm:$0xff] %vm274_vm0, %v12120_v52  ;;  %12153 = vst.msk [vmem:[%s20726_s28 + $0xf0] sm:$0xff] %vm274_vm0, %v12121_v23 }
 0x647   : > { %12154 = vst.msk [vmem:[%s20726_s28 + $0xf8] sm:$0xff] %vm274_vm0, %v12122_v49 }
 0x648 PF: > { %s15_s18 = sadd.s32 1, %s14771_s18  }
 0x649   : > { %p12_p4 = scmp.ge.s32.totalorder %s15_s18, 4  }
 0x64b   :  { %14 = sbr.rel (!%p12_p4) target bundleno = 1 (0x1), region = 90 }

</bundles_post_ra>
